<compile_context>
chip_gen: v7x
topology: tpu7x:2x2x1
jax: 0.10.0
libtpu: 0.0.40
codegen_flags: <defaults>
</compile_context>

<pallas_src>
import jax
import jax.numpy as jnp
from jax.experimental import pallas as pl
from jax.experimental.pallas import tpu as pltpu

LANE = 128                      # TPU lane width
CONV1_M_TILE = 2048             # pooled-row tile for conv1
CONV2_IMG_TILE = 64             # images per grid step for fused conv2+fc
VMEM_LIMIT = 32 * 1024 * 1024   # explicit scoped-VMEM limit (safe on v5e/v6e/v7x)


def _round_up(x, m):
    return (x + m - 1) // m * m


def _pick_tile(m, target, align=8, min_steps=2):
    """Sublane-aligned tile and padded extent (tile * steps >= m).

    Guarantees >= min_steps grid steps when m > align so both v7x TensorCores
    get work; tile never exceeds `target`.
    """
    m = max(int(m), 1)
    steps = max(1, -(-m // target))
    if m > align:
        steps = max(steps, min_steps)
    tile = _round_up(-(-m // steps), align)
    return tile, tile * steps


# ---------------------------------------------------------------------------
# Pallas kernels
# ---------------------------------------------------------------------------
def _conv_relu_pool_kernel(a_ref, w_ref, b_ref, o_ref):
    """Fused conv(as matmul) + bias + ReLU + 2x2 max-pool (running max).

    a_ref: (4, TM, K) bf16 im2col patches; leading axis = the 4 positions of a
           2x2 pooling window, rows = pooled output pixels (n, hp, wp).
    w_ref: (K, 128) bf16 weight (kh*kw*Cin x Cout, Cout zero-padded to lanes).
    b_ref: (1, 128)  f32 bias (zero-padded).
    o_ref: (TM, 128) bf16 pooled activations (lane-dense store).
    """
    w = w_ref[...]
    acc = jnp.dot(a_ref[0], w, preferred_element_type=jnp.float32)
    for q in range(1, 4):   # running max: one live f32 intermediate
        acc = jnp.maximum(acc, jnp.dot(a_ref[q], w, preferred_element_type=jnp.float32))
    o_ref[...] = jnp.maximum(acc + b_ref[...], 0.0).astype(o_ref.dtype)


def _conv2_fc_kernel(a_ref, w2_ref, b2_ref, w1_ref, b1_ref,
                     wf2_ref, bf2_ref, wf3_ref, bf3_ref, o_ref):
    """Fused conv2+ReLU+pool -> fc1+ReLU -> fc2+ReLU -> fc3 for a tile of images.

    a_ref : (4, 25, G, K2) bf16 conv2 patches; axis0 = pool-window position,
            axis1 = pooled output position p = hp*5+wp, axis2 = image in tile.
    w2_ref: (K2, 128) bf16; b2_ref: (1, 128) f32.
    w1_ref: (25, 128, 128) bf16 per-position fc1 weight (rows 0..15 = channels).
    b1/wf2/bf2/wf3/bf3: fc biases / weights, zero-padded to 128 lanes.
    o_ref : (G, 128) f32 logits (lanes 0..9 real).
    """
    w2 = w2_ref[...]
    b2 = b2_ref[...]
    n_pos = a_ref.shape[1]
    g = a_ref.shape[2]

    h1 = jnp.zeros((g, LANE), jnp.float32)
    for p in range(n_pos):
        acc = jnp.dot(a_ref[0, p], w2, preferred_element_type=jnp.float32)
        for q in range(1, 4):
            acc = jnp.maximum(acc, jnp.dot(a_ref[q, p], w2,
                                           preferred_element_type=jnp.float32))
        pooled = jnp.maximum(acc + b2, 0.0).astype(jnp.bfloat16)   # (G, 128), 16 real
        # fc1 contribution of spatial position p (flatten never materialized)
        h1 = h1 + jnp.dot(pooled, w1_ref[p], preferred_element_type=jnp.float32)

    h1 = jnp.maximum(h1 + b1_ref[...], 0.0).astype(jnp.bfloat16)
    h2 = jnp.dot(h1, wf2_ref[...], preferred_element_type=jnp.float32)
    h2 = jnp.maximum(h2 + bf2_ref[...], 0.0).astype(jnp.bfloat16)
    out = jnp.dot(h2, wf3_ref[...], preferred_element_type=jnp.float32) + bf3_ref[...]
    o_ref[...] = out.astype(o_ref.dtype)


# ---------------------------------------------------------------------------
# pallas_call wrappers (M-tiled, pipelined, "parallel" grid)
# ---------------------------------------------------------------------------
def conv1_relu_pool(a4, w, b, *, m_tile=CONV1_M_TILE):
    """a4: (4, M, K) bf16 patches, w: (K,128) bf16, b: (1,128) f32 -> (M,128) bf16."""
    _, m, k0 = a4.shape
    tm, mp = _pick_tile(m, m_tile)
    a4 = jnp.pad(a4, ((0, 0), (0, mp - m), (0, 0)))

    out = pl.pallas_call(
        _conv_relu_pool_kernel,
        out_shape=jax.ShapeDtypeStruct((mp, LANE), jnp.bfloat16),
        grid_spec=pltpu.PrefetchScalarGridSpec(
            num_scalar_prefetch=0,
            grid=(mp // tm,),
            in_specs=[
                pl.BlockSpec((4, tm, k0), lambda i: (0, i, 0)),
                pl.BlockSpec((k0, LANE), lambda i: (0, 0)),
                pl.BlockSpec((1, LANE), lambda i: (0, 0)),
            ],
            out_specs=pl.BlockSpec((tm, LANE), lambda i: (i, 0)),
        ),
        compiler_params=pltpu.CompilerParams(
            dimension_semantics=("parallel",),
            vmem_limit_bytes=VMEM_LIMIT),
    )(a4, w, b)
    return out[:m]


def conv2_fc_chain(a4, w2, b2, w1, b1, wf2, bf2, wf3, bf3, *, img_tile=CONV2_IMG_TILE):
    """a4: (4, 25, N, K2) bf16 -> (N, 128) f32 logits (first 10 lanes real)."""
    _, n_pos, n, k2 = a4.shape
    g, np_ = _pick_tile(n, img_tile)
    a4 = jnp.pad(a4, ((0, 0), (0, 0), (0, np_ - n), (0, 0)))

    out = pl.pallas_call(
        _conv2_fc_kernel,
        out_shape=jax.ShapeDtypeStruct((np_, LANE), jnp.float32),
        grid_spec=pltpu.PrefetchScalarGridSpec(
            num_scalar_prefetch=0,
            grid=(np_ // g,),
            in_specs=[
                pl.BlockSpec((4, n_pos, g, k2), lambda i: (0, 0, i, 0)),
                pl.BlockSpec((k2, LANE), lambda i: (0, 0)),
                pl.BlockSpec((1, LANE), lambda i: (0, 0)),
                pl.BlockSpec((n_pos, LANE, LANE), lambda i: (0, 0, 0)),
                pl.BlockSpec((1, LANE), lambda i: (0, 0)),
                pl.BlockSpec((LANE, LANE), lambda i: (0, 0)),
                pl.BlockSpec((1, LANE), lambda i: (0, 0)),
                pl.BlockSpec((LANE, LANE), lambda i: (0, 0)),
                pl.BlockSpec((1, LANE), lambda i: (0, 0)),
            ],
            out_specs=pl.BlockSpec((g, LANE), lambda i: (i, 0)),
        ),
        compiler_params=pltpu.CompilerParams(
            dimension_semantics=("parallel",),
            vmem_limit_bytes=VMEM_LIMIT),
    )(a4, w2, b2, w1, b1, wf2, bf2, wf3, bf3)
    return out[:n]


# ---------------------------------------------------------------------------
# Layout glue (XLA, all bf16): pooled im2col patch extraction
# ---------------------------------------------------------------------------
def _patches(x, kh, kw):
    return jax.lax.conv_general_dilated_patches(
        x, (kh, kw), (1, 1), "VALID",
        dimension_numbers=("NHWC", "HWIO", "NHWC"))            # (N, Ho, Wo, K0)


def _im2col_pooled(x, kh, kw):
    """x: (N,H,W,C) -> (4, N*Hp*Wp, C*kh*kw): one slab per 2x2 pool position."""
    n, h, w, c = x.shape
    ho, wo = h - kh + 1, w - kw + 1
    assert ho % 2 == 0 and wo % 2 == 0, (ho, wo)
    hp, wp = ho // 2, wo // 2
    k0 = c * kh * kw
    pat = _patches(x, kh, kw)
    pat = pat.reshape(n, hp, 2, wp, 2, k0).transpose(2, 4, 0, 1, 3, 5)
    return pat.reshape(4, n * hp * wp, k0), hp, wp


def _im2col_pooled_by_pos(x, kh, kw):
    """x: (N,H,W,C) -> (4, Hp*Wp, N, C*kh*kw): pool-position / spatial-position major."""
    n, h, w, c = x.shape
    ho, wo = h - kh + 1, w - kw + 1
    assert ho % 2 == 0 and wo % 2 == 0, (ho, wo)
    hp, wp = ho // 2, wo // 2
    k0 = c * kh * kw
    pat = _patches(x, kh, kw)
    pat = pat.reshape(n, hp, 2, wp, 2, k0).transpose(2, 4, 1, 3, 0, 5)  # (2,2,hp,wp,n,k0)
    return pat.reshape(4, hp * wp, n, k0), hp, wp


# ---------------------------------------------------------------------------
# Parameters: PyTorch-layout init + one-time kernel-layout preparation
# ---------------------------------------------------------------------------
def init_params(key):
    """PyTorch-layout parameters, PyTorch-default-style uniform init."""
    def uniform(k, shape, fan_in):
        bound = 1.0 / jnp.sqrt(jnp.float32(fan_in))
        return jax.random.uniform(k, shape, jnp.float32, -bound, bound)

    keys = jax.random.split(key, 10)
    return {
        "conv1_w": uniform(keys[0], (6, 3, 5, 5), 3 * 5 * 5),
        "conv1_b": uniform(keys[1], (6,), 3 * 5 * 5),
        "conv2_w": uniform(keys[2], (16, 6, 5, 5), 6 * 5 * 5),
        "conv2_b": uniform(keys[3], (16,), 6 * 5 * 5),
        "fc1_w": uniform(keys[4], (120, 16 * 5 * 5), 16 * 5 * 5),
        "fc1_b": uniform(keys[5], (120,), 16 * 5 * 5),
        "fc2_w": uniform(keys[6], (84, 120), 120),
        "fc2_b": uniform(keys[7], (84,), 120),
        "fc3_w": uniform(keys[8], (10, 84), 84),
        "fc3_b": uniform(keys[9], (10,), 84),
    }


def _pad2(a, rows, cols):
    return jnp.pad(a, ((0, rows - a.shape[0]), (0, cols - a.shape[1])))


def _prep_conv_weight(w):
    """(Cout,Cin,kh,kw) torch weight -> (K0,128) bf16 matmul weight whose rows are
    permuted to match lax.conv_general_dilated_patches' feature ordering exactly."""
    cout, cin, kh, kw = w.shape
    k0 = cin * kh * kw
    # Index-probe: feed an image whose value at (i,j,c) is the canonical flat
    # index c*kh*kw + i*kw + j; the 1x1 patch output reveals the permutation.
    probe = jnp.arange(k0, dtype=jnp.float32).reshape(cin, kh, kw)
    probe = probe.transpose(1, 2, 0)[None]                       # (1, kh, kw, cin)
    perm = jax.lax.conv_general_dilated_patches(
        probe, (kh, kw), (1, 1), "VALID",
        dimension_numbers=("NHWC", "HWIO", "NHWC")).reshape(k0)
    perm = jnp.round(perm).astype(jnp.int32)
    w_canon = jnp.transpose(w, (1, 2, 3, 0)).reshape(k0, cout)   # row = (c, i, j)
    wm = jnp.take(w_canon, perm, axis=0)                         # row order = patches
    return _pad2(wm, k0, LANE).astype(jnp.bfloat16)              # K left unpadded


def _prep_bias(b):
    return _pad2(b.reshape(1, -1), 1, LANE).astype(jnp.float32)


def prepare_params(params):
    """One-time weight prep (outside jit): transpose / permute / pad / cast."""
    # fc1 reordered from PyTorch's NCHW flatten (c,h,w) to the (h,w,c) order the
    # conv2 kernel produces, then split into 25 per-spatial-position slabs of
    # shape (16 channels, 120 units), zero-padded to (128, 128) lanes.
    fc1_hwc = params["fc1_w"].reshape(120, 16, 5, 5).transpose(2, 3, 1, 0)   # (5,5,16,120)
    fc1_hwc = fc1_hwc.reshape(25, 16, 120)
    w1 = jnp.zeros((25, LANE, LANE), jnp.float32).at[:, :16, :120].set(fc1_hwc)
    return {
        "conv1_w": _prep_conv_weight(params["conv1_w"]),          # (75, 128)  bf16
        "conv1_b": _prep_bias(params["conv1_b"]),
        "conv2_w": _prep_conv_weight(params["conv2_w"]),          # (150, 128) bf16
        "conv2_b": _prep_bias(params["conv2_b"]),
        "fc1_w": w1.astype(jnp.bfloat16),                         # (25,128,128) bf16
        "fc1_b": _prep_bias(params["fc1_b"]),
        "fc2_w": _pad2(params["fc2_w"].T, LANE, LANE).astype(jnp.bfloat16),
        "fc2_b": _prep_bias(params["fc2_b"]),
        "fc3_w": _pad2(params["fc3_w"].T, LANE, LANE).astype(jnp.bfloat16),
        "fc3_b": _prep_bias(params["fc3_b"]),
    }


# ---------------------------------------------------------------------------
# Forward pass (matches Net.forward semantics)
# ---------------------------------------------------------------------------
@jax.jit
def net_forward(x_nchw, kp):
    """x_nchw: (N, 3, 32, 32) float32 (PyTorch layout) -> logits (N, 10)."""
    n = x_nchw.shape[0]
    # NHWC, bf16 BEFORE patch extraction so all glue traffic is half-width.
    x = jnp.transpose(x_nchw, (0, 2, 3, 1)).astype(jnp.bfloat16)

    # conv1 + ReLU + 2x2 maxpool  ->  (N, 14, 14, 6) bf16
    a4, hp, wp = _im2col_pooled(x, 5, 5)                             # (4, N*196, 75) bf16
    y1 = conv1_relu_pool(a4, kp["conv1_w"], kp["conv1_b"])           # (N*196, 128) bf16
    x1 = y1[:, :6].reshape(n, hp, wp, 6)

    # conv2 + ReLU + pool + flatten + fc1/fc2/fc3, all in ONE fused kernel.
    a4p, _, _ = _im2col_pooled_by_pos(x1, 5, 5)                      # (4, 25, N, 150) bf16
    logits = conv2_fc_chain(a4p, kp["conv2_w"], kp["conv2_b"],
                            kp["fc1_w"], kp["fc1_b"],
                            kp["fc2_w"], kp["fc2_b"],
                            kp["fc3_w"], kp["fc3_b"])                # (N, 128) f32
    return logits[:, :10]


# ---------------------------------------------------------------------------
# Pure-JAX f32 reference of the PyTorch module (for correctness check)
# ---------------------------------------------------------------------------
def net_forward_ref(x_nchw, params):
    x = x_nchw.astype(jnp.float32)

    def conv(x, w, b):
        y = jax.lax.conv_general_dilated(
            x, w, (1, 1), "VALID", dimension_numbers=("NCHW", "OIHW", "NCHW"))
        return jax.nn.relu(y + b.reshape(1, -1, 1, 1))

    def pool(x):
        nb, c, h, w = x.shape
        return x.reshape(nb, c, h // 2, 2, w // 2, 2).max(axis=(3, 5))

    x = pool(conv(x, params["conv1_w"], params["conv1_b"]))
    x = pool(conv(x, params["conv2_w"], params["conv2_b"]))
    x = x.reshape(x.shape[0], -1)                                    # (N, 400) NCHW flatten
    x = jax.nn.relu(x @ params["fc1_w"].T + params["fc1_b"])
    x = jax.nn.relu(x @ params["fc2_w"].T + params["fc2_b"])
    return x @ params["fc3_w"].T + params["fc3_b"]


if __name__ == "__main__":
    key = jax.random.PRNGKey(0)
    k_params, k_x = jax.random.split(key)
    params = init_params(k_params)
    kparams = prepare_params(params)                 # one-time, outside jit

    # fc1 expects 16*5*5 = 400 features => spatial input must be 32x32.
    x = jax.random.normal(k_x, (2, 3, 32, 32), jnp.float32)   # NCHW like PyTorch

    out = jax.block_until_ready(net_forward(x, kparams))
    assert out.shape == (2, 10), out.shape

    # Cross-check against the pure-JAX f32 reference (kernel uses bf16 operands
    # with f32 accumulation, so allow a loose tolerance).
    ref = jax.block_until_ready(net_forward_ref(x, params))
    err = float(jnp.max(jnp.abs(out - ref)))
    assert err < 1e-1, f"max abs error vs reference: {err}"
    print("KERNEL_OK")
</pallas_src>

<mosaic_0001>
module attributes {stable_mosaic.version = 11 : i64} {
  func.func @_conv_relu_pool_kernel(%arg0: i32, %arg1: memref<4x200x75xbf16, #tpu.memory_space<vmem>>, %arg2: memref<75x128xbf16, #tpu.memory_space<vmem>>, %arg3: memref<1x128xf32, #tpu.memory_space<vmem>>, %arg4: memref<200x128xbf16, #tpu.memory_space<vmem>>) attributes {dimension_semantics = [#tpu.dimension_semantics<parallel>], iteration_bounds = array<i64: 2>, scalar_prefetch = 0 : i64, scratch_operands = 0 : i64, tpu.core_type = #tpu.core_type<tc>, window_params = [{transform_indices = @transform_0, window_bounds = array<i64: 4, 200, 75>}, {pipeline_mode = #tpu.pipeline_mode<synchronous>, transform_indices = @transform_1, window_bounds = array<i64: 75, 128>}, {pipeline_mode = #tpu.pipeline_mode<synchronous>, transform_indices = @transform_2, window_bounds = array<i64: 1, 128>}, {transform_indices = @transform_3, window_bounds = array<i64: 200, 128>}]} {
    %c0 = arith.constant 0 : index
    %c0_0 = arith.constant 0 : index
    %0 = vector.load %arg2[%c0, %c0_0] : memref<75x128xbf16, #tpu.memory_space<vmem>>, vector<75x128xbf16>
    %c0_1 = arith.constant 0 : index
    %c0_2 = arith.constant 0 : index
    %c0_3 = arith.constant 0 : index
    %1 = vector.load %arg1[%c0_1, %c0_2, %c0_3] : memref<4x200x75xbf16, #tpu.memory_space<vmem>>, vector<1x200x75xbf16>
    %2 = vector.shape_cast %1 : vector<1x200x75xbf16> to vector<200x75xbf16>
    %cst = arith.constant dense<0.000000e+00> : vector<200x128xf32>
    %3 = tpu.matmul %2, %0, %cst {dimension_numbers = #tpu.dot_dimension_numbers<[1], [0], [0], [1], [0, 0, 1, 1], [], []>} : vector<200x75xbf16>, vector<75x128xbf16>, vector<200x128xf32> -> vector<200x128xf32>
    %c1 = arith.constant 1 : index
    %c0_4 = arith.constant 0 : index
    %c0_5 = arith.constant 0 : index
    %4 = vector.load %arg1[%c1, %c0_4, %c0_5] : memref<4x200x75xbf16, #tpu.memory_space<vmem>>, vector<1x200x75xbf16>
    %5 = vector.shape_cast %4 : vector<1x200x75xbf16> to vector<200x75xbf16>
    %cst_6 = arith.constant dense<0.000000e+00> : vector<200x128xf32>
    %6 = tpu.matmul %5, %0, %cst_6 {dimension_numbers = #tpu.dot_dimension_numbers<[1], [0], [0], [1], [0, 0, 1, 1], [], []>} : vector<200x75xbf16>, vector<75x128xbf16>, vector<200x128xf32> -> vector<200x128xf32>
    %7 = arith.maximumf %3, %6 : vector<200x128xf32>
    %c2 = arith.constant 2 : index
    %c0_7 = arith.constant 0 : index
    %c0_8 = arith.constant 0 : index
    %8 = vector.load %arg1[%c2, %c0_7, %c0_8] : memref<4x200x75xbf16, #tpu.memory_space<vmem>>, vector<1x200x75xbf16>
    %9 = vector.shape_cast %8 : vector<1x200x75xbf16> to vector<200x75xbf16>
    %cst_9 = arith.constant dense<0.000000e+00> : vector<200x128xf32>
    %10 = tpu.matmul %9, %0, %cst_9 {dimension_numbers = #tpu.dot_dimension_numbers<[1], [0], [0], [1], [0, 0, 1, 1], [], []>} : vector<200x75xbf16>, vector<75x128xbf16>, vector<200x128xf32> -> vector<200x128xf32>
    %11 = arith.maximumf %7, %10 : vector<200x128xf32>
    %c3 = arith.constant 3 : index
    %c0_10 = arith.constant 0 : index
    %c0_11 = arith.constant 0 : index
    %12 = vector.load %arg1[%c3, %c0_10, %c0_11] : memref<4x200x75xbf16, #tpu.memory_space<vmem>>, vector<1x200x75xbf16>
    %13 = vector.shape_cast %12 : vector<1x200x75xbf16> to vector<200x75xbf16>
    %cst_12 = arith.constant dense<0.000000e+00> : vector<200x128xf32>
    %14 = tpu.matmul %13, %0, %cst_12 {dimension_numbers = #tpu.dot_dimension_numbers<[1], [0], [0], [1], [0, 0, 1, 1], [], []>} : vector<200x75xbf16>, vector<75x128xbf16>, vector<200x128xf32> -> vector<200x128xf32>
    %15 = arith.maximumf %11, %14 : vector<200x128xf32>
    %c0_13 = arith.constant 0 : index
    %c0_14 = arith.constant 0 : index
    %16 = vector.load %arg3[%c0_13, %c0_14] : memref<1x128xf32, #tpu.memory_space<vmem>>, vector<1x128xf32>
    %17 = vector.broadcast %16 : vector<1x128xf32> to vector<200x128xf32>
    %18 = arith.addf %15, %17 : vector<200x128xf32>
    %cst_15 = arith.constant 0.000000e+00 : f32
    %19 = vector.broadcast %cst_15 : f32 to vector<200x128xf32>
    %20 = arith.maximumf %18, %19 : vector<200x128xf32>
    %21 = arith.truncf %20 : vector<200x128xf32> to vector<200x128xbf16>
    %c0_16 = arith.constant 0 : index
    %c0_17 = arith.constant 0 : index
    %22 = vector.load %arg4[%c0_16, %c0_17] : memref<200x128xbf16, #tpu.memory_space<vmem>>, vector<200x128xbf16>
    tpu.vector_store %arg4[%c0_16, %c0_17], %21 {strides = array<i32>} : memref<200x128xbf16, #tpu.memory_space<vmem>>, vector<200x128xbf16>,
    return
  }
  func.func @transform_0(%arg0: i32) -> (i32, i32, i32) {
    %c0_i32 = arith.constant 0 : i32
    %c0_i32_0 = arith.constant 0 : i32
    %c0_i32_1 = arith.constant 0 : i32
    return %c0_i32, %arg0, %c0_i32_0 : i32, i32, i32
  }
  func.func @transform_1(%arg0: i32) -> (i32, i32) {
    %c0_i32 = arith.constant 0 : i32
    %c0_i32_0 = arith.constant 0 : i32
    %c0_i32_1 = arith.constant 0 : i32
    return %c0_i32, %c0_i32_0 : i32, i32
  }
  func.func @transform_2(%arg0: i32) -> (i32, i32) {
    %c0_i32 = arith.constant 0 : i32
    %c0_i32_0 = arith.constant 0 : i32
    %c0_i32_1 = arith.constant 0 : i32
    return %c0_i32, %c0_i32_0 : i32, i32
  }
  func.func @transform_3(%arg0: i32) -> (i32, i32) {
    %c0_i32 = arith.constant 0 : i32
    %c0_i32_0 = arith.constant 0 : i32
    return %arg0, %c0_i32 : i32, i32
  }
}

module attributes {stable_mosaic.version = 11 : i64} {
  func.func @_conv2_fc_kernel(%arg0: i32, %arg1: memref<4x25x8x150xbf16, #tpu.memory_space<vmem>>, %arg2: memref<150x128xbf16, #tpu.memory_space<vmem>>, %arg3: memref<1x128xf32, #tpu.memory_space<vmem>>, %arg4: memref<25x128x128xbf16, #tpu.memory_space<vmem>>, %arg5: memref<1x128xf32, #tpu.memory_space<vmem>>, %arg6: memref<128x128xbf16, #tpu.memory_space<vmem>>, %arg7: memref<1x128xf32, #tpu.memory_space<vmem>>, %arg8: memref<128x128xbf16, #tpu.memory_space<vmem>>, %arg9: memref<1x128xf32, #tpu.memory_space<vmem>>, %arg10: memref<8x128xf32, #tpu.memory_space<vmem>>) attributes {dimension_semantics = [#tpu.dimension_semantics<parallel>], iteration_bounds = array<i64: 1>, scalar_prefetch = 0 : i64, scratch_operands = 0 : i64, tpu.core_type = #tpu.core_type<tc>, window_params = [{transform_indices = @transform_0, window_bounds = array<i64: 4, 25, 8, 150>}, {pipeline_mode = #tpu.pipeline_mode<synchronous>, transform_indices = @transform_1, window_bounds = array<i64: 150, 128>}, {pipeline_mode = #tpu.pipeline_mode<synchronous>, transform_indices = @transform_2, window_bounds = array<i64: 1, 128>}, {pipeline_mode = #tpu.pipeline_mode<synchronous>, transform_indices = @transform_3, window_bounds = array<i64: 25, 128, 128>}, {pipeline_mode = #tpu.pipeline_mode<synchronous>, transform_indices = @transform_4, window_bounds = array<i64: 1, 128>}, {pipeline_mode = #tpu.pipeline_mode<synchronous>, transform_indices = @transform_5, window_bounds = array<i64: 128, 128>}, {pipeline_mode = #tpu.pipeline_mode<synchronous>, transform_indices = @transform_6, window_bounds = array<i64: 1, 128>}, {pipeline_mode = #tpu.pipeline_mode<synchronous>, transform_indices = @transform_7, window_bounds = array<i64: 128, 128>}, {pipeline_mode = #tpu.pipeline_mode<synchronous>, transform_indices = @transform_8, window_bounds = array<i64: 1, 128>}, {transform_indices = @transform_9, window_bounds = array<i64: 8, 128>}]} {
    %c0 = arith.constant 0 : index
    %c0_0 = arith.constant 0 : index
    %0 = vector.load %arg2[%c0, %c0_0] : memref<150x128xbf16, #tpu.memory_space<vmem>>, vector<150x128xbf16>
    %c0_1 = arith.constant 0 : index
    %c0_2 = arith.constant 0 : index
    %1 = vector.load %arg3[%c0_1, %c0_2] : memref<1x128xf32, #tpu.memory_space<vmem>>, vector<1x128xf32>
    %cst = arith.constant 0.000000e+00 : f32
    %2 = vector.broadcast %cst : f32 to vector<8x128xf32>
    %c0_3 = arith.constant 0 : index
    %c0_4 = arith.constant 0 : index
    %c0_5 = arith.constant 0 : index
    %c0_6 = arith.constant 0 : index
    %3 = vector.load %arg1[%c0_3, %c0_4, %c0_5, %c0_6] : memref<4x25x8x150xbf16, #tpu.memory_space<vmem>>, vector<1x1x8x150xbf16>
    %4 = vector.shape_cast %3 : vector<1x1x8x150xbf16> to vector<8x150xbf16>
    %cst_7 = arith.constant dense<0.000000e+00> : vector<8x128xf32>
    %5 = tpu.matmul %4, %0, %cst_7 {dimension_numbers = #tpu.dot_dimension_numbers<[1], [0], [0], [1], [0, 0, 1, 1], [], []>} : vector<8x150xbf16>, vector<150x128xbf16>, vector<8x128xf32> -> vector<8x128xf32>
    %c1 = arith.constant 1 : index
    %c0_8 = arith.constant 0 : index
    %c0_9 = arith.constant 0 : index
    %c0_10 = arith.constant 0 : index
    %6 = vector.load %arg1[%c1, %c0_8, %c0_9, %c0_10] : memref<4x25x8x150xbf16, #tpu.memory_space<vmem>>, vector<1x1x8x150xbf16>
    %7 = vector.shape_cast %6 : vector<1x1x8x150xbf16> to vector<8x150xbf16>
    %cst_11 = arith.constant dense<0.000000e+00> : vector<8x128xf32>
    %8 = tpu.matmul %7, %0, %cst_11 {dimension_numbers = #tpu.dot_dimension_numbers<[1], [0], [0], [1], [0, 0, 1, 1], [], []>} : vector<8x150xbf16>, vector<150x128xbf16>, vector<8x128xf32> -> vector<8x128xf32>
    %9 = arith.maximumf %5, %8 : vector<8x128xf32>
    %c2 = arith.constant 2 : index
    %c0_12 = arith.constant 0 : index
    %c0_13 = arith.constant 0 : index
    %c0_14 = arith.constant 0 : index
    %10 = vector.load %arg1[%c2, %c0_12, %c0_13, %c0_14] : memref<4x25x8x150xbf16, #tpu.memory_space<vmem>>, vector<1x1x8x150xbf16>
    %11 = vector.shape_cast %10 : vector<1x1x8x150xbf16> to vector<8x150xbf16>
    %cst_15 = arith.constant dense<0.000000e+00> : vector<8x128xf32>
    %12 = tpu.matmul %11, %0, %cst_15 {dimension_numbers = #tpu.dot_dimension_numbers<[1], [0], [0], [1], [0, 0, 1, 1], [], []>} : vector<8x150xbf16>, vector<150x128xbf16>, vector<8x128xf32> -> vector<8x128xf32>
    %13 = arith.maximumf %9, %12 : vector<8x128xf32>
    %c3 = arith.constant 3 : index
    %c0_16 = arith.constant 0 : index
    %c0_17 = arith.constant 0 : index
    %c0_18 = arith.constant 0 : index
    %14 = vector.load %arg1[%c3, %c0_16, %c0_17, %c0_18] : memref<4x25x8x150xbf16, #tpu.memory_space<vmem>>, vector<1x1x8x150xbf16>
    %15 = vector.shape_cast %14 : vector<1x1x8x150xbf16> to vector<8x150xbf16>
    %cst_19 = arith.constant dense<0.000000e+00> : vector<8x128xf32>
    %16 = tpu.matmul %15, %0, %cst_19 {dimension_numbers = #tpu.dot_dimension_numbers<[1], [0], [0], [1], [0, 0, 1, 1], [], []>} : vector<8x150xbf16>, vector<150x128xbf16>, vector<8x128xf32> -> vector<8x128xf32>
    %17 = arith.maximumf %13, %16 : vector<8x128xf32>
    %18 = vector.broadcast %1 : vector<1x128xf32> to vector<8x128xf32>
    %19 = arith.addf %17, %18 : vector<8x128xf32>
    %cst_20 = arith.constant 0.000000e+00 : f32
    %20 = vector.broadcast %cst_20 : f32 to vector<8x128xf32>
    %21 = arith.maximumf %19, %20 : vector<8x128xf32>
    %22 = arith.truncf %21 : vector<8x128xf32> to vector<8x128xbf16>
    %c0_21 = arith.constant 0 : index
    %c0_22 = arith.constant 0 : index
    %c0_23 = arith.constant 0 : index
    %23 = vector.load %arg4[%c0_21, %c0_22, %c0_23] : memref<25x128x128xbf16, #tpu.memory_space<vmem>>, vector<1x128x128xbf16>
    %24 = vector.shape_cast %23 : vector<1x128x128xbf16> to vector<128x128xbf16>
    %cst_24 = arith.constant dense<0.000000e+00> : vector<8x128xf32>
    %25 = tpu.matmul %22, %24, %cst_24 {dimension_numbers = #tpu.dot_dimension_numbers<[1], [0], [0], [1], [0, 0, 1, 1], [], []>} : vector<8x128xbf16>, vector<128x128xbf16>, vector<8x128xf32> -> vector<8x128xf32>
    %26 = arith.addf %2, %25 : vector<8x128xf32>
    %c0_25 = arith.constant 0 : index
    %c1_26 = arith.constant 1 : index
    %c0_27 = arith.constant 0 : index
    %c0_28 = arith.constant 0 : index
    %27 = vector.load %arg1[%c0_25, %c1_26, %c0_27, %c0_28] : memref<4x25x8x150xbf16, #tpu.memory_space<vmem>>, vector<1x1x8x150xbf16>
    %28 = vector.shape_cast %27 : vector<1x1x8x150xbf16> to vector<8x150xbf16>
    %cst_29 = arith.constant dense<0.000000e+00> : vector<8x128xf32>
    %29 = tpu.matmul %28, %0, %cst_29 {dimension_numbers = #tpu.dot_dimension_numbers<[1], [0], [0], [1], [0, 0, 1, 1], [], []>} : vector<8x150xbf16>, vector<150x128xbf16>, vector<8x128xf32> -> vector<8x128xf32>
    %c1_30 = arith.constant 1 : index
    %c1_31 = arith.constant 1 : index
    %c0_32 = arith.constant 0 : index
    %c0_33 = arith.constant 0 : index
    %30 = vector.load %arg1[%c1_30, %c1_31, %c0_32, %c0_33] : memref<4x25x8x150xbf16, #tpu.memory_space<vmem>>, vector<1x1x8x150xbf16>
    %31 = vector.shape_cast %30 : vector<1x1x8x150xbf16> to vector<8x150xbf16>
    %cst_34 = arith.constant dense<0.000000e+00> : vector<8x128xf32>
    %32 = tpu.matmul %31, %0, %cst_34 {dimension_numbers = #tpu.dot_dimension_numbers<[1], [0], [0], [1], [0, 0, 1, 1], [], []>} : vector<8x150xbf16>, vector<150x128xbf16>, vector<8x128xf32> -> vector<8x128xf32>
    %33 = arith.maximumf %29, %32 : vector<8x128xf32>
    %c2_35 = arith.constant 2 : index
    %c1_36 = arith.constant 1 : index
    %c0_37 = arith.constant 0 : index
    %c0_38 = arith.constant 0 : index
    %34 = vector.load %arg1[%c2_35, %c1_36, %c0_37, %c0_38] : memref<4x25x8x150xbf16, #tpu.memory_space<vmem>>, vector<1x1x8x150xbf16>
    %35 = vector.shape_cast %34 : vector<1x1x8x150xbf16> to vector<8x150xbf16>
    %cst_39 = arith.constant dense<0.000000e+00> : vector<8x128xf32>
    %36 = tpu.matmul %35, %0, %cst_39 {dimension_numbers = #tpu.dot_dimension_numbers<[1], [0], [0], [1], [0, 0, 1, 1], [], []>} : vector<8x150xbf16>, vector<150x128xbf16>, vector<8x128xf32> -> vector<8x128xf32>
    %37 = arith.maximumf %33, %36 : vector<8x128xf32>
    %c3_40 = arith.constant 3 : index
    %c1_41 = arith.constant 1 : index
    %c0_42 = arith.constant 0 : index
    %c0_43 = arith.constant 0 : index
    %38 = vector.load %arg1[%c3_40, %c1_41, %c0_42, %c0_43] : memref<4x25x8x150xbf16, #tpu.memory_space<vmem>>, vector<1x1x8x150xbf16>
    %39 = vector.shape_cast %38 : vector<1x1x8x150xbf16> to vector<8x150xbf16>
    %cst_44 = arith.constant dense<0.000000e+00> : vector<8x128xf32>
    %40 = tpu.matmul %39, %0, %cst_44 {dimension_numbers = #tpu.dot_dimension_numbers<[1], [0], [0], [1], [0, 0, 1, 1], [], []>} : vector<8x150xbf16>, vector<150x128xbf16>, vector<8x128xf32> -> vector<8x128xf32>
    %41 = arith.maximumf %37, %40 : vector<8x128xf32>
    %42 = vector.broadcast %1 : vector<1x128xf32> to vector<8x128xf32>
    %43 = arith.addf %41, %42 : vector<8x128xf32>
    %cst_45 = arith.constant 0.000000e+00 : f32
    %44 = vector.broadcast %cst_45 : f32 to vector<8x128xf32>
    %45 = arith.maximumf %43, %44 : vector<8x128xf32>
    %46 = arith.truncf %45 : vector<8x128xf32> to vector<8x128xbf16>
    %c1_46 = arith.constant 1 : index
    %c0_47 = arith.constant 0 : index
    %c0_48 = arith.constant 0 : index
    %47 = vector.load %arg4[%c1_46, %c0_47, %c0_48] : memref<25x128x128xbf16, #tpu.memory_space<vmem>>, vector<1x128x128xbf16>
    %48 = vector.shape_cast %47 : vector<1x128x128xbf16> to vector<128x128xbf16>
    %cst_49 = arith.constant dense<0.000000e+00> : vector<8x128xf32>
    %49 = tpu.matmul %46, %48, %cst_49 {dimension_numbers = #tpu.dot_dimension_numbers<[1], [0], [0], [1], [0, 0, 1, 1], [], []>} : vector<8x128xbf16>, vector<128x128xbf16>, vector<8x128xf32> -> vector<8x128xf32>
    %50 = arith.addf %26, %49 : vector<8x128xf32>
    %c0_50 = arith.constant 0 : index
    %c2_51 = arith.constant 2 : index
    %c0_52 = arith.constant 0 : index
    %c0_53 = arith.constant 0 : index
    %51 = vector.load %arg1[%c0_50, %c2_51, %c0_52, %c0_53] : memref<4x25x8x150xbf16, #tpu.memory_space<vmem>>, vector<1x1x8x150xbf16>
    %52 = vector.shape_cast %51 : vector<1x1x8x150xbf16> to vector<8x150xbf16>
    %cst_54 = arith.constant dense<0.000000e+00> : vector<8x128xf32>
    %53 = tpu.matmul %52, %0, %cst_54 {dimension_numbers = #tpu.dot_dimension_numbers<[1], [0], [0], [1], [0, 0, 1, 1], [], []>} : vector<8x150xbf16>, vector<150x128xbf16>, vector<8x128xf32> -> vector<8x128xf32>
    %c1_55 = arith.constant 1 : index
    %c2_56 = arith.constant 2 : index
    %c0_57 = arith.constant 0 : index
    %c0_58 = arith.constant 0 : index
    %54 = vector.load %arg1[%c1_55, %c2_56, %c0_57, %c0_58] : memref<4x25x8x150xbf16, #tpu.memory_space<vmem>>, vector<1x1x8x150xbf16>
    %55 = vector.shape_cast %54 : vector<1x1x8x150xbf16> to vector<8x150xbf16>
    %cst_59 = arith.constant dense<0.000000e+00> : vector<8x128xf32>
    %56 = tpu.matmul %55, %0, %cst_59 {dimension_numbers = #tpu.dot_dimension_numbers<[1], [0], [0], [1], [0, 0, 1, 1], [], []>} : vector<8x150xbf16>, vector<150x128xbf16>, vector<8x128xf32> -> vector<8x128xf32>
    %57 = arith.maximumf %53, %56 : vector<8x128xf32>
    %c2_60 = arith.constant 2 : index
    %c2_61 = arith.constant 2 : index
    %c0_62 = arith.constant 0 : index
    %c0_63 = arith.constant 0 : index
    %58 = vector.load %arg1[%c2_60, %c2_61, %c0_62, %c0_63] : memref<4x25x8x150xbf16, #tpu.memory_space<vmem>>, vector<1x1x8x150xbf16>
    %59 = vector.shape_cast %58 : vector<1x1x8x150xbf16> to vector<8x150xbf16>
    %cst_64 = arith.constant dense<0.000000e+00> : vector<8x128xf32>
    %60 = tpu.matmul %59, %0, %cst_64 {dimension_numbers = #tpu.dot_dimension_numbers<[1], [0], [0], [1], [0, 0, 1, 1], [], []>} : vector<8x150xbf16>, vector<150x128xbf16>, vector<8x128xf32> -> vector<8x128xf32>
    %61 = arith.maximumf %57, %60 : vector<8x128xf32>
    %c3_65 = arith.constant 3 : index
    %c2_66 = arith.constant 2 : index
    %c0_67 = arith.constant 0 : index
    %c0_68 = arith.constant 0 : index
    %62 = vector.load %arg1[%c3_65, %c2_66, %c0_67, %c0_68] : memref<4x25x8x150xbf16, #tpu.memory_space<vmem>>, vector<1x1x8x150xbf16>
    %63 = vector.shape_cast %62 : vector<1x1x8x150xbf16> to vector<8x150xbf16>
    %cst_69 = arith.constant dense<0.000000e+00> : vector<8x128xf32>
    %64 = tpu.matmul %63, %0, %cst_69 {dimension_numbers = #tpu.dot_dimension_numbers<[1], [0], [0], [1], [0, 0, 1, 1], [], []>} : vector<8x150xbf16>, vector<150x128xbf16>, vector<8x128xf32> -> vector<8x128xf32>
    %65 = arith.maximumf %61, %64 : vector<8x128xf32>
    %66 = vector.broadcast %1 : vector<1x128xf32> to vector<8x128xf32>
    %67 = arith.addf %65, %66 : vector<8x128xf32>
    %cst_70 = arith.constant 0.000000e+00 : f32
    %68 = vector.broadcast %cst_70 : f32 to vector<8x128xf32>
    %69 = arith.maximumf %67, %68 : vector<8x128xf32>
    %70 = arith.truncf %69 : vector<8x128xf32> to vector<8x128xbf16>
    %c2_71 = arith.constant 2 : index
    %c0_72 = arith.constant 0 : index
    %c0_73 = arith.constant 0 : index
    %71 = vector.load %arg4[%c2_71, %c0_72, %c0_73] : memref<25x128x128xbf16, #tpu.memory_space<vmem>>, vector<1x128x128xbf16>
    %72 = vector.shape_cast %71 : vector<1x128x128xbf16> to vector<128x128xbf16>
    %cst_74 = arith.constant dense<0.000000e+00> : vector<8x128xf32>
    %73 = tpu.matmul %70, %72, %cst_74 {dimension_numbers = #tpu.dot_dimension_numbers<[1], [0], [0], [1], [0, 0, 1, 1], [], []>} : vector<8x128xbf16>, vector<128x128xbf16>, vector<8x128xf32> -> vector<8x128xf32>
    %74 = arith.addf %50, %73 : vector<8x128xf32>
    %c0_75 = arith.constant 0 : index
    %c3_76 = arith.constant 3 : index
    %c0_77 = arith.constant 0 : index
    %c0_78 = arith.constant 0 : index
    %75 = vector.load %arg1[%c0_75, %c3_76, %c0_77, %c0_78] : memref<4x25x8x150xbf16, #tpu.memory_space<vmem>>, vector<1x1x8x150xbf16>
    %76 = vector.shape_cast %75 : vector<1x1x8x150xbf16> to vector<8x150xbf16>
    %cst_79 = arith.constant dense<0.000000e+00> : vector<8x128xf32>
    %77 = tpu.matmul %76, %0, %cst_79 {dimension_numbers = #tpu.dot_dimension_numbers<[1], [0], [0], [1], [0, 0, 1, 1], [], []>} : vector<8x150xbf16>, vector<150x128xbf16>, vector<8x128xf32> -> vector<8x128xf32>
    %c1_80 = arith.constant 1 : index
    %c3_81 = arith.constant 3 : index
    %c0_82 = arith.constant 0 : index
    %c0_83 = arith.constant 0 : index
    %78 = vector.load %arg1[%c1_80, %c3_81, %c0_82, %c0_83] : memref<4x25x8x150xbf16, #tpu.memory_space<vmem>>, vector<1x1x8x150xbf16>
    %79 = vector.shape_cast %78 : vector<1x1x8x150xbf16> to vector<8x150xbf16>
    %cst_84 = arith.constant dense<0.000000e+00> : vector<8x128xf32>
    %80 = tpu.matmul %79, %0, %cst_84 {dimension_numbers = #tpu.dot_dimension_numbers<[1], [0], [0], [1], [0, 0, 1, 1], [], []>} : vector<8x150xbf16>, vector<150x128xbf16>, vector<8x128xf32> -> vector<8x128xf32>
    %81 = arith.maximumf %77, %80 : vector<8x128xf32>
    %c2_85 = arith.constant 2 : index
    %c3_86 = arith.constant 3 : index
    %c0_87 = arith.constant 0 : index
    %c0_88 = arith.constant 0 : index
    %82 = vector.load %arg1[%c2_85, %c3_86, %c0_87, %c0_88] : memref<4x25x8x150xbf16, #tpu.memory_space<vmem>>, vector<1x1x8x150xbf16>
    %83 = vector.shape_cast %82 : vector<1x1x8x150xbf16> to vector<8x150xbf16>
    %cst_89 = arith.constant dense<0.000000e+00> : vector<8x128xf32>
    %84 = tpu.matmul %83, %0, %cst_89 {dimension_numbers = #tpu.dot_dimension_numbers<[1], [0], [0], [1], [0, 0, 1, 1], [], []>} : vector<8x150xbf16>, vector<150x128xbf16>, vector<8x128xf32> -> vector<8x128xf32>
    %85 = arith.maximumf %81, %84 : vector<8x128xf32>
    %c3_90 = arith.constant 3 : index
    %c3_91 = arith.constant 3 : index
    %c0_92 = arith.constant 0 : index
    %c0_93 = arith.constant 0 : index
    %86 = vector.load %arg1[%c3_90, %c3_91, %c0_92, %c0_93] : memref<4x25x8x150xbf16, #tpu.memory_space<vmem>>, vector<1x1x8x150xbf16>
    %87 = vector.shape_cast %86 : vector<1x1x8x150xbf16> to vector<8x150xbf16>
    %cst_94 = arith.constant dense<0.000000e+00> : vector<8x128xf32>
    %88 = tpu.matmul %87, %0, %cst_94 {dimension_numbers = #tpu.dot_dimension_numbers<[1], [0], [0], [1], [0, 0, 1, 1], [], []>} : vector<8x150xbf16>, vector<150x128xbf16>, vector<8x128xf32> -> vector<8x128xf32>
    %89 = arith.maximumf %85, %88 : vector<8x128xf32>
    %90 = vector.broadcast %1 : vector<1x128xf32> to vector<8x128xf32>
    %91 = arith.addf %89, %90 : vector<8x128xf32>
    %cst_95 = arith.constant 0.000000e+00 : f32
    %92 = vector.broadcast %cst_95 : f32 to vector<8x128xf32>
    %93 = arith.maximumf %91, %92 : vector<8x128xf32>
    %94 = arith.truncf %93 : vector<8x128xf32> to vector<8x128xbf16>
    %c3_96 = arith.constant 3 : index
    %c0_97 = arith.constant 0 : index
    %c0_98 = arith.constant 0 : index
    %95 = vector.load %arg4[%c3_96, %c0_97, %c0_98] : memref<25x128x128xbf16, #tpu.memory_space<vmem>>, vector<1x128x128xbf16>
    %96 = vector.shape_cast %95 : vector<1x128x128xbf16> to vector<128x128xbf16>
    %cst_99 = arith.constant dense<0.000000e+00> : vector<8x128xf32>
    %97 = tpu.matmul %94, %96, %cst_99 {dimension_numbers = #tpu.dot_dimension_numbers<[1], [0], [0], [1], [0, 0, 1, 1], [], []>} : vector<8x128xbf16>, vector<128x128xbf16>, vector<8x128xf32> -> vector<8x128xf32>
    %98 = arith.addf %74, %97 : vector<8x128xf32>
    %c0_100 = arith.constant 0 : index
    %c4 = arith.constant 4 : index
    %c0_101 = arith.constant 0 : index
    %c0_102 = arith.constant 0 : index
    %99 = vector.load %arg1[%c0_100, %c4, %c0_101, %c0_102] : memref<4x25x8x150xbf16, #tpu.memory_space<vmem>>, vector<1x1x8x150xbf16>
    %100 = vector.shape_cast %99 : vector<1x1x8x150xbf16> to vector<8x150xbf16>
    %cst_103 = arith.constant dense<0.000000e+00> : vector<8x128xf32>
    %101 = tpu.matmul %100, %0, %cst_103 {dimension_numbers = #tpu.dot_dimension_numbers<[1], [0], [0], [1], [0, 0, 1, 1], [], []>} : vector<8x150xbf16>, vector<150x128xbf16>, vector<8x128xf32> -> vector<8x128xf32>
    %c1_104 = arith.constant 1 : index
    %c4_105 = arith.constant 4 : index
    %c0_106 = arith.constant 0 : index
    %c0_107 = arith.constant 0 : index
    %102 = vector.load %arg1[%c1_104, %c4_105, %c0_106, %c0_107] : memref<4x25x8x150xbf16, #tpu.memory_space<vmem>>, vector<1x1x8x150xbf16>
    %103 = vector.shape_cast %102 : vector<1x1x8x150xbf16> to vector<8x150xbf16>
    %cst_108 = arith.constant dense<0.000000e+00> : vector<8x128xf32>
    %104 = tpu.matmul %103, %0, %cst_108 {dimension_numbers = #tpu.dot_dimension_numbers<[1], [0], [0], [1], [0, 0, 1, 1], [], []>} : vector<8x150xbf16>, vector<150x128xbf16>, vector<8x128xf32> -> vector<8x128xf32>
    %105 = arith.maximumf %101, %104 : vector<8x128xf32>
    %c2_109 = arith.constant 2 : index
    %c4_110 = arith.constant 4 : index
    %c0_111 = arith.constant 0 : index
    %c0_112 = arith.constant 0 : index
    %106 = vector.load %arg1[%c2_109, %c4_110, %c0_111, %c0_112] : memref<4x25x8x150xbf16, #tpu.memory_space<vmem>>, vector<1x1x8x150xbf16>
    %107 = vector.shape_cast %106 : vector<1x1x8x150xbf16> to vector<8x150xbf16>
    %cst_113 = arith.constant dense<0.000000e+00> : vector<8x128xf32>
    %108 = tpu.matmul %107, %0, %cst_113 {dimension_numbers = #tpu.dot_dimension_numbers<[1], [0], [0], [1], [0, 0, 1, 1], [], []>} : vector<8x150xbf16>, vector<150x128xbf16>, vector<8x128xf32> -> vector<8x128xf32>
    %109 = arith.maximumf %105, %108 : vector<8x128xf32>
    %c3_114 = arith.constant 3 : index
    %c4_115 = arith.constant 4 : index
    %c0_116 = arith.constant 0 : index
    %c0_117 = arith.constant 0 : index
    %110 = vector.load %arg1[%c3_114, %c4_115, %c0_116, %c0_117] : memref<4x25x8x150xbf16, #tpu.memory_space<vmem>>, vector<1x1x8x150xbf16>
    %111 = vector.shape_cast %110 : vector<1x1x8x150xbf16> to vector<8x150xbf16>
    %cst_118 = arith.constant dense<0.000000e+00> : vector<8x128xf32>
    %112 = tpu.matmul %111, %0, %cst_118 {dimension_numbers = #tpu.dot_dimension_numbers<[1], [0], [0], [1], [0, 0, 1, 1], [], []>} : vector<8x150xbf16>, vector<150x128xbf16>, vector<8x128xf32> -> vector<8x128xf32>
    %113 = arith.maximumf %109, %112 : vector<8x128xf32>
    %114 = vector.broadcast %1 : vector<1x128xf32> to vector<8x128xf32>
    %115 = arith.addf %113, %114 : vector<8x128xf32>
    %cst_119 = arith.constant 0.000000e+00 : f32
    %116 = vector.broadcast %cst_119 : f32 to vector<8x128xf32>
    %117 = arith.maximumf %115, %116 : vector<8x128xf32>
    %118 = arith.truncf %117 : vector<8x128xf32> to vector<8x128xbf16>
    %c4_120 = arith.constant 4 : index
    %c0_121 = arith.constant 0 : index
    %c0_122 = arith.constant 0 : index
    %119 = vector.load %arg4[%c4_120, %c0_121, %c0_122] : memref<25x128x128xbf16, #tpu.memory_space<vmem>>, vector<1x128x128xbf16>
    %120 = vector.shape_cast %119 : vector<1x128x128xbf16> to vector<128x128xbf16>
    %cst_123 = arith.constant dense<0.000000e+00> : vector<8x128xf32>
    %121 = tpu.matmul %118, %120, %cst_123 {dimension_numbers = #tpu.dot_dimension_numbers<[1], [0], [0], [1], [0, 0, 1, 1], [], []>} : vector<8x128xbf16>, vector<128x128xbf16>, vector<8x128xf32> -> vector<8x128xf32>
    %122 = arith.addf %98, %121 : vector<8x128xf32>
    %c0_124 = arith.constant 0 : index
    %c5 = arith.constant 5 : index
    %c0_125 = arith.constant 0 : index
    %c0_126 = arith.constant 0 : index
    %123 = vector.load %arg1[%c0_124, %c5, %c0_125, %c0_126] : memref<4x25x8x150xbf16, #tpu.memory_space<vmem>>, vector<1x1x8x150xbf16>
    %124 = vector.shape_cast %123 : vector<1x1x8x150xbf16> to vector<8x150xbf16>
    %cst_127 = arith.constant dense<0.000000e+00> : vector<8x128xf32>
    %125 = tpu.matmul %124, %0, %cst_127 {dimension_numbers = #tpu.dot_dimension_numbers<[1], [0], [0], [1], [0, 0, 1, 1], [], []>} : vector<8x150xbf16>, vector<150x128xbf16>, vector<8x128xf32> -> vector<8x128xf32>
    %c1_128 = arith.constant 1 : index
    %c5_129 = arith.constant 5 : index
    %c0_130 = arith.constant 0 : index
    %c0_131 = arith.constant 0 : index
    %126 = vector.load %arg1[%c1_128, %c5_129, %c0_130, %c0_131] : memref<4x25x8x150xbf16, #tpu.memory_space<vmem>>, vector<1x1x8x150xbf16>
    %127 = vector.shape_cast %126 : vector<1x1x8x150xbf16> to vector<8x150xbf16>
    %cst_132 = arith.constant dense<0.000000e+00> : vector<8x128xf32>
    %128 = tpu.matmul %127, %0, %cst_132 {dimension_numbers = #tpu.dot_dimension_numbers<[1], [0], [0], [1], [0, 0, 1, 1], [], []>} : vector<8x150xbf16>, vector<150x128xbf16>, vector<8x128xf32> -> vector<8x128xf32>
    %129 = arith.maximumf %125, %128 : vector<8x128xf32>
    %c2_133 = arith.constant 2 : index
    %c5_134 = arith.constant 5 : index
    %c0_135 = arith.constant 0 : index
    %c0_136 = arith.constant 0 : index
    %130 = vector.load %arg1[%c2_133, %c5_134, %c0_135, %c0_136] : memref<4x25x8x150xbf16, #tpu.memory_space<vmem>>, vector<1x1x8x150xbf16>
    %131 = vector.shape_cast %130 : vector<1x1x8x150xbf16> to vector<8x150xbf16>
    %cst_137 = arith.constant dense<0.000000e+00> : vector<8x128xf32>
    %132 = tpu.matmul %131, %0, %cst_137 {dimension_numbers = #tpu.dot_dimension_numbers<[1], [0], [0], [1], [0, 0, 1, 1], [], []>} : vector<8x150xbf16>, vector<150x128xbf16>, vector<8x128xf32> -> vector<8x128xf32>
    %133 = arith.maximumf %129, %132 : vector<8x128xf32>
    %c3_138 = arith.constant 3 : index
    %c5_139 = arith.constant 5 : index
    %c0_140 = arith.constant 0 : index
    %c0_141 = arith.constant 0 : index
    %134 = vector.load %arg1[%c3_138, %c5_139, %c0_140, %c0_141] : memref<4x25x8x150xbf16, #tpu.memory_space<vmem>>, vector<1x1x8x150xbf16>
    %135 = vector.shape_cast %134 : vector<1x1x8x150xbf16> to vector<8x150xbf16>
    %cst_142 = arith.constant dense<0.000000e+00> : vector<8x128xf32>
    %136 = tpu.matmul %135, %0, %cst_142 {dimension_numbers = #tpu.dot_dimension_numbers<[1], [0], [0], [1], [0, 0, 1, 1], [], []>} : vector<8x150xbf16>, vector<150x128xbf16>, vector<8x128xf32> -> vector<8x128xf32>
    %137 = arith.maximumf %133, %136 : vector<8x128xf32>
    %138 = vector.broadcast %1 : vector<1x128xf32> to vector<8x128xf32>
    %139 = arith.addf %137, %138 : vector<8x128xf32>
    %cst_143 = arith.constant 0.000000e+00 : f32
    %140 = vector.broadcast %cst_143 : f32 to vector<8x128xf32>
    %141 = arith.maximumf %139, %140 : vector<8x128xf32>
    %142 = arith.truncf %141 : vector<8x128xf32> to vector<8x128xbf16>
    %c5_144 = arith.constant 5 : index
    %c0_145 = arith.constant 0 : index
    %c0_146 = arith.constant 0 : index
    %143 = vector.load %arg4[%c5_144, %c0_145, %c0_146] : memref<25x128x128xbf16, #tpu.memory_space<vmem>>, vector<1x128x128xbf16>
    %144 = vector.shape_cast %143 : vector<1x128x128xbf16> to vector<128x128xbf16>
    %cst_147 = arith.constant dense<0.000000e+00> : vector<8x128xf32>
    %145 = tpu.matmul %142, %144, %cst_147 {dimension_numbers = #tpu.dot_dimension_numbers<[1], [0], [0], [1], [0, 0, 1, 1], [], []>} : vector<8x128xbf16>, vector<128x128xbf16>, vector<8x128xf32> -> vector<8x128xf32>
    %146 = arith.addf %122, %145 : vector<8x128xf32>
    %c0_148 = arith.constant 0 : index
    %c6 = arith.constant 6 : index
    %c0_149 = arith.constant 0 : index
    %c0_150 = arith.constant 0 : index
    %147 = vector.load %arg1[%c0_148, %c6, %c0_149, %c0_150] : memref<4x25x8x150xbf16, #tpu.memory_space<vmem>>, vector<1x1x8x150xbf16>
    %148 = vector.shape_cast %147 : vector<1x1x8x150xbf16> to vector<8x150xbf16>
    %cst_151 = arith.constant dense<0.000000e+00> : vector<8x128xf32>
    %149 = tpu.matmul %148, %0, %cst_151 {dimension_numbers = #tpu.dot_dimension_numbers<[1], [0], [0], [1], [0, 0, 1, 1], [], []>} : vector<8x150xbf16>, vector<150x128xbf16>, vector<8x128xf32> -> vector<8x128xf32>
    %c1_152 = arith.constant 1 : index
    %c6_153 = arith.constant 6 : index
    %c0_154 = arith.constant 0 : index
    %c0_155 = arith.constant 0 : index
    %150 = vector.load %arg1[%c1_152, %c6_153, %c0_154, %c0_155] : memref<4x25x8x150xbf16, #tpu.memory_space<vmem>>, vector<1x1x8x150xbf16>
    %151 = vector.shape_cast %150 : vector<1x1x8x150xbf16> to vector<8x150xbf16>
    %cst_156 = arith.constant dense<0.000000e+00> : vector<8x128xf32>
    %152 = tpu.matmul %151, %0, %cst_156 {dimension_numbers = #tpu.dot_dimension_numbers<[1], [0], [0], [1], [0, 0, 1, 1], [], []>} : vector<8x150xbf16>, vector<150x128xbf16>, vector<8x128xf32> -> vector<8x128xf32>
    %153 = arith.maximumf %149, %152 : vector<8x128xf32>
    %c2_157 = arith.constant 2 : index
    %c6_158 = arith.constant 6 : index
    %c0_159 = arith.constant 0 : index
    %c0_160 = arith.constant 0 : index
    %154 = vector.load %arg1[%c2_157, %c6_158, %c0_159, %c0_160] : memref<4x25x8x150xbf16, #tpu.memory_space<vmem>>, vector<1x1x8x150xbf16>
    %155 = vector.shape_cast %154 : vector<1x1x8x150xbf16> to vector<8x150xbf16>
    %cst_161 = arith.constant dense<0.000000e+00> : vector<8x128xf32>
    %156 = tpu.matmul %155, %0, %cst_161 {dimension_numbers = #tpu.dot_dimension_numbers<[1], [0], [0], [1], [0, 0, 1, 1], [], []>} : vector<8x150xbf16>, vector<150x128xbf16>, vector<8x128xf32> -> vector<8x128xf32>
    %157 = arith.maximumf %153, %156 : vector<8x128xf32>
    %c3_162 = arith.constant 3 : index
    %c6_163 = arith.constant 6 : index
    %c0_164 = arith.constant 0 : index
    %c0_165 = arith.constant 0 : index
    %158 = vector.load %arg1[%c3_162, %c6_163, %c0_164, %c0_165] : memref<4x25x8x150xbf16, #tpu.memory_space<vmem>>, vector<1x1x8x150xbf16>
    %159 = vector.shape_cast %158 : vector<1x1x8x150xbf16> to vector<8x150xbf16>
    %cst_166 = arith.constant dense<0.000000e+00> : vector<8x128xf32>
    %160 = tpu.matmul %159, %0, %cst_166 {dimension_numbers = #tpu.dot_dimension_numbers<[1], [0], [0], [1], [0, 0, 1, 1], [], []>} : vector<8x150xbf16>, vector<150x128xbf16>, vector<8x128xf32> -> vector<8x128xf32>
    %161 = arith.maximumf %157, %160 : vector<8x128xf32>
    %162 = vector.broadcast %1 : vector<1x128xf32> to vector<8x128xf32>
    %163 = arith.addf %161, %162 : vector<8x128xf32>
    %cst_167 = arith.constant 0.000000e+00 : f32
    %164 = vector.broadcast %cst_167 : f32 to vector<8x128xf32>
    %165 = arith.maximumf %163, %164 : vector<8x128xf32>
    %166 = arith.truncf %165 : vector<8x128xf32> to vector<8x128xbf16>
    %c6_168 = arith.constant 6 : index
    %c0_169 = arith.constant 0 : index
    %c0_170 = arith.constant 0 : index
    %167 = vector.load %arg4[%c6_168, %c0_169, %c0_170] : memref<25x128x128xbf16, #tpu.memory_space<vmem>>, vector<1x128x128xbf16>
    %168 = vector.shape_cast %167 : vector<1x128x128xbf16> to vector<128x128xbf16>
    %cst_171 = arith.constant dense<0.000000e+00> : vector<8x128xf32>
    %169 = tpu.matmul %166, %168, %cst_171 {dimension_numbers = #tpu.dot_dimension_numbers<[1], [0], [0], [1], [0, 0, 1, 1], [], []>} : vector<8x128xbf16>, vector<128x128xbf16>, vector<8x128xf32> -> vector<8x128xf32>
    %170 = arith.addf %146, %169 : vector<8x128xf32>
    %c0_172 = arith.constant 0 : index
    %c7 = arith.constant 7 : index
    %c0_173 = arith.constant 0 : index
    %c0_174 = arith.constant 0 : index
    %171 = vector.load %arg1[%c0_172, %c7, %c0_173, %c0_174] : memref<4x25x8x150xbf16, #tpu.memory_space<vmem>>, vector<1x1x8x150xbf16>
    %172 = vector.shape_cast %171 : vector<1x1x8x150xbf16> to vector<8x150xbf16>
    %cst_175 = arith.constant dense<0.000000e+00> : vector<8x128xf32>
    %173 = tpu.matmul %172, %0, %cst_175 {dimension_numbers = #tpu.dot_dimension_numbers<[1], [0], [0], [1], [0, 0, 1, 1], [], []>} : vector<8x150xbf16>, vector<150x128xbf16>, vector<8x128xf32> -> vector<8x128xf32>
    %c1_176 = arith.constant 1 : index
    %c7_177 = arith.constant 7 : index
    %c0_178 = arith.constant 0 : index
    %c0_179 = arith.constant 0 : index
    %174 = vector.load %arg1[%c1_176, %c7_177, %c0_178, %c0_179] : memref<4x25x8x150xbf16, #tpu.memory_space<vmem>>, vector<1x1x8x150xbf16>
    %175 = vector.shape_cast %174 : vector<1x1x8x150xbf16> to vector<8x150xbf16>
    %cst_180 = arith.constant dense<0.000000e+00> : vector<8x128xf32>
    %176 = tpu.matmul %175, %0, %cst_180 {dimension_numbers = #tpu.dot_dimension_numbers<[1], [0], [0], [1], [0, 0, 1, 1], [], []>} : vector<8x150xbf16>, vector<150x128xbf16>, vector<8x128xf32> -> vector<8x128xf32>
    %177 = arith.maximumf %173, %176 : vector<8x128xf32>
    %c2_181 = arith.constant 2 : index
    %c7_182 = arith.constant 7 : index
    %c0_183 = arith.constant 0 : index
    %c0_184 = arith.constant 0 : index
    %178 = vector.load %arg1[%c2_181, %c7_182, %c0_183, %c0_184] : memref<4x25x8x150xbf16, #tpu.memory_space<vmem>>, vector<1x1x8x150xbf16>
    %179 = vector.shape_cast %178 : vector<1x1x8x150xbf16> to vector<8x150xbf16>
    %cst_185 = arith.constant dense<0.000000e+00> : vector<8x128xf32>
    %180 = tpu.matmul %179, %0, %cst_185 {dimension_numbers = #tpu.dot_dimension_numbers<[1], [0], [0], [1], [0, 0, 1, 1], [], []>} : vector<8x150xbf16>, vector<150x128xbf16>, vector<8x128xf32> -> vector<8x128xf32>
    %181 = arith.maximumf %177, %180 : vector<8x128xf32>
    %c3_186 = arith.constant 3 : index
    %c7_187 = arith.constant 7 : index
    %c0_188 = arith.constant 0 : index
    %c0_189 = arith.constant 0 : index
    %182 = vector.load %arg1[%c3_186, %c7_187, %c0_188, %c0_189] : memref<4x25x8x150xbf16, #tpu.memory_space<vmem>>, vector<1x1x8x150xbf16>
    %183 = vector.shape_cast %182 : vector<1x1x8x150xbf16> to vector<8x150xbf16>
    %cst_190 = arith.constant dense<0.000000e+00> : vector<8x128xf32>
    %184 = tpu.matmul %183, %0, %cst_190 {dimension_numbers = #tpu.dot_dimension_numbers<[1], [0], [0], [1], [0, 0, 1, 1], [], []>} : vector<8x150xbf16>, vector<150x128xbf16>, vector<8x128xf32> -> vector<8x128xf32>
    %185 = arith.maximumf %181, %184 : vector<8x128xf32>
    %186 = vector.broadcast %1 : vector<1x128xf32> to vector<8x128xf32>
    %187 = arith.addf %185, %186 : vector<8x128xf32>
    %cst_191 = arith.constant 0.000000e+00 : f32
    %188 = vector.broadcast %cst_191 : f32 to vector<8x128xf32>
    %189 = arith.maximumf %187, %188 : vector<8x128xf32>
    %190 = arith.truncf %189 : vector<8x128xf32> to vector<8x128xbf16>
    %c7_192 = arith.constant 7 : index
    %c0_193 = arith.constant 0 : index
    %c0_194 = arith.constant 0 : index
    %191 = vector.load %arg4[%c7_192, %c0_193, %c0_194] : memref<25x128x128xbf16, #tpu.memory_space<vmem>>, vector<1x128x128xbf16>
    %192 = vector.shape_cast %191 : vector<1x128x128xbf16> to vector<128x128xbf16>
    %cst_195 = arith.constant dense<0.000000e+00> : vector<8x128xf32>
    %193 = tpu.matmul %190, %192, %cst_195 {dimension_numbers = #tpu.dot_dimension_numbers<[1], [0], [0], [1], [0, 0, 1, 1], [], []>} : vector<8x128xbf16>, vector<128x128xbf16>, vector<8x128xf32> -> vector<8x128xf32>
    %194 = arith.addf %170, %193 : vector<8x128xf32>
    %c0_196 = arith.constant 0 : index
    %c8 = arith.constant 8 : index
    %c0_197 = arith.constant 0 : index
    %c0_198 = arith.constant 0 : index
    %195 = vector.load %arg1[%c0_196, %c8, %c0_197, %c0_198] : memref<4x25x8x150xbf16, #tpu.memory_space<vmem>>, vector<1x1x8x150xbf16>
    %196 = vector.shape_cast %195 : vector<1x1x8x150xbf16> to vector<8x150xbf16>
    %cst_199 = arith.constant dense<0.000000e+00> : vector<8x128xf32>
    %197 = tpu.matmul %196, %0, %cst_199 {dimension_numbers = #tpu.dot_dimension_numbers<[1], [0], [0], [1], [0, 0, 1, 1], [], []>} : vector<8x150xbf16>, vector<150x128xbf16>, vector<8x128xf32> -> vector<8x128xf32>
    %c1_200 = arith.constant 1 : index
    %c8_201 = arith.constant 8 : index
    %c0_202 = arith.constant 0 : index
    %c0_203 = arith.constant 0 : index
    %198 = vector.load %arg1[%c1_200, %c8_201, %c0_202, %c0_203] : memref<4x25x8x150xbf16, #tpu.memory_space<vmem>>, vector<1x1x8x150xbf16>
    %199 = vector.shape_cast %198 : vector<1x1x8x150xbf16> to vector<8x150xbf16>
    %cst_204 = arith.constant dense<0.000000e+00> : vector<8x128xf32>
    %200 = tpu.matmul %199, %0, %cst_204 {dimension_numbers = #tpu.dot_dimension_numbers<[1], [0], [0], [1], [0, 0, 1, 1], [], []>} : vector<8x150xbf16>, vector<150x128xbf16>, vector<8x128xf32> -> vector<8x128xf32>
    %201 = arith.maximumf %197, %200 : vector<8x128xf32>
    %c2_205 = arith.constant 2 : index
    %c8_206 = arith.constant 8 : index
    %c0_207 = arith.constant 0 : index
    %c0_208 = arith.constant 0 : index
    %202 = vector.load %arg1[%c2_205, %c8_206, %c0_207, %c0_208] : memref<4x25x8x150xbf16, #tpu.memory_space<vmem>>, vector<1x1x8x150xbf16>
    %203 = vector.shape_cast %202 : vector<1x1x8x150xbf16> to vector<8x150xbf16>
    %cst_209 = arith.constant dense<0.000000e+00> : vector<8x128xf32>
    %204 = tpu.matmul %203, %0, %cst_209 {dimension_numbers = #tpu.dot_dimension_numbers<[1], [0], [0], [1], [0, 0, 1, 1], [], []>} : vector<8x150xbf16>, vector<150x128xbf16>, vector<8x128xf32> -> vector<8x128xf32>
    %205 = arith.maximumf %201, %204 : vector<8x128xf32>
    %c3_210 = arith.constant 3 : index
    %c8_211 = arith.constant 8 : index
    %c0_212 = arith.constant 0 : index
    %c0_213 = arith.constant 0 : index
    %206 = vector.load %arg1[%c3_210, %c8_211, %c0_212, %c0_213] : memref<4x25x8x150xbf16, #tpu.memory_space<vmem>>, vector<1x1x8x150xbf16>
    %207 = vector.shape_cast %206 : vector<1x1x8x150xbf16> to vector<8x150xbf16>
    %cst_214 = arith.constant dense<0.000000e+00> : vector<8x128xf32>
    %208 = tpu.matmul %207, %0, %cst_214 {dimension_numbers = #tpu.dot_dimension_numbers<[1], [0], [0], [1], [0, 0, 1, 1], [], []>} : vector<8x150xbf16>, vector<150x128xbf16>, vector<8x128xf32> -> vector<8x128xf32>
    %209 = arith.maximumf %205, %208 : vector<8x128xf32>
    %210 = vector.broadcast %1 : vector<1x128xf32> to vector<8x128xf32>
    %211 = arith.addf %209, %210 : vector<8x128xf32>
    %cst_215 = arith.constant 0.000000e+00 : f32
    %212 = vector.broadcast %cst_215 : f32 to vector<8x128xf32>
    %213 = arith.maximumf %211, %212 : vector<8x128xf32>
    %214 = arith.truncf %213 : vector<8x128xf32> to vector<8x128xbf16>
    %c8_216 = arith.constant 8 : index
    %c0_217 = arith.constant 0 : index
    %c0_218 = arith.constant 0 : index
    %215 = vector.load %arg4[%c8_216, %c0_217, %c0_218] : memref<25x128x128xbf16, #tpu.memory_space<vmem>>, vector<1x128x128xbf16>
    %216 = vector.shape_cast %215 : vector<1x128x128xbf16> to vector<128x128xbf16>
    %cst_219 = arith.constant dense<0.000000e+00> : vector<8x128xf32>
    %217 = tpu.matmul %214, %216, %cst_219 {dimension_numbers = #tpu.dot_dimension_numbers<[1], [0], [0], [1], [0, 0, 1, 1], [], []>} : vector<8x128xbf16>, vector<128x128xbf16>, vector<8x128xf32> -> vector<8x128xf32>
    %218 = arith.addf %194, %217 : vector<8x128xf32>
    %c0_220 = arith.constant 0 : index
    %c9 = arith.constant 9 : index
    %c0_221 = arith.constant 0 : index
    %c0_222 = arith.constant 0 : index
    %219 = vector.load %arg1[%c0_220, %c9, %c0_221, %c0_222] : memref<4x25x8x150xbf16, #tpu.memory_space<vmem>>, vector<1x1x8x150xbf16>
    %220 = vector.shape_cast %219 : vector<1x1x8x150xbf16> to vector<8x150xbf16>
    %cst_223 = arith.constant dense<0.000000e+00> : vector<8x128xf32>
    %221 = tpu.matmul %220, %0, %cst_223 {dimension_numbers = #tpu.dot_dimension_numbers<[1], [0], [0], [1], [0, 0, 1, 1], [], []>} : vector<8x150xbf16>, vector<150x128xbf16>, vector<8x128xf32> -> vector<8x128xf32>
    %c1_224 = arith.constant 1 : index
    %c9_225 = arith.constant 9 : index
    %c0_226 = arith.constant 0 : index
    %c0_227 = arith.constant 0 : index
    %222 = vector.load %arg1[%c1_224, %c9_225, %c0_226, %c0_227] : memref<4x25x8x150xbf16, #tpu.memory_space<vmem>>, vector<1x1x8x150xbf16>
    %223 = vector.shape_cast %222 : vector<1x1x8x150xbf16> to vector<8x150xbf16>
    %cst_228 = arith.constant dense<0.000000e+00> : vector<8x128xf32>
    %224 = tpu.matmul %223, %0, %cst_228 {dimension_numbers = #tpu.dot_dimension_numbers<[1], [0], [0], [1], [0, 0, 1, 1], [], []>} : vector<8x150xbf16>, vector<150x128xbf16>, vector<8x128xf32> -> vector<8x128xf32>
    %225 = arith.maximumf %221, %224 : vector<8x128xf32>
    %c2_229 = arith.constant 2 : index
    %c9_230 = arith.constant 9 : index
    %c0_231 = arith.constant 0 : index
    %c0_232 = arith.constant 0 : index
    %226 = vector.load %arg1[%c2_229, %c9_230, %c0_231, %c0_232] : memref<4x25x8x150xbf16, #tpu.memory_space<vmem>>, vector<1x1x8x150xbf16>
    %227 = vector.shape_cast %226 : vector<1x1x8x150xbf16> to vector<8x150xbf16>
    %cst_233 = arith.constant dense<0.000000e+00> : vector<8x128xf32>
    %228 = tpu.matmul %227, %0, %cst_233 {dimension_numbers = #tpu.dot_dimension_numbers<[1], [0], [0], [1], [0, 0, 1, 1], [], []>} : vector<8x150xbf16>, vector<150x128xbf16>, vector<8x128xf32> -> vector<8x128xf32>
    %229 = arith.maximumf %225, %228 : vector<8x128xf32>
    %c3_234 = arith.constant 3 : index
    %c9_235 = arith.constant 9 : index
    %c0_236 = arith.constant 0 : index
    %c0_237 = arith.constant 0 : index
    %230 = vector.load %arg1[%c3_234, %c9_235, %c0_236, %c0_237] : memref<4x25x8x150xbf16, #tpu.memory_space<vmem>>, vector<1x1x8x150xbf16>
    %231 = vector.shape_cast %230 : vector<1x1x8x150xbf16> to vector<8x150xbf16>
    %cst_238 = arith.constant dense<0.000000e+00> : vector<8x128xf32>
    %232 = tpu.matmul %231, %0, %cst_238 {dimension_numbers = #tpu.dot_dimension_numbers<[1], [0], [0], [1], [0, 0, 1, 1], [], []>} : vector<8x150xbf16>, vector<150x128xbf16>, vector<8x128xf32> -> vector<8x128xf32>
    %233 = arith.maximumf %229, %232 : vector<8x128xf32>
    %234 = vector.broadcast %1 : vector<1x128xf32> to vector<8x128xf32>
    %235 = arith.addf %233, %234 : vector<8x128xf32>
    %cst_239 = arith.constant 0.000000e+00 : f32
    %236 = vector.broadcast %cst_239 : f32 to vector<8x128xf32>
    %237 = arith.maximumf %235, %236 : vector<8x128xf32>
    %238 = arith.truncf %237 : vector<8x128xf32> to vector<8x128xbf16>
    %c9_240 = arith.constant 9 : index
    %c0_241 = arith.constant 0 : index
    %c0_242 = arith.constant 0 : index
    %239 = vector.load %arg4[%c9_240, %c0_241, %c0_242] : memref<25x128x128xbf16, #tpu.memory_space<vmem>>, vector<1x128x128xbf16>
    %240 = vector.shape_cast %239 : vector<1x128x128xbf16> to vector<128x128xbf16>
    %cst_243 = arith.constant dense<0.000000e+00> : vector<8x128xf32>
    %241 = tpu.matmul %238, %240, %cst_243 {dimension_numbers = #tpu.dot_dimension_numbers<[1], [0], [0], [1], [0, 0, 1, 1], [], []>} : vector<8x128xbf16>, vector<128x128xbf16>, vector<8x128xf32> -> vector<8x128xf32>
    %242 = arith.addf %218, %241 : vector<8x128xf32>
    %c0_244 = arith.constant 0 : index
    %c10 = arith.constant 10 : index
    %c0_245 = arith.constant 0 : index
    %c0_246 = arith.constant 0 : index
    %243 = vector.load %arg1[%c0_244, %c10, %c0_245, %c0_246] : memref<4x25x8x150xbf16, #tpu.memory_space<vmem>>, vector<1x1x8x150xbf16>
    %244 = vector.shape_cast %243 : vector<1x1x8x150xbf16> to vector<8x150xbf16>
    %cst_247 = arith.constant dense<0.000000e+00> : vector<8x128xf32>
    %245 = tpu.matmul %244, %0, %cst_247 {dimension_numbers = #tpu.dot_dimension_numbers<[1], [0], [0], [1], [0, 0, 1, 1], [], []>} : vector<8x150xbf16>, vector<150x128xbf16>, vector<8x128xf32> -> vector<8x128xf32>
    %c1_248 = arith.constant 1 : index
    %c10_249 = arith.constant 10 : index
    %c0_250 = arith.constant 0 : index
    %c0_251 = arith.constant 0 : index
    %246 = vector.load %arg1[%c1_248, %c10_249, %c0_250, %c0_251] : memref<4x25x8x150xbf16, #tpu.memory_space<vmem>>, vector<1x1x8x150xbf16>
    %247 = vector.shape_cast %246 : vector<1x1x8x150xbf16> to vector<8x150xbf16>
    %cst_252 = arith.constant dense<0.000000e+00> : vector<8x128xf32>
    %248 = tpu.matmul %247, %0, %cst_252 {dimension_numbers = #tpu.dot_dimension_numbers<[1], [0], [0], [1], [0, 0, 1, 1], [], []>} : vector<8x150xbf16>, vector<150x128xbf16>, vector<8x128xf32> -> vector<8x128xf32>
    %249 = arith.maximumf %245, %248 : vector<8x128xf32>
    %c2_253 = arith.constant 2 : index
    %c10_254 = arith.constant 10 : index
    %c0_255 = arith.constant 0 : index
    %c0_256 = arith.constant 0 : index
    %250 = vector.load %arg1[%c2_253, %c10_254, %c0_255, %c0_256] : memref<4x25x8x150xbf16, #tpu.memory_space<vmem>>, vector<1x1x8x150xbf16>
    %251 = vector.shape_cast %250 : vector<1x1x8x150xbf16> to vector<8x150xbf16>
    %cst_257 = arith.constant dense<0.000000e+00> : vector<8x128xf32>
    %252 = tpu.matmul %251, %0, %cst_257 {dimension_numbers = #tpu.dot_dimension_numbers<[1], [0], [0], [1], [0, 0, 1, 1], [], []>} : vector<8x150xbf16>, vector<150x128xbf16>, vector<8x128xf32> -> vector<8x128xf32>
    %253 = arith.maximumf %249, %252 : vector<8x128xf32>
    %c3_258 = arith.constant 3 : index
    %c10_259 = arith.constant 10 : index
    %c0_260 = arith.constant 0 : index
    %c0_261 = arith.constant 0 : index
    %254 = vector.load %arg1[%c3_258, %c10_259, %c0_260, %c0_261] : memref<4x25x8x150xbf16, #tpu.memory_space<vmem>>, vector<1x1x8x150xbf16>
    %255 = vector.shape_cast %254 : vector<1x1x8x150xbf16> to vector<8x150xbf16>
    %cst_262 = arith.constant dense<0.000000e+00> : vector<8x128xf32>
    %256 = tpu.matmul %255, %0, %cst_262 {dimension_numbers = #tpu.dot_dimension_numbers<[1], [0], [0], [1], [0, 0, 1, 1], [], []>} : vector<8x150xbf16>, vector<150x128xbf16>, vector<8x128xf32> -> vector<8x128xf32>
    %257 = arith.maximumf %253, %256 : vector<8x128xf32>
    %258 = vector.broadcast %1 : vector<1x128xf32> to vector<8x128xf32>
    %259 = arith.addf %257, %258 : vector<8x128xf32>
    %cst_263 = arith.constant 0.000000e+00 : f32
    %260 = vector.broadcast %cst_263 : f32 to vector<8x128xf32>
    %261 = arith.maximumf %259, %260 : vector<8x128xf32>
    %262 = arith.truncf %261 : vector<8x128xf32> to vector<8x128xbf16>
    %c10_264 = arith.constant 10 : index
    %c0_265 = arith.constant 0 : index
    %c0_266 = arith.constant 0 : index
    %263 = vector.load %arg4[%c10_264, %c0_265, %c0_266] : memref<25x128x128xbf16, #tpu.memory_space<vmem>>, vector<1x128x128xbf16>
    %264 = vector.shape_cast %263 : vector<1x128x128xbf16> to vector<128x128xbf16>
    %cst_267 = arith.constant dense<0.000000e+00> : vector<8x128xf32>
    %265 = tpu.matmul %262, %264, %cst_267 {dimension_numbers = #tpu.dot_dimension_numbers<[1], [0], [0], [1], [0, 0, 1, 1], [], []>} : vector<8x128xbf16>, vector<128x128xbf16>, vector<8x128xf32> -> vector<8x128xf32>
    %266 = arith.addf %242, %265 : vector<8x128xf32>
    %c0_268 = arith.constant 0 : index
    %c11 = arith.constant 11 : index
    %c0_269 = arith.constant 0 : index
    %c0_270 = arith.constant 0 : index
    %267 = vector.load %arg1[%c0_268, %c11, %c0_269, %c0_270] : memref<4x25x8x150xbf16, #tpu.memory_space<vmem>>, vector<1x1x8x150xbf16>
    %268 = vector.shape_cast %267 : vector<1x1x8x150xbf16> to vector<8x150xbf16>
    %cst_271 = arith.constant dense<0.000000e+00> : vector<8x128xf32>
    %269 = tpu.matmul %268, %0, %cst_271 {dimension_numbers = #tpu.dot_dimension_numbers<[1], [0], [0], [1], [0, 0, 1, 1], [], []>} : vector<8x150xbf16>, vector<150x128xbf16>, vector<8x128xf32> -> vector<8x128xf32>
    %c1_272 = arith.constant 1 : index
    %c11_273 = arith.constant 11 : index
    %c0_274 = arith.constant 0 : index
    %c0_275 = arith.constant 0 : index
    %270 = vector.load %arg1[%c1_272, %c11_273, %c0_274, %c0_275] : memref<4x25x8x150xbf16, #tpu.memory_space<vmem>>, vector<1x1x8x150xbf16>
    %271 = vector.shape_cast %270 : vector<1x1x8x150xbf16> to vector<8x150xbf16>
    %cst_276 = arith.constant dense<0.000000e+00> : vector<8x128xf32>
    %272 = tpu.matmul %271, %0, %cst_276 {dimension_numbers = #tpu.dot_dimension_numbers<[1], [0], [0], [1], [0, 0, 1, 1], [], []>} : vector<8x150xbf16>, vector<150x128xbf16>, vector<8x128xf32> -> vector<8x128xf32>
    %273 = arith.maximumf %269, %272 : vector<8x128xf32>
    %c2_277 = arith.constant 2 : index
    %c11_278 = arith.constant 11 : index
    %c0_279 = arith.constant 0 : index
    %c0_280 = arith.constant 0 : index
    %274 = vector.load %arg1[%c2_277, %c11_278, %c0_279, %c0_280] : memref<4x25x8x150xbf16, #tpu.memory_space<vmem>>, vector<1x1x8x150xbf16>
    %275 = vector.shape_cast %274 : vector<1x1x8x150xbf16> to vector<8x150xbf16>
    %cst_281 = arith.constant dense<0.000000e+00> : vector<8x128xf32>
    %276 = tpu.matmul %275, %0, %cst_281 {dimension_numbers = #tpu.dot_dimension_numbers<[1], [0], [0], [1], [0, 0, 1, 1], [], []>} : vector<8x150xbf16>, vector<150x128xbf16>, vector<8x128xf32> -> vector<8x128xf32>
    %277 = arith.maximumf %273, %276 : vector<8x128xf32>
    %c3_282 = arith.constant 3 : index
    %c11_283 = arith.constant 11 : index
    %c0_284 = arith.constant 0 : index
    %c0_285 = arith.constant 0 : index
    %278 = vector.load %arg1[%c3_282, %c11_283, %c0_284, %c0_285] : memref<4x25x8x150xbf16, #tpu.memory_space<vmem>>, vector<1x1x8x150xbf16>
    %279 = vector.shape_cast %278 : vector<1x1x8x150xbf16> to vector<8x150xbf16>
    %cst_286 = arith.constant dense<0.000000e+00> : vector<8x128xf32>
    %280 = tpu.matmul %279, %0, %cst_286 {dimension_numbers = #tpu.dot_dimension_numbers<[1], [0], [0], [1], [0, 0, 1, 1], [], []>} : vector<8x150xbf16>, vector<150x128xbf16>, vector<8x128xf32> -> vector<8x128xf32>
    %281 = arith.maximumf %277, %280 : vector<8x128xf32>
    %282 = vector.broadcast %1 : vector<1x128xf32> to vector<8x128xf32>
    %283 = arith.addf %281, %282 : vector<8x128xf32>
    %cst_287 = arith.constant 0.000000e+00 : f32
    %284 = vector.broadcast %cst_287 : f32 to vector<8x128xf32>
    %285 = arith.maximumf %283, %284 : vector<8x128xf32>
    %286 = arith.truncf %285 : vector<8x128xf32> to vector<8x128xbf16>
    %c11_288 = arith.constant 11 : index
    %c0_289 = arith.constant 0 : index
    %c0_290 = arith.constant 0 : index
    %287 = vector.load %arg4[%c11_288, %c0_289, %c0_290] : memref<25x128x128xbf16, #tpu.memory_space<vmem>>, vector<1x128x128xbf16>
    %288 = vector.shape_cast %287 : vector<1x128x128xbf16> to vector<128x128xbf16>
    %cst_291 = arith.constant dense<0.000000e+00> : vector<8x128xf32>
    %289 = tpu.matmul %286, %288, %cst_291 {dimension_numbers = #tpu.dot_dimension_numbers<[1], [0], [0], [1], [0, 0, 1, 1], [], []>} : vector<8x128xbf16>, vector<128x128xbf16>, vector<8x128xf32> -> vector<8x128xf32>
    %290 = arith.addf %266, %289 : vector<8x128xf32>
    %c0_292 = arith.constant 0 : index
    %c12 = arith.constant 12 : index
    %c0_293 = arith.constant 0 : index
    %c0_294 = arith.constant 0 : index
    %291 = vector.load %arg1[%c0_292, %c12, %c0_293, %c0_294] : memref<4x25x8x150xbf16, #tpu.memory_space<vmem>>, vector<1x1x8x150xbf16>
    %292 = vector.shape_cast %291 : vector<1x1x8x150xbf16> to vector<8x150xbf16>
    %cst_295 = arith.constant dense<0.000000e+00> : vector<8x128xf32>
    %293 = tpu.matmul %292, %0, %cst_295 {dimension_numbers = #tpu.dot_dimension_numbers<[1], [0], [0], [1], [0, 0, 1, 1], [], []>} : vector<8x150xbf16>, vector<150x128xbf16>, vector<8x128xf32> -> vector<8x128xf32>
    %c1_296 = arith.constant 1 : index
    %c12_297 = arith.constant 12 : index
    %c0_298 = arith.constant 0 : index
    %c0_299 = arith.constant 0 : index
    %294 = vector.load %arg1[%c1_296, %c12_297, %c0_298, %c0_299] : memref<4x25x8x150xbf16, #tpu.memory_space<vmem>>, vector<1x1x8x150xbf16>
    %295 = vector.shape_cast %294 : vector<1x1x8x150xbf16> to vector<8x150xbf16>
    %cst_300 = arith.constant dense<0.000000e+00> : vector<8x128xf32>
    %296 = tpu.matmul %295, %0, %cst_300 {dimension_numbers = #tpu.dot_dimension_numbers<[1], [0], [0], [1], [0, 0, 1, 1], [], []>} : vector<8x150xbf16>, vector<150x128xbf16>, vector<8x128xf32> -> vector<8x128xf32>
    %297 = arith.maximumf %293, %296 : vector<8x128xf32>
    %c2_301 = arith.constant 2 : index
    %c12_302 = arith.constant 12 : index
    %c0_303 = arith.constant 0 : index
    %c0_304 = arith.constant 0 : index
    %298 = vector.load %arg1[%c2_301, %c12_302, %c0_303, %c0_304] : memref<4x25x8x150xbf16, #tpu.memory_space<vmem>>, vector<1x1x8x150xbf16>
    %299 = vector.shape_cast %298 : vector<1x1x8x150xbf16> to vector<8x150xbf16>
    %cst_305 = arith.constant dense<0.000000e+00> : vector<8x128xf32>
    %300 = tpu.matmul %299, %0, %cst_305 {dimension_numbers = #tpu.dot_dimension_numbers<[1], [0], [0], [1], [0, 0, 1, 1], [], []>} : vector<8x150xbf16>, vector<150x128xbf16>, vector<8x128xf32> -> vector<8x128xf32>
    %301 = arith.maximumf %297, %300 : vector<8x128xf32>
    %c3_306 = arith.constant 3 : index
    %c12_307 = arith.constant 12 : index
    %c0_308 = arith.constant 0 : index
    %c0_309 = arith.constant 0 : index
    %302 = vector.load %arg1[%c3_306, %c12_307, %c0_308, %c0_309] : memref<4x25x8x150xbf16, #tpu.memory_space<vmem>>, vector<1x1x8x150xbf16>
    %303 = vector.shape_cast %302 : vector<1x1x8x150xbf16> to vector<8x150xbf16>
    %cst_310 = arith.constant dense<0.000000e+00> : vector<8x128xf32>
    %304 = tpu.matmul %303, %0, %cst_310 {dimension_numbers = #tpu.dot_dimension_numbers<[1], [0], [0], [1], [0, 0, 1, 1], [], []>} : vector<8x150xbf16>, vector<150x128xbf16>, vector<8x128xf32> -> vector<8x128xf32>
    %305 = arith.maximumf %301, %304 : vector<8x128xf32>
    %306 = vector.broadcast %1 : vector<1x128xf32> to vector<8x128xf32>
    %307 = arith.addf %305, %306 : vector<8x128xf32>
    %cst_311 = arith.constant 0.000000e+00 : f32
    %308 = vector.broadcast %cst_311 : f32 to vector<8x128xf32>
    %309 = arith.maximumf %307, %308 : vector<8x128xf32>
    %310 = arith.truncf %309 : vector<8x128xf32> to vector<8x128xbf16>
    %c12_312 = arith.constant 12 : index
    %c0_313 = arith.constant 0 : index
    %c0_314 = arith.constant 0 : index
    %311 = vector.load %arg4[%c12_312, %c0_313, %c0_314] : memref<25x128x128xbf16, #tpu.memory_space<vmem>>, vector<1x128x128xbf16>
    %312 = vector.shape_cast %311 : vector<1x128x128xbf16> to vector<128x128xbf16>
    %cst_315 = arith.constant dense<0.000000e+00> : vector<8x128xf32>
    %313 = tpu.matmul %310, %312, %cst_315 {dimension_numbers = #tpu.dot_dimension_numbers<[1], [0], [0], [1], [0, 0, 1, 1], [], []>} : vector<8x128xbf16>, vector<128x128xbf16>, vector<8x128xf32> -> vector<8x128xf32>
    %314 = arith.addf %290, %313 : vector<8x128xf32>
    %c0_316 = arith.constant 0 : index
    %c13 = arith.constant 13 : index
    %c0_317 = arith.constant 0 : index
    %c0_318 = arith.constant 0 : index
    %315 = vector.load %arg1[%c0_316, %c13, %c0_317, %c0_318] : memref<4x25x8x150xbf16, #tpu.memory_space<vmem>>, vector<1x1x8x150xbf16>
    %316 = vector.shape_cast %315 : vector<1x1x8x150xbf16> to vector<8x150xbf16>
    %cst_319 = arith.constant dense<0.000000e+00> : vector<8x128xf32>
    %317 = tpu.matmul %316, %0, %cst_319 {dimension_numbers = #tpu.dot_dimension_numbers<[1], [0], [0], [1], [0, 0, 1, 1], [], []>} : vector<8x150xbf16>, vector<150x128xbf16>, vector<8x128xf32> -> vector<8x128xf32>
    %c1_320 = arith.constant 1 : index
    %c13_321 = arith.constant 13 : index
    %c0_322 = arith.constant 0 : index
    %c0_323 = arith.constant 0 : index
    %318 = vector.load %arg1[%c1_320, %c13_321, %c0_322, %c0_323] : memref<4x25x8x150xbf16, #tpu.memory_space<vmem>>, vector<1x1x8x150xbf16>
    %319 = vector.shape_cast %318 : vector<1x1x8x150xbf16> to vector<8x150xbf16>
    %cst_324 = arith.constant dense<0.000000e+00> : vector<8x128xf32>
    %320 = tpu.matmul %319, %0, %cst_324 {dimension_numbers = #tpu.dot_dimension_numbers<[1], [0], [0], [1], [0, 0, 1, 1], [], []>} : vector<8x150xbf16>, vector<150x128xbf16>, vector<8x128xf32> -> vector<8x128xf32>
    %321 = arith.maximumf %317, %320 : vector<8x128xf32>
    %c2_325 = arith.constant 2 : index
    %c13_326 = arith.constant 13 : index
    %c0_327 = arith.constant 0 : index
    %c0_328 = arith.constant 0 : index
    %322 = vector.load %arg1[%c2_325, %c13_326, %c0_327, %c0_328] : memref<4x25x8x150xbf16, #tpu.memory_space<vmem>>, vector<1x1x8x150xbf16>
    %323 = vector.shape_cast %322 : vector<1x1x8x150xbf16> to vector<8x150xbf16>
    %cst_329 = arith.constant dense<0.000000e+00> : vector<8x128xf32>
    %324 = tpu.matmul %323, %0, %cst_329 {dimension_numbers = #tpu.dot_dimension_numbers<[1], [0], [0], [1], [0, 0, 1, 1], [], []>} : vector<8x150xbf16>, vector<150x128xbf16>, vector<8x128xf32> -> vector<8x128xf32>
    %325 = arith.maximumf %321, %324 : vector<8x128xf32>
    %c3_330 = arith.constant 3 : index
    %c13_331 = arith.constant 13 : index
    %c0_332 = arith.constant 0 : index
    %c0_333 = arith.constant 0 : index
    %326 = vector.load %arg1[%c3_330, %c13_331, %c0_332, %c0_333] : memref<4x25x8x150xbf16, #tpu.memory_space<vmem>>, vector<1x1x8x150xbf16>
    %327 = vector.shape_cast %326 : vector<1x1x8x150xbf16> to vector<8x150xbf16>
    %cst_334 = arith.constant dense<0.000000e+00> : vector<8x128xf32>
    %328 = tpu.matmul %327, %0, %cst_334 {dimension_numbers = #tpu.dot_dimension_numbers<[1], [0], [0], [1], [0, 0, 1, 1], [], []>} : vector<8x150xbf16>, vector<150x128xbf16>, vector<8x128xf32> -> vector<8x128xf32>
    %329 = arith.maximumf %325, %328 : vector<8x128xf32>
    %330 = vector.broadcast %1 : vector<1x128xf32> to vector<8x128xf32>
    %331 = arith.addf %329, %330 : vector<8x128xf32>
    %cst_335 = arith.constant 0.000000e+00 : f32
    %332 = vector.broadcast %cst_335 : f32 to vector<8x128xf32>
    %333 = arith.maximumf %331, %332 : vector<8x128xf32>
    %334 = arith.truncf %333 : vector<8x128xf32> to vector<8x128xbf16>
    %c13_336 = arith.constant 13 : index
    %c0_337 = arith.constant 0 : index
    %c0_338 = arith.constant 0 : index
    %335 = vector.load %arg4[%c13_336, %c0_337, %c0_338] : memref<25x128x128xbf16, #tpu.memory_space<vmem>>, vector<1x128x128xbf16>
    %336 = vector.shape_cast %335 : vector<1x128x128xbf16> to vector<128x128xbf16>
    %cst_339 = arith.constant dense<0.000000e+00> : vector<8x128xf32>
    %337 = tpu.matmul %334, %336, %cst_339 {dimension_numbers = #tpu.dot_dimension_numbers<[1], [0], [0], [1], [0, 0, 1, 1], [], []>} : vector<8x128xbf16>, vector<128x128xbf16>, vector<8x128xf32> -> vector<8x128xf32>
    %338 = arith.addf %314, %337 : vector<8x128xf32>
    %c0_340 = arith.constant 0 : index
    %c14 = arith.constant 14 : index
    %c0_341 = arith.constant 0 : index
    %c0_342 = arith.constant 0 : index
    %339 = vector.load %arg1[%c0_340, %c14, %c0_341, %c0_342] : memref<4x25x8x150xbf16, #tpu.memory_space<vmem>>, vector<1x1x8x150xbf16>
    %340 = vector.shape_cast %339 : vector<1x1x8x150xbf16> to vector<8x150xbf16>
    %cst_343 = arith.constant dense<0.000000e+00> : vector<8x128xf32>
    %341 = tpu.matmul %340, %0, %cst_343 {dimension_numbers = #tpu.dot_dimension_numbers<[1], [0], [0], [1], [0, 0, 1, 1], [], []>} : vector<8x150xbf16>, vector<150x128xbf16>, vector<8x128xf32> -> vector<8x128xf32>
    %c1_344 = arith.constant 1 : index
    %c14_345 = arith.constant 14 : index
    %c0_346 = arith.constant 0 : index
    %c0_347 = arith.constant 0 : index
    %342 = vector.load %arg1[%c1_344, %c14_345, %c0_346, %c0_347] : memref<4x25x8x150xbf16, #tpu.memory_space<vmem>>, vector<1x1x8x150xbf16>
    %343 = vector.shape_cast %342 : vector<1x1x8x150xbf16> to vector<8x150xbf16>
    %cst_348 = arith.constant dense<0.000000e+00> : vector<8x128xf32>
    %344 = tpu.matmul %343, %0, %cst_348 {dimension_numbers = #tpu.dot_dimension_numbers<[1], [0], [0], [1], [0, 0, 1, 1], [], []>} : vector<8x150xbf16>, vector<150x128xbf16>, vector<8x128xf32> -> vector<8x128xf32>
    %345 = arith.maximumf %341, %344 : vector<8x128xf32>
    %c2_349 = arith.constant 2 : index
    %c14_350 = arith.constant 14 : index
    %c0_351 = arith.constant 0 : index
    %c0_352 = arith.constant 0 : index
    %346 = vector.load %arg1[%c2_349, %c14_350, %c0_351, %c0_352] : memref<4x25x8x150xbf16, #tpu.memory_space<vmem>>, vector<1x1x8x150xbf16>
    %347 = vector.shape_cast %346 : vector<1x1x8x150xbf16> to vector<8x150xbf16>
    %cst_353 = arith.constant dense<0.000000e+00> : vector<8x128xf32>
    %348 = tpu.matmul %347, %0, %cst_353 {dimension_numbers = #tpu.dot_dimension_numbers<[1], [0], [0], [1], [0, 0, 1, 1], [], []>} : vector<8x150xbf16>, vector<150x128xbf16>, vector<8x128xf32> -> vector<8x128xf32>
    %349 = arith.maximumf %345, %348 : vector<8x128xf32>
    %c3_354 = arith.constant 3 : index
    %c14_355 = arith.constant 14 : index
    %c0_356 = arith.constant 0 : index
    %c0_357 = arith.constant 0 : index
    %350 = vector.load %arg1[%c3_354, %c14_355, %c0_356, %c0_357] : memref<4x25x8x150xbf16, #tpu.memory_space<vmem>>, vector<1x1x8x150xbf16>
    %351 = vector.shape_cast %350 : vector<1x1x8x150xbf16> to vector<8x150xbf16>
    %cst_358 = arith.constant dense<0.000000e+00> : vector<8x128xf32>
    %352 = tpu.matmul %351, %0, %cst_358 {dimension_numbers = #tpu.dot_dimension_numbers<[1], [0], [0], [1], [0, 0, 1, 1], [], []>} : vector<8x150xbf16>, vector<150x128xbf16>, vector<8x128xf32> -> vector<8x128xf32>
    %353 = arith.maximumf %349, %352 : vector<8x128xf32>
    %354 = vector.broadcast %1 : vector<1x128xf32> to vector<8x128xf32>
    %355 = arith.addf %353, %354 : vector<8x128xf32>
    %cst_359 = arith.constant 0.000000e+00 : f32
    %356 = vector.broadcast %cst_359 : f32 to vector<8x128xf32>
    %357 = arith.maximumf %355, %356 : vector<8x128xf32>
    %358 = arith.truncf %357 : vector<8x128xf32> to vector<8x128xbf16>
    %c14_360 = arith.constant 14 : index
    %c0_361 = arith.constant 0 : index
    %c0_362 = arith.constant 0 : index
    %359 = vector.load %arg4[%c14_360, %c0_361, %c0_362] : memref<25x128x128xbf16, #tpu.memory_space<vmem>>, vector<1x128x128xbf16>
    %360 = vector.shape_cast %359 : vector<1x128x128xbf16> to vector<128x128xbf16>
    %cst_363 = arith.constant dense<0.000000e+00> : vector<8x128xf32>
    %361 = tpu.matmul %358, %360, %cst_363 {dimension_numbers = #tpu.dot_dimension_numbers<[1], [0], [0], [1], [0, 0, 1, 1], [], []>} : vector<8x128xbf16>, vector<128x128xbf16>, vector<8x128xf32> -> vector<8x128xf32>
    %362 = arith.addf %338, %361 : vector<8x128xf32>
    %c0_364 = arith.constant 0 : index
    %c15 = arith.constant 15 : index
    %c0_365 = arith.constant 0 : index
    %c0_366 = arith.constant 0 : index
    %363 = vector.load %arg1[%c0_364, %c15, %c0_365, %c0_366] : memref<4x25x8x150xbf16, #tpu.memory_space<vmem>>, vector<1x1x8x150xbf16>
    %364 = vector.shape_cast %363 : vector<1x1x8x150xbf16> to vector<8x150xbf16>
    %cst_367 = arith.constant dense<0.000000e+00> : vector<8x128xf32>
    %365 = tpu.matmul %364, %0, %cst_367 {dimension_numbers = #tpu.dot_dimension_numbers<[1], [0], [0], [1], [0, 0, 1, 1], [], []>} : vector<8x150xbf16>, vector<150x128xbf16>, vector<8x128xf32> -> vector<8x128xf32>
    %c1_368 = arith.constant 1 : index
    %c15_369 = arith.constant 15 : index
    %c0_370 = arith.constant 0 : index
    %c0_371 = arith.constant 0 : index
    %366 = vector.load %arg1[%c1_368, %c15_369, %c0_370, %c0_371] : memref<4x25x8x150xbf16, #tpu.memory_space<vmem>>, vector<1x1x8x150xbf16>
    %367 = vector.shape_cast %366 : vector<1x1x8x150xbf16> to vector<8x150xbf16>
    %cst_372 = arith.constant dense<0.000000e+00> : vector<8x128xf32>
    %368 = tpu.matmul %367, %0, %cst_372 {dimension_numbers = #tpu.dot_dimension_numbers<[1], [0], [0], [1], [0, 0, 1, 1], [], []>} : vector<8x150xbf16>, vector<150x128xbf16>, vector<8x128xf32> -> vector<8x128xf32>
    %369 = arith.maximumf %365, %368 : vector<8x128xf32>
    %c2_373 = arith.constant 2 : index
    %c15_374 = arith.constant 15 : index
    %c0_375 = arith.constant 0 : index
    %c0_376 = arith.constant 0 : index
    %370 = vector.load %arg1[%c2_373, %c15_374, %c0_375, %c0_376] : memref<4x25x8x150xbf16, #tpu.memory_space<vmem>>, vector<1x1x8x150xbf16>
    %371 = vector.shape_cast %370 : vector<1x1x8x150xbf16> to vector<8x150xbf16>
    %cst_377 = arith.constant dense<0.000000e+00> : vector<8x128xf32>
    %372 = tpu.matmul %371, %0, %cst_377 {dimension_numbers = #tpu.dot_dimension_numbers<[1], [0], [0], [1], [0, 0, 1, 1], [], []>} : vector<8x150xbf16>, vector<150x128xbf16>, vector<8x128xf32> -> vector<8x128xf32>
    %373 = arith.maximumf %369, %372 : vector<8x128xf32>
    %c3_378 = arith.constant 3 : index
    %c15_379 = arith.constant 15 : index
    %c0_380 = arith.constant 0 : index
    %c0_381 = arith.constant 0 : index
    %374 = vector.load %arg1[%c3_378, %c15_379, %c0_380, %c0_381] : memref<4x25x8x150xbf16, #tpu.memory_space<vmem>>, vector<1x1x8x150xbf16>
    %375 = vector.shape_cast %374 : vector<1x1x8x150xbf16> to vector<8x150xbf16>
    %cst_382 = arith.constant dense<0.000000e+00> : vector<8x128xf32>
    %376 = tpu.matmul %375, %0, %cst_382 {dimension_numbers = #tpu.dot_dimension_numbers<[1], [0], [0], [1], [0, 0, 1, 1], [], []>} : vector<8x150xbf16>, vector<150x128xbf16>, vector<8x128xf32> -> vector<8x128xf32>
    %377 = arith.maximumf %373, %376 : vector<8x128xf32>
    %378 = vector.broadcast %1 : vector<1x128xf32> to vector<8x128xf32>
    %379 = arith.addf %377, %378 : vector<8x128xf32>
    %cst_383 = arith.constant 0.000000e+00 : f32
    %380 = vector.broadcast %cst_383 : f32 to vector<8x128xf32>
    %381 = arith.maximumf %379, %380 : vector<8x128xf32>
    %382 = arith.truncf %381 : vector<8x128xf32> to vector<8x128xbf16>
    %c15_384 = arith.constant 15 : index
    %c0_385 = arith.constant 0 : index
    %c0_386 = arith.constant 0 : index
    %383 = vector.load %arg4[%c15_384, %c0_385, %c0_386] : memref<25x128x128xbf16, #tpu.memory_space<vmem>>, vector<1x128x128xbf16>
    %384 = vector.shape_cast %383 : vector<1x128x128xbf16> to vector<128x128xbf16>
    %cst_387 = arith.constant dense<0.000000e+00> : vector<8x128xf32>
    %385 = tpu.matmul %382, %384, %cst_387 {dimension_numbers = #tpu.dot_dimension_numbers<[1], [0], [0], [1], [0, 0, 1, 1], [], []>} : vector<8x128xbf16>, vector<128x128xbf16>, vector<8x128xf32> -> vector<8x128xf32>
    %386 = arith.addf %362, %385 : vector<8x128xf32>
    %c0_388 = arith.constant 0 : index
    %c16 = arith.constant 16 : index
    %c0_389 = arith.constant 0 : index
    %c0_390 = arith.constant 0 : index
    %387 = vector.load %arg1[%c0_388, %c16, %c0_389, %c0_390] : memref<4x25x8x150xbf16, #tpu.memory_space<vmem>>, vector<1x1x8x150xbf16>
    %388 = vector.shape_cast %387 : vector<1x1x8x150xbf16> to vector<8x150xbf16>
    %cst_391 = arith.constant dense<0.000000e+00> : vector<8x128xf32>
    %389 = tpu.matmul %388, %0, %cst_391 {dimension_numbers = #tpu.dot_dimension_numbers<[1], [0], [0], [1], [0, 0, 1, 1], [], []>} : vector<8x150xbf16>, vector<150x128xbf16>, vector<8x128xf32> -> vector<8x128xf32>
    %c1_392 = arith.constant 1 : index
    %c16_393 = arith.constant 16 : index
    %c0_394 = arith.constant 0 : index
    %c0_395 = arith.constant 0 : index
    %390 = vector.load %arg1[%c1_392, %c16_393, %c0_394, %c0_395] : memref<4x25x8x150xbf16, #tpu.memory_space<vmem>>, vector<1x1x8x150xbf16>
    %391 = vector.shape_cast %390 : vector<1x1x8x150xbf16> to vector<8x150xbf16>
    %cst_396 = arith.constant dense<0.000000e+00> : vector<8x128xf32>
    %392 = tpu.matmul %391, %0, %cst_396 {dimension_numbers = #tpu.dot_dimension_numbers<[1], [0], [0], [1], [0, 0, 1, 1], [], []>} : vector<8x150xbf16>, vector<150x128xbf16>, vector<8x128xf32> -> vector<8x128xf32>
    %393 = arith.maximumf %389, %392 : vector<8x128xf32>
    %c2_397 = arith.constant 2 : index
    %c16_398 = arith.constant 16 : index
    %c0_399 = arith.constant 0 : index
    %c0_400 = arith.constant 0 : index
    %394 = vector.load %arg1[%c2_397, %c16_398, %c0_399, %c0_400] : memref<4x25x8x150xbf16, #tpu.memory_space<vmem>>, vector<1x1x8x150xbf16>
    %395 = vector.shape_cast %394 : vector<1x1x8x150xbf16> to vector<8x150xbf16>
    %cst_401 = arith.constant dense<0.000000e+00> : vector<8x128xf32>
    %396 = tpu.matmul %395, %0, %cst_401 {dimension_numbers = #tpu.dot_dimension_numbers<[1], [0], [0], [1], [0, 0, 1, 1], [], []>} : vector<8x150xbf16>, vector<150x128xbf16>, vector<8x128xf32> -> vector<8x128xf32>
    %397 = arith.maximumf %393, %396 : vector<8x128xf32>
    %c3_402 = arith.constant 3 : index
    %c16_403 = arith.constant 16 : index
    %c0_404 = arith.constant 0 : index
    %c0_405 = arith.constant 0 : index
    %398 = vector.load %arg1[%c3_402, %c16_403, %c0_404, %c0_405] : memref<4x25x8x150xbf16, #tpu.memory_space<vmem>>, vector<1x1x8x150xbf16>
    %399 = vector.shape_cast %398 : vector<1x1x8x150xbf16> to vector<8x150xbf16>
    %cst_406 = arith.constant dense<0.000000e+00> : vector<8x128xf32>
    %400 = tpu.matmul %399, %0, %cst_406 {dimension_numbers = #tpu.dot_dimension_numbers<[1], [0], [0], [1], [0, 0, 1, 1], [], []>} : vector<8x150xbf16>, vector<150x128xbf16>, vector<8x128xf32> -> vector<8x128xf32>
    %401 = arith.maximumf %397, %400 : vector<8x128xf32>
    %402 = vector.broadcast %1 : vector<1x128xf32> to vector<8x128xf32>
    %403 = arith.addf %401, %402 : vector<8x128xf32>
    %cst_407 = arith.constant 0.000000e+00 : f32
    %404 = vector.broadcast %cst_407 : f32 to vector<8x128xf32>
    %405 = arith.maximumf %403, %404 : vector<8x128xf32>
    %406 = arith.truncf %405 : vector<8x128xf32> to vector<8x128xbf16>
    %c16_408 = arith.constant 16 : index
    %c0_409 = arith.constant 0 : index
    %c0_410 = arith.constant 0 : index
    %407 = vector.load %arg4[%c16_408, %c0_409, %c0_410] : memref<25x128x128xbf16, #tpu.memory_space<vmem>>, vector<1x128x128xbf16>
    %408 = vector.shape_cast %407 : vector<1x128x128xbf16> to vector<128x128xbf16>
    %cst_411 = arith.constant dense<0.000000e+00> : vector<8x128xf32>
    %409 = tpu.matmul %406, %408, %cst_411 {dimension_numbers = #tpu.dot_dimension_numbers<[1], [0], [0], [1], [0, 0, 1, 1], [], []>} : vector<8x128xbf16>, vector<128x128xbf16>, vector<8x128xf32> -> vector<8x128xf32>
    %410 = arith.addf %386, %409 : vector<8x128xf32>
    %c0_412 = arith.constant 0 : index
    %c17 = arith.constant 17 : index
    %c0_413 = arith.constant 0 : index
    %c0_414 = arith.constant 0 : index
    %411 = vector.load %arg1[%c0_412, %c17, %c0_413, %c0_414] : memref<4x25x8x150xbf16, #tpu.memory_space<vmem>>, vector<1x1x8x150xbf16>
    %412 = vector.shape_cast %411 : vector<1x1x8x150xbf16> to vector<8x150xbf16>
    %cst_415 = arith.constant dense<0.000000e+00> : vector<8x128xf32>
    %413 = tpu.matmul %412, %0, %cst_415 {dimension_numbers = #tpu.dot_dimension_numbers<[1], [0], [0], [1], [0, 0, 1, 1], [], []>} : vector<8x150xbf16>, vector<150x128xbf16>, vector<8x128xf32> -> vector<8x128xf32>
    %c1_416 = arith.constant 1 : index
    %c17_417 = arith.constant 17 : index
    %c0_418 = arith.constant 0 : index
    %c0_419 = arith.constant 0 : index
    %414 = vector.load %arg1[%c1_416, %c17_417, %c0_418, %c0_419] : memref<4x25x8x150xbf16, #tpu.memory_space<vmem>>, vector<1x1x8x150xbf16>
    %415 = vector.shape_cast %414 : vector<1x1x8x150xbf16> to vector<8x150xbf16>
    %cst_420 = arith.constant dense<0.000000e+00> : vector<8x128xf32>
    %416 = tpu.matmul %415, %0, %cst_420 {dimension_numbers = #tpu.dot_dimension_numbers<[1], [0], [0], [1], [0, 0, 1, 1], [], []>} : vector<8x150xbf16>, vector<150x128xbf16>, vector<8x128xf32> -> vector<8x128xf32>
    %417 = arith.maximumf %413, %416 : vector<8x128xf32>
    %c2_421 = arith.constant 2 : index
    %c17_422 = arith.constant 17 : index
    %c0_423 = arith.constant 0 : index
    %c0_424 = arith.constant 0 : index
    %418 = vector.load %arg1[%c2_421, %c17_422, %c0_423, %c0_424] : memref<4x25x8x150xbf16, #tpu.memory_space<vmem>>, vector<1x1x8x150xbf16>
    %419 = vector.shape_cast %418 : vector<1x1x8x150xbf16> to vector<8x150xbf16>
    %cst_425 = arith.constant dense<0.000000e+00> : vector<8x128xf32>
    %420 = tpu.matmul %419, %0, %cst_425 {dimension_numbers = #tpu.dot_dimension_numbers<[1], [0], [0], [1], [0, 0, 1, 1], [], []>} : vector<8x150xbf16>, vector<150x128xbf16>, vector<8x128xf32> -> vector<8x128xf32>
    %421 = arith.maximumf %417, %420 : vector<8x128xf32>
    %c3_426 = arith.constant 3 : index
    %c17_427 = arith.constant 17 : index
    %c0_428 = arith.constant 0 : index
    %c0_429 = arith.constant 0 : index
    %422 = vector.load %arg1[%c3_426, %c17_427, %c0_428, %c0_429] : memref<4x25x8x150xbf16, #tpu.memory_space<vmem>>, vector<1x1x8x150xbf16>
    %423 = vector.shape_cast %422 : vector<1x1x8x150xbf16> to vector<8x150xbf16>
    %cst_430 = arith.constant dense<0.000000e+00> : vector<8x128xf32>
    %424 = tpu.matmul %423, %0, %cst_430 {dimension_numbers = #tpu.dot_dimension_numbers<[1], [0], [0], [1], [0, 0, 1, 1], [], []>} : vector<8x150xbf16>, vector<150x128xbf16>, vector<8x128xf32> -> vector<8x128xf32>
    %425 = arith.maximumf %421, %424 : vector<8x128xf32>
    %426 = vector.broadcast %1 : vector<1x128xf32> to vector<8x128xf32>
    %427 = arith.addf %425, %426 : vector<8x128xf32>
    %cst_431 = arith.constant 0.000000e+00 : f32
    %428 = vector.broadcast %cst_431 : f32 to vector<8x128xf32>
    %429 = arith.maximumf %427, %428 : vector<8x128xf32>
    %430 = arith.truncf %429 : vector<8x128xf32> to vector<8x128xbf16>
    %c17_432 = arith.constant 17 : index
    %c0_433 = arith.constant 0 : index
    %c0_434 = arith.constant 0 : index
    %431 = vector.load %arg4[%c17_432, %c0_433, %c0_434] : memref<25x128x128xbf16, #tpu.memory_space<vmem>>, vector<1x128x128xbf16>
    %432 = vector.shape_cast %431 : vector<1x128x128xbf16> to vector<128x128xbf16>
    %cst_435 = arith.constant dense<0.000000e+00> : vector<8x128xf32>
    %433 = tpu.matmul %430, %432, %cst_435 {dimension_numbers = #tpu.dot_dimension_numbers<[1], [0], [0], [1], [0, 0, 1, 1], [], []>} : vector<8x128xbf16>, vector<128x128xbf16>, vector<8x128xf32> -> vector<8x128xf32>
    %434 = arith.addf %410, %433 : vector<8x128xf32>
    %c0_436 = arith.constant 0 : index
    %c18 = arith.constant 18 : index
    %c0_437 = arith.constant 0 : index
    %c0_438 = arith.constant 0 : index
    %435 = vector.load %arg1[%c0_436, %c18, %c0_437, %c0_438] : memref<4x25x8x150xbf16, #tpu.memory_space<vmem>>, vector<1x1x8x150xbf16>
    %436 = vector.shape_cast %435 : vector<1x1x8x150xbf16> to vector<8x150xbf16>
    %cst_439 = arith.constant dense<0.000000e+00> : vector<8x128xf32>
    %437 = tpu.matmul %436, %0, %cst_439 {dimension_numbers = #tpu.dot_dimension_numbers<[1], [0], [0], [1], [0, 0, 1, 1], [], []>} : vector<8x150xbf16>, vector<150x128xbf16>, vector<8x128xf32> -> vector<8x128xf32>
    %c1_440 = arith.constant 1 : index
    %c18_441 = arith.constant 18 : index
    %c0_442 = arith.constant 0 : index
    %c0_443 = arith.constant 0 : index
    %438 = vector.load %arg1[%c1_440, %c18_441, %c0_442, %c0_443] : memref<4x25x8x150xbf16, #tpu.memory_space<vmem>>, vector<1x1x8x150xbf16>
    %439 = vector.shape_cast %438 : vector<1x1x8x150xbf16> to vector<8x150xbf16>
    %cst_444 = arith.constant dense<0.000000e+00> : vector<8x128xf32>
    %440 = tpu.matmul %439, %0, %cst_444 {dimension_numbers = #tpu.dot_dimension_numbers<[1], [0], [0], [1], [0, 0, 1, 1], [], []>} : vector<8x150xbf16>, vector<150x128xbf16>, vector<8x128xf32> -> vector<8x128xf32>
    %441 = arith.maximumf %437, %440 : vector<8x128xf32>
    %c2_445 = arith.constant 2 : index
    %c18_446 = arith.constant 18 : index
    %c0_447 = arith.constant 0 : index
    %c0_448 = arith.constant 0 : index
    %442 = vector.load %arg1[%c2_445, %c18_446, %c0_447, %c0_448] : memref<4x25x8x150xbf16, #tpu.memory_space<vmem>>, vector<1x1x8x150xbf16>
    %443 = vector.shape_cast %442 : vector<1x1x8x150xbf16> to vector<8x150xbf16>
    %cst_449 = arith.constant dense<0.000000e+00> : vector<8x128xf32>
    %444 = tpu.matmul %443, %0, %cst_449 {dimension_numbers = #tpu.dot_dimension_numbers<[1], [0], [0], [1], [0, 0, 1, 1], [], []>} : vector<8x150xbf16>, vector<150x128xbf16>, vector<8x128xf32> -> vector<8x128xf32>
    %445 = arith.maximumf %441, %444 : vector<8x128xf32>
    %c3_450 = arith.constant 3 : index
    %c18_451 = arith.constant 18 : index
    %c0_452 = arith.constant 0 : index
    %c0_453 = arith.constant 0 : index
    %446 = vector.load %arg1[%c3_450, %c18_451, %c0_452, %c0_453] : memref<4x25x8x150xbf16, #tpu.memory_space<vmem>>, vector<1x1x8x150xbf16>
    %447 = vector.shape_cast %446 : vector<1x1x8x150xbf16> to vector<8x150xbf16>
    %cst_454 = arith.constant dense<0.000000e+00> : vector<8x128xf32>
    %448 = tpu.matmul %447, %0, %cst_454 {dimension_numbers = #tpu.dot_dimension_numbers<[1], [0], [0], [1], [0, 0, 1, 1], [], []>} : vector<8x150xbf16>, vector<150x128xbf16>, vector<8x128xf32> -> vector<8x128xf32>
    %449 = arith.maximumf %445, %448 : vector<8x128xf32>
    %450 = vector.broadcast %1 : vector<1x128xf32> to vector<8x128xf32>
    %451 = arith.addf %449, %450 : vector<8x128xf32>
    %cst_455 = arith.constant 0.000000e+00 : f32
    %452 = vector.broadcast %cst_455 : f32 to vector<8x128xf32>
    %453 = arith.maximumf %451, %452 : vector<8x128xf32>
    %454 = arith.truncf %453 : vector<8x128xf32> to vector<8x128xbf16>
    %c18_456 = arith.constant 18 : index
    %c0_457 = arith.constant 0 : index
    %c0_458 = arith.constant 0 : index
    %455 = vector.load %arg4[%c18_456, %c0_457, %c0_458] : memref<25x128x128xbf16, #tpu.memory_space<vmem>>, vector<1x128x128xbf16>
    %456 = vector.shape_cast %455 : vector<1x128x128xbf16> to vector<128x128xbf16>
    %cst_459 = arith.constant dense<0.000000e+00> : vector<8x128xf32>
    %457 = tpu.matmul %454, %456, %cst_459 {dimension_numbers = #tpu.dot_dimension_numbers<[1], [0], [0], [1], [0, 0, 1, 1], [], []>} : vector<8x128xbf16>, vector<128x128xbf16>, vector<8x128xf32> -> vector<8x128xf32>
    %458 = arith.addf %434, %457 : vector<8x128xf32>
    %c0_460 = arith.constant 0 : index
    %c19 = arith.constant 19 : index
    %c0_461 = arith.constant 0 : index
    %c0_462 = arith.constant 0 : index
    %459 = vector.load %arg1[%c0_460, %c19, %c0_461, %c0_462] : memref<4x25x8x150xbf16, #tpu.memory_space<vmem>>, vector<1x1x8x150xbf16>
    %460 = vector.shape_cast %459 : vector<1x1x8x150xbf16> to vector<8x150xbf16>
    %cst_463 = arith.constant dense<0.000000e+00> : vector<8x128xf32>
    %461 = tpu.matmul %460, %0, %cst_463 {dimension_numbers = #tpu.dot_dimension_numbers<[1], [0], [0], [1], [0, 0, 1, 1], [], []>} : vector<8x150xbf16>, vector<150x128xbf16>, vector<8x128xf32> -> vector<8x128xf32>
    %c1_464 = arith.constant 1 : index
    %c19_465 = arith.constant 19 : index
    %c0_466 = arith.constant 0 : index
    %c0_467 = arith.constant 0 : index
    %462 = vector.load %arg1[%c1_464, %c19_465, %c0_466, %c0_467] : memref<4x25x8x150xbf16, #tpu.memory_space<vmem>>, vector<1x1x8x150xbf16>
    %463 = vector.shape_cast %462 : vector<1x1x8x150xbf16> to vector<8x150xbf16>
    %cst_468 = arith.constant dense<0.000000e+00> : vector<8x128xf32>
    %464 = tpu.matmul %463, %0, %cst_468 {dimension_numbers = #tpu.dot_dimension_numbers<[1], [0], [0], [1], [0, 0, 1, 1], [], []>} : vector<8x150xbf16>, vector<150x128xbf16>, vector<8x128xf32> -> vector<8x128xf32>
    %465 = arith.maximumf %461, %464 : vector<8x128xf32>
    %c2_469 = arith.constant 2 : index
    %c19_470 = arith.constant 19 : index
    %c0_471 = arith.constant 0 : index
    %c0_472 = arith.constant 0 : index
    %466 = vector.load %arg1[%c2_469, %c19_470, %c0_471, %c0_472] : memref<4x25x8x150xbf16, #tpu.memory_space<vmem>>, vector<1x1x8x150xbf16>
    %467 = vector.shape_cast %466 : vector<1x1x8x150xbf16> to vector<8x150xbf16>
    %cst_473 = arith.constant dense<0.000000e+00> : vector<8x128xf32>
    %468 = tpu.matmul %467, %0, %cst_473 {dimension_numbers = #tpu.dot_dimension_numbers<[1], [0], [0], [1], [0, 0, 1, 1], [], []>} : vector<8x150xbf16>, vector<150x128xbf16>, vector<8x128xf32> -> vector<8x128xf32>
    %469 = arith.maximumf %465, %468 : vector<8x128xf32>
    %c3_474 = arith.constant 3 : index
    %c19_475 = arith.constant 19 : index
    %c0_476 = arith.constant 0 : index
    %c0_477 = arith.constant 0 : index
    %470 = vector.load %arg1[%c3_474, %c19_475, %c0_476, %c0_477] : memref<4x25x8x150xbf16, #tpu.memory_space<vmem>>, vector<1x1x8x150xbf16>
    %471 = vector.shape_cast %470 : vector<1x1x8x150xbf16> to vector<8x150xbf16>
    %cst_478 = arith.constant dense<0.000000e+00> : vector<8x128xf32>
    %472 = tpu.matmul %471, %0, %cst_478 {dimension_numbers = #tpu.dot_dimension_numbers<[1], [0], [0], [1], [0, 0, 1, 1], [], []>} : vector<8x150xbf16>, vector<150x128xbf16>, vector<8x128xf32> -> vector<8x128xf32>
    %473 = arith.maximumf %469, %472 : vector<8x128xf32>
    %474 = vector.broadcast %1 : vector<1x128xf32> to vector<8x128xf32>
    %475 = arith.addf %473, %474 : vector<8x128xf32>
    %cst_479 = arith.constant 0.000000e+00 : f32
    %476 = vector.broadcast %cst_479 : f32 to vector<8x128xf32>
    %477 = arith.maximumf %475, %476 : vector<8x128xf32>
    %478 = arith.truncf %477 : vector<8x128xf32> to vector<8x128xbf16>
    %c19_480 = arith.constant 19 : index
    %c0_481 = arith.constant 0 : index
    %c0_482 = arith.constant 0 : index
    %479 = vector.load %arg4[%c19_480, %c0_481, %c0_482] : memref<25x128x128xbf16, #tpu.memory_space<vmem>>, vector<1x128x128xbf16>
    %480 = vector.shape_cast %479 : vector<1x128x128xbf16> to vector<128x128xbf16>
    %cst_483 = arith.constant dense<0.000000e+00> : vector<8x128xf32>
    %481 = tpu.matmul %478, %480, %cst_483 {dimension_numbers = #tpu.dot_dimension_numbers<[1], [0], [0], [1], [0, 0, 1, 1], [], []>} : vector<8x128xbf16>, vector<128x128xbf16>, vector<8x128xf32> -> vector<8x128xf32>
    %482 = arith.addf %458, %481 : vector<8x128xf32>
    %c0_484 = arith.constant 0 : index
    %c20 = arith.constant 20 : index
    %c0_485 = arith.constant 0 : index
    %c0_486 = arith.constant 0 : index
    %483 = vector.load %arg1[%c0_484, %c20, %c0_485, %c0_486] : memref<4x25x8x150xbf16, #tpu.memory_space<vmem>>, vector<1x1x8x150xbf16>
    %484 = vector.shape_cast %483 : vector<1x1x8x150xbf16> to vector<8x150xbf16>
    %cst_487 = arith.constant dense<0.000000e+00> : vector<8x128xf32>
    %485 = tpu.matmul %484, %0, %cst_487 {dimension_numbers = #tpu.dot_dimension_numbers<[1], [0], [0], [1], [0, 0, 1, 1], [], []>} : vector<8x150xbf16>, vector<150x128xbf16>, vector<8x128xf32> -> vector<8x128xf32>
    %c1_488 = arith.constant 1 : index
    %c20_489 = arith.constant 20 : index
    %c0_490 = arith.constant 0 : index
    %c0_491 = arith.constant 0 : index
    %486 = vector.load %arg1[%c1_488, %c20_489, %c0_490, %c0_491] : memref<4x25x8x150xbf16, #tpu.memory_space<vmem>>, vector<1x1x8x150xbf16>
    %487 = vector.shape_cast %486 : vector<1x1x8x150xbf16> to vector<8x150xbf16>
    %cst_492 = arith.constant dense<0.000000e+00> : vector<8x128xf32>
    %488 = tpu.matmul %487, %0, %cst_492 {dimension_numbers = #tpu.dot_dimension_numbers<[1], [0], [0], [1], [0, 0, 1, 1], [], []>} : vector<8x150xbf16>, vector<150x128xbf16>, vector<8x128xf32> -> vector<8x128xf32>
    %489 = arith.maximumf %485, %488 : vector<8x128xf32>
    %c2_493 = arith.constant 2 : index
    %c20_494 = arith.constant 20 : index
    %c0_495 = arith.constant 0 : index
    %c0_496 = arith.constant 0 : index
    %490 = vector.load %arg1[%c2_493, %c20_494, %c0_495, %c0_496] : memref<4x25x8x150xbf16, #tpu.memory_space<vmem>>, vector<1x1x8x150xbf16>
    %491 = vector.shape_cast %490 : vector<1x1x8x150xbf16> to vector<8x150xbf16>
    %cst_497 = arith.constant dense<0.000000e+00> : vector<8x128xf32>
    %492 = tpu.matmul %491, %0, %cst_497 {dimension_numbers = #tpu.dot_dimension_numbers<[1], [0], [0], [1], [0, 0, 1, 1], [], []>} : vector<8x150xbf16>, vector<150x128xbf16>, vector<8x128xf32> -> vector<8x128xf32>
    %493 = arith.maximumf %489, %492 : vector<8x128xf32>
    %c3_498 = arith.constant 3 : index
    %c20_499 = arith.constant 20 : index
    %c0_500 = arith.constant 0 : index
    %c0_501 = arith.constant 0 : index
    %494 = vector.load %arg1[%c3_498, %c20_499, %c0_500, %c0_501] : memref<4x25x8x150xbf16, #tpu.memory_space<vmem>>, vector<1x1x8x150xbf16>
    %495 = vector.shape_cast %494 : vector<1x1x8x150xbf16> to vector<8x150xbf16>
    %cst_502 = arith.constant dense<0.000000e+00> : vector<8x128xf32>
    %496 = tpu.matmul %495, %0, %cst_502 {dimension_numbers = #tpu.dot_dimension_numbers<[1], [0], [0], [1], [0, 0, 1, 1], [], []>} : vector<8x150xbf16>, vector<150x128xbf16>, vector<8x128xf32> -> vector<8x128xf32>
    %497 = arith.maximumf %493, %496 : vector<8x128xf32>
    %498 = vector.broadcast %1 : vector<1x128xf32> to vector<8x128xf32>
    %499 = arith.addf %497, %498 : vector<8x128xf32>
    %cst_503 = arith.constant 0.000000e+00 : f32
    %500 = vector.broadcast %cst_503 : f32 to vector<8x128xf32>
    %501 = arith.maximumf %499, %500 : vector<8x128xf32>
    %502 = arith.truncf %501 : vector<8x128xf32> to vector<8x128xbf16>
    %c20_504 = arith.constant 20 : index
    %c0_505 = arith.constant 0 : index
    %c0_506 = arith.constant 0 : index
    %503 = vector.load %arg4[%c20_504, %c0_505, %c0_506] : memref<25x128x128xbf16, #tpu.memory_space<vmem>>, vector<1x128x128xbf16>
    %504 = vector.shape_cast %503 : vector<1x128x128xbf16> to vector<128x128xbf16>
    %cst_507 = arith.constant dense<0.000000e+00> : vector<8x128xf32>
    %505 = tpu.matmul %502, %504, %cst_507 {dimension_numbers = #tpu.dot_dimension_numbers<[1], [0], [0], [1], [0, 0, 1, 1], [], []>} : vector<8x128xbf16>, vector<128x128xbf16>, vector<8x128xf32> -> vector<8x128xf32>
    %506 = arith.addf %482, %505 : vector<8x128xf32>
    %c0_508 = arith.constant 0 : index
    %c21 = arith.constant 21 : index
    %c0_509 = arith.constant 0 : index
    %c0_510 = arith.constant 0 : index
    %507 = vector.load %arg1[%c0_508, %c21, %c0_509, %c0_510] : memref<4x25x8x150xbf16, #tpu.memory_space<vmem>>, vector<1x1x8x150xbf16>
    %508 = vector.shape_cast %507 : vector<1x1x8x150xbf16> to vector<8x150xbf16>
    %cst_511 = arith.constant dense<0.000000e+00> : vector<8x128xf32>
    %509 = tpu.matmul %508, %0, %cst_511 {dimension_numbers = #tpu.dot_dimension_numbers<[1], [0], [0], [1], [0, 0, 1, 1], [], []>} : vector<8x150xbf16>, vector<150x128xbf16>, vector<8x128xf32> -> vector<8x128xf32>
    %c1_512 = arith.constant 1 : index
    %c21_513 = arith.constant 21 : index
    %c0_514 = arith.constant 0 : index
    %c0_515 = arith.constant 0 : index
    %510 = vector.load %arg1[%c1_512, %c21_513, %c0_514, %c0_515] : memref<4x25x8x150xbf16, #tpu.memory_space<vmem>>, vector<1x1x8x150xbf16>
    %511 = vector.shape_cast %510 : vector<1x1x8x150xbf16> to vector<8x150xbf16>
    %cst_516 = arith.constant dense<0.000000e+00> : vector<8x128xf32>
    %512 = tpu.matmul %511, %0, %cst_516 {dimension_numbers = #tpu.dot_dimension_numbers<[1], [0], [0], [1], [0, 0, 1, 1], [], []>} : vector<8x150xbf16>, vector<150x128xbf16>, vector<8x128xf32> -> vector<8x128xf32>
    %513 = arith.maximumf %509, %512 : vector<8x128xf32>
    %c2_517 = arith.constant 2 : index
    %c21_518 = arith.constant 21 : index
    %c0_519 = arith.constant 0 : index
    %c0_520 = arith.constant 0 : index
    %514 = vector.load %arg1[%c2_517, %c21_518, %c0_519, %c0_520] : memref<4x25x8x150xbf16, #tpu.memory_space<vmem>>, vector<1x1x8x150xbf16>
    %515 = vector.shape_cast %514 : vector<1x1x8x150xbf16> to vector<8x150xbf16>
    %cst_521 = arith.constant dense<0.000000e+00> : vector<8x128xf32>
    %516 = tpu.matmul %515, %0, %cst_521 {dimension_numbers = #tpu.dot_dimension_numbers<[1], [0], [0], [1], [0, 0, 1, 1], [], []>} : vector<8x150xbf16>, vector<150x128xbf16>, vector<8x128xf32> -> vector<8x128xf32>
    %517 = arith.maximumf %513, %516 : vector<8x128xf32>
    %c3_522 = arith.constant 3 : index
    %c21_523 = arith.constant 21 : index
    %c0_524 = arith.constant 0 : index
    %c0_525 = arith.constant 0 : index
    %518 = vector.load %arg1[%c3_522, %c21_523, %c0_524, %c0_525] : memref<4x25x8x150xbf16, #tpu.memory_space<vmem>>, vector<1x1x8x150xbf16>
    %519 = vector.shape_cast %518 : vector<1x1x8x150xbf16> to vector<8x150xbf16>
    %cst_526 = arith.constant dense<0.000000e+00> : vector<8x128xf32>
    %520 = tpu.matmul %519, %0, %cst_526 {dimension_numbers = #tpu.dot_dimension_numbers<[1], [0], [0], [1], [0, 0, 1, 1], [], []>} : vector<8x150xbf16>, vector<150x128xbf16>, vector<8x128xf32> -> vector<8x128xf32>
    %521 = arith.maximumf %517, %520 : vector<8x128xf32>
    %522 = vector.broadcast %1 : vector<1x128xf32> to vector<8x128xf32>
    %523 = arith.addf %521, %522 : vector<8x128xf32>
    %cst_527 = arith.constant 0.000000e+00 : f32
    %524 = vector.broadcast %cst_527 : f32 to vector<8x128xf32>
    %525 = arith.maximumf %523, %524 : vector<8x128xf32>
    %526 = arith.truncf %525 : vector<8x128xf32> to vector<8x128xbf16>
    %c21_528 = arith.constant 21 : index
    %c0_529 = arith.constant 0 : index
    %c0_530 = arith.constant 0 : index
    %527 = vector.load %arg4[%c21_528, %c0_529, %c0_530] : memref<25x128x128xbf16, #tpu.memory_space<vmem>>, vector<1x128x128xbf16>
    %528 = vector.shape_cast %527 : vector<1x128x128xbf16> to vector<128x128xbf16>
    %cst_531 = arith.constant dense<0.000000e+00> : vector<8x128xf32>
    %529 = tpu.matmul %526, %528, %cst_531 {dimension_numbers = #tpu.dot_dimension_numbers<[1], [0], [0], [1], [0, 0, 1, 1], [], []>} : vector<8x128xbf16>, vector<128x128xbf16>, vector<8x128xf32> -> vector<8x128xf32>
    %530 = arith.addf %506, %529 : vector<8x128xf32>
    %c0_532 = arith.constant 0 : index
    %c22 = arith.constant 22 : index
    %c0_533 = arith.constant 0 : index
    %c0_534 = arith.constant 0 : index
    %531 = vector.load %arg1[%c0_532, %c22, %c0_533, %c0_534] : memref<4x25x8x150xbf16, #tpu.memory_space<vmem>>, vector<1x1x8x150xbf16>
    %532 = vector.shape_cast %531 : vector<1x1x8x150xbf16> to vector<8x150xbf16>
    %cst_535 = arith.constant dense<0.000000e+00> : vector<8x128xf32>
    %533 = tpu.matmul %532, %0, %cst_535 {dimension_numbers = #tpu.dot_dimension_numbers<[1], [0], [0], [1], [0, 0, 1, 1], [], []>} : vector<8x150xbf16>, vector<150x128xbf16>, vector<8x128xf32> -> vector<8x128xf32>
    %c1_536 = arith.constant 1 : index
    %c22_537 = arith.constant 22 : index
    %c0_538 = arith.constant 0 : index
    %c0_539 = arith.constant 0 : index
    %534 = vector.load %arg1[%c1_536, %c22_537, %c0_538, %c0_539] : memref<4x25x8x150xbf16, #tpu.memory_space<vmem>>, vector<1x1x8x150xbf16>
    %535 = vector.shape_cast %534 : vector<1x1x8x150xbf16> to vector<8x150xbf16>
    %cst_540 = arith.constant dense<0.000000e+00> : vector<8x128xf32>
    %536 = tpu.matmul %535, %0, %cst_540 {dimension_numbers = #tpu.dot_dimension_numbers<[1], [0], [0], [1], [0, 0, 1, 1], [], []>} : vector<8x150xbf16>, vector<150x128xbf16>, vector<8x128xf32> -> vector<8x128xf32>
    %537 = arith.maximumf %533, %536 : vector<8x128xf32>
    %c2_541 = arith.constant 2 : index
    %c22_542 = arith.constant 22 : index
    %c0_543 = arith.constant 0 : index
    %c0_544 = arith.constant 0 : index
    %538 = vector.load %arg1[%c2_541, %c22_542, %c0_543, %c0_544] : memref<4x25x8x150xbf16, #tpu.memory_space<vmem>>, vector<1x1x8x150xbf16>
    %539 = vector.shape_cast %538 : vector<1x1x8x150xbf16> to vector<8x150xbf16>
    %cst_545 = arith.constant dense<0.000000e+00> : vector<8x128xf32>
    %540 = tpu.matmul %539, %0, %cst_545 {dimension_numbers = #tpu.dot_dimension_numbers<[1], [0], [0], [1], [0, 0, 1, 1], [], []>} : vector<8x150xbf16>, vector<150x128xbf16>, vector<8x128xf32> -> vector<8x128xf32>
    %541 = arith.maximumf %537, %540 : vector<8x128xf32>
    %c3_546 = arith.constant 3 : index
    %c22_547 = arith.constant 22 : index
    %c0_548 = arith.constant 0 : index
    %c0_549 = arith.constant 0 : index
    %542 = vector.load %arg1[%c3_546, %c22_547, %c0_548, %c0_549] : memref<4x25x8x150xbf16, #tpu.memory_space<vmem>>, vector<1x1x8x150xbf16>
    %543 = vector.shape_cast %542 : vector<1x1x8x150xbf16> to vector<8x150xbf16>
    %cst_550 = arith.constant dense<0.000000e+00> : vector<8x128xf32>
    %544 = tpu.matmul %543, %0, %cst_550 {dimension_numbers = #tpu.dot_dimension_numbers<[1], [0], [0], [1], [0, 0, 1, 1], [], []>} : vector<8x150xbf16>, vector<150x128xbf16>, vector<8x128xf32> -> vector<8x128xf32>
    %545 = arith.maximumf %541, %544 : vector<8x128xf32>
    %546 = vector.broadcast %1 : vector<1x128xf32> to vector<8x128xf32>
    %547 = arith.addf %545, %546 : vector<8x128xf32>
    %cst_551 = arith.constant 0.000000e+00 : f32
    %548 = vector.broadcast %cst_551 : f32 to vector<8x128xf32>
    %549 = arith.maximumf %547, %548 : vector<8x128xf32>
    %550 = arith.truncf %549 : vector<8x128xf32> to vector<8x128xbf16>
    %c22_552 = arith.constant 22 : index
    %c0_553 = arith.constant 0 : index
    %c0_554 = arith.constant 0 : index
    %551 = vector.load %arg4[%c22_552, %c0_553, %c0_554] : memref<25x128x128xbf16, #tpu.memory_space<vmem>>, vector<1x128x128xbf16>
    %552 = vector.shape_cast %551 : vector<1x128x128xbf16> to vector<128x128xbf16>
    %cst_555 = arith.constant dense<0.000000e+00> : vector<8x128xf32>
    %553 = tpu.matmul %550, %552, %cst_555 {dimension_numbers = #tpu.dot_dimension_numbers<[1], [0], [0], [1], [0, 0, 1, 1], [], []>} : vector<8x128xbf16>, vector<128x128xbf16>, vector<8x128xf32> -> vector<8x128xf32>
    %554 = arith.addf %530, %553 : vector<8x128xf32>
    %c0_556 = arith.constant 0 : index
    %c23 = arith.constant 23 : index
    %c0_557 = arith.constant 0 : index
    %c0_558 = arith.constant 0 : index
    %555 = vector.load %arg1[%c0_556, %c23, %c0_557, %c0_558] : memref<4x25x8x150xbf16, #tpu.memory_space<vmem>>, vector<1x1x8x150xbf16>
    %556 = vector.shape_cast %555 : vector<1x1x8x150xbf16> to vector<8x150xbf16>
    %cst_559 = arith.constant dense<0.000000e+00> : vector<8x128xf32>
    %557 = tpu.matmul %556, %0, %cst_559 {dimension_numbers = #tpu.dot_dimension_numbers<[1], [0], [0], [1], [0, 0, 1, 1], [], []>} : vector<8x150xbf16>, vector<150x128xbf16>, vector<8x128xf32> -> vector<8x128xf32>
    %c1_560 = arith.constant 1 : index
    %c23_561 = arith.constant 23 : index
    %c0_562 = arith.constant 0 : index
    %c0_563 = arith.constant 0 : index
    %558 = vector.load %arg1[%c1_560, %c23_561, %c0_562, %c0_563] : memref<4x25x8x150xbf16, #tpu.memory_space<vmem>>, vector<1x1x8x150xbf16>
    %559 = vector.shape_cast %558 : vector<1x1x8x150xbf16> to vector<8x150xbf16>
    %cst_564 = arith.constant dense<0.000000e+00> : vector<8x128xf32>
    %560 = tpu.matmul %559, %0, %cst_564 {dimension_numbers = #tpu.dot_dimension_numbers<[1], [0], [0], [1], [0, 0, 1, 1], [], []>} : vector<8x150xbf16>, vector<150x128xbf16>, vector<8x128xf32> -> vector<8x128xf32>
    %561 = arith.maximumf %557, %560 : vector<8x128xf32>
    %c2_565 = arith.constant 2 : index
    %c23_566 = arith.constant 23 : index
    %c0_567 = arith.constant 0 : index
    %c0_568 = arith.constant 0 : index
    %562 = vector.load %arg1[%c2_565, %c23_566, %c0_567, %c0_568] : memref<4x25x8x150xbf16, #tpu.memory_space<vmem>>, vector<1x1x8x150xbf16>
    %563 = vector.shape_cast %562 : vector<1x1x8x150xbf16> to vector<8x150xbf16>
    %cst_569 = arith.constant dense<0.000000e+00> : vector<8x128xf32>
    %564 = tpu.matmul %563, %0, %cst_569 {dimension_numbers = #tpu.dot_dimension_numbers<[1], [0], [0], [1], [0, 0, 1, 1], [], []>} : vector<8x150xbf16>, vector<150x128xbf16>, vector<8x128xf32> -> vector<8x128xf32>
    %565 = arith.maximumf %561, %564 : vector<8x128xf32>
    %c3_570 = arith.constant 3 : index
    %c23_571 = arith.constant 23 : index
    %c0_572 = arith.constant 0 : index
    %c0_573 = arith.constant 0 : index
    %566 = vector.load %arg1[%c3_570, %c23_571, %c0_572, %c0_573] : memref<4x25x8x150xbf16, #tpu.memory_space<vmem>>, vector<1x1x8x150xbf16>
    %567 = vector.shape_cast %566 : vector<1x1x8x150xbf16> to vector<8x150xbf16>
    %cst_574 = arith.constant dense<0.000000e+00> : vector<8x128xf32>
    %568 = tpu.matmul %567, %0, %cst_574 {dimension_numbers = #tpu.dot_dimension_numbers<[1], [0], [0], [1], [0, 0, 1, 1], [], []>} : vector<8x150xbf16>, vector<150x128xbf16>, vector<8x128xf32> -> vector<8x128xf32>
    %569 = arith.maximumf %565, %568 : vector<8x128xf32>
    %570 = vector.broadcast %1 : vector<1x128xf32> to vector<8x128xf32>
    %571 = arith.addf %569, %570 : vector<8x128xf32>
    %cst_575 = arith.constant 0.000000e+00 : f32
    %572 = vector.broadcast %cst_575 : f32 to vector<8x128xf32>
    %573 = arith.maximumf %571, %572 : vector<8x128xf32>
    %574 = arith.truncf %573 : vector<8x128xf32> to vector<8x128xbf16>
    %c23_576 = arith.constant 23 : index
    %c0_577 = arith.constant 0 : index
    %c0_578 = arith.constant 0 : index
    %575 = vector.load %arg4[%c23_576, %c0_577, %c0_578] : memref<25x128x128xbf16, #tpu.memory_space<vmem>>, vector<1x128x128xbf16>
    %576 = vector.shape_cast %575 : vector<1x128x128xbf16> to vector<128x128xbf16>
    %cst_579 = arith.constant dense<0.000000e+00> : vector<8x128xf32>
    %577 = tpu.matmul %574, %576, %cst_579 {dimension_numbers = #tpu.dot_dimension_numbers<[1], [0], [0], [1], [0, 0, 1, 1], [], []>} : vector<8x128xbf16>, vector<128x128xbf16>, vector<8x128xf32> -> vector<8x128xf32>
    %578 = arith.addf %554, %577 : vector<8x128xf32>
    %c0_580 = arith.constant 0 : index
    %c24 = arith.constant 24 : index
    %c0_581 = arith.constant 0 : index
    %c0_582 = arith.constant 0 : index
    %579 = vector.load %arg1[%c0_580, %c24, %c0_581, %c0_582] : memref<4x25x8x150xbf16, #tpu.memory_space<vmem>>, vector<1x1x8x150xbf16>
    %580 = vector.shape_cast %579 : vector<1x1x8x150xbf16> to vector<8x150xbf16>
    %cst_583 = arith.constant dense<0.000000e+00> : vector<8x128xf32>
    %581 = tpu.matmul %580, %0, %cst_583 {dimension_numbers = #tpu.dot_dimension_numbers<[1], [0], [0], [1], [0, 0, 1, 1], [], []>} : vector<8x150xbf16>, vector<150x128xbf16>, vector<8x128xf32> -> vector<8x128xf32>
    %c1_584 = arith.constant 1 : index
    %c24_585 = arith.constant 24 : index
    %c0_586 = arith.constant 0 : index
    %c0_587 = arith.constant 0 : index
    %582 = vector.load %arg1[%c1_584, %c24_585, %c0_586, %c0_587] : memref<4x25x8x150xbf16, #tpu.memory_space<vmem>>, vector<1x1x8x150xbf16>
    %583 = vector.shape_cast %582 : vector<1x1x8x150xbf16> to vector<8x150xbf16>
    %cst_588 = arith.constant dense<0.000000e+00> : vector<8x128xf32>
    %584 = tpu.matmul %583, %0, %cst_588 {dimension_numbers = #tpu.dot_dimension_numbers<[1], [0], [0], [1], [0, 0, 1, 1], [], []>} : vector<8x150xbf16>, vector<150x128xbf16>, vector<8x128xf32> -> vector<8x128xf32>
    %585 = arith.maximumf %581, %584 : vector<8x128xf32>
    %c2_589 = arith.constant 2 : index
    %c24_590 = arith.constant 24 : index
    %c0_591 = arith.constant 0 : index
    %c0_592 = arith.constant 0 : index
    %586 = vector.load %arg1[%c2_589, %c24_590, %c0_591, %c0_592] : memref<4x25x8x150xbf16, #tpu.memory_space<vmem>>, vector<1x1x8x150xbf16>
    %587 = vector.shape_cast %586 : vector<1x1x8x150xbf16> to vector<8x150xbf16>
    %cst_593 = arith.constant dense<0.000000e+00> : vector<8x128xf32>
    %588 = tpu.matmul %587, %0, %cst_593 {dimension_numbers = #tpu.dot_dimension_numbers<[1], [0], [0], [1], [0, 0, 1, 1], [], []>} : vector<8x150xbf16>, vector<150x128xbf16>, vector<8x128xf32> -> vector<8x128xf32>
    %589 = arith.maximumf %585, %588 : vector<8x128xf32>
    %c3_594 = arith.constant 3 : index
    %c24_595 = arith.constant 24 : index
    %c0_596 = arith.constant 0 : index
    %c0_597 = arith.constant 0 : index
    %590 = vector.load %arg1[%c3_594, %c24_595, %c0_596, %c0_597] : memref<4x25x8x150xbf16, #tpu.memory_space<vmem>>, vector<1x1x8x150xbf16>
    %591 = vector.shape_cast %590 : vector<1x1x8x150xbf16> to vector<8x150xbf16>
    %cst_598 = arith.constant dense<0.000000e+00> : vector<8x128xf32>
    %592 = tpu.matmul %591, %0, %cst_598 {dimension_numbers = #tpu.dot_dimension_numbers<[1], [0], [0], [1], [0, 0, 1, 1], [], []>} : vector<8x150xbf16>, vector<150x128xbf16>, vector<8x128xf32> -> vector<8x128xf32>
    %593 = arith.maximumf %589, %592 : vector<8x128xf32>
    %594 = vector.broadcast %1 : vector<1x128xf32> to vector<8x128xf32>
    %595 = arith.addf %593, %594 : vector<8x128xf32>
    %cst_599 = arith.constant 0.000000e+00 : f32
    %596 = vector.broadcast %cst_599 : f32 to vector<8x128xf32>
    %597 = arith.maximumf %595, %596 : vector<8x128xf32>
    %598 = arith.truncf %597 : vector<8x128xf32> to vector<8x128xbf16>
    %c24_600 = arith.constant 24 : index
    %c0_601 = arith.constant 0 : index
    %c0_602 = arith.constant 0 : index
    %599 = vector.load %arg4[%c24_600, %c0_601, %c0_602] : memref<25x128x128xbf16, #tpu.memory_space<vmem>>, vector<1x128x128xbf16>
    %600 = vector.shape_cast %599 : vector<1x128x128xbf16> to vector<128x128xbf16>
    %cst_603 = arith.constant dense<0.000000e+00> : vector<8x128xf32>
    %601 = tpu.matmul %598, %600, %cst_603 {dimension_numbers = #tpu.dot_dimension_numbers<[1], [0], [0], [1], [0, 0, 1, 1], [], []>} : vector<8x128xbf16>, vector<128x128xbf16>, vector<8x128xf32> -> vector<8x128xf32>
    %602 = arith.addf %578, %601 : vector<8x128xf32>
    %c0_604 = arith.constant 0 : index
    %c0_605 = arith.constant 0 : index
    %603 = vector.load %arg5[%c0_604, %c0_605] : memref<1x128xf32, #tpu.memory_space<vmem>>, vector<1x128xf32>
    %604 = vector.broadcast %603 : vector<1x128xf32> to vector<8x128xf32>
    %605 = arith.addf %602, %604 : vector<8x128xf32>
    %cst_606 = arith.constant 0.000000e+00 : f32
    %606 = vector.broadcast %cst_606 : f32 to vector<8x128xf32>
    %607 = arith.maximumf %605, %606 : vector<8x128xf32>
    %608 = arith.truncf %607 : vector<8x128xf32> to vector<8x128xbf16>
    %c0_607 = arith.constant 0 : index
    %c0_608 = arith.constant 0 : index
    %609 = vector.load %arg6[%c0_607, %c0_608] : memref<128x128xbf16, #tpu.memory_space<vmem>>, vector<128x128xbf16>
    %cst_609 = arith.constant dense<0.000000e+00> : vector<8x128xf32>
    %610 = tpu.matmul %608, %609, %cst_609 {dimension_numbers = #tpu.dot_dimension_numbers<[1], [0], [0], [1], [0, 0, 1, 1], [], []>} : vector<8x128xbf16>, vector<128x128xbf16>, vector<8x128xf32> -> vector<8x128xf32>
    %c0_610 = arith.constant 0 : index
    %c0_611 = arith.constant 0 : index
    %611 = vector.load %arg7[%c0_610, %c0_611] : memref<1x128xf32, #tpu.memory_space<vmem>>, vector<1x128xf32>
    %612 = vector.broadcast %611 : vector<1x128xf32> to vector<8x128xf32>
    %613 = arith.addf %610, %612 : vector<8x128xf32>
    %cst_612 = arith.constant 0.000000e+00 : f32
    %614 = vector.broadcast %cst_612 : f32 to vector<8x128xf32>
    %615 = arith.maximumf %613, %614 : vector<8x128xf32>
    %616 = arith.truncf %615 : vector<8x128xf32> to vector<8x128xbf16>
    %c0_613 = arith.constant 0 : index
    %c0_614 = arith.constant 0 : index
    %617 = vector.load %arg8[%c0_613, %c0_614] : memref<128x128xbf16, #tpu.memory_space<vmem>>, vector<128x128xbf16>
    %cst_615 = arith.constant dense<0.000000e+00> : vector<8x128xf32>
    %618 = tpu.matmul %616, %617, %cst_615 {dimension_numbers = #tpu.dot_dimension_numbers<[1], [0], [0], [1], [0, 0, 1, 1], [], []>} : vector<8x128xbf16>, vector<128x128xbf16>, vector<8x128xf32> -> vector<8x128xf32>
    %c0_616 = arith.constant 0 : index
    %c0_617 = arith.constant 0 : index
    %619 = vector.load %arg9[%c0_616, %c0_617] : memref<1x128xf32, #tpu.memory_space<vmem>>, vector<1x128xf32>
    %620 = vector.broadcast %619 : vector<1x128xf32> to vector<8x128xf32>
    %621 = arith.addf %618, %620 : vector<8x128xf32>
    %c0_618 = arith.constant 0 : index
    %c0_619 = arith.constant 0 : index
    %622 = vector.load %arg10[%c0_618, %c0_619] : memref<8x128xf32, #tpu.memory_space<vmem>>, vector<8x128xf32>
    tpu.vector_store %arg10[%c0_618, %c0_619], %621 {strides = array<i32>} : memref<8x128xf32, #tpu.memory_space<vmem>>, vector<8x128xf32>,
    return
  }
  func.func @transform_0(%arg0: i32) -> (i32, i32, i32, i32) {
    %c0_i32 = arith.constant 0 : i32
    %c0_i32_0 = arith.constant 0 : i32
    %c0_i32_1 = arith.constant 0 : i32
    %c0_i32_2 = arith.constant 0 : i32
    return %c0_i32, %c0_i32_0, %arg0, %c0_i32_1 : i32, i32, i32, i32
  }
  func.func @transform_1(%arg0: i32) -> (i32, i32) {
    %c0_i32 = arith.constant 0 : i32
    %c0_i32_0 = arith.constant 0 : i32
    %c0_i32_1 = arith.constant 0 : i32
    return %c0_i32, %c0_i32_0 : i32, i32
  }
  func.func @transform_2(%arg0: i32) -> (i32, i32) {
    %c0_i32 = arith.constant 0 : i32
    %c0_i32_0 = arith.constant 0 : i32
    %c0_i32_1 = arith.constant 0 : i32
    return %c0_i32, %c0_i32_0 : i32, i32
  }
  func.func @transform_3(%arg0: i32) -> (i32, i32, i32) {
    %c0_i32 = arith.constant 0 : i32
    %c0_i32_0 = arith.constant 0 : i32
    %c0_i32_1 = arith.constant 0 : i32
    %c0_i32_2 = arith.constant 0 : i32
    return %c0_i32, %c0_i32_0, %c0_i32_1 : i32, i32, i32
  }
  func.func @transform_4(%arg0: i32) -> (i32, i32) {
    %c0_i32 = arith.constant 0 : i32
    %c0_i32_0 = arith.constant 0 : i32
    %c0_i32_1 = arith.constant 0 : i32
    return %c0_i32, %c0_i32_0 : i32, i32
  }
  func.func @transform_5(%arg0: i32) -> (i32, i32) {
    %c0_i32 = arith.constant 0 : i32
    %c0_i32_0 = arith.constant 0 : i32
    %c0_i32_1 = arith.constant 0 : i32
    return %c0_i32, %c0_i32_0 : i32, i32
  }
  func.func @transform_6(%arg0: i32) -> (i32, i32) {
    %c0_i32 = arith.constant 0 : i32
    %c0_i32_0 = arith.constant 0 : i32
    %c0_i32_1 = arith.constant 0 : i32
    return %c0_i32, %c0_i32_0 : i32, i32
  }
  func.func @transform_7(%arg0: i32) -> (i32, i32) {
    %c0_i32 = arith.constant 0 : i32
    %c0_i32_0 = arith.constant 0 : i32
    %c0_i32_1 = arith.constant 0 : i32
    return %c0_i32, %c0_i32_0 : i32, i32
  }
  func.func @transform_8(%arg0: i32) -> (i32, i32) {
    %c0_i32 = arith.constant 0 : i32
    %c0_i32_0 = arith.constant 0 : i32
    %c0_i32_1 = arith.constant 0 : i32
    return %c0_i32, %c0_i32_0 : i32, i32
  }
  func.func @transform_9(%arg0: i32) -> (i32, i32) {
    %c0_i32 = arith.constant 0 : i32
    %c0_i32_0 = arith.constant 0 : i32
    return %arg0, %c0_i32 : i32, i32
  }
}

</mosaic_0001>

<bundles_post_ra>
// kernel: net_forward.2
= control target key start
LH: loop header
LB: loop body
LE: loop exit
PB: predicated region body
PF: predicated region fallthrough
CT: control target
= control target key end

     0   :  { %s2803_s12 = smov 0   ;;  %s2805_s13 = smov 0   ;;  %s3478_s0 = inlined_call_operand.vmem [shape: bf16[4,400,75], index: 0, kind: input, shape index: {}]   ;;  %s3479_s1 = inlined_call_operand.vmem [shape: bf16[75,128], index: 1, kind: input, shape index: {}]   ;;  %s3480_s2 = inlined_call_operand.vmem [shape: f32[1,128], index: 2, kind: input, shape index: {}]   ;;  %s3481_s3 = inlined_call_operand.vmem [shape: bf16[400,128], index: 3, kind: output, shape index: {}]  }
   0x1   :  { %s2807_s14 = smov 0  }
   0x2 LB: > { %s2034_s15 = sadd.s32 4294967295, %s2778_s14   ;;  %s2820_s16 = sadd.s32 1, %s2778_s14   ;;  %s2778_s14 = sphi %s2807_s14, %s3513_s14   ;;  %s2774_s13 = sphi %s2805_s13, %s3512_s13   ;;  %s2770_s12 = sphi %s2803_s12, %s3511_s12  }
   0x3   : > { %s17_s17 = ssub.s32 %s2778_s14, %s2820_s16  ;;  %s20_s18 = sadd.s32 1, %s2774_s13 }
   0x4   : > { %p18_p0 = scmp.eq.s32.totalorder %s17_s17, 0  ;;  %p27_p1 = scmp.ne.s32.totalorder %s2774_s13, %s2770_s12 }
   0x5   : > { %p28_p2 = scmp.eq.s32.totalorder %s2778_s14, 0  ;;  %p2037_p4 = scmp.ge.s32.totalorder %s2778_s14, 2 }
   0x6   : > { %s2829_s19 = scalar_select %p18_p0, %s2774_s13, %s20_s18  }
   0x7   : > { %p29_p3 = por %p28_p2, %p27_p1  ;;  %127 = sbr.rel (%p2037_p4) target bundleno = 45 (0x2d), region = 24 }
   0xe   : > { %130 = sbr.rel (!%p29_p3) target bundleno = 45 (0x2d), region = 28  ;;  %s132_s20 = sand.u32 (%p29_p3), 1, %s2774_s13  }
   0xf   : > { %s2253_s21 = smul.u32 (%p29_p3), 100, %s2778_s14 }
  0x10   : > { %s2670_s22 = smul.u32 (%p29_p3), 400, %s132_s20 }
  0x11   : > { %s2837_s25 = scalar_lea.vmem (%p29_p3), %s3478_s0, %s2253_s21 }
  0x12   : > { %v153_v0 = vld [vmem:[%s2837_s25] sm:$0xff] (%p29_p3)   ;;  %v157_v1 = vld [vmem:[%s2837_s25 + $0x8] sm:$0xff] (%p29_p3)   ;;  %v161_v2 = vld [vmem:[%s2837_s25 + $0x10] sm:$0xff] (%p29_p3)   ;;  %s2842_s26 = scalar_lea.vmem (%p29_p3), [#allocation2], %s2670_s22 }
  0x13   : > { %154 = vst [vmem:[%s2842_s26] sm:$0xff] (%p29_p3), %v153_v0   ;;  %158 = vst [vmem:[%s2842_s26 + $0x8] sm:$0xff] (%p29_p3), %v157_v1   ;;  %v165_v3 = vld [vmem:[%s2837_s25 + $0x18] sm:$0xff] (%p29_p3)   ;;  %v169_v4 = vld [vmem:[%s2837_s25 + $0x20] sm:$0xff] (%p29_p3)  }
  0x14   : > { %162 = vst [vmem:[%s2842_s26 + $0x10] sm:$0xff] (%p29_p3), %v161_v2   ;;  %v173_v5 = vld [vmem:[%s2837_s25 + $0x28] sm:$0xff] (%p29_p3)   ;;  %166 = vst [vmem:[%s2842_s26 + $0x18] sm:$0xff] (%p29_p3), %v165_v3   ;;  %v177_v6 = vld [vmem:[%s2837_s25 + $0x30] sm:$0xff] (%p29_p3)  }
  0x15   : > { %170 = vst [vmem:[%s2842_s26 + $0x20] sm:$0xff] %v169_v4   ;;  %174 = vst [vmem:[%s2842_s26 + $0x28] sm:$0xff] %v173_v5   ;;  %v181_v7 = vld [vmem:[%s2837_s25 + $0x38] sm:$0xff]   ;;  %v185_v8 = vld [vmem:[%s2837_s25 + $0x40] sm:$0xff]  }
  0x16   : > { %178 = vst [vmem:[%s2842_s26 + $0x30] sm:$0xff] %v177_v6   ;;  %182 = vst [vmem:[%s2842_s26 + $0x38] sm:$0xff] %v181_v7   ;;  %v189_v9 = vld [vmem:[%s2837_s25 + $0x48] sm:$0xff]   ;;  %v193_v10 = vld [vmem:[%s2837_s25 + $0x50] sm:$0xff]  }
  0x17   : > { %186 = vst [vmem:[%s2842_s26 + $0x40] sm:$0xff] %v185_v8   ;;  %v197_v11 = vld [vmem:[%s2837_s25 + $0x58] sm:$0xff]   ;;  %190 = vst [vmem:[%s2842_s26 + $0x48] sm:$0xff] %v189_v9   ;;  %v201_v12 = vld [vmem:[%s2837_s25 + $0x60] sm:$0xf] }
  0x18   : > { %194 = vst [vmem:[%s2842_s26 + $0x50] sm:$0xff] %v193_v10   ;;  %198 = vst [vmem:[%s2842_s26 + $0x58] sm:$0xff] %v197_v11   ;;  %v203_v13 = vld [vmem:[%s2837_s25 + $0xc8] sm:$0xff]   ;;  %v207_v14 = vld [vmem:[%s2837_s25 + $0xd0] sm:$0xff]  }
  0x19   : > { %202 = vst [vmem:[%s2842_s26 + $0x60] sm:$0xf] %v201_v12  ;;  %204 = vst [vmem:[%s2842_s26 + $0x64] sm:$0xff] %v203_v13   ;;  %v211_v15 = vld [vmem:[%s2837_s25 + $0xd8] sm:$0xff]   ;;  %v215_v16 = vld [vmem:[%s2837_s25 + $0xe0] sm:$0xff]  }
  0x1a   : > { %208 = vst [vmem:[%s2842_s26 + $0x6c] sm:$0xff] %v207_v14   ;;  %v219_v17 = vld [vmem:[%s2837_s25 + $0xe8] sm:$0xff]   ;;  %212 = vst [vmem:[%s2842_s26 + $0x74] sm:$0xff] %v211_v15   ;;  %v223_v18 = vld [vmem:[%s2837_s25 + $0xf0] sm:$0xff]  }
  0x1b   : > { %216 = vst [vmem:[%s2842_s26 + $0x7c] sm:$0xff] %v215_v16   ;;  %220 = vst [vmem:[%s2842_s26 + $0x84] sm:$0xff] %v219_v17   ;;  %v227_v19 = vld [vmem:[%s2837_s25 + $0xf8] sm:$0xff]   ;;  %v231_v20 = vld [vmem:[%s2837_s25 + $0x100] sm:$0xff]  }
  0x1c   : > { %224 = vst [vmem:[%s2842_s26 + $0x8c] sm:$0xff] %v223_v18   ;;  %228 = vst [vmem:[%s2842_s26 + $0x94] sm:$0xff] %v227_v19   ;;  %v235_v21 = vld [vmem:[%s2837_s25 + $0x108] sm:$0xff]   ;;  %v239_v22 = vld [vmem:[%s2837_s25 + $0x110] sm:$0xff]  }
  0x1d   : > { %232 = vst [vmem:[%s2842_s26 + $0x9c] sm:$0xff] %v231_v20   ;;  %v243_v23 = vld [vmem:[%s2837_s25 + $0x118] sm:$0xff]   ;;  %236 = vst [vmem:[%s2842_s26 + $0xa4] sm:$0xff] %v235_v21   ;;  %v247_v24 = vld [vmem:[%s2837_s25 + $0x120] sm:$0xff]  }
  0x1e   : > { %240 = vst [vmem:[%s2842_s26 + $0xac] sm:$0xff] %v239_v22   ;;  %244 = vst [vmem:[%s2842_s26 + $0xb4] sm:$0xff] %v243_v23   ;;  %v251_v25 = vld [vmem:[%s2837_s25 + $0x128] sm:$0xf]  ;;  %v253_v26 = vld [vmem:[%s2837_s25 + $0x190] sm:$0xff]  }
  0x1f   : > { %248 = vst [vmem:[%s2842_s26 + $0xbc] sm:$0xff] %v247_v24   ;;  %252 = vst [vmem:[%s2842_s26 + $0xc4] sm:$0xf] %v251_v25  ;;  %v257_v27 = vld [vmem:[%s2837_s25 + $0x198] sm:$0xff]   ;;  %v261_v28 = vld [vmem:[%s2837_s25 + $0x1a0] sm:$0xff]  }
  0x20   : > { %254 = vst [vmem:[%s2842_s26 + $0xc8] sm:$0xff] %v253_v26   ;;  %v265_v29 = vld [vmem:[%s2837_s25 + $0x1a8] sm:$0xff]   ;;  %258 = vst [vmem:[%s2842_s26 + $0xd0] sm:$0xff] %v257_v27   ;;  %v269_v30 = vld [vmem:[%s2837_s25 + $0x1b0] sm:$0xff]  }
  0x21   : > { %262 = vst [vmem:[%s2842_s26 + $0xd8] sm:$0xff] %v261_v28   ;;  %266 = vst [vmem:[%s2842_s26 + $0xe0] sm:$0xff] %v265_v29   ;;  %v273_v31 = vld [vmem:[%s2837_s25 + $0x1b8] sm:$0xff]   ;;  %v277_v32 = vld [vmem:[%s2837_s25 + $0x1c0] sm:$0xff]  }
  0x22   : > { %270 = vst [vmem:[%s2842_s26 + $0xe8] sm:$0xff] %v269_v30   ;;  %274 = vst [vmem:[%s2842_s26 + $0xf0] sm:$0xff] %v273_v31   ;;  %v281_v33 = vld [vmem:[%s2837_s25 + $0x1c8] sm:$0xff]   ;;  %v285_v34 = vld [vmem:[%s2837_s25 + $0x1d0] sm:$0xff]  }
  0x23   : > { %278 = vst [vmem:[%s2842_s26 + $0xf8] sm:$0xff] %v277_v32   ;;  %v289_v35 = vld [vmem:[%s2837_s25 + $0x1d8] sm:$0xff]   ;;  %282 = vst [vmem:[%s2842_s26 + $0x100] sm:$0xff] %v281_v33   ;;  %v293_v36 = vld [vmem:[%s2837_s25 + $0x1e0] sm:$0xff]  }
  0x24   : > { %286 = vst [vmem:[%s2842_s26 + $0x108] sm:$0xff] %v285_v34   ;;  %290 = vst [vmem:[%s2842_s26 + $0x110] sm:$0xff] %v289_v35   ;;  %v297_v37 = vld [vmem:[%s2837_s25 + $0x1e8] sm:$0xff]   ;;  %v301_v38 = vld [vmem:[%s2837_s25 + $0x1f0] sm:$0xf] }
  0x25   : > { %294 = vst [vmem:[%s2842_s26 + $0x118] sm:$0xff] %v293_v36   ;;  %298 = vst [vmem:[%s2842_s26 + $0x120] sm:$0xff] %v297_v37   ;;  %v303_v39 = vld [vmem:[%s2837_s25 + $0x258] sm:$0xff]   ;;  %v307_v40 = vld [vmem:[%s2837_s25 + $0x260] sm:$0xff]  }
  0x26   : > { %302 = vst [vmem:[%s2842_s26 + $0x128] sm:$0xf] %v301_v38  ;;  %v311_v41 = vld [vmem:[%s2837_s25 + $0x268] sm:$0xff]   ;;  %304 = vst [vmem:[%s2842_s26 + $0x12c] sm:$0xff] %v303_v39   ;;  %v315_v42 = vld [vmem:[%s2837_s25 + $0x270] sm:$0xff]  }
  0x27   : > { %308 = vst [vmem:[%s2842_s26 + $0x134] sm:$0xff] %v307_v40   ;;  %312 = vst [vmem:[%s2842_s26 + $0x13c] sm:$0xff] %v311_v41   ;;  %v319_v43 = vld [vmem:[%s2837_s25 + $0x278] sm:$0xff]   ;;  %v323_v44 = vld [vmem:[%s2837_s25 + $0x280] sm:$0xff]  }
  0x28   : > { %316 = vst [vmem:[%s2842_s26 + $0x144] sm:$0xff] %v315_v42   ;;  %320 = vst [vmem:[%s2842_s26 + $0x14c] sm:$0xff] %v319_v43   ;;  %v327_v45 = vld [vmem:[%s2837_s25 + $0x288] sm:$0xff]   ;;  %v331_v46 = vld [vmem:[%s2837_s25 + $0x290] sm:$0xff]  }
  0x29   : > { %324 = vst [vmem:[%s2842_s26 + $0x154] sm:$0xff] %v323_v44   ;;  %v335_v47 = vld [vmem:[%s2837_s25 + $0x298] sm:$0xff]   ;;  %328 = vst [vmem:[%s2842_s26 + $0x15c] sm:$0xff] %v327_v45   ;;  %v339_v48 = vld [vmem:[%s2837_s25 + $0x2a0] sm:$0xff]  }
  0x2a   : > { %332 = vst [vmem:[%s2842_s26 + $0x164] sm:$0xff] %v331_v46   ;;  %336 = vst [vmem:[%s2842_s26 + $0x16c] sm:$0xff] %v335_v47   ;;  %v343_v49 = vld [vmem:[%s2837_s25 + $0x2a8] sm:$0xff]   ;;  %v347_v50 = vld [vmem:[%s2837_s25 + $0x2b0] sm:$0xff]  }
  0x2b   : > { %340 = vst [vmem:[%s2842_s26 + $0x174] sm:$0xff] %v339_v48   ;;  %344 = vst [vmem:[%s2842_s26 + $0x17c] sm:$0xff] %v343_v49   ;;  %v351_v51 = vld [vmem:[%s2837_s25 + $0x2b8] sm:$0xf] }
  0x2c   : > { %348 = vst [vmem:[%s2842_s26 + $0x184] sm:$0xff] %v347_v50   ;;  %352 = vst [vmem:[%s2842_s26 + $0x18c] sm:$0xf] %v351_v51 }
  0x2d PF: > { %p2039_p5 = scmp.ge.s32.totalorder %s2778_s14, 1  ;;  %p574_p6 = scmp.lt.s32.totalorder %s2778_s14, 3 }
  0x2f   : > { %p575_p7 = pnand %p2039_p5, %p574_p6 }
  0x31   : > { %578 = sbr.rel (%p575_p7) target bundleno = 500 (0x1f4), region = 69 }
  0x38   : > { %v2699_v52 = vld [vmem:[%s3479_s1] sm:$0xff]   ;;  %v2780_v53 = vmov 0.0   ;;  %v2700_v54 = vld [vmem:[%s3479_s1 + $0x8] sm:$0xff]   ;;  %vm779_vm0 = vcmask 1044480   ;;  %s581_s4 = sand.u32 1, %s2770_s12   ;;  %v2701_v55 = vld [vmem:[%s3479_s1 + $0x10] sm:$0xff]  }
  0x39   : > { %2422 = vmatprep.subr.bf16.mxu0 %v2780_v53  ;;  %2484 = vmatprep.subr.bf16.mxu1 %v2780_v53  ;;  %s2671_s7 = smul.u32 400, %s581_s4  ;;  %vm780_vm1 = vcmask 1045504   ;;  %v2781_v56 = vmov 65535   ;;  %vm2782_vm2 = vmmov 0   ;;  %v2702_v58 = vld [vmem:[%s3479_s1 + $0x18] sm:$0xff]   ;;  %vm739_vm3 = vcmask 613376  }
  0x3a   : > { %2423 = vmatpush3.bf16.msra.mxu0 %v2699_v52  ;;  %2485 = vmatpush3.bf16.msra.mxu1 %v2699_v52  ;;  %v781_v57 = vsel %vm779_vm0, 4294967295, %v2781_v56  ;;  %v2703_v59 = vld [vmem:[%s3479_s1 + $0x20] sm:$0x3f]   ;;  %s605_s17 = smul.u32 25, %s2034_s15 }
  0x3b   : > { %2424 = vmatprep.subr.bf16.mxu0 %v2780_v53  ;;  %2486 = vmatprep.subr.bf16.mxu1 %v2780_v53  ;;  %s2970_s10 = scalar_lea.vmem [#allocation2], %s2671_s7  ;;  %v782_v60 = vsel %vm780_vm1, %v781_v57, 0 }
  0x3c   : > { %2432 = vmatprep.mubr.msk.bf16.mxu0 %vm2782_vm2, %v2780_v53  ;;  %2494 = vmatprep.mubr.msk.bf16.mxu1 %vm2782_vm2, %v2780_v53  ;;  %v784_v61 = vand.u32 %v2703_v59, %v782_v60  ;;  %v2704_v62 = vld [vmem:[%s2970_s10] sm:$0xff]   ;;  %v2706_v0 = vld [vmem:[%s2970_s10 + $0x8] sm:$0xff]   ;;  %v2708_v2 = vld [vmem:[%s2970_s10 + $0x10] sm:$0xff]   ;;  %p606_p8 = scmp.lt.s32.totalorder %s605_s17, 49 }
  0x3d   : > { %v2705_v63 = vld [vmem:[%s2970_s10 + $0x64] sm:$0xff]   ;;  %v2707_v1 = vld [vmem:[%s2970_s10 + $0x6c] sm:$0xff]   ;;  %v2709_v3 = vld [vmem:[%s2970_s10 + $0x74] sm:$0xff]  }
  0x3e   : > { %2425 = vmatpush3.bf16.msra.mxu0 %v2700_v54  ;;  %2487 = vmatpush3.bf16.msra.mxu1 %v2700_v54  ;;  %v2710_v4 = vld [vmem:[%s2970_s10 + $0x18] sm:$0xff]   ;;  %v2712_v6 = vld [vmem:[%s2970_s10 + $0x20] sm:$0xff]   ;;  %v2714_v8 = vld [vmem:[%s2970_s10 + $0x28] sm:$0xff]   ;;  %s3515_s17 = smov (!%p606_p8, %s605_s17), 49 }
  0x3f   : > { %2426 = vmatprep.subr.bf16.mxu0 %v2780_v53  ;;  %2488 = vmatprep.subr.bf16.mxu1 %v2780_v53  ;;  %v2711_v5 = vld [vmem:[%s2970_s10 + $0x7c] sm:$0xff]   ;;  %v2713_v7 = vld [vmem:[%s2970_s10 + $0x84] sm:$0xff]   ;;  %v2715_v9 = vld [vmem:[%s2970_s10 + $0x8c] sm:$0xff]   ;;  %s2040_s14 = sshll.u32 %s3515_s17, 2 }
  0x40   : > { %v2716_v10 = vld [vmem:[%s2970_s10 + $0x30] sm:$0xff]   ;;  %v2718_v12 = vld [vmem:[%s2970_s10 + $0x38] sm:$0xff]   ;;  %v2720_v14 = vld [vmem:[%s2970_s10 + $0x40] sm:$0xff]   ;;  %s3364_s22 = scalar_lea.vmem %s3481_s3, %s2040_s14 }
  0x41   : > { %v2717_v11 = vld [vmem:[%s2970_s10 + $0x94] sm:$0xff]   ;;  %v2719_v13 = vld [vmem:[%s2970_s10 + $0x9c] sm:$0xff]   ;;  %v2721_v15 = vld [vmem:[%s2970_s10 + $0xa4] sm:$0xff]  }
  0x42   : > { %2427 = vmatpush3.bf16.msra.mxu0 %v2701_v55  ;;  %2489 = vmatpush3.bf16.msra.mxu1 %v2701_v55  ;;  %v2722_v16 = vld [vmem:[%s2970_s10 + $0x48] sm:$0xff]   ;;  %v2724_v18 = vld [vmem:[%s2970_s10 + $0x50] sm:$0xff]   ;;  %v2726_v20 = vld [vmem:[%s2970_s10 + $0x58] sm:$0xff]  }
  0x43   : > { %2428 = vmatprep.subr.bf16.mxu0 %v2780_v53  ;;  %2490 = vmatprep.subr.bf16.mxu1 %v2780_v53  ;;  %v2723_v17 = vld [vmem:[%s2970_s10 + $0xac] sm:$0xff]   ;;  %v2725_v19 = vld [vmem:[%s2970_s10 + $0xb4] sm:$0xff]   ;;  %v2727_v21 = vld [vmem:[%s2970_s10 + $0xbc] sm:$0xff]  }
  0x44   : > { %v2728_v22 = vld [vmem:[%s2970_s10 + $0x60] ss:$0 sps:$4 sm:$0xff]   ;;  %v2729_v23 = vld [vmem:[%s2970_s10 + $0xc4] ss:$0 sps:$4 sm:$0xff]   ;;  %v2730_v24 = vld [vmem:[%s2970_s10 + $0xc8] sm:$0xff]  }
  0x45   : > { %v2731_v25 = vld [vmem:[%s2970_s10 + $0x12c] sm:$0xff]   ;;  %v2733_v27 = vld [vmem:[%s2970_s10 + $0x134] sm:$0xff]   ;;  %v2735_v29 = vld [vmem:[%s2970_s10 + $0x13c] sm:$0xff]  }
  0x46   : > { %2429 = vmatpush3.bf16.msra.mxu0 %v2702_v58  ;;  %2491 = vmatpush3.bf16.msra.mxu1 %v2702_v58  ;;  %v2732_v26 = vld [vmem:[%s2970_s10 + $0xd0] sm:$0xff]   ;;  %v2734_v28 = vld [vmem:[%s2970_s10 + $0xd8] sm:$0xff]   ;;  %v2736_v30 = vld [vmem:[%s2970_s10 + $0xe0] sm:$0xff]  }
  0x47   : > { %2430 = vmatprep.subr.bf16.mxu0 %v2780_v53  ;;  %2492 = vmatprep.subr.bf16.mxu1 %v2780_v53  ;;  %v2737_v31 = vld [vmem:[%s2970_s10 + $0x144] sm:$0xff]   ;;  %v2739_v33 = vld [vmem:[%s2970_s10 + $0x14c] sm:$0xff]   ;;  %v2741_v35 = vld [vmem:[%s2970_s10 + $0x154] sm:$0xff]  }
  0x48   : > { %v2738_v32 = vld [vmem:[%s2970_s10 + $0xe8] sm:$0xff]   ;;  %v2740_v34 = vld [vmem:[%s2970_s10 + $0xf0] sm:$0xff]   ;;  %v2742_v36 = vld [vmem:[%s2970_s10 + $0xf8] sm:$0xff]  }
  0x49   : > { %v2743_v37 = vld [vmem:[%s2970_s10 + $0x15c] sm:$0xff]   ;;  %v2745_v39 = vld [vmem:[%s2970_s10 + $0x164] sm:$0xff]   ;;  %v2747_v41 = vld [vmem:[%s2970_s10 + $0x16c] sm:$0xff]  }
  0x4a   : > { %2431 = vmatpush3.bf16.msra.mxu0 %v784_v61  ;;  %2493 = vmatpush3.bf16.msra.mxu1 %v784_v61  ;;  %v2744_v38 = vld [vmem:[%s2970_s10 + $0x100] sm:$0xff]   ;;  %v2746_v40 = vld [vmem:[%s2970_s10 + $0x108] sm:$0xff]   ;;  %v2748_v42 = vld [vmem:[%s2970_s10 + $0x110] sm:$0xff]  }
  0x4b   : > { %2546 = vmatprep.subr.bf16.mxu0 %v2780_v53  ;;  %2608 = vmatprep.subr.bf16.mxu1 %v2780_v53  ;;  %v2749_v43 = vld [vmem:[%s2970_s10 + $0x174] sm:$0xff]   ;;  %v2751_v45 = vld [vmem:[%s2970_s10 + $0x17c] sm:$0xff]   ;;  %v2753_v47 = vld [vmem:[%s2970_s10 + $0x184] sm:$0xff]  }
  0x4c   : > { %v2750_v44 = vld [vmem:[%s2970_s10 + $0x118] sm:$0xff]   ;;  %v2752_v46 = vld [vmem:[%s2970_s10 + $0x120] sm:$0xff]   ;;  %v2754_v48 = vld [vmem:[%s2970_s10 + $0x128] ss:$0 sps:$4 sm:$0xff]  }
  0x4d   : > { %2433 = vmatmul.mubr.msk.bf16.vlgmr.msra.gmra.mrb[0].mxu0 %vm739_vm3, %v2704_v62  ;;  %2495 = vmatmul.mubr.msk.bf16.vlgmr.msra.gmra.mrb[0].mxu1 %vm739_vm3, %v2705_v63  ;;  %v2755_v49 = vld [vmem:[%s2970_s10 + $0x18c] ss:$0 sps:$4 sm:$0xff]  }
  0x4e   : > { %2547 = vmatpush3.bf16.msra.mxu0 %v2699_v52  ;;  %2609 = vmatpush3.bf16.msra.mxu1 %v2699_v52 }
  0x4f   : > { %2436 = vmatprep.mubr.msk.bf16.mxu0 %vm2782_vm2, %v2780_v53  ;;  %2498 = vmatprep.mubr.msk.bf16.mxu1 %vm2782_vm2, %v2780_v53 }
  0x50   : > { %2548 = vmatprep.subr.bf16.mxu0 %v2780_v53  ;;  %2610 = vmatprep.subr.bf16.mxu1 %v2780_v53 }
  0x52   : > { %2549 = vmatpush3.bf16.msra.mxu0 %v2700_v54  ;;  %2611 = vmatpush3.bf16.msra.mxu1 %v2700_v54 }
  0x53   : > { %2550 = vmatprep.subr.bf16.mxu0 %v2780_v53  ;;  %2612 = vmatprep.subr.bf16.mxu1 %v2780_v53 }
  0x55   : > { %2437 = vmatmul.mubr.msk.bf16.gmra.mrb[4].mxu0 %vm739_vm3, %v2706_v0  ;;  %2499 = vmatmul.mubr.msk.bf16.gmra.mrb[4].mxu1 %vm739_vm3, %v2707_v1 }
  0x56   : > { %2440 = vmatprep.mubr.msk.bf16.mxu0 %vm2782_vm2, %v2780_v53  ;;  %2502 = vmatprep.mubr.msk.bf16.mxu1 %vm2782_vm2, %v2780_v53 }
  0x57   : > { %2551 = vmatpush3.bf16.msra.mxu0 %v2701_v55  ;;  %2613 = vmatpush3.bf16.msra.mxu1 %v2701_v55 }
  0x58   : > { %2552 = vmatprep.subr.bf16.mxu0 %v2780_v53  ;;  %2614 = vmatprep.subr.bf16.mxu1 %v2780_v53 }
  0x5b   : > { %2553 = vmatpush3.bf16.msra.mxu0 %v2702_v58  ;;  %2615 = vmatpush3.bf16.msra.mxu1 %v2702_v58 }
  0x5c   : > { %2554 = vmatprep.subr.bf16.mxu0 %v2780_v53  ;;  %2616 = vmatprep.subr.bf16.mxu1 %v2780_v53 }
  0x5d   : > { %2441 = vmatmul.mubr.msk.bf16.gmra.mrb[8].mxu0 %vm739_vm3, %v2708_v2  ;;  %2503 = vmatmul.mubr.msk.bf16.gmra.mrb[8].mxu1 %vm739_vm3, %v2709_v3 }
  0x5e   : > { %2444 = vmatprep.mubr.msk.bf16.mxu0 %vm2782_vm2, %v2780_v53  ;;  %2506 = vmatprep.mubr.msk.bf16.mxu1 %vm2782_vm2, %v2780_v53 }
  0x5f   : > { %2555 = vmatpush3.bf16.msra.mxu0 %v784_v61  ;;  %2617 = vmatpush3.bf16.msra.mxu1 %v784_v61 }
  0x65   : > { %2445 = vmatmul.mubr.msk.bf16.gmra.mrb[12].mxu0 %vm739_vm3, %v2710_v4  ;;  %2507 = vmatmul.mubr.msk.bf16.gmra.mrb[12].mxu1 %vm739_vm3, %v2711_v5 }
  0x66   : > { %2448 = vmatprep.mubr.msk.bf16.mxu0 %vm2782_vm2, %v2780_v53  ;;  %2510 = vmatprep.mubr.msk.bf16.mxu1 %vm2782_vm2, %v2780_v53 }
  0x6d   : > { %2449 = vmatmul.mubr.msk.bf16.gmra.mrb[16].mxu0 %vm739_vm3, %v2712_v6  ;;  %2511 = vmatmul.mubr.msk.bf16.gmra.mrb[16].mxu1 %vm739_vm3, %v2713_v7 }
  0x6e   : > { %2452 = vmatprep.mubr.msk.bf16.mxu0 %vm2782_vm2, %v2780_v53  ;;  %2514 = vmatprep.mubr.msk.bf16.mxu1 %vm2782_vm2, %v2780_v53 }
  0x75   : > { %2453 = vmatmul.mubr.msk.bf16.gmra.mrb[20].mxu0 %vm739_vm3, %v2714_v8  ;;  %2515 = vmatmul.mubr.msk.bf16.gmra.mrb[20].mxu1 %vm739_vm3, %v2715_v9 }
  0x76   : > { %2456 = vmatprep.mubr.msk.bf16.mxu0 %vm2782_vm2, %v2780_v53  ;;  %2518 = vmatprep.mubr.msk.bf16.mxu1 %vm2782_vm2, %v2780_v53 }
  0x7d   : > { %2457 = vmatmul.mubr.msk.bf16.gmra.mrb[24].mxu0 %vm739_vm3, %v2716_v10  ;;  %2519 = vmatmul.mubr.msk.bf16.gmra.mrb[24].mxu1 %vm739_vm3, %v2717_v11 }
  0x7e   : > { %2460 = vmatprep.mubr.msk.bf16.mxu0 %vm2782_vm2, %v2780_v53  ;;  %2522 = vmatprep.mubr.msk.bf16.mxu1 %vm2782_vm2, %v2780_v53 }
  0x85   : > { %2461 = vmatmul.mubr.msk.bf16.gmra.mrb[28].mxu0 %vm739_vm3, %v2718_v12  ;;  %2523 = vmatmul.mubr.msk.bf16.gmra.mrb[28].mxu1 %vm739_vm3, %v2719_v13 }
  0x86   : > { %2464 = vmatprep.mubr.msk.bf16.mxu0 %vm2782_vm2, %v2780_v53  ;;  %2526 = vmatprep.mubr.msk.bf16.mxu1 %vm2782_vm2, %v2780_v53 }
  0x8d   : > { %2465 = vmatmul.mubr.msk.bf16.gmra.mrb[32].mxu0 %vm739_vm3, %v2720_v14  ;;  %2527 = vmatmul.mubr.msk.bf16.gmra.mrb[32].mxu1 %vm739_vm3, %v2721_v15 }
  0x8e   : > { %2468 = vmatprep.mubr.msk.bf16.mxu0 %vm2782_vm2, %v2780_v53  ;;  %2530 = vmatprep.mubr.msk.bf16.mxu1 %vm2782_vm2, %v2780_v53 }
  0x95   : > { %2469 = vmatmul.mubr.msk.bf16.gmra.mrb[36].mxu0 %vm739_vm3, %v2722_v16  ;;  %2531 = vmatmul.mubr.msk.bf16.gmra.mrb[36].mxu1 %vm739_vm3, %v2723_v17 }
  0x96   : > { %2472 = vmatprep.mubr.msk.bf16.mxu0 %vm2782_vm2, %v2780_v53  ;;  %2534 = vmatprep.mubr.msk.bf16.mxu1 %vm2782_vm2, %v2780_v53 }
  0x9d   : > { %2473 = vmatmul.mubr.msk.bf16.gmra.mrb[40].mxu0 %vm739_vm3, %v2724_v18  ;;  %2535 = vmatmul.mubr.msk.bf16.gmra.mrb[40].mxu1 %vm739_vm3, %v2725_v19 }
  0x9e   : > { %2476 = vmatprep.mubr.msk.bf16.mxu0 %vm2782_vm2, %v2780_v53  ;;  %2538 = vmatprep.mubr.msk.bf16.mxu1 %vm2782_vm2, %v2780_v53 }
  0xa5   : > { %2477 = vmatmul.mubr.msk.bf16.gmra.mrb[44].mxu0 %vm739_vm3, %v2726_v20  ;;  %2539 = vmatmul.mubr.msk.bf16.gmra.mrb[44].mxu1 %vm739_vm3, %v2727_v21 }
  0xa6   : > { %2480 = vmatprep.mubr.msk.bf16.mxu0 %vm2782_vm2, %v2780_v53  ;;  %2542 = vmatprep.mubr.msk.bf16.mxu1 %vm2782_vm2, %v2780_v53 }
  0xad   : > { %2481 = vmatmul.mubr.msk.bf16.gmra.mrb[48].mxu0 %vm739_vm3, %v2728_v22  ;;  %2543 = vmatmul.mubr.msk.bf16.gmra.mrb[48].mxu1 %vm739_vm3, %v2729_v23 }
  0xae   : > { %2556 = vmatprep.mubr.msk.bf16.mxu0 %vm2782_vm2, %v2780_v53  ;;  %2618 = vmatprep.mubr.msk.bf16.mxu1 %vm2782_vm2, %v2780_v53 }
  0xb5   : > { %2557 = vmatmul.mubr.msk.bf16.vlgmr.msra.gmra.mrb[52].mxu0 %vm739_vm3, %v2730_v24  ;;  %2619 = vmatmul.mubr.msk.bf16.vlgmr.msra.gmra.mrb[52].mxu1 %vm739_vm3, %v2731_v25 }
  0xb6   : > { %2560 = vmatprep.mubr.msk.bf16.mxu0 %vm2782_vm2, %v2780_v53  ;;  %2622 = vmatprep.mubr.msk.bf16.mxu1 %vm2782_vm2, %v2780_v53 }
  0xbd   : > { %2561 = vmatmul.mubr.msk.bf16.gmra.mrb[56].mxu0 %vm739_vm3, %v2732_v26  ;;  %2623 = vmatmul.mubr.msk.bf16.gmra.mrb[56].mxu1 %vm739_vm3, %v2733_v27 }
  0xbe   : > { %2564 = vmatprep.mubr.msk.bf16.mxu0 %vm2782_vm2, %v2780_v53  ;;  %2626 = vmatprep.mubr.msk.bf16.mxu1 %vm2782_vm2, %v2780_v53 }
  0xc5   : > { %2565 = vmatmul.mubr.msk.bf16.gmra.mrb[60].mxu0 %vm739_vm3, %v2734_v28  ;;  %2627 = vmatmul.mubr.msk.bf16.gmra.mrb[60].mxu1 %vm739_vm3, %v2735_v29 }
  0xc6   : > { %2568 = vmatprep.mubr.msk.bf16.mxu0 %vm2782_vm2, %v2780_v53  ;;  %2630 = vmatprep.mubr.msk.bf16.mxu1 %vm2782_vm2, %v2780_v53 }
  0xcd   : > { %2569 = vmatmul.mubr.msk.bf16.gmra.mrb[64].mxu0 %vm739_vm3, %v2736_v30  ;;  %2631 = vmatmul.mubr.msk.bf16.gmra.mrb[64].mxu1 %vm739_vm3, %v2737_v31 }
  0xce   : > { %2572 = vmatprep.mubr.msk.bf16.mxu0 %vm2782_vm2, %v2780_v53  ;;  %2634 = vmatprep.mubr.msk.bf16.mxu1 %vm2782_vm2, %v2780_v53 }
  0xd5   : > { %2573 = vmatmul.mubr.msk.bf16.gmra.mrb[68].mxu0 %vm739_vm3, %v2738_v32  ;;  %2635 = vmatmul.mubr.msk.bf16.gmra.mrb[68].mxu1 %vm739_vm3, %v2739_v33 }
  0xd6   : > { %2576 = vmatprep.mubr.msk.bf16.mxu0 %vm2782_vm2, %v2780_v53  ;;  %2638 = vmatprep.mubr.msk.bf16.mxu1 %vm2782_vm2, %v2780_v53 }
  0xdd   : > { %2577 = vmatmul.mubr.msk.bf16.gmra.mrb[72].mxu0 %vm739_vm3, %v2740_v34  ;;  %2639 = vmatmul.mubr.msk.bf16.gmra.mrb[72].mxu1 %vm739_vm3, %v2741_v35 }
  0xde   : > { %2580 = vmatprep.mubr.msk.bf16.mxu0 %vm2782_vm2, %v2780_v53  ;;  %2642 = vmatprep.mubr.msk.bf16.mxu1 %vm2782_vm2, %v2780_v53 }
  0xe5   : > { %2581 = vmatmul.mubr.msk.bf16.gmra.mrb[76].mxu0 %vm739_vm3, %v2742_v36  ;;  %2643 = vmatmul.mubr.msk.bf16.gmra.mrb[76].mxu1 %vm739_vm3, %v2743_v37 }
  0xe6   : > { %2584 = vmatprep.mubr.msk.bf16.mxu0 %vm2782_vm2, %v2780_v53  ;;  %2646 = vmatprep.mubr.msk.bf16.mxu1 %vm2782_vm2, %v2780_v53 }
  0xed   : > { %2585 = vmatmul.mubr.msk.bf16.gmra.mrb[80].mxu0 %vm739_vm3, %v2744_v38  ;;  %2647 = vmatmul.mubr.msk.bf16.gmra.mrb[80].mxu1 %vm739_vm3, %v2745_v39 }
  0xee   : > { %2588 = vmatprep.mubr.msk.bf16.mxu0 %vm2782_vm2, %v2780_v53  ;;  %2650 = vmatprep.mubr.msk.bf16.mxu1 %vm2782_vm2, %v2780_v53 }
  0xf5   : > { %2589 = vmatmul.mubr.msk.bf16.gmra.mrb[84].mxu0 %vm739_vm3, %v2746_v40  ;;  %2651 = vmatmul.mubr.msk.bf16.gmra.mrb[84].mxu1 %vm739_vm3, %v2747_v41 }
  0xf6   : > { %2592 = vmatprep.mubr.msk.bf16.mxu0 %vm2782_vm2, %v2780_v53  ;;  %2654 = vmatprep.mubr.msk.bf16.mxu1 %vm2782_vm2, %v2780_v53 }
  0xfd   : > { %2593 = vmatmul.mubr.msk.bf16.gmra.mrb[88].mxu0 %vm739_vm3, %v2748_v42  ;;  %2655 = vmatmul.mubr.msk.bf16.gmra.mrb[88].mxu1 %vm739_vm3, %v2749_v43 }
  0xfe   : > { %2596 = vmatprep.mubr.msk.bf16.mxu0 %vm2782_vm2, %v2780_v53  ;;  %2658 = vmatprep.mubr.msk.bf16.mxu1 %vm2782_vm2, %v2780_v53 }
 0x105   : > { %2597 = vmatmul.mubr.msk.bf16.gmra.mrb[92].mxu0 %vm739_vm3, %v2750_v44  ;;  %2659 = vmatmul.mubr.msk.bf16.gmra.mrb[92].mxu1 %vm739_vm3, %v2751_v45 }
 0x106   : > { %2600 = vmatprep.mubr.msk.bf16.mxu0 %vm2782_vm2, %v2780_v53  ;;  %2662 = vmatprep.mubr.msk.bf16.mxu1 %vm2782_vm2, %v2780_v53 }
 0x10d   : > { %2601 = vmatmul.mubr.msk.bf16.gmra.mrb[96].mxu0 %vm739_vm3, %v2752_v46  ;;  %2663 = vmatmul.mubr.msk.bf16.gmra.mrb[96].mxu1 %vm739_vm3, %v2753_v47 }
 0x10e   : > { %2604 = vmatprep.mubr.msk.bf16.mxu0 %vm2782_vm2, %v2780_v53  ;;  %2666 = vmatprep.mubr.msk.bf16.mxu1 %vm2782_vm2, %v2780_v53 }
 0x115   : > { %2605 = vmatmul.mubr.msk.bf16.gmra.mrb[100].mxu0 %vm739_vm3, %v2754_v48  ;;  %2667 = vmatmul.mubr.msk.bf16.gmra.mrb[100].mxu1 %vm739_vm3, %v2755_v49 }
 0x120   : > { %v3193_v50 = vpop.f32.mrb[0].mxu0  ;;  %v3195_v51 = vpop.f32.mrb[0].mxu1 }
 0x121   : > { %v1186_v52 = vmax.f32 %v3193_v50, %v3195_v51  ;;  %v2434_v54 = vpop.f32.mrb[1].mxu0  ;;  %v2496_v55 = vpop.f32.mrb[1].mxu1 }
 0x122   : > { %v3199_v56 = vpop.f32.mrb[2].mxu0  ;;  %v3201_v57 = vpop.f32.mrb[2].mxu1 }
 0x123   : > { %v1187_v53 = vmax.f32 %v3199_v56, %v3201_v57  ;;  %v2435_v58 = vpop.f32.mrb[3].mxu0  ;;  %v2497_v59 = vpop.f32.mrb[3].mxu1 }
 0x128   : > { %v3205_v60 = vpop.f32.mrb[4].mxu0  ;;  %v3207_v61 = vpop.f32.mrb[4].mxu1 }
 0x129   : > { %v2438_v63 = vpop.f32.mrb[5].mxu0  ;;  %v2500_v0 = vpop.f32.mrb[5].mxu1 }
 0x12a   : > { %v3211_v1 = vpop.f32.mrb[6].mxu0  ;;  %v3213_v2 = vpop.f32.mrb[6].mxu1 }
 0x12b   : > { %v2439_v4 = vpop.f32.mrb[7].mxu0  ;;  %v2501_v5 = vpop.f32.mrb[7].mxu1 }
 0x130   : > { %v3217_v6 = vpop.f32.mrb[8].mxu0  ;;  %v3219_v7 = vpop.f32.mrb[8].mxu1 }
 0x131   : > { %v2442_v9 = vpop.f32.mrb[9].mxu0  ;;  %v2504_v10 = vpop.f32.mrb[9].mxu1 }
 0x132   : > { %v3223_v11 = vpop.f32.mrb[10].mxu0  ;;  %v3225_v12 = vpop.f32.mrb[10].mxu1 }
 0x133   : > { %v2443_v14 = vpop.f32.mrb[11].mxu0  ;;  %v2505_v15 = vpop.f32.mrb[11].mxu1 }
 0x138   : > { %v3229_v16 = vpop.f32.mrb[12].mxu0  ;;  %v3231_v17 = vpop.f32.mrb[12].mxu1 }
 0x139   : > { %v2446_v19 = vpop.f32.mrb[13].mxu0  ;;  %v2508_v20 = vpop.f32.mrb[13].mxu1 }
 0x13a   : > { %v3235_v21 = vpop.f32.mrb[14].mxu0  ;;  %v3237_v22 = vpop.f32.mrb[14].mxu1 }
 0x13b   : > { %v2447_v24 = vpop.f32.mrb[15].mxu0  ;;  %v2509_v25 = vpop.f32.mrb[15].mxu1 }
 0x140   : > { %v3241_v26 = vpop.f32.mrb[16].mxu0  ;;  %v3243_v27 = vpop.f32.mrb[16].mxu1 }
 0x141   : > { %v2450_v29 = vpop.f32.mrb[17].mxu0  ;;  %v2512_v30 = vpop.f32.mrb[17].mxu1 }
 0x142   : > { %v3247_v31 = vpop.f32.mrb[18].mxu0  ;;  %v3249_v32 = vpop.f32.mrb[18].mxu1 }
 0x143   : > { %v2451_v34 = vpop.f32.mrb[19].mxu0  ;;  %v2513_v35 = vpop.f32.mrb[19].mxu1 }
 0x148   : > { %v3253_v36 = vpop.f32.mrb[20].mxu0  ;;  %v3255_v37 = vpop.f32.mrb[20].mxu1 }
 0x149   : > { %v2454_v39 = vpop.f32.mrb[21].mxu0  ;;  %v2516_v40 = vpop.f32.mrb[21].mxu1 }
 0x14a   : > { %v3259_v41 = vpop.f32.mrb[22].mxu0  ;;  %v3261_v42 = vpop.f32.mrb[22].mxu1 }
 0x14b   : > { %v2455_v44 = vpop.f32.mrb[23].mxu0  ;;  %v2517_v45 = vpop.f32.mrb[23].mxu1 }
 0x150   : > { %v3265_v46 = vpop.f32.mrb[24].mxu0  ;;  %v3267_v47 = vpop.f32.mrb[24].mxu1 }
 0x151   : > { %v2458_v49 = vpop.f32.mrb[25].mxu0  ;;  %v2520_v54 = vpop.f32.mrb[25].mxu1 }
 0x152   : > { %v3271_v55 = vpop.f32.mrb[26].mxu0  ;;  %v3273_v58 = vpop.f32.mrb[26].mxu1 }
 0x153   : > { %v2459_v63 = vpop.f32.mrb[27].mxu0  ;;  %v2521_v0 = vpop.f32.mrb[27].mxu1 }
 0x158   : > { %v3277_v4 = vpop.f32.mrb[28].mxu0  ;;  %v3279_v5 = vpop.f32.mrb[28].mxu1 }
 0x159   : > { %v2462_v10 = vpop.f32.mrb[29].mxu0  ;;  %v2524_v14 = vpop.f32.mrb[29].mxu1 }
 0x15a   : > { %v3283_v15 = vpop.f32.mrb[30].mxu0  ;;  %v3285_v19 = vpop.f32.mrb[30].mxu1 }
 0x15b   : > { %v2463_v24 = vpop.f32.mrb[31].mxu0  ;;  %v2525_v25 = vpop.f32.mrb[31].mxu1 }
 0x160   : > { %v3289_v29 = vpop.f32.mrb[32].mxu0  ;;  %v3291_v30 = vpop.f32.mrb[32].mxu1 }
 0x161   : > { %v2466_v35 = vpop.f32.mrb[33].mxu0  ;;  %v2528_v39 = vpop.f32.mrb[33].mxu1 }
 0x162   : > { %v3295_v40 = vpop.f32.mrb[34].mxu0  ;;  %v3297_v44 = vpop.f32.mrb[34].mxu1 }
 0x163   : > { %v2467_v49 = vpop.f32.mrb[35].mxu0  ;;  %v2529_v54 = vpop.f32.mrb[35].mxu1 }
 0x168   : > { %v3301_v63 = vpop.f32.mrb[36].mxu0  ;;  %v3303_v0 = vpop.f32.mrb[36].mxu1 }
 0x169   : > { %v2470_v14 = vpop.f32.mrb[37].mxu0  ;;  %v2532_v24 = vpop.f32.mrb[37].mxu1 }
 0x16a   : > { %v3307_v25 = vpop.f32.mrb[38].mxu0  ;;  %v3309_v35 = vpop.f32.mrb[38].mxu1 }
 0x16b   : > { %v2471_v34 = vpop.f32.mrb[39].mxu0  ;;  %v2533_v45 = vpop.f32.mrb[39].mxu1 }
 0x170   : > { %v3313_v49 = vpop.f32.mrb[40].mxu0  ;;  %v3315_v54 = vpop.f32.mrb[40].mxu1 }
 0x171   : > { %v2474_v9 = vpop.f32.mrb[41].mxu0  ;;  %v2536_v10 = vpop.f32.mrb[41].mxu1 }
 0x172   : > { %v3319_v14 = vpop.f32.mrb[42].mxu0  ;;  %v3321_v24 = vpop.f32.mrb[42].mxu1 }
 0x173   : > { %v2475_v48 = vpop.f32.mrb[43].mxu0  ;;  %v2537_v39 = vpop.f32.mrb[43].mxu1 }
 0x178   : > { %v3325_v34 = vpop.f32.mrb[44].mxu0  ;;  %v3327_v45 = vpop.f32.mrb[44].mxu1 }
 0x179   : > { %v2478_v38 = vpop.f32.mrb[45].mxu0  ;;  %v2540_v9 = vpop.f32.mrb[45].mxu1 }
 0x17a   : > { %v3331_v10 = vpop.f32.mrb[46].mxu0  ;;  %v3333_v20 = vpop.f32.mrb[46].mxu1 }
 0x17b   : > { %v2479_v59 = vpop.f32.mrb[47].mxu0  ;;  %v2541_v48 = vpop.f32.mrb[47].mxu1 }
 0x180   : > { %v3337_v39 = vpop.f32.mrb[48].mxu0  ;;  %v3339_v28 = vpop.f32.mrb[48].mxu1 }
 0x181   : > { %3484 = vst [vmem:[#allocation3_spill] sm:$0xff] %v3337_v39  ;;  %3485 = vst [vmem:[#allocation4_spill] sm:$0xff] %v3339_v28  ;;  %v2482_v43 = vpop.f32.mrb[49].mxu0  ;;  %v2544_v38 = vpop.f32.mrb[49].mxu1 }
 0x182   : > { %v919_v18 = vpop.f32.mrb[50].mxu0  ;;  %v1183_v9 = vpop.f32.mrb[50].mxu1  ;;  %v3351_v43 = vld [vmem:[%s3480_s2] ss:$0 sm:$0xff] }
 0x183   : > { %v2483_v13 = vpop.f32.mrb[51].mxu0  ;;  %v2545_v8 = vpop.f32.mrb[51].mxu1 }
 0x188   : > { %v1373_v3 = vpop.f32.mrb[52].mxu0  ;;  %v1662_v33 = vpop.f32.mrb[52].mxu1 }
 0x189   : > { %v1475_v59 = vmax.f32 %v1186_v52, %v1373_v3  ;;  %v2558_v48 = vpop.f32.mrb[53].mxu0  ;;  %v2620_v62 = vpop.f32.mrb[53].mxu1 }
 0x18a   : > { %v1376_v18 = vpop.f32.mrb[54].mxu0  ;;  %v1665_v38 = vpop.f32.mrb[54].mxu1 }
 0x18b   : > { %v1764_v13 = vmax.f32 %v1475_v59, %v1662_v33  ;;  %v1476_v8 = vmax.f32 %v1187_v53, %v1376_v18  ;;  %v2559_v9 = vpop.f32.mrb[55].mxu0  ;;  %v2621_v23 = vpop.f32.mrb[55].mxu1  ;;  %v3486_v33 = vmax.f32 %v3205_v60, %v3207_v61 }
 0x18d   : > { %v1796_v50 = vadd.f32 %v3351_v43, %v1764_v13  ;;  %v1765_v51 = vmax.f32 %v1476_v8, %v1665_v38  ;;  %v3487_v38 = vmax.f32 %v3211_v1, %v3213_v2 }
 0x18f   : > { %v1797_v52 = vadd.f32 %v3351_v43, %v1765_v51  ;;  %v1821_v48 = vmax.f32 %v1796_v50, 0.0 }
 0x190   : > { %v1381_v62 = vpop.f32.mrb[56].mxu0  ;;  %v1670_v3 = vpop.f32.mrb[56].mxu1 }
 0x191   : > { %v1822_v28 = vmax.f32 %v1797_v52, 0.0  ;;  %v1477_v59 = vmax.f32 %v3486_v33, %v1381_v62  ;;  %v2562_v39 = vpop.f32.mrb[57].mxu0  ;;  %v2624_v56 = vpop.f32.mrb[57].mxu1 }
 0x192   : > { %v1384_v57 = vpop.f32.mrb[58].mxu0  ;;  %v1673_v53 = vpop.f32.mrb[58].mxu1 }
 0x193   : > { %v2282_v23 = vpack.c.bf16 %v1822_v28, %v1821_v48  ;;  %v1766_v18 = vmax.f32 %v1477_v59, %v1670_v3  ;;  %v1478_v13 = vmax.f32 %v3487_v38, %v1384_v57  ;;  %v2563_v8 = vpop.f32.mrb[59].mxu0  ;;  %v2625_v9 = vpop.f32.mrb[59].mxu1  ;;  %v3488_v28 = vmax.f32 %v3217_v6, %v3219_v7 }
 0x194   : > { %v3489_v57 = vmax.f32 %v3223_v11, %v3225_v12 }
 0x195   : > { %2283 = vst [vmem:[%s3364_s22] sm:$0xff] %v2282_v23   ;;  %v1798_v60 = vadd.f32 %v3351_v43, %v1766_v18  ;;  %v1767_v61 = vmax.f32 %v1478_v13, %v1673_v53 }
 0x197   : > { %v1799_v39 = vadd.f32 %v3351_v43, %v1767_v61  ;;  %v1823_v52 = vmax.f32 %v1798_v60, 0.0  ;;  %v3490_v61 = vmax.f32 %v3229_v16, %v3231_v17 }
 0x198   : > { %v1389_v50 = vpop.f32.mrb[60].mxu0  ;;  %v1678_v51 = vpop.f32.mrb[60].mxu1 }
 0x199   : > { %v1824_v62 = vmax.f32 %v1799_v39, 0.0  ;;  %v1479_v3 = vmax.f32 %v3488_v28, %v1389_v50  ;;  %v2566_v48 = vpop.f32.mrb[61].mxu0  ;;  %v2628_v1 = vpop.f32.mrb[61].mxu1  ;;  %v3491_v28 = vmax.f32 %v3235_v21, %v3237_v22 }
 0x19a   : > { %v1392_v2 = vpop.f32.mrb[62].mxu0  ;;  %v1681_v33 = vpop.f32.mrb[62].mxu1 }
 0x19b   : > { %v2287_v59 = vpack.c.bf16 %v1824_v62, %v1823_v52  ;;  %v1768_v56 = vmax.f32 %v1479_v3, %v1678_v51  ;;  %v1480_v53 = vmax.f32 %v3489_v57, %v1392_v2  ;;  %v2567_v23 = vpop.f32.mrb[63].mxu0  ;;  %v2629_v18 = vpop.f32.mrb[63].mxu1 }
 0x19d   : > { %2339 = vst [vmem:[%s3364_s22 + $0x8] sm:$0xff] %v2287_v59   ;;  %v1800_v38 = vadd.f32 %v3351_v43, %v1768_v56  ;;  %v1769_v13 = vmax.f32 %v1480_v53, %v1681_v33  ;;  %v3492_v53 = vmax.f32 %v3241_v26, %v3243_v27 }
 0x19f   : > { %v1801_v6 = vadd.f32 %v3351_v43, %v1769_v13  ;;  %v1825_v9 = vmax.f32 %v1800_v38, 0.0 }
 0x1a0   : > { %v1397_v7 = vpop.f32.mrb[64].mxu0  ;;  %v1686_v8 = vpop.f32.mrb[64].mxu1 }
 0x1a1   : > { %v1826_v60 = vmax.f32 %v1801_v6, 0.0  ;;  %v1481_v39 = vmax.f32 %v3490_v61, %v1397_v7  ;;  %v2570_v50 = vpop.f32.mrb[65].mxu0  ;;  %v2632_v11 = vpop.f32.mrb[65].mxu1  ;;  %v3493_v7 = vmax.f32 %v3247_v31, %v3249_v32 }
 0x1a2   : > { %v1400_v12 = vpop.f32.mrb[66].mxu0  ;;  %v1689_v51 = vpop.f32.mrb[66].mxu1 }
 0x1a3   : > { %v2292_v52 = vpack.c.bf16 %v1826_v60, %v1825_v9  ;;  %v1770_v62 = vmax.f32 %v1481_v39, %v1686_v8  ;;  %v1482_v3 = vmax.f32 %v3491_v28, %v1400_v12  ;;  %v2571_v48 = vpop.f32.mrb[67].mxu0  ;;  %v2633_v1 = vpop.f32.mrb[67].mxu1 }
 0x1a4   : > { %v3495_v1 = vmax.f32 %v3259_v41, %v3261_v42 }
 0x1a5   : > { %2340 = vst [vmem:[%s3364_s22 + $0x10] sm:$0xff] %v2292_v52   ;;  %v1802_v2 = vadd.f32 %v3351_v43, %v1770_v62  ;;  %v1771_v33 = vmax.f32 %v1482_v3, %v1689_v51  ;;  %v3494_v51 = vmax.f32 %v3253_v36, %v3255_v37 }
 0x1a7   : > { %v1803_v16 = vadd.f32 %v3351_v43, %v1771_v33  ;;  %v1827_v56 = vmax.f32 %v1802_v2, 0.0 }
 0x1a8   : > { %v1405_v17 = vpop.f32.mrb[68].mxu0  ;;  %v1694_v59 = vpop.f32.mrb[68].mxu1 }
 0x1a9   : > { %v1828_v57 = vmax.f32 %v1803_v16, 0.0  ;;  %v1483_v23 = vmax.f32 %v3492_v53, %v1405_v17  ;;  %v2574_v18 = vpop.f32.mrb[69].mxu0  ;;  %v2636_v21 = vpop.f32.mrb[69].mxu1 }
 0x1aa   : > { %v1408_v22 = vpop.f32.mrb[70].mxu0  ;;  %v1697_v38 = vpop.f32.mrb[70].mxu1 }
 0x1ab   : > { %v2297_v13 = vpack.c.bf16 %v1828_v57, %v1827_v56  ;;  %v1772_v6 = vmax.f32 %v1483_v23, %v1694_v59  ;;  %v1484_v8 = vmax.f32 %v3493_v7, %v1408_v22  ;;  %v2575_v9 = vpop.f32.mrb[71].mxu0  ;;  %v2637_v60 = vpop.f32.mrb[71].mxu1  ;;  %v3496_v23 = vmax.f32 %v3265_v46, %v3267_v47 }
 0x1ad   : > { %2341 = vst [vmem:[%s3364_s22 + $0x18] sm:$0xff] %v2297_v13   ;;  %v1804_v61 = vadd.f32 %v3351_v43, %v1772_v6  ;;  %v1773_v39 = vmax.f32 %v1484_v8, %v1697_v38  ;;  %v3497_v6 = vmax.f32 %v3271_v55, %v3273_v58 }
 0x1af   : > { %v1805_v26 = vadd.f32 %v3351_v43, %v1773_v39  ;;  %v1829_v11 = vmax.f32 %v1804_v61, 0.0 }
 0x1b0   : > { %v1413_v27 = vpop.f32.mrb[72].mxu0  ;;  %v1702_v50 = vpop.f32.mrb[72].mxu1 }
 0x1b1   : > { %v1830_v12 = vmax.f32 %v1805_v26, 0.0  ;;  %v1485_v52 = vmax.f32 %v3494_v51, %v1413_v27  ;;  %v2578_v62 = vpop.f32.mrb[73].mxu0  ;;  %v2640_v31 = vpop.f32.mrb[73].mxu1 }
 0x1b2   : > { %v1416_v32 = vpop.f32.mrb[74].mxu0  ;;  %v1705_v28 = vpop.f32.mrb[74].mxu1  ;;  %v3499_v31 = vmax.f32 %v3283_v15, %v3285_v19 }
 0x1b3   : > { %v2302_v3 = vpack.c.bf16 %v1830_v12, %v1829_v11  ;;  %v1774_v48 = vmax.f32 %v1485_v52, %v1702_v50  ;;  %v1486_v2 = vmax.f32 %v3495_v1, %v1416_v32  ;;  %v2579_v33 = vpop.f32.mrb[75].mxu0  ;;  %v2641_v16 = vpop.f32.mrb[75].mxu1  ;;  %v3498_v50 = vmax.f32 %v3277_v4, %v3279_v5 }
 0x1b5   : > { %2342 = vst [vmem:[%s3364_s22 + $0x20] sm:$0xff] %v2302_v3   ;;  %v1806_v17 = vadd.f32 %v3351_v43, %v1774_v48  ;;  %v1775_v59 = vmax.f32 %v1486_v2, %v1705_v28 }
 0x1b7   : > { %v1807_v36 = vadd.f32 %v3351_v43, %v1775_v59  ;;  %v1831_v57 = vmax.f32 %v1806_v17, 0.0  ;;  %v3500_v17 = vmax.f32 %v3289_v29, %v3291_v30 }
 0x1b8   : > { %v1421_v37 = vpop.f32.mrb[76].mxu0  ;;  %v1710_v56 = vpop.f32.mrb[76].mxu1 }
 0x1b9   : > { %v1832_v53 = vmax.f32 %v1807_v36, 0.0  ;;  %v1487_v18 = vmax.f32 %v3496_v23, %v1421_v37  ;;  %v2582_v21 = vpop.f32.mrb[77].mxu0  ;;  %v2644_v41 = vpop.f32.mrb[77].mxu1 }
 0x1ba   : > { %v1424_v42 = vpop.f32.mrb[78].mxu0  ;;  %v1713_v22 = vpop.f32.mrb[78].mxu1 }
 0x1bb   : > { %v2307_v38 = vpack.c.bf16 %v1832_v53, %v1831_v57  ;;  %v1776_v13 = vmax.f32 %v1487_v18, %v1710_v56  ;;  %v1488_v7 = vmax.f32 %v3497_v6, %v1424_v42  ;;  %v2583_v8 = vpop.f32.mrb[79].mxu0  ;;  %v2645_v9 = vpop.f32.mrb[79].mxu1  ;;  %v3501_v53 = vmax.f32 %v3295_v40, %v3297_v44 }
 0x1bc   : > { %v3502_v6 = vmax.f32 %v3301_v63, %v3303_v0 }
 0x1bd   : > { %2343 = vst [vmem:[%s3364_s22 + $0x28] sm:$0xff] %v2307_v38   ;;  %v1808_v60 = vadd.f32 %v3351_v43, %v1776_v13  ;;  %v1777_v61 = vmax.f32 %v1488_v7, %v1713_v22 }
 0x1bf   : > { %v1809_v46 = vadd.f32 %v3351_v43, %v1777_v61  ;;  %v1833_v26 = vmax.f32 %v1808_v60, 0.0 }
 0x1c0   : > { %v1429_v47 = vpop.f32.mrb[80].mxu0  ;;  %v1718_v39 = vpop.f32.mrb[80].mxu1 }
 0x1c1   : > { %v1834_v27 = vmax.f32 %v1809_v46, 0.0  ;;  %v1489_v11 = vmax.f32 %v3498_v50, %v1429_v47  ;;  %v2586_v12 = vpop.f32.mrb[81].mxu0  ;;  %v2648_v55 = vpop.f32.mrb[81].mxu1  ;;  %v3503_v46 = vmax.f32 %v3307_v25, %v3309_v35 }
 0x1c2   : > { %v1432_v58 = vpop.f32.mrb[82].mxu0  ;;  %v1721_v51 = vpop.f32.mrb[82].mxu1 }
 0x1c3   : > { %v2312_v52 = vpack.c.bf16 %v1834_v27, %v1833_v26  ;;  %v1778_v62 = vmax.f32 %v1489_v11, %v1718_v39  ;;  %v1490_v32 = vmax.f32 %v3499_v31, %v1432_v58  ;;  %v2587_v28 = vpop.f32.mrb[83].mxu0  ;;  %v2649_v3 = vpop.f32.mrb[83].mxu1  ;;  %v3504_v58 = vmax.f32 %v3313_v49, %v3315_v54 }
 0x1c4   : > { %v3505_v28 = vmax.f32 %v3319_v14, %v3321_v24 }
 0x1c5   : > { %2344 = vst [vmem:[%s3364_s22 + $0x30] sm:$0xff] %v2312_v52   ;;  %v1810_v48 = vadd.f32 %v3351_v43, %v1778_v62  ;;  %v1779_v1 = vmax.f32 %v1490_v32, %v1721_v51 }
 0x1c7   : > { %v1811_v4 = vadd.f32 %v3351_v43, %v1779_v1  ;;  %v1835_v33 = vmax.f32 %v1810_v48, 0.0 }
 0x1c8   : > { %v1437_v5 = vpop.f32.mrb[84].mxu0  ;;  %v1726_v2 = vpop.f32.mrb[84].mxu1 }
 0x1c9   : > { %v1836_v16 = vmax.f32 %v1811_v4, 0.0  ;;  %v1491_v59 = vmax.f32 %v3500_v17, %v1437_v5  ;;  %v2590_v36 = vpop.f32.mrb[85].mxu0  ;;  %v2652_v15 = vpop.f32.mrb[85].mxu1  ;;  %v3506_v17 = vmax.f32 %v3325_v34, %v3327_v45 }
 0x1ca   : > { %v1440_v19 = vpop.f32.mrb[86].mxu0  ;;  %v1729_v37 = vpop.f32.mrb[86].mxu1 }
 0x1cb   : > { %v2317_v56 = vpack.c.bf16 %v1836_v16, %v1835_v33  ;;  %v1780_v57 = vmax.f32 %v1491_v59, %v1726_v2  ;;  %v1492_v23 = vmax.f32 %v3501_v53, %v1440_v19  ;;  %v2591_v18 = vpop.f32.mrb[87].mxu0  ;;  %v2653_v21 = vpop.f32.mrb[87].mxu1 }
 0x1cd   : > { %2345 = vst [vmem:[%s3364_s22 + $0x38] sm:$0xff] %v2317_v56   ;;  %v1812_v41 = vadd.f32 %v3351_v43, %v1780_v57  ;;  %v1781_v42 = vmax.f32 %v1492_v23, %v1729_v37  ;;  %v3507_v56 = vmax.f32 %v3331_v10, %v3333_v20 }
 0x1cf   : > { %v1813_v29 = vadd.f32 %v3351_v43, %v1781_v42  ;;  %v1837_v38 = vmax.f32 %v1812_v41, 0.0 }
 0x1d0   : > { %v1445_v30 = vpop.f32.mrb[88].mxu0  ;;  %v1734_v22 = vpop.f32.mrb[88].mxu1 }
 0x1d1   : > { %v1838_v13 = vmax.f32 %v1813_v29, 0.0  ;;  %v1493_v7 = vmax.f32 %v3502_v6, %v1445_v30  ;;  %v2594_v8 = vpop.f32.mrb[89].mxu0  ;;  %v2656_v40 = vpop.f32.mrb[89].mxu1  ;;  %v3508_v30 = vld [vmem:[#allocation3_spill] sm:$0xff] }
 0x1d2   : > { %v1448_v44 = vpop.f32.mrb[90].mxu0  ;;  %v1737_v9 = vpop.f32.mrb[90].mxu1 }
 0x1d3   : > { %v2322_v60 = vpack.c.bf16 %v1838_v13, %v1837_v38  ;;  %v1782_v61 = vmax.f32 %v1493_v7, %v1734_v22  ;;  %v1494_v47 = vmax.f32 %v3503_v46, %v1448_v44  ;;  %v2595_v39 = vpop.f32.mrb[91].mxu0  ;;  %v2657_v26 = vpop.f32.mrb[91].mxu1  ;;  %v3509_v22 = vld [vmem:[#allocation4_spill] sm:$0xff] }
 0x1d4   : > { %v3510_v38 = vmax.f32 %v3508_v30, %v3509_v22 }
 0x1d5   : > { %2346 = vst [vmem:[%s3364_s22 + $0x40] sm:$0xff] %v2322_v60   ;;  %v1814_v27 = vadd.f32 %v3351_v43, %v1782_v61  ;;  %v1783_v50 = vmax.f32 %v1494_v47, %v1737_v9 }
 0x1d7   : > { %v1815_v63 = vadd.f32 %v3351_v43, %v1783_v50  ;;  %v1839_v12 = vmax.f32 %v1814_v27, 0.0 }
 0x1d8   : > { %v1453_v0 = vpop.f32.mrb[92].mxu0  ;;  %v1742_v11 = vpop.f32.mrb[92].mxu1 }
 0x1d9   : > { %v1840_v55 = vmax.f32 %v1815_v63, 0.0  ;;  %v1495_v51 = vmax.f32 %v3504_v58, %v1453_v0  ;;  %v2598_v52 = vpop.f32.mrb[93].mxu0  ;;  %v2660_v25 = vpop.f32.mrb[93].mxu1 }
 0x1da   : > { %v1456_v35 = vpop.f32.mrb[94].mxu0  ;;  %v1745_v62 = vpop.f32.mrb[94].mxu1 }
 0x1db   : > { %v2327_v31 = vpack.c.bf16 %v1840_v55, %v1839_v12  ;;  %v1784_v32 = vmax.f32 %v1495_v51, %v1742_v11  ;;  %v1496_v3 = vmax.f32 %v3505_v28, %v1456_v35  ;;  %v2599_v48 = vpop.f32.mrb[95].mxu0  ;;  %v2661_v1 = vpop.f32.mrb[95].mxu1 }
 0x1dd   : > { %2347 = vst [vmem:[%s3364_s22 + $0x48] sm:$0xff] %v2327_v31   ;;  %v1816_v4 = vadd.f32 %v3351_v43, %v1784_v32  ;;  %v1785_v5 = vmax.f32 %v1496_v3, %v1745_v62 }
 0x1df   : > { %v1817_v49 = vadd.f32 %v3351_v43, %v1785_v5  ;;  %v1841_v33 = vmax.f32 %v1816_v4, 0.0 }
 0x1e0   : > { %v1461_v54 = vpop.f32.mrb[96].mxu0  ;;  %v1750_v2 = vpop.f32.mrb[96].mxu1 }
 0x1e1   : > { %v1842_v16 = vmax.f32 %v1817_v49, 0.0  ;;  %v1497_v59 = vmax.f32 %v3506_v17, %v1461_v54  ;;  %v2602_v36 = vpop.f32.mrb[97].mxu0  ;;  %v2664_v14 = vpop.f32.mrb[97].mxu1 }
 0x1e2   : > { %v1464_v24 = vpop.f32.mrb[98].mxu0  ;;  %v1753_v15 = vpop.f32.mrb[98].mxu1 }
 0x1e3   : > { %v2332_v19 = vpack.c.bf16 %v1842_v16, %v1841_v33  ;;  %v1786_v37 = vmax.f32 %v1497_v59, %v1750_v2  ;;  %v1498_v57 = vmax.f32 %v3507_v56, %v1464_v24  ;;  %v2603_v53 = vpop.f32.mrb[99].mxu0  ;;  %v2665_v23 = vpop.f32.mrb[99].mxu1 }
 0x1e5   : > { %2348 = vst [vmem:[%s3364_s22 + $0x50] sm:$0xff] %v2332_v19   ;;  %v1818_v18 = vadd.f32 %v3351_v43, %v1786_v37  ;;  %v1787_v21 = vmax.f32 %v1498_v57, %v1753_v15 }
 0x1e7   : > { %v1819_v34 = vadd.f32 %v3351_v43, %v1787_v21  ;;  %v1843_v42 = vmax.f32 %v1818_v18, 0.0 }
 0x1e8   : > { %v1469_v45 = vpop.f32.mrb[100].mxu0  ;;  %v1758_v41 = vpop.f32.mrb[100].mxu1 }
 0x1e9   : > { %v1844_v29 = vmax.f32 %v1819_v34, 0.0  ;;  %v1499_v13 = vmax.f32 %v3510_v38, %v1469_v45  ;;  %v2606_v20 = vpop.f32.mrb[101].mxu0  ;;  %v2668_v10 = vpop.f32.mrb[101].mxu1 }
 0x1ea   : > { %v1472_v6 = vpop.f32.mrb[102].mxu0  ;;  %v1761_v7 = vpop.f32.mrb[102].mxu1 }
 0x1eb   : > { %v2337_v8 = vpack.c.bf16 %v1844_v29, %v1843_v42  ;;  %v1788_v40 = vmax.f32 %v1499_v13, %v1758_v41  ;;  %v2607_v44 = vpop.f32.mrb[103].mxu0  ;;  %v2669_v9 = vpop.f32.mrb[103].mxu1 }
 0x1ed   : > { %2349 = vst [vmem:[%s3364_s22 + $0x58] sm:$0xff] %v2337_v8   ;;  %v1820_v60 = vadd.f32 %v3351_v43, %v1788_v40 }
 0x1ef   : > { %v1845_v61 = vmax.f32 %v1820_v60, 0.0 }
 0x1f1   : > { %v2278_v46 = vpack.c.bf16 %v1845_v61, %v1845_v61 }
 0x1f3   : > { %1971 = vst [vmem:[%s3364_s22 + $0x60] sm:$0xf] %v2278_v46 }
 0x1f4 PF: > { %p10_p9 = scmp.ge.s32.totalorder %s2820_s16, 4   ;;  %s3511_s12 = smov %s2774_s13 }
 0x1f5   : > { %s3512_s13 = smov %s2829_s19  ;;  %s3513_s14 = smov %s2820_s16 }
 0x1f6   :  { %12 = sbr.rel (!%p10_p9) target bundleno = 2 (0x2), region = 111 }

// kernel: net_forward.3
= control target key start
LH: loop header
LB: loop body
LE: loop exit
PB: predicated region body
PF: predicated region fallthrough
CT: control target
= control target key end

     0   :  { %v10550_v0 = vmov 0   ;;  %vm117_vm0 = vcmask 179200   ;;  %vm121_vm1 = vcmask 1042432   ;;  %v10551_v37 = vmov 0.0   ;;  %s14547_s1 = inlined_call_operand.vmem [shape: bf16[150,128], index: 1, kind: input, shape index: {}]   ;;  %s14548_s0 = inlined_call_operand.vmem [shape: bf16[4,25,8,150], index: 0, kind: input, shape index: {}]   ;;  %s14549_s3 = inlined_call_operand.vmem [shape: bf16[25,128,128], index: 3, kind: input, shape index: {}]   ;;  %s14550_s2 = inlined_call_operand.vmem [shape: f32[1,128], index: 2, kind: input, shape index: {}]   ;;  %s14551_s5 = inlined_call_operand.vmem [shape: bf16[128,128], index: 5, kind: input, shape index: {}]   ;;  %s14552_s7 = inlined_call_operand.vmem [shape: bf16[128,128], index: 7, kind: input, shape index: {}]   ;;  %s14553_s4 = inlined_call_operand.vmem [shape: f32[1,128], index: 4, kind: input, shape index: {}]   ;;  %s14554_s6 = inlined_call_operand.vmem [shape: f32[1,128], index: 6, kind: input, shape index: {}]   ;;  %s14555_s8 = inlined_call_operand.vmem [shape: f32[1,128], index: 8, kind: input, shape index: {}]   ;;  %s14556_s9 = inlined_call_operand.vmem [shape: f32[8,128], index: 9, kind: output, shape index: {}]  }
   0x1   :  { %125 = vmatprep.subr.bf16.mxu0 %v10550_v0  ;;  %176 = vmatprep.subr.bf16.mxu1 %v10550_v0  ;;  %v10608_v1 = vld [vmem:[%s14547_s1] sm:$0xff]   ;;  %v10615_v2 = vld [vmem:[%s14547_s1 + $0x8] sm:$0xff]   ;;  %v10624_v3 = vld [vmem:[%s14547_s1 + $0x10] sm:$0xff]   ;;  %vm10552_vm2 = vmmov 0  }
   0x2   :  { %126 = vmatpush1.bf16.msra.mxu0 %v10608_v1  ;;  %177 = vmatpush1.bf16.msra.mxu1 %v10608_v1  ;;  %v53_v4 = vld [vmem:[%s14548_s0] sm:$0xff]  ;;  %v10636_v5 = vld [vmem:[%s14547_s1 + $0x18] sm:$0xff]   ;;  %v8269_v7 = vld [vmem:[%s14548_s0 + $0xc8] sm:$0xff] }
   0x3   :  { %127 = vmatprep.subr.bf16.mxu0 %v10550_v0  ;;  %178 = vmatprep.subr.bf16.mxu1 %v10550_v0  ;;  %v8257_v6 = vcombine.high %v53_v4, %v53_v4  ;;  %v8271_v8 = vcombine.high %v8269_v7, %v8269_v7  ;;  %v10650_v9 = vld [vmem:[%s14547_s1 + $0x20] sm:$0xff]   ;;  %v10659_v10 = vld [vmem:[%s14547_s1 + $0x28] sm:$0xff]   ;;  %v10668_v11 = vld [vmem:[%s14547_s1 + $0x30] sm:$0xff]   ;;  %v8256_v16 = vcombine.low %v53_v4, %v53_v4 }
   0x4   :  { %v10677_v12 = vld [vmem:[%s14547_s1 + $0x38] sm:$0xff]   ;;  %v10686_v13 = vld [vmem:[%s14547_s1 + $0x40] sm:$0xff]   ;;  %v10064_v14 = vld [vmem:[%s14547_s1 + $0x48] ss:$0 sps:$4 sm:$0x77]   ;;  %v8270_v17 = vcombine.low %v8269_v7, %v8269_v7 }
   0x5   :  { %8268 = vmatprep.mubr.msk.bf16.mxu0 %vm117_vm0, %v8257_v6  ;;  %8272 = vmatprep.mubr.msk.bf16.mxu1 %vm117_vm0, %v8271_v8  ;;  %v10697_v15 = vsel %vm121_vm1, %v10064_v14, 0  ;;  %v8273_v18 = vld [vmem:[%s14548_s0 + $0x190] sm:$0xff]  ;;  %v8277_v19 = vld [vmem:[%s14548_s0 + $0x258] sm:$0xff]  ;;  %v8282_v24 = vld [vmem:[%s14548_s0 + $0x8] sm:$0xff] }
   0x6   :  { %128 = vmatpush1.bf16.msra.mxu0 %v10615_v2  ;;  %179 = vmatpush1.bf16.msra.mxu1 %v10615_v2  ;;  %v8275_v20 = vcombine.high %v8273_v18, %v8273_v18  ;;  %v8279_v21 = vcombine.high %v8277_v19, %v8277_v19  ;;  %v8274_v22 = vcombine.low %v8273_v18, %v8273_v18  ;;  %v8286_v25 = vld [vmem:[%s14548_s0 + $0xd0] sm:$0xff]  ;;  %v8290_v30 = vld [vmem:[%s14548_s0 + $0x198] sm:$0xff]  ;;  %v8294_v31 = vld [vmem:[%s14548_s0 + $0x260] sm:$0xff] }
   0x7   :  { %129 = vmatprep.subr.bf16.mxu0 %v10550_v0  ;;  %180 = vmatprep.subr.bf16.mxu1 %v10550_v0  ;;  %v8278_v23 = vcombine.low %v8277_v19, %v8277_v19  ;;  %v8284_v26 = vcombine.high %v8282_v24, %v8282_v24  ;;  %v8288_v27 = vcombine.high %v8286_v25, %v8286_v25  ;;  %v10081_v34 = vld [vmem:[%s14549_s3] sm:$0xff]   ;;  %v10082_v38 = vld [vmem:[%s14549_s3 + $0x8] sm:$0xff]   ;;  %v10083_v39 = vld [vmem:[%s14549_s3 + $0x10] sm:$0xff]  }
   0x8   :  { %v8283_v28 = vcombine.low %v8282_v24, %v8282_v24  ;;  %v8287_v29 = vcombine.low %v8286_v25, %v8286_v25  ;;  %v8292_v32 = vcombine.high %v8290_v30, %v8290_v30  ;;  %v8296_v33 = vcombine.high %v8294_v31, %v8294_v31  ;;  %v10084_v40 = vld [vmem:[%s14549_s3 + $0x18] sm:$0xff]   ;;  %v10085_v41 = vld [vmem:[%s14549_s3 + $0x20] sm:$0xff]   ;;  %v10086_v42 = vld [vmem:[%s14549_s3 + $0x28] sm:$0xff]  }
   0x9   :  { %v8291_v35 = vcombine.low %v8290_v30, %v8290_v30  ;;  %v8295_v36 = vcombine.low %v8294_v31, %v8294_v31  ;;  %v10087_v43 = vld [vmem:[%s14549_s3 + $0x30] sm:$0xff]   ;;  %v10088_v44 = vld [vmem:[%s14549_s3 + $0x38] sm:$0xff]   ;;  %v10089_v45 = vld [vmem:[%s14549_s3 + $0x40] sm:$0xff]  }
   0xa   :  { %130 = vmatpush1.bf16.msra.mxu0 %v10624_v3  ;;  %181 = vmatpush1.bf16.msra.mxu1 %v10624_v3  ;;  %v10090_v46 = vld [vmem:[%s14549_s3 + $0x48] sm:$0xff]   ;;  %v10091_v47 = vld [vmem:[%s14549_s3 + $0x50] sm:$0xff]   ;;  %v10092_v48 = vld [vmem:[%s14549_s3 + $0x58] sm:$0xff]  }
   0xb   :  { %131 = vmatprep.subr.bf16.mxu0 %v10550_v0  ;;  %182 = vmatprep.subr.bf16.mxu1 %v10550_v0  ;;  %v10093_v49 = vld [vmem:[%s14549_s3 + $0x60] sm:$0xff]   ;;  %v10094_v50 = vld [vmem:[%s14549_s3 + $0x68] sm:$0xff]   ;;  %v10095_v51 = vld [vmem:[%s14549_s3 + $0x70] sm:$0xff]  }
   0xc   :  { %v10096_v52 = vld [vmem:[%s14549_s3 + $0x78] sm:$0xff]   ;;  %v10918_v4 = vld [vmem:[%s14550_s2] ss:$0 sm:$0xff]  ;;  %v10942_v18 = vld [vmem:[%s14547_s1 + $0x10] sm:$0xff]  }
   0xd   :  { %v10949_v19 = vld [vmem:[%s14547_s1 + $0x18] sm:$0xff]  }
   0xe   :  { %132 = vmatpush1.bf16.msra.mxu0 %v10636_v5  ;;  %183 = vmatpush1.bf16.msra.mxu1 %v10636_v5  ;;  %v10977_v25 = vld [vmem:[%s14547_s1 + $0x38] sm:$0xff]  }
   0xf   :  { %133 = vmatprep.subr.bf16.mxu0 %v10550_v0  ;;  %184 = vmatprep.subr.bf16.mxu1 %v10550_v0 }
  0x12   :  { %134 = vmatpush1.bf16.msra.mxu0 %v10650_v9  ;;  %185 = vmatpush1.bf16.msra.mxu1 %v10650_v9 }
  0x13   :  { %135 = vmatprep.subr.bf16.mxu0 %v10550_v0  ;;  %186 = vmatprep.subr.bf16.mxu1 %v10550_v0 }
  0x16   :  { %136 = vmatpush1.bf16.msra.mxu0 %v10659_v10  ;;  %187 = vmatpush1.bf16.msra.mxu1 %v10659_v10 }
  0x17   :  { %137 = vmatprep.subr.bf16.mxu0 %v10550_v0  ;;  %188 = vmatprep.subr.bf16.mxu1 %v10550_v0 }
  0x1a   :  { %138 = vmatpush1.bf16.msra.mxu0 %v10668_v11  ;;  %189 = vmatpush1.bf16.msra.mxu1 %v10668_v11 }
  0x1b   :  { %139 = vmatprep.subr.bf16.mxu0 %v10550_v0  ;;  %190 = vmatprep.subr.bf16.mxu1 %v10550_v0 }
  0x1e   :  { %140 = vmatpush1.bf16.msra.mxu0 %v10677_v12  ;;  %191 = vmatpush1.bf16.msra.mxu1 %v10677_v12 }
  0x1f   :  { %141 = vmatprep.subr.bf16.mxu0 %v10550_v0  ;;  %192 = vmatprep.subr.bf16.mxu1 %v10550_v0 }
  0x22   :  { %142 = vmatpush1.bf16.msra.mxu0 %v10686_v13  ;;  %193 = vmatpush1.bf16.msra.mxu1 %v10686_v13 }
  0x23   :  { %143 = vmatprep.subr.bf16.mxu0 %v10550_v0  ;;  %194 = vmatprep.subr.bf16.mxu1 %v10550_v0 }
  0x26   :  { %144 = vmatpush1.bf16.msra.mxu0 %v10697_v15  ;;  %195 = vmatpush1.bf16.msra.mxu1 %v10697_v15 }
  0x27   :  { %228 = vmatprep.subr.bf16.mxu0 %v10550_v0  ;;  %280 = vmatprep.subr.bf16.mxu1 %v10550_v0 }
  0x29   :  { %158 = vmatmul.mubr.bf16.vlgmr.msra.gmra.mrb[0].mxu0 %v8256_v16  ;;  %209 = vmatmul.mubr.bf16.vlgmr.msra.gmra.mrb[0].mxu1 %v8270_v17  ;;  %v10927_v16 = vld [vmem:[%s14547_s1] sm:$0xff]   ;;  %v10935_v17 = vld [vmem:[%s14547_s1 + $0x8] sm:$0xff]  }
  0x2a   :  { %229 = vmatpush1.bf16.msra.mxu0 %v10608_v1  ;;  %281 = vmatpush1.bf16.msra.mxu1 %v10608_v1 }
  0x2b   :  { %230 = vmatprep.subr.bf16.mxu0 %v10550_v0  ;;  %282 = vmatprep.subr.bf16.mxu1 %v10550_v0 }
  0x2c   :  { %8276 = vmatprep.mubr.msk.bf16.mxu0 %vm117_vm0, %v8275_v20  ;;  %8280 = vmatprep.mubr.msk.bf16.mxu1 %vm117_vm0, %v8279_v21  ;;  %v10956_v20 = vld [vmem:[%s14547_s1 + $0x20] sm:$0xff]   ;;  %v10963_v21 = vld [vmem:[%s14547_s1 + $0x28] sm:$0xff]  }
  0x2e   :  { %231 = vmatpush1.bf16.msra.mxu0 %v10615_v2  ;;  %283 = vmatpush1.bf16.msra.mxu1 %v10615_v2 }
  0x2f   :  { %232 = vmatprep.subr.bf16.mxu0 %v10550_v0  ;;  %284 = vmatprep.subr.bf16.mxu1 %v10550_v0 }
  0x32   :  { %233 = vmatpush1.bf16.msra.mxu0 %v10624_v3  ;;  %285 = vmatpush1.bf16.msra.mxu1 %v10624_v3 }
  0x33   :  { %234 = vmatprep.subr.bf16.mxu0 %v10550_v0  ;;  %286 = vmatprep.subr.bf16.mxu1 %v10550_v0 }
  0x36   :  { %235 = vmatpush1.bf16.msra.mxu0 %v10636_v5  ;;  %287 = vmatpush1.bf16.msra.mxu1 %v10636_v5 }
  0x37   :  { %236 = vmatprep.subr.bf16.mxu0 %v10550_v0  ;;  %288 = vmatprep.subr.bf16.mxu1 %v10550_v0 }
  0x3a   :  { %237 = vmatpush1.bf16.msra.mxu0 %v10650_v9  ;;  %289 = vmatpush1.bf16.msra.mxu1 %v10650_v9 }
  0x3b   :  { %238 = vmatprep.subr.bf16.mxu0 %v10550_v0  ;;  %290 = vmatprep.subr.bf16.mxu1 %v10550_v0 }
  0x3e   :  { %239 = vmatpush1.bf16.msra.mxu0 %v10659_v10  ;;  %291 = vmatpush1.bf16.msra.mxu1 %v10659_v10 }
  0x3f   :  { %240 = vmatprep.subr.bf16.mxu0 %v10550_v0  ;;  %292 = vmatprep.subr.bf16.mxu1 %v10550_v0 }
  0x42   :  { %241 = vmatpush1.bf16.msra.mxu0 %v10668_v11  ;;  %293 = vmatpush1.bf16.msra.mxu1 %v10668_v11 }
  0x43   :  { %242 = vmatprep.subr.bf16.mxu0 %v10550_v0  ;;  %294 = vmatprep.subr.bf16.mxu1 %v10550_v0 }
  0x46   :  { %243 = vmatpush1.bf16.msra.mxu0 %v10677_v12  ;;  %295 = vmatpush1.bf16.msra.mxu1 %v10677_v12 }
  0x47   :  { %244 = vmatprep.subr.bf16.mxu0 %v10550_v0  ;;  %296 = vmatprep.subr.bf16.mxu1 %v10550_v0 }
  0x4a   :  { %245 = vmatpush1.bf16.msra.mxu0 %v10686_v13  ;;  %297 = vmatpush1.bf16.msra.mxu1 %v10686_v13 }
  0x4b   :  { %246 = vmatprep.subr.bf16.mxu0 %v10550_v0  ;;  %298 = vmatprep.subr.bf16.mxu1 %v10550_v0 }
  0x4e   :  { %247 = vmatpush1.bf16.msra.mxu0 %v10697_v15  ;;  %299 = vmatpush1.bf16.msra.mxu1 %v10697_v15 }
  0x4f   :  { %357 = vmatprep.subr.bf16.mxu0 %v10550_v0  ;;  %408 = vmatprep.subr.bf16.mxu1 %v10550_v0 }
  0x51   :  { %261 = vmatmul.mubr.bf16.vlgmr.msra.gmra.mrb[4].mxu0 %v8274_v22  ;;  %313 = vmatmul.mubr.bf16.vlgmr.msra.gmra.mrb[4].mxu1 %v8278_v23  ;;  %v10970_v22 = vld [vmem:[%s14547_s1 + $0x30] sm:$0xff]  }
  0x52   :  { %358 = vmatpush1.bf16.msra.mxu0 %v10608_v1  ;;  %409 = vmatpush1.bf16.msra.mxu1 %v10608_v1 }
  0x53   :  { %359 = vmatprep.subr.bf16.mxu0 %v10550_v0  ;;  %410 = vmatprep.subr.bf16.mxu1 %v10550_v0 }
  0x54   :  { %8285 = vmatprep.mubr.msk.bf16.mxu0 %vm117_vm0, %v8284_v26  ;;  %8289 = vmatprep.mubr.msk.bf16.mxu1 %vm117_vm0, %v8288_v27 }
  0x56   :  { %360 = vmatpush1.bf16.msra.mxu0 %v10615_v2  ;;  %411 = vmatpush1.bf16.msra.mxu1 %v10615_v2 }
  0x57   :  { %361 = vmatprep.subr.bf16.mxu0 %v10550_v0  ;;  %412 = vmatprep.subr.bf16.mxu1 %v10550_v0 }
  0x5a   :  { %362 = vmatpush1.bf16.msra.mxu0 %v10624_v3  ;;  %413 = vmatpush1.bf16.msra.mxu1 %v10624_v3 }
  0x5b   :  { %363 = vmatprep.subr.bf16.mxu0 %v10550_v0  ;;  %414 = vmatprep.subr.bf16.mxu1 %v10550_v0 }
  0x5e   :  { %364 = vmatpush1.bf16.msra.mxu0 %v10636_v5  ;;  %415 = vmatpush1.bf16.msra.mxu1 %v10636_v5 }
  0x5f   :  { %365 = vmatprep.subr.bf16.mxu0 %v10550_v0  ;;  %416 = vmatprep.subr.bf16.mxu1 %v10550_v0 }
  0x62   :  { %366 = vmatpush1.bf16.msra.mxu0 %v10650_v9  ;;  %417 = vmatpush1.bf16.msra.mxu1 %v10650_v9 }
  0x63   :  { %367 = vmatprep.subr.bf16.mxu0 %v10550_v0  ;;  %418 = vmatprep.subr.bf16.mxu1 %v10550_v0 }
  0x66   :  { %368 = vmatpush1.bf16.msra.mxu0 %v10659_v10  ;;  %419 = vmatpush1.bf16.msra.mxu1 %v10659_v10 }
  0x67   :  { %369 = vmatprep.subr.bf16.mxu0 %v10550_v0  ;;  %420 = vmatprep.subr.bf16.mxu1 %v10550_v0 }
  0x6a   :  { %370 = vmatpush1.bf16.msra.mxu0 %v10668_v11  ;;  %421 = vmatpush1.bf16.msra.mxu1 %v10668_v11 }
  0x6b   :  { %371 = vmatprep.subr.bf16.mxu0 %v10550_v0  ;;  %422 = vmatprep.subr.bf16.mxu1 %v10550_v0 }
  0x6e   :  { %372 = vmatpush1.bf16.msra.mxu0 %v10677_v12  ;;  %423 = vmatpush1.bf16.msra.mxu1 %v10677_v12 }
  0x6f   :  { %373 = vmatprep.subr.bf16.mxu0 %v10550_v0  ;;  %424 = vmatprep.subr.bf16.mxu1 %v10550_v0 }
  0x72   :  { %374 = vmatpush1.bf16.msra.mxu0 %v10686_v13  ;;  %425 = vmatpush1.bf16.msra.mxu1 %v10686_v13 }
  0x73   :  { %375 = vmatprep.subr.bf16.mxu0 %v10550_v0  ;;  %426 = vmatprep.subr.bf16.mxu1 %v10550_v0 }
  0x76   :  { %376 = vmatpush1.bf16.msra.mxu0 %v10697_v15  ;;  %427 = vmatpush1.bf16.msra.mxu1 %v10697_v15 }
  0x77   :  { %460 = vmatprep.subr.bf16.mxu0 %v10550_v0  ;;  %512 = vmatprep.subr.bf16.mxu1 %v10550_v0 }
  0x79   :  { %390 = vmatmul.mubr.bf16.vlgmr.msra.gmra.mrb[8].mxu0 %v8283_v28  ;;  %441 = vmatmul.mubr.bf16.vlgmr.msra.gmra.mrb[8].mxu1 %v8287_v29 }
  0x7a   :  { %461 = vmatpush1.bf16.msra.mxu0 %v10608_v1  ;;  %513 = vmatpush1.bf16.msra.mxu1 %v10608_v1 }
  0x7b   :  { %462 = vmatprep.subr.bf16.mxu0 %v10550_v0  ;;  %514 = vmatprep.subr.bf16.mxu1 %v10550_v0 }
  0x7c   :  { %8293 = vmatprep.mubr.msk.bf16.mxu0 %vm117_vm0, %v8292_v32  ;;  %8297 = vmatprep.mubr.msk.bf16.mxu1 %vm117_vm0, %v8296_v33  ;;  %v10984_v33 = vld [vmem:[%s14547_s1 + $0x40] sm:$0xff]  }
  0x7e   :  { %463 = vmatpush1.bf16.msra.mxu0 %v10615_v2  ;;  %515 = vmatpush1.bf16.msra.mxu1 %v10615_v2 }
  0x7f   :  { %464 = vmatprep.subr.bf16.mxu0 %v10550_v0  ;;  %516 = vmatprep.subr.bf16.mxu1 %v10550_v0 }
  0x82   :  { %465 = vmatpush1.bf16.msra.mxu0 %v10624_v3  ;;  %517 = vmatpush1.bf16.msra.mxu1 %v10624_v3 }
  0x83   :  { %466 = vmatprep.subr.bf16.mxu0 %v10550_v0  ;;  %518 = vmatprep.subr.bf16.mxu1 %v10550_v0 }
  0x86   :  { %467 = vmatpush1.bf16.msra.mxu0 %v10636_v5  ;;  %519 = vmatpush1.bf16.msra.mxu1 %v10636_v5 }
  0x87   :  { %468 = vmatprep.subr.bf16.mxu0 %v10550_v0  ;;  %520 = vmatprep.subr.bf16.mxu1 %v10550_v0 }
  0x8a   :  { %469 = vmatpush1.bf16.msra.mxu0 %v10650_v9  ;;  %521 = vmatpush1.bf16.msra.mxu1 %v10650_v9 }
  0x8b   :  { %470 = vmatprep.subr.bf16.mxu0 %v10550_v0  ;;  %522 = vmatprep.subr.bf16.mxu1 %v10550_v0 }
  0x8e   :  { %471 = vmatpush1.bf16.msra.mxu0 %v10659_v10  ;;  %523 = vmatpush1.bf16.msra.mxu1 %v10659_v10 }
  0x8f   :  { %472 = vmatprep.subr.bf16.mxu0 %v10550_v0  ;;  %524 = vmatprep.subr.bf16.mxu1 %v10550_v0 }
  0x92   :  { %473 = vmatpush1.bf16.msra.mxu0 %v10668_v11  ;;  %525 = vmatpush1.bf16.msra.mxu1 %v10668_v11  ;;  %v8334_v11 = vld [vmem:[%s14548_s0 + $0xd8] sm:$0xff] }
  0x93   :  { %474 = vmatprep.subr.bf16.mxu0 %v10550_v0  ;;  %526 = vmatprep.subr.bf16.mxu1 %v10550_v0 }
  0x96   :  { %475 = vmatpush1.bf16.msra.mxu0 %v10677_v12  ;;  %527 = vmatpush1.bf16.msra.mxu1 %v10677_v12 }
  0x97   :  { %476 = vmatprep.subr.bf16.mxu0 %v10550_v0  ;;  %528 = vmatprep.subr.bf16.mxu1 %v10550_v0 }
  0x9a   :  { %477 = vmatpush1.bf16.msra.mxu0 %v10686_v13  ;;  %529 = vmatpush1.bf16.msra.mxu1 %v10686_v13  ;;  %v8336_v13 = vcombine.high %v8334_v11, %v8334_v11 }
  0x9b   :  { %478 = vmatprep.subr.bf16.mxu0 %v10550_v0  ;;  %530 = vmatprep.subr.bf16.mxu1 %v10550_v0 }
  0x9e   :  { %479 = vmatpush1.bf16.msra.mxu0 %v10697_v15  ;;  %531 = vmatpush1.bf16.msra.mxu1 %v10697_v15 }
  0x9f   :  { %9532 = vmatprep.subr.bf16.mxu1 %v10551_v37  ;;  %9512 = vmatprep.subr.bf16.mxu0 %v10551_v37 }
  0xa1   :  { %493 = vmatmul.mubr.bf16.vlgmr.msra.gmra.mrb[12].mxu0 %v8291_v35  ;;  %545 = vmatmul.mubr.bf16.vlgmr.msra.gmra.mrb[12].mxu1 %v8295_v36  ;;  %v8335_v35 = vcombine.low %v8334_v11, %v8334_v11  ;;  %v8370_v11 = vld [vmem:[%s14548_s0 + $0x18] sm:$0xff] }
  0xa2   :  { %9533 = vmatpush3.bf16.msra.mxu1 %v10081_v34  ;;  %9548 = vmatprep.mubr.msk.bf16.mxu1 %vm10552_vm2, %v10551_v37  ;;  %v8342_v34 = vld [vmem:[%s14548_s0 + $0x268] sm:$0xff] }
  0xa3   :  { %9534 = vmatprep.subr.bf16.mxu1 %v10551_v37  ;;  %9528 = vmatprep.mubr.msk.bf16.mxu0 %vm10552_vm2, %v10551_v37  ;;  %v8344_v36 = vcombine.high %v8342_v34, %v8342_v34 }
  0xa4   :  { %9513 = vmatpush3.bf16.msra.mxu0 %v10089_v45 }
  0xa5   :  { %9514 = vmatprep.subr.bf16.mxu0 %v10551_v37 }
  0xa6   :  { %9535 = vmatpush3.bf16.msra.mxu1 %v10082_v38 }
  0xa7   :  { %9536 = vmatprep.subr.bf16.mxu1 %v10551_v37 }
  0xa8   :  { %9515 = vmatpush3.bf16.msra.mxu0 %v10090_v46 }
  0xa9   :  { %9516 = vmatprep.subr.bf16.mxu0 %v10551_v37 }
  0xaa   :  { %9537 = vmatpush3.bf16.msra.mxu1 %v10083_v39 }
  0xab   :  { %9538 = vmatprep.subr.bf16.mxu1 %v10551_v37 }
  0xac   :  { %9517 = vmatpush3.bf16.msra.mxu0 %v10091_v47 }
  0xad   :  { %9518 = vmatprep.subr.bf16.mxu0 %v10551_v37 }
  0xae   :  { %9539 = vmatpush3.bf16.msra.mxu1 %v10084_v40 }
  0xaf   :  { %9540 = vmatprep.subr.bf16.mxu1 %v10551_v37 }
  0xb0   :  { %9519 = vmatpush3.bf16.msra.mxu0 %v10092_v48 }
  0xb1   :  { %9520 = vmatprep.subr.bf16.mxu0 %v10551_v37 }
  0xb2   :  { %9541 = vmatpush3.bf16.msra.mxu1 %v10085_v41 }
  0xb3   :  { %9542 = vmatprep.subr.bf16.mxu1 %v10551_v37 }
  0xb4   :  { %9521 = vmatpush3.bf16.msra.mxu0 %v10093_v49  ;;  %v8330_v49 = vld [vmem:[%s14548_s0 + $0x10] sm:$0xff] }
  0xb5   :  { %9522 = vmatprep.subr.bf16.mxu0 %v10551_v37 }
  0xb6   :  { %9543 = vmatpush3.bf16.msra.mxu1 %v10086_v42 }
  0xb7   :  { %9544 = vmatprep.subr.bf16.mxu1 %v10551_v37 }
  0xb8   :  { %9523 = vmatpush3.bf16.msra.mxu0 %v10094_v50 }
  0xb9   :  { %9524 = vmatprep.subr.bf16.mxu0 %v10551_v37 }
  0xba   :  { %9545 = vmatpush3.bf16.msra.mxu1 %v10087_v43 }
  0xbb   :  { %9546 = vmatprep.subr.bf16.mxu1 %v10551_v37 }
  0xbc   :  { %9525 = vmatpush3.bf16.msra.mxu0 %v10095_v51  ;;  %v8343_v51 = vcombine.low %v8342_v34, %v8342_v34 }
  0xbd   :  { %9526 = vmatprep.subr.bf16.mxu0 %v10551_v37 }
  0xbe   :  { %9547 = vmatpush3.bf16.msra.mxu1 %v10088_v44 }
  0xbf   :  { %811 = vmatprep.subr.bf16.mxu1 %v10550_v0 }
  0xc0   :  { %9527 = vmatpush3.bf16.msra.mxu0 %v10096_v52  ;;  %v8332_v52 = vcombine.high %v8330_v49, %v8330_v49 }
  0xc1   :  { %760 = vmatprep.subr.bf16.mxu0 %v10550_v0 }
  0xfc   :  { %v159_v53 = vpop.f32.mrb[0].mxu0  ;;  %v210_v54 = vpop.f32.mrb[0].mxu1 }
  0xfd   :  { %v216_v55 = vmax.f32 %v159_v53, %v210_v54  ;;  %v161_v56 = vpop.f32.mrb[1].mxu0  ;;  %v212_v57 = vpop.f32.mrb[1].mxu1  ;;  %v8338_v54 = vld [vmem:[%s14548_s0 + $0x1a0] sm:$0xff] }
  0xfe   :  { %v162_v58 = vpop.f32.mrb[2].mxu0  ;;  %v213_v59 = vpop.f32.mrb[2].mxu1  ;;  %v8340_v56 = vcombine.high %v8338_v54, %v8338_v54  ;;  %v8339_v57 = vcombine.low %v8338_v54, %v8338_v54  ;;  %v8382_v54 = vld [vmem:[%s14548_s0 + $0x270] sm:$0xff] }
  0xff   :  { %v163_v60 = vpop.f32.mrb[3].mxu0  ;;  %v214_v61 = vpop.f32.mrb[3].mxu1  ;;  %v10105_v58 = vld [vmem:[%s14549_s3 + $0x80] sm:$0xff]   ;;  %v10106_v59 = vld [vmem:[%s14549_s3 + $0x88] sm:$0xff]  }
 0x124   :  { %v262_v62 = vpop.f32.mrb[4].mxu0  ;;  %v314_v63 = vpop.f32.mrb[4].mxu1 }
 0x125   :  { %v268_v1 = vmax.f32 %v216_v55, %v262_v62  ;;  %v264_v2 = vpop.f32.mrb[5].mxu0  ;;  %v316_v3 = vpop.f32.mrb[5].mxu1  ;;  %v8331_v55 = vcombine.low %v8330_v49, %v8330_v49  ;;  %v10107_v62 = vld [vmem:[%s14549_s3 + $0x90] sm:$0xff]  }
 0x126   :  { %v265_v5 = vpop.f32.mrb[6].mxu0  ;;  %v317_v6 = vpop.f32.mrb[6].mxu1  ;;  %v10108_v2 = vld [vmem:[%s14549_s3 + $0x98] sm:$0xff]   ;;  %v10109_v3 = vld [vmem:[%s14549_s3 + $0xa0] sm:$0xff]  }
 0x127   :  { %v320_v7 = vmax.f32 %v268_v1, %v314_v63  ;;  %v266_v8 = vpop.f32.mrb[7].mxu0  ;;  %v318_v9 = vpop.f32.mrb[7].mxu1  ;;  %v10110_v5 = vld [vmem:[%s14549_s3 + $0xa8] sm:$0xff]   ;;  %v10111_v6 = vld [vmem:[%s14549_s3 + $0xb0] sm:$0xff]  }
 0x129   :  { %v327_v10 = vadd.f32 %v10918_v4, %v320_v7  ;;  %v10112_v7 = vld [vmem:[%s14549_s3 + $0xb8] sm:$0xff]  }
 0x12b   :  { %v328_v12 = vmax.f32 %v327_v10, 0.0 }
 0x12d   :  { %v329_v14 = vpack.c.bf16 %v328_v12, %v328_v12 }
 0x12f   :  { %9549 = vmatmul.mubr.bf16.vlgmr.msra.gmra.mrb[16].mxu1 %v329_v14  ;;  %v8371_v14 = vcombine.low %v8370_v11, %v8370_v11 }
 0x130   :  { %812 = vmatpush1.bf16.msra.mxu1 %v10927_v16  ;;  %8337 = vmatprep.mubr.msk.bf16.mxu1 %vm117_vm0, %v8336_v13  ;;  %v8372_v13 = vcombine.high %v8370_v11, %v8370_v11  ;;  %v10128_v11 = vld [vmem:[%s14549_s3 + $0xf8] sm:$0xff]  }
 0x131   :  { %813 = vmatprep.subr.bf16.mxu1 %v10550_v0 }
 0x134   :  { %814 = vmatpush1.bf16.msra.mxu1 %v10935_v17 }
 0x135   :  { %815 = vmatprep.subr.bf16.mxu1 %v10550_v0 }
 0x138   :  { %816 = vmatpush1.bf16.msra.mxu1 %v10942_v18 }
 0x139   :  { %817 = vmatprep.subr.bf16.mxu1 %v10550_v0 }
 0x13c   :  { %818 = vmatpush1.bf16.msra.mxu1 %v10949_v19 }
 0x13d   :  { %819 = vmatprep.subr.bf16.mxu1 %v10550_v0 }
 0x140   :  { %820 = vmatpush1.bf16.msra.mxu1 %v10956_v20 }
 0x141   :  { %821 = vmatprep.subr.bf16.mxu1 %v10550_v0 }
 0x144   :  { %822 = vmatpush1.bf16.msra.mxu1 %v10963_v21 }
 0x145   :  { %823 = vmatprep.subr.bf16.mxu1 %v10550_v0 }
 0x148   :  { %824 = vmatpush1.bf16.msra.mxu1 %v10970_v22 }
 0x149   :  { %825 = vmatprep.subr.bf16.mxu1 %v10550_v0 }
 0x14c   :  { %v391_v23 = vpop.f32.mrb[8].mxu0  ;;  %v442_v24 = vpop.f32.mrb[8].mxu1  ;;  %826 = vmatpush1.bf16.msra.mxu1 %v10977_v25 }
 0x14d   :  { %v448_v26 = vmax.f32 %v391_v23, %v442_v24  ;;  %v393_v27 = vpop.f32.mrb[9].mxu0  ;;  %v444_v28 = vpop.f32.mrb[9].mxu1  ;;  %827 = vmatprep.subr.bf16.mxu1 %v10550_v0 }
 0x14e   :  { %v394_v29 = vpop.f32.mrb[10].mxu0  ;;  %v445_v30 = vpop.f32.mrb[10].mxu1 }
 0x14f   :  { %v395_v31 = vpop.f32.mrb[11].mxu0  ;;  %v446_v32 = vpop.f32.mrb[11].mxu1  ;;  %v8378_v29 = vld [vmem:[%s14548_s0 + $0x1a8] sm:$0xff] }
 0x150   :  { %828 = vmatpush1.bf16.msra.mxu1 %v10984_v33  ;;  %v8380_v32 = vcombine.high %v8378_v29, %v8378_v29 }
 0x151   :  { %829 = vmatprep.subr.bf16.mxu1 %v10550_v0 }
 0x154   :  { %830 = vmatpush1.bf16.msra.mxu1 %v10697_v15 }
 0x155   :  { %915 = vmatprep.subr.bf16.mxu1 %v10550_v0 }
 0x157   :  { %844 = vmatmul.mubr.bf16.vlgmr.msra.gmra.mrb[20].mxu1 %v8335_v35 }
 0x158   :  { %916 = vmatpush1.bf16.msra.mxu1 %v10927_v16  ;;  %8345 = vmatprep.mubr.msk.bf16.mxu1 %vm117_vm0, %v8344_v36  ;;  %v8379_v36 = vcombine.low %v8378_v29, %v8378_v29 }
 0x159   :  { %917 = vmatprep.subr.bf16.mxu1 %v10550_v0 }
 0x15c   :  { %918 = vmatpush1.bf16.msra.mxu1 %v10935_v17 }
 0x15d   :  { %919 = vmatprep.subr.bf16.mxu1 %v10550_v0 }
 0x160   :  { %920 = vmatpush1.bf16.msra.mxu1 %v10942_v18 }
 0x161   :  { %921 = vmatprep.subr.bf16.mxu1 %v10550_v0 }
 0x164   :  { %922 = vmatpush1.bf16.msra.mxu1 %v10949_v19 }
 0x165   :  { %923 = vmatprep.subr.bf16.mxu1 %v10550_v0 }
 0x168   :  { %924 = vmatpush1.bf16.msra.mxu1 %v10956_v20 }
 0x169   :  { %925 = vmatprep.subr.bf16.mxu1 %v10550_v0 }
 0x16c   :  { %926 = vmatpush1.bf16.msra.mxu1 %v10963_v21 }
 0x16d   :  { %927 = vmatprep.subr.bf16.mxu1 %v10550_v0 }
 0x170   :  { %928 = vmatpush1.bf16.msra.mxu1 %v10970_v22 }
 0x171   :  { %929 = vmatprep.subr.bf16.mxu1 %v10550_v0 }
 0x174   :  { %v494_v38 = vpop.f32.mrb[12].mxu0  ;;  %v546_v39 = vpop.f32.mrb[12].mxu1  ;;  %930 = vmatpush1.bf16.msra.mxu1 %v10977_v25 }
 0x175   :  { %v500_v40 = vmax.f32 %v448_v26, %v494_v38  ;;  %v496_v41 = vpop.f32.mrb[13].mxu0  ;;  %v548_v42 = vpop.f32.mrb[13].mxu1  ;;  %931 = vmatprep.subr.bf16.mxu1 %v10550_v0 }
 0x176   :  { %v497_v43 = vpop.f32.mrb[14].mxu0  ;;  %v549_v44 = vpop.f32.mrb[14].mxu1 }
 0x177   :  { %v552_v45 = vmax.f32 %v500_v40, %v546_v39  ;;  %v498_v46 = vpop.f32.mrb[15].mxu0  ;;  %v550_v47 = vpop.f32.mrb[15].mxu1 }
 0x178   :  { %932 = vmatpush1.bf16.msra.mxu1 %v10984_v33 }
 0x179   :  { %v553_v48 = vadd.f32 %v10918_v4, %v552_v45  ;;  %933 = vmatprep.subr.bf16.mxu1 %v10550_v0 }
 0x17b   :  { %v554_v50 = vmax.f32 %v553_v48, 0.0 }
 0x17c   :  { %934 = vmatpush1.bf16.msra.mxu1 %v10697_v15 }
 0x17d   :  { %v555_v53 = vpack.c.bf16 %v554_v50, %v554_v50  ;;  %1076 = vmatprep.subr.bf16.mxu1 %v10550_v0  ;;  %v8374_v50 = vld [vmem:[%s14548_s0 + $0xe0] sm:$0xff] }
 0x17f   :  { %9529 = vmatmul.mubr.bf16.vlgmr.msra.gmra.mrb[16].mxu0 %v555_v53  ;;  %948 = vmatmul.mubr.bf16.vlgmr.msra.gmra.mrb[24].mxu1 %v8343_v51 }
 0x180   :  { %761 = vmatpush1.bf16.msra.mxu0 %v10927_v16  ;;  %8333 = vmatprep.mubr.msk.bf16.mxu0 %vm117_vm0, %v8332_v52  ;;  %v8376_v52 = vcombine.high %v8374_v50, %v8374_v50 }
 0x181   :  { %762 = vmatprep.subr.bf16.mxu0 %v10550_v0  ;;  %1077 = vmatpush1.bf16.msra.mxu1 %v10927_v16 }
 0x182   :  { %1078 = vmatprep.subr.bf16.mxu1 %v10550_v0  ;;  %8373 = vmatprep.mubr.msk.bf16.mxu1 %vm117_vm0, %v8372_v13 }
 0x184   :  { %763 = vmatpush1.bf16.msra.mxu0 %v10935_v17 }
 0x185   :  { %764 = vmatprep.subr.bf16.mxu0 %v10550_v0  ;;  %1079 = vmatpush1.bf16.msra.mxu1 %v10935_v17 }
 0x186   :  { %1080 = vmatprep.subr.bf16.mxu1 %v10550_v0 }
 0x188   :  { %765 = vmatpush1.bf16.msra.mxu0 %v10942_v18 }
 0x189   :  { %766 = vmatprep.subr.bf16.mxu0 %v10550_v0  ;;  %1081 = vmatpush1.bf16.msra.mxu1 %v10942_v18 }
 0x18a   :  { %1082 = vmatprep.subr.bf16.mxu1 %v10550_v0 }
 0x18c   :  { %767 = vmatpush1.bf16.msra.mxu0 %v10949_v19 }
 0x18d   :  { %768 = vmatprep.subr.bf16.mxu0 %v10550_v0  ;;  %1083 = vmatpush1.bf16.msra.mxu1 %v10949_v19 }
 0x18e   :  { %1084 = vmatprep.subr.bf16.mxu1 %v10550_v0 }
 0x190   :  { %769 = vmatpush1.bf16.msra.mxu0 %v10956_v20 }
 0x191   :  { %770 = vmatprep.subr.bf16.mxu0 %v10550_v0  ;;  %1085 = vmatpush1.bf16.msra.mxu1 %v10956_v20 }
 0x192   :  { %1086 = vmatprep.subr.bf16.mxu1 %v10550_v0 }
 0x194   :  { %771 = vmatpush1.bf16.msra.mxu0 %v10963_v21 }
 0x195   :  { %772 = vmatprep.subr.bf16.mxu0 %v10550_v0  ;;  %1087 = vmatpush1.bf16.msra.mxu1 %v10963_v21 }
 0x196   :  { %1088 = vmatprep.subr.bf16.mxu1 %v10550_v0 }
 0x198   :  { %773 = vmatpush1.bf16.msra.mxu0 %v10970_v22 }
 0x199   :  { %774 = vmatprep.subr.bf16.mxu0 %v10550_v0  ;;  %1089 = vmatpush1.bf16.msra.mxu1 %v10970_v22 }
 0x19a   :  { %1090 = vmatprep.subr.bf16.mxu1 %v10550_v0 }
 0x19c   :  { %775 = vmatpush1.bf16.msra.mxu0 %v10977_v25 }
 0x19d   :  { %776 = vmatprep.subr.bf16.mxu0 %v10550_v0  ;;  %1091 = vmatpush1.bf16.msra.mxu1 %v10977_v25 }
 0x19e   :  { %1092 = vmatprep.subr.bf16.mxu1 %v10550_v0 }
 0x1a0   :  { %777 = vmatpush1.bf16.msra.mxu0 %v10984_v33 }
 0x1a1   :  { %778 = vmatprep.subr.bf16.mxu0 %v10550_v0  ;;  %1093 = vmatpush1.bf16.msra.mxu1 %v10984_v33 }
 0x1a2   :  { %1094 = vmatprep.subr.bf16.mxu1 %v10550_v0 }
 0x1a4   :  { %779 = vmatpush1.bf16.msra.mxu0 %v10697_v15 }
 0x1a5   :  { %863 = vmatprep.subr.bf16.mxu0 %v10550_v0  ;;  %1095 = vmatpush1.bf16.msra.mxu1 %v10697_v15 }
 0x1a6   :  { %1179 = vmatprep.subr.bf16.mxu1 %v10550_v0 }
 0x1a7   :  { %793 = vmatmul.mubr.bf16.vlgmr.msra.gmra.mrb[20].mxu0 %v8331_v55  ;;  %v8375_v55 = vcombine.low %v8374_v50, %v8374_v50 }
 0x1a8   :  { %864 = vmatpush1.bf16.msra.mxu0 %v10927_v16  ;;  %8341 = vmatprep.mubr.msk.bf16.mxu0 %vm117_vm0, %v8340_v56  ;;  %v8384_v56 = vcombine.high %v8382_v54, %v8382_v54 }
 0x1a9   :  { %865 = vmatprep.subr.bf16.mxu0 %v10550_v0  ;;  %1109 = vmatmul.mubr.bf16.vlgmr.msra.gmra.mrb[28].mxu1 %v8371_v14 }
 0x1aa   :  { %1180 = vmatpush1.bf16.msra.mxu1 %v10927_v16  ;;  %8381 = vmatprep.mubr.msk.bf16.mxu1 %vm117_vm0, %v8380_v32 }
 0x1ab   :  { %1181 = vmatprep.subr.bf16.mxu1 %v10550_v0 }
 0x1ac   :  { %866 = vmatpush1.bf16.msra.mxu0 %v10935_v17 }
 0x1ad   :  { %867 = vmatprep.subr.bf16.mxu0 %v10550_v0 }
 0x1ae   :  { %1182 = vmatpush1.bf16.msra.mxu1 %v10935_v17 }
 0x1af   :  { %1183 = vmatprep.subr.bf16.mxu1 %v10550_v0 }
 0x1b0   :  { %868 = vmatpush1.bf16.msra.mxu0 %v10942_v18 }
 0x1b1   :  { %869 = vmatprep.subr.bf16.mxu0 %v10550_v0 }
 0x1b2   :  { %1184 = vmatpush1.bf16.msra.mxu1 %v10942_v18 }
 0x1b3   :  { %1185 = vmatprep.subr.bf16.mxu1 %v10550_v0 }
 0x1b4   :  { %870 = vmatpush1.bf16.msra.mxu0 %v10949_v19 }
 0x1b5   :  { %871 = vmatprep.subr.bf16.mxu0 %v10550_v0 }
 0x1b6   :  { %1186 = vmatpush1.bf16.msra.mxu1 %v10949_v19 }
 0x1b7   :  { %1187 = vmatprep.subr.bf16.mxu1 %v10550_v0 }
 0x1b8   :  { %872 = vmatpush1.bf16.msra.mxu0 %v10956_v20 }
 0x1b9   :  { %873 = vmatprep.subr.bf16.mxu0 %v10550_v0 }
 0x1ba   :  { %1188 = vmatpush1.bf16.msra.mxu1 %v10956_v20 }
 0x1bb   :  { %1189 = vmatprep.subr.bf16.mxu1 %v10550_v0 }
 0x1bc   :  { %874 = vmatpush1.bf16.msra.mxu0 %v10963_v21 }
 0x1bd   :  { %875 = vmatprep.subr.bf16.mxu0 %v10550_v0 }
 0x1be   :  { %1190 = vmatpush1.bf16.msra.mxu1 %v10963_v21 }
 0x1bf   :  { %1191 = vmatprep.subr.bf16.mxu1 %v10550_v0 }
 0x1c0   :  { %876 = vmatpush1.bf16.msra.mxu0 %v10970_v22 }
 0x1c1   :  { %877 = vmatprep.subr.bf16.mxu0 %v10550_v0 }
 0x1c2   :  { %1192 = vmatpush1.bf16.msra.mxu1 %v10970_v22 }
 0x1c3   :  { %1193 = vmatprep.subr.bf16.mxu1 %v10550_v0 }
 0x1c4   :  { %878 = vmatpush1.bf16.msra.mxu0 %v10977_v25 }
 0x1c5   :  { %879 = vmatprep.subr.bf16.mxu0 %v10550_v0 }
 0x1c6   :  { %1194 = vmatpush1.bf16.msra.mxu1 %v10977_v25 }
 0x1c7   :  { %1195 = vmatprep.subr.bf16.mxu1 %v10550_v0 }
 0x1c8   :  { %880 = vmatpush1.bf16.msra.mxu0 %v10984_v33 }
 0x1c9   :  { %881 = vmatprep.subr.bf16.mxu0 %v10550_v0 }
 0x1ca   :  { %1196 = vmatpush1.bf16.msra.mxu1 %v10984_v33 }
 0x1cb   :  { %1197 = vmatprep.subr.bf16.mxu1 %v10550_v0 }
 0x1cc   :  { %882 = vmatpush1.bf16.msra.mxu0 %v10697_v15 }
 0x1cd   :  { %9552 = vmatprep.subr.bf16.mxu0 %v10551_v37 }
 0x1ce   :  { %1198 = vmatpush1.bf16.msra.mxu1 %v10697_v15 }
 0x1cf   :  { %896 = vmatmul.mubr.bf16.vlgmr.msra.gmra.mrb[24].mxu0 %v8339_v57  ;;  %9572 = vmatprep.subr.bf16.mxu1 %v10551_v37  ;;  %v8383_v57 = vcombine.low %v8382_v54, %v8382_v54 }
 0x1d0   :  { %9568 = vmatprep.mubr.msk.bf16.mxu0 %vm10552_vm2, %v10551_v37  ;;  %9553 = vmatpush3.bf16.msra.mxu0 %v10105_v58 }
 0x1d1   :  { %9554 = vmatprep.subr.bf16.mxu0 %v10551_v37  ;;  %1212 = vmatmul.mubr.bf16.vlgmr.msra.gmra.mrb[32].mxu1 %v8379_v36 }
 0x1d2   :  { %9588 = vmatprep.mubr.msk.bf16.mxu1 %vm10552_vm2, %v10551_v37 }
 0x1d4   :  { %9555 = vmatpush3.bf16.msra.mxu0 %v10106_v59 }
 0x1d5   :  { %9556 = vmatprep.subr.bf16.mxu0 %v10551_v37 }
 0x1d8   :  { %9557 = vmatpush3.bf16.msra.mxu0 %v10107_v62 }
 0x1d9   :  { %9558 = vmatprep.subr.bf16.mxu0 %v10551_v37 }
 0x1dc   :  { %9559 = vmatpush3.bf16.msra.mxu0 %v10108_v2  ;;  %v10122_v2 = vld [vmem:[%s14549_s3 + $0xc8] sm:$0xff]  }
 0x1dd   :  { %9560 = vmatprep.subr.bf16.mxu0 %v10551_v37 }
 0x1e0   :  { %9561 = vmatpush3.bf16.msra.mxu0 %v10109_v3 }
 0x1e1   :  { %9562 = vmatprep.subr.bf16.mxu0 %v10551_v37 }
 0x1e4   :  { %9563 = vmatpush3.bf16.msra.mxu0 %v10110_v5 }
 0x1e5   :  { %9564 = vmatprep.subr.bf16.mxu0 %v10551_v37 }
 0x1e8   :  { %9565 = vmatpush3.bf16.msra.mxu0 %v10111_v6  ;;  %v10123_v6 = vld [vmem:[%s14549_s3 + $0xd0] sm:$0xff]  }
 0x1e9   :  { %9566 = vmatprep.subr.bf16.mxu0 %v10551_v37 }
 0x1ec   :  { %9567 = vmatpush3.bf16.msra.mxu0 %v10112_v7  ;;  %v10124_v7 = vld [vmem:[%s14549_s3 + $0xd8] sm:$0xff]  }
 0x1ed   :  { %1127 = vmatprep.subr.bf16.mxu0 %v10550_v0 }
 0x202   :  { %v743_v60 = vpop.f32.mrb[16].mxu1 }
 0x203   :  { %v9550_v61 = vpop.f32.mrb[17].mxu1 }
 0x204   :  { %v746_v63 = vpop.f32.mrb[18].mxu1 }
 0x205   :  { %v9551_v1 = vpop.f32.mrb[19].mxu1  ;;  %v10121_v63 = vld [vmem:[%s14549_s3 + $0xc0] sm:$0xff]  }
 0x206   :  { %9573 = vmatpush3.bf16.msra.mxu1 %v10121_v63  ;;  %v10139_v63 = vld [vmem:[%s14549_s3 + $0x110] sm:$0xff]  }
 0x207   :  { %9574 = vmatprep.subr.bf16.mxu1 %v10551_v37 }
 0x20a   :  { %9575 = vmatpush3.bf16.msra.mxu1 %v10122_v2  ;;  %v10141_v2 = vld [vmem:[%s14549_s3 + $0x120] sm:$0xff]  }
 0x20b   :  { %9576 = vmatprep.subr.bf16.mxu1 %v10551_v37 }
 0x20e   :  { %9577 = vmatpush3.bf16.msra.mxu1 %v10123_v6  ;;  %v10144_v6 = vld [vmem:[%s14549_s3 + $0x138] sm:$0xff]  }
 0x20f   :  { %9578 = vmatprep.subr.bf16.mxu1 %v10551_v37 }
 0x212   :  { %9579 = vmatpush3.bf16.msra.mxu1 %v10124_v7  ;;  %v8450_v7 = vld [vmem:[%s14548_s0 + $0x28] sm:$0xff] }
 0x213   :  { %9580 = vmatprep.subr.bf16.mxu1 %v10551_v37 }
 0x22a   :  { %v845_v8 = vpop.f32.mrb[20].mxu1 }
 0x22b   :  { %v847_v9 = vpop.f32.mrb[21].mxu1 }
 0x22c   :  { %v848_v10 = vpop.f32.mrb[22].mxu1  ;;  %v10126_v9 = vld [vmem:[%s14549_s3 + $0xe8] sm:$0xff]  }
 0x22d   :  { %v849_v12 = vpop.f32.mrb[23].mxu1  ;;  %v10127_v10 = vld [vmem:[%s14549_s3 + $0xf0] sm:$0xff]  }
 0x22e   :  { %v8410_v12 = vld [vmem:[%s14548_s0 + $0x20] sm:$0xff] }
 0x22f   :  { %v8412_v13 = vcombine.high %v8410_v12, %v8410_v12  ;;  %v8411_v14 = vcombine.low %v8410_v12, %v8410_v12 }
 0x252   :  { %v655_v23 = vpop.f32.mrb[16].mxu0  ;;  %v949_v24 = vpop.f32.mrb[24].mxu1 }
 0x253   :  { %v11139_v26 = vadd.f32 %v743_v60, %v655_v23  ;;  %v9530_v27 = vpop.f32.mrb[17].mxu0  ;;  %v951_v28 = vpop.f32.mrb[25].mxu1  ;;  %v8418_v23 = vld [vmem:[%s14548_s0 + $0x1b0] sm:$0xff] }
 0x254   :  { %v658_v30 = vpop.f32.mrb[18].mxu0  ;;  %v952_v31 = vpop.f32.mrb[26].mxu1  ;;  %v8420_v27 = vcombine.high %v8418_v23, %v8418_v23 }
 0x255   :  { %v9531_v34 = vpop.f32.mrb[19].mxu0  ;;  %v953_v35 = vpop.f32.mrb[27].mxu1  ;;  %v8419_v30 = vcombine.low %v8418_v23, %v8418_v23 }
 0x27a   :  { %v794_v38 = vpop.f32.mrb[20].mxu0 }
 0x27b   :  { %v851_v39 = vmax.f32 %v794_v38, %v845_v8  ;;  %v796_v40 = vpop.f32.mrb[21].mxu0  ;;  %v10125_v8 = vld [vmem:[%s14549_s3 + $0xe0] sm:$0xff]  }
 0x27c   :  { %v797_v41 = vpop.f32.mrb[22].mxu0  ;;  %v11201_v58 = vpop.f32.mrb[28].mxu1  ;;  %9581 = vmatpush3.bf16.msra.mxu1 %v10125_v8  ;;  %v8452_v8 = vcombine.high %v8450_v7, %v8450_v7 }
 0x27d   :  { %v798_v42 = vpop.f32.mrb[23].mxu0  ;;  %v1112_v59 = vpop.f32.mrb[29].mxu1  ;;  %9582 = vmatprep.subr.bf16.mxu1 %v10551_v37 }
 0x27e   :  { %v1113_v60 = vpop.f32.mrb[30].mxu1 }
 0x27f   :  { %v1114_v61 = vpop.f32.mrb[31].mxu1  ;;  %v10138_v60 = vld [vmem:[%s14549_s3 + $0x108] sm:$0xff]  }
 0x280   :  { %9583 = vmatpush3.bf16.msra.mxu1 %v10126_v9  ;;  %v8451_v9 = vcombine.low %v8450_v7, %v8450_v7 }
 0x281   :  { %9584 = vmatprep.subr.bf16.mxu1 %v10551_v37 }
 0x284   :  { %9585 = vmatpush3.bf16.msra.mxu1 %v10127_v10 }
 0x285   :  { %9586 = vmatprep.subr.bf16.mxu1 %v10551_v37 }
 0x288   :  { %9587 = vmatpush3.bf16.msra.mxu1 %v10128_v11 }
 0x289   :  { %1443 = vmatprep.subr.bf16.mxu1 %v10550_v0 }
 0x2a2   :  { %v897_v43 = vpop.f32.mrb[24].mxu0 }
 0x2a3   :  { %v903_v44 = vmax.f32 %v851_v39, %v897_v43  ;;  %v899_v45 = vpop.f32.mrb[25].mxu0 }
 0x2a4   :  { %v900_v46 = vpop.f32.mrb[26].mxu0  ;;  %v11220_v62 = vpop.f32.mrb[32].mxu1 }
 0x2a5   :  { %v955_v47 = vmax.f32 %v903_v44, %v949_v24  ;;  %v901_v48 = vpop.f32.mrb[27].mxu0  ;;  %v1215_v1 = vpop.f32.mrb[33].mxu1  ;;  %v8414_v46 = vld [vmem:[%s14548_s0 + $0xe8] sm:$0xff] }
 0x2a6   :  { %v1216_v3 = vpop.f32.mrb[34].mxu1  ;;  %v8416_v48 = vcombine.high %v8414_v46, %v8414_v46  ;;  %v8415_v50 = vcombine.low %v8414_v46, %v8414_v46  ;;  %v10140_v1 = vld [vmem:[%s14549_s3 + $0x118] sm:$0xff]   ;;  %v8462_v46 = vld [vmem:[%s14548_s0 + $0x280] sm:$0xff] }
 0x2a7   :  { %v956_v49 = vadd.f32 %v10918_v4, %v955_v47  ;;  %v1217_v5 = vpop.f32.mrb[35].mxu1  ;;  %v10142_v3 = vld [vmem:[%s14549_s3 + $0x128] sm:$0xff]  }
 0x2a8   :  { %v10143_v5 = vld [vmem:[%s14549_s3 + $0x130] sm:$0xff]  }
 0x2a9   :  { %v957_v51 = vmax.f32 %v956_v49, 0.0 }
 0x2ab   :  { %v958_v53 = vpack.c.bf16 %v957_v51, %v957_v51 }
 0x2ad   :  { %9569 = vmatmul.mubr.bf16.vlgmr.msra.gmra.mrb[28].mxu0 %v958_v53 }
 0x2ae   :  { %1128 = vmatpush1.bf16.msra.mxu0 %v10927_v16  ;;  %8377 = vmatprep.mubr.msk.bf16.mxu0 %vm117_vm0, %v8376_v52 }
 0x2af   :  { %1129 = vmatprep.subr.bf16.mxu0 %v10550_v0 }
 0x2b2   :  { %1130 = vmatpush1.bf16.msra.mxu0 %v10935_v17 }
 0x2b3   :  { %1131 = vmatprep.subr.bf16.mxu0 %v10550_v0 }
 0x2b6   :  { %1132 = vmatpush1.bf16.msra.mxu0 %v10942_v18 }
 0x2b7   :  { %1133 = vmatprep.subr.bf16.mxu0 %v10550_v0 }
 0x2ba   :  { %1134 = vmatpush1.bf16.msra.mxu0 %v10949_v19 }
 0x2bb   :  { %1135 = vmatprep.subr.bf16.mxu0 %v10550_v0 }
 0x2be   :  { %1136 = vmatpush1.bf16.msra.mxu0 %v10956_v20 }
 0x2bf   :  { %1137 = vmatprep.subr.bf16.mxu0 %v10550_v0 }
 0x2c2   :  { %1138 = vmatpush1.bf16.msra.mxu0 %v10963_v21 }
 0x2c3   :  { %1139 = vmatprep.subr.bf16.mxu0 %v10550_v0 }
 0x2c6   :  { %1140 = vmatpush1.bf16.msra.mxu0 %v10970_v22 }
 0x2c7   :  { %1141 = vmatprep.subr.bf16.mxu0 %v10550_v0 }
 0x2ca   :  { %1142 = vmatpush1.bf16.msra.mxu0 %v10977_v25 }
 0x2cb   :  { %1143 = vmatprep.subr.bf16.mxu0 %v10550_v0 }
 0x2ce   :  { %1144 = vmatpush1.bf16.msra.mxu0 %v10984_v33 }
 0x2cf   :  { %1145 = vmatprep.subr.bf16.mxu0 %v10550_v0 }
 0x2d2   :  { %1146 = vmatpush1.bf16.msra.mxu0 %v10697_v15 }
 0x2d3   :  { %1231 = vmatprep.subr.bf16.mxu0 %v10550_v0 }
 0x2d5   :  { %1160 = vmatmul.mubr.bf16.vlgmr.msra.gmra.mrb[32].mxu0 %v8375_v55 }
 0x2d6   :  { %1232 = vmatpush1.bf16.msra.mxu0 %v10927_v16  ;;  %8385 = vmatprep.mubr.msk.bf16.mxu0 %vm117_vm0, %v8384_v56 }
 0x2d7   :  { %1233 = vmatprep.subr.bf16.mxu0 %v10550_v0 }
 0x2da   :  { %1234 = vmatpush1.bf16.msra.mxu0 %v10935_v17 }
 0x2db   :  { %1235 = vmatprep.subr.bf16.mxu0 %v10550_v0 }
 0x2de   :  { %1236 = vmatpush1.bf16.msra.mxu0 %v10942_v18 }
 0x2df   :  { %1237 = vmatprep.subr.bf16.mxu0 %v10550_v0 }
 0x2e2   :  { %1238 = vmatpush1.bf16.msra.mxu0 %v10949_v19 }
 0x2e3   :  { %1239 = vmatprep.subr.bf16.mxu0 %v10550_v0 }
 0x2e6   :  { %1240 = vmatpush1.bf16.msra.mxu0 %v10956_v20 }
 0x2e7   :  { %1241 = vmatprep.subr.bf16.mxu0 %v10550_v0 }
 0x2ea   :  { %1242 = vmatpush1.bf16.msra.mxu0 %v10963_v21 }
 0x2eb   :  { %1243 = vmatprep.subr.bf16.mxu0 %v10550_v0 }
 0x2ee   :  { %1244 = vmatpush1.bf16.msra.mxu0 %v10970_v22 }
 0x2ef   :  { %1245 = vmatprep.subr.bf16.mxu0 %v10550_v0 }
 0x2f2   :  { %1246 = vmatpush1.bf16.msra.mxu0 %v10977_v25 }
 0x2f3   :  { %1247 = vmatprep.subr.bf16.mxu0 %v10550_v0 }
 0x2f6   :  { %1248 = vmatpush1.bf16.msra.mxu0 %v10984_v33 }
 0x2f7   :  { %1249 = vmatprep.subr.bf16.mxu0 %v10550_v0 }
 0x2fa   :  { %1250 = vmatpush1.bf16.msra.mxu0 %v10697_v15 }
 0x2fb   :  { %1392 = vmatprep.subr.bf16.mxu0 %v10550_v0 }
 0x2fd   :  { %1264 = vmatmul.mubr.bf16.vlgmr.msra.gmra.mrb[36].mxu0 %v8383_v57 }
 0x2fe   :  { %1393 = vmatpush1.bf16.msra.mxu0 %v10927_v16  ;;  %8413 = vmatprep.mubr.msk.bf16.mxu0 %vm117_vm0, %v8412_v13 }
 0x2ff   :  { %1394 = vmatprep.subr.bf16.mxu0 %v10550_v0 }
 0x302   :  { %1395 = vmatpush1.bf16.msra.mxu0 %v10935_v17 }
 0x303   :  { %1396 = vmatprep.subr.bf16.mxu0 %v10550_v0 }
 0x306   :  { %1397 = vmatpush1.bf16.msra.mxu0 %v10942_v18 }
 0x307   :  { %1398 = vmatprep.subr.bf16.mxu0 %v10550_v0 }
 0x30a   :  { %1399 = vmatpush1.bf16.msra.mxu0 %v10949_v19 }
 0x30b   :  { %1400 = vmatprep.subr.bf16.mxu0 %v10550_v0 }
 0x30e   :  { %1401 = vmatpush1.bf16.msra.mxu0 %v10956_v20 }
 0x30f   :  { %1402 = vmatprep.subr.bf16.mxu0 %v10550_v0 }
 0x312   :  { %1403 = vmatpush1.bf16.msra.mxu0 %v10963_v21 }
 0x313   :  { %1404 = vmatprep.subr.bf16.mxu0 %v10550_v0 }
 0x316   :  { %1405 = vmatpush1.bf16.msra.mxu0 %v10970_v22 }
 0x317   :  { %1406 = vmatprep.subr.bf16.mxu0 %v10550_v0 }
 0x31a   :  { %1407 = vmatpush1.bf16.msra.mxu0 %v10977_v25 }
 0x31b   :  { %1408 = vmatprep.subr.bf16.mxu0 %v10550_v0 }
 0x31e   :  { %1409 = vmatpush1.bf16.msra.mxu0 %v10984_v33 }
 0x31f   :  { %1410 = vmatprep.subr.bf16.mxu0 %v10550_v0 }
 0x322   :  { %1411 = vmatpush1.bf16.msra.mxu0 %v10697_v15 }
 0x323   :  { %1495 = vmatprep.subr.bf16.mxu0 %v10550_v0 }
 0x325   :  { %1425 = vmatmul.mubr.bf16.vlgmr.msra.gmra.mrb[40].mxu0 %v8411_v14 }
 0x326   :  { %1496 = vmatpush1.bf16.msra.mxu0 %v10927_v16  ;;  %8421 = vmatprep.mubr.msk.bf16.mxu0 %vm117_vm0, %v8420_v27 }
 0x327   :  { %1497 = vmatprep.subr.bf16.mxu0 %v10550_v0 }
 0x32a   :  { %1498 = vmatpush1.bf16.msra.mxu0 %v10935_v17 }
 0x32b   :  { %1499 = vmatprep.subr.bf16.mxu0 %v10550_v0 }
 0x32e   :  { %1500 = vmatpush1.bf16.msra.mxu0 %v10942_v18 }
 0x32f   :  { %1501 = vmatprep.subr.bf16.mxu0 %v10550_v0 }
 0x332   :  { %1502 = vmatpush1.bf16.msra.mxu0 %v10949_v19 }
 0x333   :  { %1503 = vmatprep.subr.bf16.mxu0 %v10550_v0 }
 0x336   :  { %1504 = vmatpush1.bf16.msra.mxu0 %v10956_v20 }
 0x337   :  { %1505 = vmatprep.subr.bf16.mxu0 %v10550_v0 }
 0x33a   :  { %1506 = vmatpush1.bf16.msra.mxu0 %v10963_v21 }
 0x33b   :  { %1507 = vmatprep.subr.bf16.mxu0 %v10550_v0 }
 0x33e   :  { %1508 = vmatpush1.bf16.msra.mxu0 %v10970_v22 }
 0x33f   :  { %1509 = vmatprep.subr.bf16.mxu0 %v10550_v0 }
 0x342   :  { %1510 = vmatpush1.bf16.msra.mxu0 %v10977_v25 }
 0x343   :  { %1511 = vmatprep.subr.bf16.mxu0 %v10550_v0 }
 0x346   :  { %1512 = vmatpush1.bf16.msra.mxu0 %v10984_v33 }
 0x347   :  { %1513 = vmatprep.subr.bf16.mxu0 %v10550_v0 }
 0x34a   :  { %1514 = vmatpush1.bf16.msra.mxu0 %v10697_v15 }
 0x34b   :  { %9592 = vmatprep.subr.bf16.mxu0 %v10551_v37 }
 0x34d   :  { %1528 = vmatmul.mubr.bf16.vlgmr.msra.gmra.mrb[44].mxu0 %v8419_v30 }
 0x34e   :  { %9608 = vmatprep.mubr.msk.bf16.mxu0 %vm10552_vm2, %v10551_v37 }
 0x380   :  { %v1058_v24 = vpop.f32.mrb[28].mxu0 }
 0x381   :  { %v11280_v28 = vadd.f32 %v1058_v24, %v11139_v26  ;;  %v9570_v29 = vpop.f32.mrb[29].mxu0 }
 0x382   :  { %v1061_v31 = vpop.f32.mrb[30].mxu0  ;;  %v11432_v29 = vld [vmem:[%s14550_s2] ss:$0 sm:$0xff] }
 0x383   :  { %v9571_v32 = vpop.f32.mrb[31].mxu0 }
 0x384   :  { %v8454_v32 = vld [vmem:[%s14548_s0 + $0xf0] sm:$0xff] }
 0x3a8   :  { %v1161_v34 = vpop.f32.mrb[32].mxu0 }
 0x3a9   :  { %v1167_v35 = vmax.f32 %v11201_v58, %v1161_v34  ;;  %v1163_v36 = vpop.f32.mrb[33].mxu0  ;;  %v10137_v58 = vld [vmem:[%s14549_s3 + $0x100] sm:$0xff]  }
 0x3aa   :  { %v1164_v26 = vpop.f32.mrb[34].mxu0  ;;  %9593 = vmatpush3.bf16.msra.mxu0 %v10137_v58 }
 0x3ab   :  { %v1219_v38 = vmax.f32 %v1167_v35, %v11220_v62  ;;  %v1165_v39 = vpop.f32.mrb[35].mxu0  ;;  %9594 = vmatprep.subr.bf16.mxu0 %v10551_v37  ;;  %v8456_v35 = vcombine.high %v8454_v32, %v8454_v32  ;;  %v11441_v26 = vld [vmem:[%s14547_s1] sm:$0xff]  }
 0x3ac   :  { %v11456_v39 = vld [vmem:[%s14547_s1 + $0x10] sm:$0xff]  }
 0x3ae   :  { %9595 = vmatpush3.bf16.msra.mxu0 %v10138_v60  ;;  %v10156_v60 = vld [vmem:[%s14549_s3 + $0x158] sm:$0xff]  }
 0x3af   :  { %9596 = vmatprep.subr.bf16.mxu0 %v10551_v37 }
 0x3b2   :  { %9597 = vmatpush3.bf16.msra.mxu0 %v10139_v63  ;;  %v10159_v63 = vld [vmem:[%s14549_s3 + $0x170] sm:$0xff]  }
 0x3b3   :  { %9598 = vmatprep.subr.bf16.mxu0 %v10551_v37 }
 0x3b6   :  { %9599 = vmatpush3.bf16.msra.mxu0 %v10140_v1  ;;  %v10160_v1 = vld [vmem:[%s14549_s3 + $0x178] sm:$0xff]  }
 0x3b7   :  { %9600 = vmatprep.subr.bf16.mxu0 %v10551_v37 }
 0x3ba   :  { %9601 = vmatpush3.bf16.msra.mxu0 %v10141_v2  ;;  %v8490_v2 = vld [vmem:[%s14548_s0 + $0x30] sm:$0xff] }
 0x3bb   :  { %9602 = vmatprep.subr.bf16.mxu0 %v10551_v37 }
 0x3be   :  { %9603 = vmatpush3.bf16.msra.mxu0 %v10142_v3  ;;  %v8492_v3 = vcombine.high %v8490_v2, %v8490_v2 }
 0x3bf   :  { %9604 = vmatprep.subr.bf16.mxu0 %v10551_v37 }
 0x3c2   :  { %9605 = vmatpush3.bf16.msra.mxu0 %v10143_v5  ;;  %v8491_v5 = vcombine.low %v8490_v2, %v8490_v2 }
 0x3c3   :  { %9606 = vmatprep.subr.bf16.mxu0 %v10551_v37 }
 0x3c6   :  { %9607 = vmatpush3.bf16.msra.mxu0 %v10144_v6  ;;  %v8498_v6 = vld [vmem:[%s14548_s0 + $0x1c0] sm:$0xff] }
 0x3c7   :  { %1759 = vmatprep.subr.bf16.mxu0 %v10550_v0 }
 0x3d0   :  { %v1265_v40 = vpop.f32.mrb[36].mxu0 }
 0x3d1   :  { %v1271_v41 = vmax.f32 %v1219_v38, %v1265_v40  ;;  %v1267_v42 = vpop.f32.mrb[37].mxu0  ;;  %v11449_v38 = vld [vmem:[%s14547_s1 + $0x8] sm:$0xff]   ;;  %v11463_v40 = vld [vmem:[%s14547_s1 + $0x18] sm:$0xff]  }
 0x3d2   :  { %v1268_v43 = vpop.f32.mrb[38].mxu0  ;;  %v11477_v42 = vld [vmem:[%s14547_s1 + $0x28] sm:$0xff]  }
 0x3d3   :  { %v1272_v44 = vadd.f32 %v10918_v4, %v1271_v41  ;;  %v1269_v45 = vpop.f32.mrb[39].mxu0  ;;  %v8422_v4 = vld [vmem:[%s14548_s0 + $0x278] sm:$0xff]  ;;  %v11470_v41 = vld [vmem:[%s14547_s1 + $0x20] sm:$0xff]   ;;  %v11484_v43 = vld [vmem:[%s14547_s1 + $0x30] sm:$0xff]  }
 0x3d4   :  { %v8424_v51 = vcombine.high %v8422_v4, %v8422_v4  ;;  %v8423_v52 = vcombine.low %v8422_v4, %v8422_v4  ;;  %v11498_v45 = vld [vmem:[%s14547_s1 + $0x40] sm:$0xff]  }
 0x3d5   :  { %v1273_v47 = vmax.f32 %v1272_v44, 0.0  ;;  %v11491_v44 = vld [vmem:[%s14547_s1 + $0x38] sm:$0xff]  }
 0x3d7   :  { %v1274_v49 = vpack.c.bf16 %v1273_v47, %v1273_v47  ;;  %v8455_v47 = vcombine.low %v8454_v32, %v8454_v32  ;;  %v8502_v32 = vld [vmem:[%s14548_s0 + $0x288] sm:$0xff] }
 0x3d9   :  { %9589 = vmatmul.mubr.bf16.vlgmr.msra.gmra.mrb[36].mxu1 %v1274_v49  ;;  %v8463_v49 = vcombine.low %v8462_v46, %v8462_v46 }
 0x3da   :  { %1444 = vmatpush1.bf16.msra.mxu1 %v10927_v16  ;;  %8417 = vmatprep.mubr.msk.bf16.mxu1 %vm117_vm0, %v8416_v48  ;;  %v8464_v48 = vcombine.high %v8462_v46, %v8462_v46 }
 0x3db   :  { %1445 = vmatprep.subr.bf16.mxu1 %v10550_v0 }
 0x3de   :  { %1446 = vmatpush1.bf16.msra.mxu1 %v10935_v17 }
 0x3df   :  { %1447 = vmatprep.subr.bf16.mxu1 %v10550_v0 }
 0x3e2   :  { %1448 = vmatpush1.bf16.msra.mxu1 %v10942_v18 }
 0x3e3   :  { %1449 = vmatprep.subr.bf16.mxu1 %v10550_v0 }
 0x3e6   :  { %1450 = vmatpush1.bf16.msra.mxu1 %v10949_v19 }
 0x3e7   :  { %1451 = vmatprep.subr.bf16.mxu1 %v10550_v0 }
 0x3ea   :  { %1452 = vmatpush1.bf16.msra.mxu1 %v10956_v20 }
 0x3eb   :  { %1453 = vmatprep.subr.bf16.mxu1 %v10550_v0 }
 0x3ee   :  { %1454 = vmatpush1.bf16.msra.mxu1 %v10963_v21 }
 0x3ef   :  { %1455 = vmatprep.subr.bf16.mxu1 %v10550_v0 }
 0x3f2   :  { %1456 = vmatpush1.bf16.msra.mxu1 %v10970_v22 }
 0x3f3   :  { %1457 = vmatprep.subr.bf16.mxu1 %v10550_v0 }
 0x3f6   :  { %1458 = vmatpush1.bf16.msra.mxu1 %v10977_v25 }
 0x3f7   :  { %1459 = vmatprep.subr.bf16.mxu1 %v10550_v0 }
 0x3f8   :  { %v11341_v53 = vpop.f32.mrb[40].mxu0 }
 0x3f9   :  { %v1428_v54 = vpop.f32.mrb[41].mxu0 }
 0x3fa   :  { %1460 = vmatpush1.bf16.msra.mxu1 %v10984_v33  ;;  %v1429_v55 = vpop.f32.mrb[42].mxu0  ;;  %v10153_v54 = vld [vmem:[%s14549_s3 + $0x140] sm:$0xff]  }
 0x3fb   :  { %1461 = vmatprep.subr.bf16.mxu1 %v10550_v0  ;;  %v1430_v56 = vpop.f32.mrb[43].mxu0 }
 0x3fc   :  { %v10154_v56 = vld [vmem:[%s14549_s3 + $0x148] sm:$0xff]  }
 0x3fe   :  { %1462 = vmatpush1.bf16.msra.mxu1 %v10697_v15 }
 0x3ff   :  { %1547 = vmatprep.subr.bf16.mxu1 %v10550_v0 }
 0x401   :  { %1476 = vmatmul.mubr.bf16.vlgmr.msra.gmra.mrb[40].mxu1 %v8415_v50 }
 0x402   :  { %1548 = vmatpush1.bf16.msra.mxu1 %v10927_v16  ;;  %8425 = vmatprep.mubr.msk.bf16.mxu1 %vm117_vm0, %v8424_v51 }
 0x403   :  { %1549 = vmatprep.subr.bf16.mxu1 %v10550_v0 }
 0x406   :  { %1550 = vmatpush1.bf16.msra.mxu1 %v10935_v17 }
 0x407   :  { %1551 = vmatprep.subr.bf16.mxu1 %v10550_v0 }
 0x40a   :  { %1552 = vmatpush1.bf16.msra.mxu1 %v10942_v18 }
 0x40b   :  { %1553 = vmatprep.subr.bf16.mxu1 %v10550_v0 }
 0x40e   :  { %1554 = vmatpush1.bf16.msra.mxu1 %v10949_v19 }
 0x40f   :  { %1555 = vmatprep.subr.bf16.mxu1 %v10550_v0 }
 0x412   :  { %1556 = vmatpush1.bf16.msra.mxu1 %v10956_v20 }
 0x413   :  { %1557 = vmatprep.subr.bf16.mxu1 %v10550_v0 }
 0x416   :  { %1558 = vmatpush1.bf16.msra.mxu1 %v10963_v21 }
 0x417   :  { %1559 = vmatprep.subr.bf16.mxu1 %v10550_v0 }
 0x41a   :  { %1560 = vmatpush1.bf16.msra.mxu1 %v10970_v22 }
 0x41b   :  { %1561 = vmatprep.subr.bf16.mxu1 %v10550_v0 }
 0x41e   :  { %1562 = vmatpush1.bf16.msra.mxu1 %v10977_v25 }
 0x41f   :  { %1563 = vmatprep.subr.bf16.mxu1 %v10550_v0 }
 0x420   :  { %v11360_v57 = vpop.f32.mrb[44].mxu0 }
 0x421   :  { %v1531_v59 = vpop.f32.mrb[45].mxu0 }
 0x422   :  { %1564 = vmatpush1.bf16.msra.mxu1 %v10984_v33  ;;  %v1532_v61 = vpop.f32.mrb[46].mxu0  ;;  %v10155_v59 = vld [vmem:[%s14549_s3 + $0x150] sm:$0xff]  }
 0x423   :  { %1565 = vmatprep.subr.bf16.mxu1 %v10550_v0  ;;  %v1533_v62 = vpop.f32.mrb[47].mxu0  ;;  %v10157_v61 = vld [vmem:[%s14549_s3 + $0x160] sm:$0xff]  }
 0x424   :  { %v10158_v62 = vld [vmem:[%s14549_s3 + $0x168] sm:$0xff]  }
 0x426   :  { %1566 = vmatpush1.bf16.msra.mxu1 %v10697_v15 }
 0x427   :  { %1708 = vmatprep.subr.bf16.mxu1 %v10550_v0 }
 0x429   :  { %1580 = vmatmul.mubr.bf16.vlgmr.msra.gmra.mrb[44].mxu1 %v8423_v52 }
 0x42a   :  { %1709 = vmatpush1.bf16.msra.mxu1 %v10927_v16  ;;  %8453 = vmatprep.mubr.msk.bf16.mxu1 %vm117_vm0, %v8452_v8  ;;  %v8500_v8 = vcombine.high %v8498_v6, %v8498_v6 }
 0x42b   :  { %1710 = vmatprep.subr.bf16.mxu1 %v10550_v0 }
 0x42e   :  { %1711 = vmatpush1.bf16.msra.mxu1 %v10935_v17 }
 0x42f   :  { %1712 = vmatprep.subr.bf16.mxu1 %v10550_v0 }
 0x432   :  { %1713 = vmatpush1.bf16.msra.mxu1 %v10942_v18 }
 0x433   :  { %1714 = vmatprep.subr.bf16.mxu1 %v10550_v0 }
 0x436   :  { %1715 = vmatpush1.bf16.msra.mxu1 %v10949_v19 }
 0x437   :  { %1716 = vmatprep.subr.bf16.mxu1 %v10550_v0 }
 0x43a   :  { %1717 = vmatpush1.bf16.msra.mxu1 %v10956_v20 }
 0x43b   :  { %1718 = vmatprep.subr.bf16.mxu1 %v10550_v0 }
 0x43e   :  { %1719 = vmatpush1.bf16.msra.mxu1 %v10963_v21 }
 0x43f   :  { %1720 = vmatprep.subr.bf16.mxu1 %v10550_v0 }
 0x442   :  { %1721 = vmatpush1.bf16.msra.mxu1 %v10970_v22 }
 0x443   :  { %1722 = vmatprep.subr.bf16.mxu1 %v10550_v0 }
 0x446   :  { %1723 = vmatpush1.bf16.msra.mxu1 %v10977_v25 }
 0x447   :  { %1724 = vmatprep.subr.bf16.mxu1 %v10550_v0 }
 0x44a   :  { %1725 = vmatpush1.bf16.msra.mxu1 %v10984_v33 }
 0x44b   :  { %1726 = vmatprep.subr.bf16.mxu1 %v10550_v0 }
 0x44e   :  { %1727 = vmatpush1.bf16.msra.mxu1 %v10697_v15 }
 0x44f   :  { %1811 = vmatprep.subr.bf16.mxu1 %v10550_v0 }
 0x451   :  { %1741 = vmatmul.mubr.bf16.vlgmr.msra.gmra.mrb[48].mxu1 %v8451_v9 }
 0x452   :  { %1812 = vmatpush1.bf16.msra.mxu1 %v10927_v16  ;;  %v8458_v16 = vld [vmem:[%s14548_s0 + $0x1b8] sm:$0xff] }
 0x453   :  { %1813 = vmatprep.subr.bf16.mxu1 %v10550_v0 }
 0x456   :  { %1814 = vmatpush1.bf16.msra.mxu1 %v10935_v17 }
 0x457   :  { %1815 = vmatprep.subr.bf16.mxu1 %v10550_v0 }
 0x45a   :  { %1816 = vmatpush1.bf16.msra.mxu1 %v10942_v18  ;;  %v8460_v18 = vcombine.high %v8458_v16, %v8458_v16 }
 0x45b   :  { %1817 = vmatprep.subr.bf16.mxu1 %v10550_v0 }
 0x45c   :  { %8461 = vmatprep.mubr.msk.bf16.mxu1 %vm117_vm0, %v8460_v18 }
 0x45e   :  { %1818 = vmatpush1.bf16.msra.mxu1 %v10949_v19 }
 0x45f   :  { %1819 = vmatprep.subr.bf16.mxu1 %v10550_v0 }
 0x462   :  { %1820 = vmatpush1.bf16.msra.mxu1 %v10956_v20 }
 0x463   :  { %1821 = vmatprep.subr.bf16.mxu1 %v10550_v0 }
 0x466   :  { %1822 = vmatpush1.bf16.msra.mxu1 %v10963_v21  ;;  %v8459_v21 = vcombine.low %v8458_v16, %v8458_v16 }
 0x467   :  { %1823 = vmatprep.subr.bf16.mxu1 %v10550_v0 }
 0x46a   :  { %1824 = vmatpush1.bf16.msra.mxu1 %v10970_v22 }
 0x46b   :  { %1825 = vmatprep.subr.bf16.mxu1 %v10550_v0 }
 0x46e   :  { %1826 = vmatpush1.bf16.msra.mxu1 %v10977_v25 }
 0x46f   :  { %1827 = vmatprep.subr.bf16.mxu1 %v10550_v0 }
 0x472   :  { %1828 = vmatpush1.bf16.msra.mxu1 %v10984_v33 }
 0x473   :  { %1829 = vmatprep.subr.bf16.mxu1 %v10550_v0 }
 0x476   :  { %1830 = vmatpush1.bf16.msra.mxu1 %v10697_v15 }
 0x477   :  { %9612 = vmatprep.subr.bf16.mxu1 %v10551_v37 }
 0x479   :  { %1844 = vmatmul.mubr.bf16.vlgmr.msra.gmra.mrb[52].mxu1 %v8459_v21 }
 0x47a   :  { %9628 = vmatprep.mubr.msk.bf16.mxu1 %vm10552_vm2, %v10551_v37  ;;  %9613 = vmatpush3.bf16.msra.mxu1 %v10153_v54 }
 0x47b   :  { %9614 = vmatprep.subr.bf16.mxu1 %v10551_v37 }
 0x47e   :  { %9615 = vmatpush3.bf16.msra.mxu1 %v10154_v56  ;;  %v10172_v56 = vld [vmem:[%s14549_s3 + $0x198] sm:$0xff]  }
 0x47f   :  { %9616 = vmatprep.subr.bf16.mxu1 %v10551_v37 }
 0x482   :  { %9617 = vmatpush3.bf16.msra.mxu1 %v10155_v59  ;;  %v10175_v59 = vld [vmem:[%s14549_s3 + $0x1b0] sm:$0xff]  }
 0x483   :  { %9618 = vmatprep.subr.bf16.mxu1 %v10551_v37 }
 0x486   :  { %9619 = vmatpush3.bf16.msra.mxu1 %v10156_v60  ;;  %v10176_v60 = vld [vmem:[%s14549_s3 + $0x1b8] sm:$0xff]  }
 0x487   :  { %9620 = vmatprep.subr.bf16.mxu1 %v10551_v37 }
 0x48a   :  { %9621 = vmatpush3.bf16.msra.mxu1 %v10157_v61  ;;  %v8530_v61 = vld [vmem:[%s14548_s0 + $0x38] sm:$0xff] }
 0x48b   :  { %9622 = vmatprep.subr.bf16.mxu1 %v10551_v37 }
 0x48e   :  { %9623 = vmatpush3.bf16.msra.mxu1 %v10158_v62  ;;  %v8532_v62 = vcombine.high %v8530_v61, %v8530_v61 }
 0x48f   :  { %9624 = vmatprep.subr.bf16.mxu1 %v10551_v37 }
 0x492   :  { %9625 = vmatpush3.bf16.msra.mxu1 %v10159_v63  ;;  %v8531_v63 = vcombine.low %v8530_v61, %v8530_v61 }
 0x493   :  { %9626 = vmatprep.subr.bf16.mxu1 %v10551_v37 }
 0x496   :  { %9627 = vmatpush3.bf16.msra.mxu1 %v10160_v1  ;;  %v8538_v1 = vld [vmem:[%s14548_s0 + $0x1c8] sm:$0xff] }
 0x497   :  { %2075 = vmatprep.subr.bf16.mxu1 %v10550_v0 }
 0x4ac   :  { %v1374_v17 = vpop.f32.mrb[36].mxu1 }
 0x4ad   :  { %v11420_v19 = vadd.f32 %v1374_v17, %v11280_v28  ;;  %v9590_v20 = vpop.f32.mrb[37].mxu1  ;;  %v8499_v17 = vcombine.low %v8498_v6, %v8498_v6 }
 0x4ae   :  { %v1377_v22 = vpop.f32.mrb[38].mxu1 }
 0x4af   :  { %v9591_v25 = vpop.f32.mrb[39].mxu1 }
 0x4d4   :  { %v1477_v33 = vpop.f32.mrb[40].mxu1 }
 0x4d5   :  { %v1483_v10 = vmax.f32 %v11341_v53, %v1477_v33  ;;  %v1479_v11 = vpop.f32.mrb[41].mxu1 }
 0x4d6   :  { %v1480_v12 = vpop.f32.mrb[42].mxu1 }
 0x4d7   :  { %v1535_v13 = vmax.f32 %v1483_v10, %v11360_v57  ;;  %v1481_v14 = vpop.f32.mrb[43].mxu1 }
 0x4fc   :  { %v1581_v23 = vpop.f32.mrb[44].mxu1 }
 0x4fd   :  { %v1587_v24 = vmax.f32 %v1535_v13, %v1581_v23  ;;  %v1583_v27 = vpop.f32.mrb[45].mxu1 }
 0x4fe   :  { %v1584_v28 = vpop.f32.mrb[46].mxu1  ;;  %v8494_v27 = vld [vmem:[%s14548_s0 + $0xf8] sm:$0xff] }
 0x4ff   :  { %v1588_v30 = vadd.f32 %v11432_v29, %v1587_v24  ;;  %v1585_v31 = vpop.f32.mrb[47].mxu1 }
 0x501   :  { %v1589_v34 = vmax.f32 %v1588_v30, 0.0  ;;  %v8496_v30 = vcombine.high %v8494_v27, %v8494_v27 }
 0x503   :  { %v1590_v36 = vpack.c.bf16 %v1589_v34, %v1589_v34  ;;  %v8495_v34 = vcombine.low %v8494_v27, %v8494_v27  ;;  %v8542_v27 = vld [vmem:[%s14548_s0 + $0x290] sm:$0xff] }
 0x505   :  { %9609 = vmatmul.mubr.bf16.vlgmr.msra.gmra.mrb[48].mxu0 %v1590_v36  ;;  %v8503_v36 = vcombine.low %v8502_v32, %v8502_v32 }
 0x506   :  { %1760 = vmatpush1.bf16.msra.mxu0 %v11441_v26  ;;  %8457 = vmatprep.mubr.msk.bf16.mxu0 %vm117_vm0, %v8456_v35  ;;  %v8504_v35 = vcombine.high %v8502_v32, %v8502_v32 }
 0x507   :  { %1761 = vmatprep.subr.bf16.mxu0 %v10550_v0 }
 0x50a   :  { %1762 = vmatpush1.bf16.msra.mxu0 %v11449_v38 }
 0x50b   :  { %1763 = vmatprep.subr.bf16.mxu0 %v10550_v0 }
 0x50e   :  { %1764 = vmatpush1.bf16.msra.mxu0 %v11456_v39 }
 0x50f   :  { %1765 = vmatprep.subr.bf16.mxu0 %v10550_v0 }
 0x512   :  { %1766 = vmatpush1.bf16.msra.mxu0 %v11463_v40 }
 0x513   :  { %1767 = vmatprep.subr.bf16.mxu0 %v10550_v0 }
 0x516   :  { %1768 = vmatpush1.bf16.msra.mxu0 %v11470_v41 }
 0x517   :  { %1769 = vmatprep.subr.bf16.mxu0 %v10550_v0 }
 0x51a   :  { %1770 = vmatpush1.bf16.msra.mxu0 %v11477_v42 }
 0x51b   :  { %1771 = vmatprep.subr.bf16.mxu0 %v10550_v0 }
 0x51e   :  { %1772 = vmatpush1.bf16.msra.mxu0 %v11484_v43 }
 0x51f   :  { %1773 = vmatprep.subr.bf16.mxu0 %v10550_v0 }
 0x522   :  { %1774 = vmatpush1.bf16.msra.mxu0 %v11491_v44 }
 0x523   :  { %1775 = vmatprep.subr.bf16.mxu0 %v10550_v0 }
 0x524   :  { %v11531_v4 = vpop.f32.mrb[48].mxu1 }
 0x525   :  { %v1744_v50 = vpop.f32.mrb[49].mxu1 }
 0x526   :  { %1776 = vmatpush1.bf16.msra.mxu0 %v11498_v45  ;;  %v1745_v51 = vpop.f32.mrb[50].mxu1  ;;  %v10169_v50 = vld [vmem:[%s14549_s3 + $0x180] sm:$0xff]  }
 0x527   :  { %1777 = vmatprep.subr.bf16.mxu0 %v10550_v0  ;;  %v1746_v52 = vpop.f32.mrb[51].mxu1 }
 0x528   :  { %v10170_v52 = vld [vmem:[%s14549_s3 + $0x188] sm:$0xff]  }
 0x52a   :  { %1778 = vmatpush1.bf16.msra.mxu0 %v10697_v15 }
 0x52b   :  { %1863 = vmatprep.subr.bf16.mxu0 %v10550_v0 }
 0x52d   :  { %1792 = vmatmul.mubr.bf16.vlgmr.msra.gmra.mrb[52].mxu0 %v8455_v47 }
 0x52e   :  { %1864 = vmatpush1.bf16.msra.mxu0 %v11441_v26  ;;  %8465 = vmatprep.mubr.msk.bf16.mxu0 %vm117_vm0, %v8464_v48 }
 0x52f   :  { %1865 = vmatprep.subr.bf16.mxu0 %v10550_v0 }
 0x532   :  { %1866 = vmatpush1.bf16.msra.mxu0 %v11449_v38 }
 0x533   :  { %1867 = vmatprep.subr.bf16.mxu0 %v10550_v0 }
 0x536   :  { %1868 = vmatpush1.bf16.msra.mxu0 %v11456_v39 }
 0x537   :  { %1869 = vmatprep.subr.bf16.mxu0 %v10550_v0 }
 0x53a   :  { %1870 = vmatpush1.bf16.msra.mxu0 %v11463_v40 }
 0x53b   :  { %1871 = vmatprep.subr.bf16.mxu0 %v10550_v0 }
 0x53e   :  { %1872 = vmatpush1.bf16.msra.mxu0 %v11470_v41 }
 0x53f   :  { %1873 = vmatprep.subr.bf16.mxu0 %v10550_v0 }
 0x542   :  { %1874 = vmatpush1.bf16.msra.mxu0 %v11477_v42 }
 0x543   :  { %1875 = vmatprep.subr.bf16.mxu0 %v10550_v0 }
 0x546   :  { %1876 = vmatpush1.bf16.msra.mxu0 %v11484_v43 }
 0x547   :  { %1877 = vmatprep.subr.bf16.mxu0 %v10550_v0 }
 0x54a   :  { %1878 = vmatpush1.bf16.msra.mxu0 %v11491_v44 }
 0x54b   :  { %1879 = vmatprep.subr.bf16.mxu0 %v10550_v0 }
 0x54c   :  { %v11550_v53 = vpop.f32.mrb[52].mxu1 }
 0x54d   :  { %v1847_v55 = vpop.f32.mrb[53].mxu1 }
 0x54e   :  { %1880 = vmatpush1.bf16.msra.mxu0 %v11498_v45  ;;  %v1848_v57 = vpop.f32.mrb[54].mxu1  ;;  %v10171_v55 = vld [vmem:[%s14549_s3 + $0x190] sm:$0xff]  }
 0x54f   :  { %1881 = vmatprep.subr.bf16.mxu0 %v10550_v0  ;;  %v1849_v58 = vpop.f32.mrb[55].mxu1  ;;  %v10173_v57 = vld [vmem:[%s14549_s3 + $0x1a0] sm:$0xff]  }
 0x550   :  { %v10174_v58 = vld [vmem:[%s14549_s3 + $0x1a8] sm:$0xff]  }
 0x552   :  { %1882 = vmatpush1.bf16.msra.mxu0 %v10697_v15 }
 0x553   :  { %2024 = vmatprep.subr.bf16.mxu0 %v10550_v0 }
 0x555   :  { %1896 = vmatmul.mubr.bf16.vlgmr.msra.gmra.mrb[56].mxu0 %v8463_v49 }
 0x556   :  { %2025 = vmatpush1.bf16.msra.mxu0 %v11441_v26  ;;  %8493 = vmatprep.mubr.msk.bf16.mxu0 %vm117_vm0, %v8492_v3  ;;  %v8540_v3 = vcombine.high %v8538_v1, %v8538_v1 }
 0x557   :  { %2026 = vmatprep.subr.bf16.mxu0 %v10550_v0 }
 0x55a   :  { %2027 = vmatpush1.bf16.msra.mxu0 %v11449_v38 }
 0x55b   :  { %2028 = vmatprep.subr.bf16.mxu0 %v10550_v0 }
 0x55e   :  { %2029 = vmatpush1.bf16.msra.mxu0 %v11456_v39 }
 0x55f   :  { %2030 = vmatprep.subr.bf16.mxu0 %v10550_v0 }
 0x562   :  { %2031 = vmatpush1.bf16.msra.mxu0 %v11463_v40 }
 0x563   :  { %2032 = vmatprep.subr.bf16.mxu0 %v10550_v0 }
 0x566   :  { %2033 = vmatpush1.bf16.msra.mxu0 %v11470_v41 }
 0x567   :  { %2034 = vmatprep.subr.bf16.mxu0 %v10550_v0 }
 0x56a   :  { %2035 = vmatpush1.bf16.msra.mxu0 %v11477_v42 }
 0x56b   :  { %2036 = vmatprep.subr.bf16.mxu0 %v10550_v0 }
 0x56e   :  { %2037 = vmatpush1.bf16.msra.mxu0 %v11484_v43 }
 0x56f   :  { %2038 = vmatprep.subr.bf16.mxu0 %v10550_v0 }
 0x572   :  { %2039 = vmatpush1.bf16.msra.mxu0 %v11491_v44 }
 0x573   :  { %2040 = vmatprep.subr.bf16.mxu0 %v10550_v0 }
 0x576   :  { %2041 = vmatpush1.bf16.msra.mxu0 %v11498_v45 }
 0x577   :  { %2042 = vmatprep.subr.bf16.mxu0 %v10550_v0 }
 0x57a   :  { %2043 = vmatpush1.bf16.msra.mxu0 %v10697_v15 }
 0x57b   :  { %2127 = vmatprep.subr.bf16.mxu0 %v10550_v0 }
 0x57d   :  { %2057 = vmatmul.mubr.bf16.vlgmr.msra.gmra.mrb[60].mxu0 %v8491_v5 }
 0x57e   :  { %2128 = vmatpush1.bf16.msra.mxu0 %v11441_v26  ;;  %8501 = vmatprep.mubr.msk.bf16.mxu0 %vm117_vm0, %v8500_v8 }
 0x57f   :  { %2129 = vmatprep.subr.bf16.mxu0 %v10550_v0 }
 0x582   :  { %2130 = vmatpush1.bf16.msra.mxu0 %v11449_v38 }
 0x583   :  { %2131 = vmatprep.subr.bf16.mxu0 %v10550_v0 }
 0x586   :  { %2132 = vmatpush1.bf16.msra.mxu0 %v11456_v39 }
 0x587   :  { %2133 = vmatprep.subr.bf16.mxu0 %v10550_v0 }
 0x58a   :  { %2134 = vmatpush1.bf16.msra.mxu0 %v11463_v40 }
 0x58b   :  { %2135 = vmatprep.subr.bf16.mxu0 %v10550_v0 }
 0x58e   :  { %2136 = vmatpush1.bf16.msra.mxu0 %v11470_v41 }
 0x58f   :  { %2137 = vmatprep.subr.bf16.mxu0 %v10550_v0 }
 0x592   :  { %2138 = vmatpush1.bf16.msra.mxu0 %v11477_v42 }
 0x593   :  { %2139 = vmatprep.subr.bf16.mxu0 %v10550_v0 }
 0x596   :  { %2140 = vmatpush1.bf16.msra.mxu0 %v11484_v43 }
 0x597   :  { %2141 = vmatprep.subr.bf16.mxu0 %v10550_v0 }
 0x59a   :  { %2142 = vmatpush1.bf16.msra.mxu0 %v11491_v44 }
 0x59b   :  { %2143 = vmatprep.subr.bf16.mxu0 %v10550_v0 }
 0x59e   :  { %2144 = vmatpush1.bf16.msra.mxu0 %v11498_v45 }
 0x59f   :  { %2145 = vmatprep.subr.bf16.mxu0 %v10550_v0 }
 0x5a2   :  { %2146 = vmatpush1.bf16.msra.mxu0 %v10697_v15 }
 0x5a3   :  { %9632 = vmatprep.subr.bf16.mxu0 %v10551_v37 }
 0x5a5   :  { %2160 = vmatmul.mubr.bf16.vlgmr.msra.gmra.mrb[64].mxu0 %v8499_v17 }
 0x5a6   :  { %9648 = vmatprep.mubr.msk.bf16.mxu0 %vm10552_vm2, %v10551_v37  ;;  %9633 = vmatpush3.bf16.msra.mxu0 %v10169_v50 }
 0x5a7   :  { %9634 = vmatprep.subr.bf16.mxu0 %v10551_v37 }
 0x5aa   :  { %9635 = vmatpush3.bf16.msra.mxu0 %v10170_v52  ;;  %v10188_v52 = vld [vmem:[%s14549_s3 + $0x1d8] sm:$0xff]  }
 0x5ab   :  { %9636 = vmatprep.subr.bf16.mxu0 %v10551_v37 }
 0x5ae   :  { %9637 = vmatpush3.bf16.msra.mxu0 %v10171_v55  ;;  %v10191_v55 = vld [vmem:[%s14549_s3 + $0x1f0] sm:$0xff]  }
 0x5af   :  { %9638 = vmatprep.subr.bf16.mxu0 %v10551_v37 }
 0x5b2   :  { %9639 = vmatpush3.bf16.msra.mxu0 %v10172_v56  ;;  %v10192_v56 = vld [vmem:[%s14549_s3 + $0x1f8] sm:$0xff]  }
 0x5b3   :  { %9640 = vmatprep.subr.bf16.mxu0 %v10551_v37 }
 0x5b6   :  { %9641 = vmatpush3.bf16.msra.mxu0 %v10173_v57  ;;  %v8570_v57 = vld [vmem:[%s14548_s0 + $0x40] sm:$0xff] }
 0x5b7   :  { %9642 = vmatprep.subr.bf16.mxu0 %v10551_v37 }
 0x5ba   :  { %9643 = vmatpush3.bf16.msra.mxu0 %v10174_v58  ;;  %v8572_v58 = vcombine.high %v8570_v57, %v8570_v57 }
 0x5bb   :  { %9644 = vmatprep.subr.bf16.mxu0 %v10551_v37 }
 0x5be   :  { %9645 = vmatpush3.bf16.msra.mxu0 %v10175_v59  ;;  %v8571_v59 = vcombine.low %v8570_v57, %v8570_v57 }
 0x5bf   :  { %9646 = vmatprep.subr.bf16.mxu0 %v10551_v37 }
 0x5c2   :  { %9647 = vmatpush3.bf16.msra.mxu0 %v10176_v60  ;;  %v8578_v60 = vld [vmem:[%s14548_s0 + $0x1d0] sm:$0xff] }
 0x5c3   :  { %2391 = vmatprep.subr.bf16.mxu0 %v10550_v0 }
 0x5d8   :  { %v1690_v7 = vpop.f32.mrb[48].mxu0 }
 0x5d9   :  { %v11610_v9 = vadd.f32 %v1690_v7, %v11420_v19  ;;  %v9610_v16 = vpop.f32.mrb[49].mxu0  ;;  %v8539_v7 = vcombine.low %v8538_v1, %v8538_v1 }
 0x5da   :  { %v1693_v18 = vpop.f32.mrb[50].mxu0 }
 0x5db   :  { %v9611_v20 = vpop.f32.mrb[51].mxu0 }
 0x600   :  { %v1793_v21 = vpop.f32.mrb[52].mxu0 }
 0x601   :  { %v1799_v22 = vmax.f32 %v11531_v4, %v1793_v21  ;;  %v1795_v25 = vpop.f32.mrb[53].mxu0 }
 0x602   :  { %v1796_v19 = vpop.f32.mrb[54].mxu0 }
 0x603   :  { %v1851_v33 = vmax.f32 %v1799_v22, %v11550_v53  ;;  %v1797_v10 = vpop.f32.mrb[55].mxu0 }
 0x628   :  { %v1897_v11 = vpop.f32.mrb[56].mxu0 }
 0x629   :  { %v1903_v12 = vmax.f32 %v1851_v33, %v1897_v11  ;;  %v1899_v13 = vpop.f32.mrb[57].mxu0 }
 0x62a   :  { %v1900_v14 = vpop.f32.mrb[58].mxu0  ;;  %v8534_v13 = vld [vmem:[%s14548_s0 + $0x100] sm:$0xff] }
 0x62b   :  { %v1904_v23 = vadd.f32 %v11432_v29, %v1903_v12  ;;  %v1901_v24 = vpop.f32.mrb[59].mxu0 }
 0x62d   :  { %v1905_v28 = vmax.f32 %v1904_v23, 0.0  ;;  %v8536_v23 = vcombine.high %v8534_v13, %v8534_v13 }
 0x62f   :  { %v1906_v31 = vpack.c.bf16 %v1905_v28, %v1905_v28  ;;  %v8535_v28 = vcombine.low %v8534_v13, %v8534_v13 }
 0x631   :  { %9629 = vmatmul.mubr.bf16.vlgmr.msra.gmra.mrb[56].mxu1 %v1906_v31  ;;  %v8543_v31 = vcombine.low %v8542_v27, %v8542_v27 }
 0x632   :  { %2076 = vmatpush1.bf16.msra.mxu1 %v11441_v26  ;;  %8497 = vmatprep.mubr.msk.bf16.mxu1 %vm117_vm0, %v8496_v30  ;;  %v8544_v30 = vcombine.high %v8542_v27, %v8542_v27 }
 0x633   :  { %2077 = vmatprep.subr.bf16.mxu1 %v10550_v0 }
 0x636   :  { %2078 = vmatpush1.bf16.msra.mxu1 %v11449_v38 }
 0x637   :  { %2079 = vmatprep.subr.bf16.mxu1 %v10550_v0 }
 0x63a   :  { %2080 = vmatpush1.bf16.msra.mxu1 %v11456_v39 }
 0x63b   :  { %2081 = vmatprep.subr.bf16.mxu1 %v10550_v0 }
 0x63e   :  { %2082 = vmatpush1.bf16.msra.mxu1 %v11463_v40 }
 0x63f   :  { %2083 = vmatprep.subr.bf16.mxu1 %v10550_v0 }
 0x642   :  { %2084 = vmatpush1.bf16.msra.mxu1 %v11470_v41 }
 0x643   :  { %2085 = vmatprep.subr.bf16.mxu1 %v10550_v0 }
 0x646   :  { %2086 = vmatpush1.bf16.msra.mxu1 %v11477_v42 }
 0x647   :  { %2087 = vmatprep.subr.bf16.mxu1 %v10550_v0 }
 0x64a   :  { %2088 = vmatpush1.bf16.msra.mxu1 %v11484_v43 }
 0x64b   :  { %2089 = vmatprep.subr.bf16.mxu1 %v10550_v0 }
 0x64e   :  { %2090 = vmatpush1.bf16.msra.mxu1 %v11491_v44 }
 0x64f   :  { %2091 = vmatprep.subr.bf16.mxu1 %v10550_v0 }
 0x650   :  { %v11671_v46 = vpop.f32.mrb[60].mxu0 }
 0x651   :  { %v2060_v47 = vpop.f32.mrb[61].mxu0 }
 0x652   :  { %2092 = vmatpush1.bf16.msra.mxu1 %v11498_v45  ;;  %v2061_v48 = vpop.f32.mrb[62].mxu0  ;;  %v10185_v47 = vld [vmem:[%s14549_s3 + $0x1c0] sm:$0xff]  }
 0x653   :  { %2093 = vmatprep.subr.bf16.mxu1 %v10550_v0  ;;  %v2062_v49 = vpop.f32.mrb[63].mxu0 }
 0x654   :  { %v10186_v49 = vld [vmem:[%s14549_s3 + $0x1c8] sm:$0xff]  }
 0x656   :  { %2094 = vmatpush1.bf16.msra.mxu1 %v10697_v15 }
 0x657   :  { %2179 = vmatprep.subr.bf16.mxu1 %v10550_v0 }
 0x659   :  { %2108 = vmatmul.mubr.bf16.vlgmr.msra.gmra.mrb[60].mxu1 %v8495_v34 }
 0x65a   :  { %2180 = vmatpush1.bf16.msra.mxu1 %v11441_v26  ;;  %8505 = vmatprep.mubr.msk.bf16.mxu1 %vm117_vm0, %v8504_v35 }
 0x65b   :  { %2181 = vmatprep.subr.bf16.mxu1 %v10550_v0 }
 0x65e   :  { %2182 = vmatpush1.bf16.msra.mxu1 %v11449_v38 }
 0x65f   :  { %2183 = vmatprep.subr.bf16.mxu1 %v10550_v0 }
 0x662   :  { %2184 = vmatpush1.bf16.msra.mxu1 %v11456_v39 }
 0x663   :  { %2185 = vmatprep.subr.bf16.mxu1 %v10550_v0 }
 0x666   :  { %2186 = vmatpush1.bf16.msra.mxu1 %v11463_v40 }
 0x667   :  { %2187 = vmatprep.subr.bf16.mxu1 %v10550_v0 }
 0x66a   :  { %2188 = vmatpush1.bf16.msra.mxu1 %v11470_v41 }
 0x66b   :  { %2189 = vmatprep.subr.bf16.mxu1 %v10550_v0 }
 0x66e   :  { %2190 = vmatpush1.bf16.msra.mxu1 %v11477_v42 }
 0x66f   :  { %2191 = vmatprep.subr.bf16.mxu1 %v10550_v0 }
 0x672   :  { %2192 = vmatpush1.bf16.msra.mxu1 %v11484_v43 }
 0x673   :  { %2193 = vmatprep.subr.bf16.mxu1 %v10550_v0 }
 0x676   :  { %2194 = vmatpush1.bf16.msra.mxu1 %v11491_v44 }
 0x677   :  { %2195 = vmatprep.subr.bf16.mxu1 %v10550_v0 }
 0x678   :  { %v11690_v4 = vpop.f32.mrb[64].mxu0 }
 0x679   :  { %v2163_v51 = vpop.f32.mrb[65].mxu0 }
 0x67a   :  { %2196 = vmatpush1.bf16.msra.mxu1 %v11498_v45  ;;  %v2164_v53 = vpop.f32.mrb[66].mxu0  ;;  %v10187_v51 = vld [vmem:[%s14549_s3 + $0x1d0] sm:$0xff]  }
 0x67b   :  { %2197 = vmatprep.subr.bf16.mxu1 %v10550_v0  ;;  %v2165_v54 = vpop.f32.mrb[67].mxu0  ;;  %v10189_v53 = vld [vmem:[%s14549_s3 + $0x1e0] sm:$0xff]  }
 0x67c   :  { %v10190_v54 = vld [vmem:[%s14549_s3 + $0x1e8] sm:$0xff]  }
 0x67e   :  { %2198 = vmatpush1.bf16.msra.mxu1 %v10697_v15 }
 0x67f   :  { %2340 = vmatprep.subr.bf16.mxu1 %v10550_v0 }
 0x681   :  { %2212 = vmatmul.mubr.bf16.vlgmr.msra.gmra.mrb[64].mxu1 %v8503_v36 }
 0x682   :  { %2341 = vmatpush1.bf16.msra.mxu1 %v11441_v26  ;;  %8533 = vmatprep.mubr.msk.bf16.mxu1 %vm117_vm0, %v8532_v62  ;;  %v8580_v62 = vcombine.high %v8578_v60, %v8578_v60 }
 0x683   :  { %2342 = vmatprep.subr.bf16.mxu1 %v10550_v0 }
 0x686   :  { %2343 = vmatpush1.bf16.msra.mxu1 %v11449_v38 }
 0x687   :  { %2344 = vmatprep.subr.bf16.mxu1 %v10550_v0 }
 0x68a   :  { %2345 = vmatpush1.bf16.msra.mxu1 %v11456_v39 }
 0x68b   :  { %2346 = vmatprep.subr.bf16.mxu1 %v10550_v0 }
 0x68e   :  { %2347 = vmatpush1.bf16.msra.mxu1 %v11463_v40 }
 0x68f   :  { %2348 = vmatprep.subr.bf16.mxu1 %v10550_v0 }
 0x692   :  { %2349 = vmatpush1.bf16.msra.mxu1 %v11470_v41 }
 0x693   :  { %2350 = vmatprep.subr.bf16.mxu1 %v10550_v0 }
 0x696   :  { %2351 = vmatpush1.bf16.msra.mxu1 %v11477_v42 }
 0x697   :  { %2352 = vmatprep.subr.bf16.mxu1 %v10550_v0 }
 0x69a   :  { %2353 = vmatpush1.bf16.msra.mxu1 %v11484_v43 }
 0x69b   :  { %2354 = vmatprep.subr.bf16.mxu1 %v10550_v0 }
 0x69e   :  { %2355 = vmatpush1.bf16.msra.mxu1 %v11491_v44 }
 0x69f   :  { %2356 = vmatprep.subr.bf16.mxu1 %v10550_v0 }
 0x6a2   :  { %2357 = vmatpush1.bf16.msra.mxu1 %v11498_v45 }
 0x6a3   :  { %2358 = vmatprep.subr.bf16.mxu1 %v10550_v0 }
 0x6a6   :  { %2359 = vmatpush1.bf16.msra.mxu1 %v10697_v15 }
 0x6a7   :  { %2443 = vmatprep.subr.bf16.mxu1 %v10550_v0 }
 0x6a9   :  { %2373 = vmatmul.mubr.bf16.vlgmr.msra.gmra.mrb[68].mxu1 %v8531_v63 }
 0x6aa   :  { %2444 = vmatpush1.bf16.msra.mxu1 %v11441_v26  ;;  %8541 = vmatprep.mubr.msk.bf16.mxu1 %vm117_vm0, %v8540_v3 }
 0x6ab   :  { %2445 = vmatprep.subr.bf16.mxu1 %v10550_v0 }
 0x6ae   :  { %2446 = vmatpush1.bf16.msra.mxu1 %v11449_v38 }
 0x6af   :  { %2447 = vmatprep.subr.bf16.mxu1 %v10550_v0 }
 0x6b2   :  { %2448 = vmatpush1.bf16.msra.mxu1 %v11456_v39 }
 0x6b3   :  { %2449 = vmatprep.subr.bf16.mxu1 %v10550_v0 }
 0x6b6   :  { %2450 = vmatpush1.bf16.msra.mxu1 %v11463_v40 }
 0x6b7   :  { %2451 = vmatprep.subr.bf16.mxu1 %v10550_v0 }
 0x6ba   :  { %2452 = vmatpush1.bf16.msra.mxu1 %v11470_v41 }
 0x6bb   :  { %2453 = vmatprep.subr.bf16.mxu1 %v10550_v0 }
 0x6be   :  { %2454 = vmatpush1.bf16.msra.mxu1 %v11477_v42 }
 0x6bf   :  { %2455 = vmatprep.subr.bf16.mxu1 %v10550_v0 }
 0x6c2   :  { %2456 = vmatpush1.bf16.msra.mxu1 %v11484_v43 }
 0x6c3   :  { %2457 = vmatprep.subr.bf16.mxu1 %v10550_v0 }
 0x6c6   :  { %2458 = vmatpush1.bf16.msra.mxu1 %v11491_v44 }
 0x6c7   :  { %2459 = vmatprep.subr.bf16.mxu1 %v10550_v0 }
 0x6ca   :  { %2460 = vmatpush1.bf16.msra.mxu1 %v11498_v45 }
 0x6cb   :  { %2461 = vmatprep.subr.bf16.mxu1 %v10550_v0 }
 0x6ce   :  { %2462 = vmatpush1.bf16.msra.mxu1 %v10697_v15 }
 0x6cf   :  { %9652 = vmatprep.subr.bf16.mxu1 %v10551_v37 }
 0x6d1   :  { %2476 = vmatmul.mubr.bf16.vlgmr.msra.gmra.mrb[72].mxu1 %v8539_v7 }
 0x6d2   :  { %9668 = vmatprep.mubr.msk.bf16.mxu1 %vm10552_vm2, %v10551_v37  ;;  %9653 = vmatpush3.bf16.msra.mxu1 %v10185_v47  ;;  %v12011_v47 = vld [vmem:[%s14547_s1] sm:$0xff]  }
 0x6d3   :  { %9654 = vmatprep.subr.bf16.mxu1 %v10551_v37 }
 0x6d6   :  { %9655 = vmatpush3.bf16.msra.mxu1 %v10186_v49  ;;  %v12025_v49 = vld [vmem:[%s14547_s1 + $0x10] sm:$0xff]  }
 0x6d7   :  { %9656 = vmatprep.subr.bf16.mxu1 %v10551_v37 }
 0x6da   :  { %9657 = vmatpush3.bf16.msra.mxu1 %v10187_v51  ;;  %v12046_v51 = vld [vmem:[%s14547_s1 + $0x28] sm:$0xff]  }
 0x6db   :  { %9658 = vmatprep.subr.bf16.mxu1 %v10551_v37 }
 0x6de   :  { %9659 = vmatpush3.bf16.msra.mxu1 %v10188_v52  ;;  %v12053_v52 = vld [vmem:[%s14547_s1 + $0x30] sm:$0xff]  }
 0x6df   :  { %9660 = vmatprep.subr.bf16.mxu1 %v10551_v37 }
 0x6e2   :  { %9661 = vmatpush3.bf16.msra.mxu1 %v10189_v53  ;;  %v12060_v53 = vld [vmem:[%s14547_s1 + $0x38] sm:$0xff]  }
 0x6e3   :  { %9662 = vmatprep.subr.bf16.mxu1 %v10551_v37 }
 0x6e6   :  { %9663 = vmatpush3.bf16.msra.mxu1 %v10190_v54  ;;  %v12067_v54 = vld [vmem:[%s14547_s1 + $0x40] sm:$0xff]  }
 0x6e7   :  { %9664 = vmatprep.subr.bf16.mxu1 %v10551_v37 }
 0x6ea   :  { %9665 = vmatpush3.bf16.msra.mxu1 %v10191_v55  ;;  %v8618_v55 = vld [vmem:[%s14548_s0 + $0x1d8] sm:$0xff] }
 0x6eb   :  { %9666 = vmatprep.subr.bf16.mxu1 %v10551_v37  ;;  %v8620_v57 = vcombine.high %v8618_v55, %v8618_v55 }
 0x6ee   :  { %9667 = vmatpush3.bf16.msra.mxu1 %v10192_v56 }
 0x6ef   :  { %2707 = vmatprep.subr.bf16.mxu1 %v10550_v0 }
 0x704   :  { %v2006_v2 = vpop.f32.mrb[56].mxu1 }
 0x705   :  { %v11750_v5 = vadd.f32 %v2006_v2, %v11610_v9  ;;  %v9630_v6 = vpop.f32.mrb[57].mxu1  ;;  %v8579_v2 = vcombine.low %v8578_v60, %v8578_v60  ;;  %v8619_v60 = vcombine.low %v8618_v55, %v8618_v55 }
 0x706   :  { %v2009_v8 = vpop.f32.mrb[58].mxu1 }
 0x707   :  { %v9631_v16 = vpop.f32.mrb[59].mxu1 }
 0x72c   :  { %v2109_v17 = vpop.f32.mrb[60].mxu1 }
 0x72d   :  { %v2115_v18 = vmax.f32 %v11671_v46, %v2109_v17  ;;  %v2111_v20 = vpop.f32.mrb[61].mxu1 }
 0x72e   :  { %v2112_v9 = vpop.f32.mrb[62].mxu1 }
 0x72f   :  { %v2167_v21 = vmax.f32 %v2115_v18, %v11690_v4  ;;  %v2113_v22 = vpop.f32.mrb[63].mxu1 }
 0x754   :  { %v2213_v25 = vpop.f32.mrb[64].mxu1 }
 0x755   :  { %v2219_v19 = vmax.f32 %v2167_v21, %v2213_v25  ;;  %v2215_v33 = vpop.f32.mrb[65].mxu1 }
 0x756   :  { %v2216_v10 = vpop.f32.mrb[66].mxu1  ;;  %v8574_v33 = vld [vmem:[%s14548_s0 + $0x108] sm:$0xff] }
 0x757   :  { %v2220_v11 = vadd.f32 %v11432_v29, %v2219_v19  ;;  %v2217_v12 = vpop.f32.mrb[67].mxu1  ;;  %v8575_v13 = vcombine.low %v8574_v33, %v8574_v33 }
 0x759   :  { %v2221_v14 = vmax.f32 %v2220_v11, 0.0  ;;  %v8576_v11 = vcombine.high %v8574_v33, %v8574_v33  ;;  %v8622_v33 = vld [vmem:[%s14548_s0 + $0x2a0] sm:$0xff] }
 0x75b   :  { %v2222_v24 = vpack.c.bf16 %v2221_v14, %v2221_v14 }
 0x75d   :  { %9649 = vmatmul.mubr.bf16.vlgmr.msra.gmra.mrb[68].mxu0 %v2222_v24 }
 0x75e   :  { %2392 = vmatpush1.bf16.msra.mxu0 %v11441_v26  ;;  %8537 = vmatprep.mubr.msk.bf16.mxu0 %vm117_vm0, %v8536_v23 }
 0x75f   :  { %2393 = vmatprep.subr.bf16.mxu0 %v10550_v0 }
 0x762   :  { %2394 = vmatpush1.bf16.msra.mxu0 %v11449_v38 }
 0x763   :  { %2395 = vmatprep.subr.bf16.mxu0 %v10550_v0 }
 0x766   :  { %2396 = vmatpush1.bf16.msra.mxu0 %v11456_v39 }
 0x767   :  { %2397 = vmatprep.subr.bf16.mxu0 %v10550_v0 }
 0x76a   :  { %2398 = vmatpush1.bf16.msra.mxu0 %v11463_v40 }
 0x76b   :  { %2399 = vmatprep.subr.bf16.mxu0 %v10550_v0 }
 0x76e   :  { %2400 = vmatpush1.bf16.msra.mxu0 %v11470_v41 }
 0x76f   :  { %2401 = vmatprep.subr.bf16.mxu0 %v10550_v0 }
 0x772   :  { %2402 = vmatpush1.bf16.msra.mxu0 %v11477_v42 }
 0x773   :  { %2403 = vmatprep.subr.bf16.mxu0 %v10550_v0 }
 0x776   :  { %2404 = vmatpush1.bf16.msra.mxu0 %v11484_v43 }
 0x777   :  { %2405 = vmatprep.subr.bf16.mxu0 %v10550_v0 }
 0x77a   :  { %2406 = vmatpush1.bf16.msra.mxu0 %v11491_v44 }
 0x77b   :  { %2407 = vmatprep.subr.bf16.mxu0 %v10550_v0 }
 0x77c   :  { %v11811_v32 = vpop.f32.mrb[68].mxu1 }
 0x77d   :  { %v2376_v34 = vpop.f32.mrb[69].mxu1 }
 0x77e   :  { %2408 = vmatpush1.bf16.msra.mxu0 %v11498_v45  ;;  %v2377_v35 = vpop.f32.mrb[70].mxu1  ;;  %v10208_v34 = vld [vmem:[%s14549_s3 + $0x238] sm:$0xff]  }
 0x77f   :  { %2409 = vmatprep.subr.bf16.mxu0 %v10550_v0  ;;  %v2378_v36 = vpop.f32.mrb[71].mxu1  ;;  %v8610_v35 = vld [vmem:[%s14548_s0 + $0x48] sm:$0xff] }
 0x780   :  { %v8612_v36 = vcombine.high %v8610_v35, %v8610_v35 }
 0x782   :  { %2410 = vmatpush1.bf16.msra.mxu0 %v10697_v15 }
 0x783   :  { %2495 = vmatprep.subr.bf16.mxu0 %v10550_v0 }
 0x785   :  { %2424 = vmatmul.mubr.bf16.vlgmr.msra.gmra.mrb[72].mxu0 %v8535_v28 }
 0x786   :  { %2496 = vmatpush1.bf16.msra.mxu0 %v11441_v26  ;;  %8545 = vmatprep.mubr.msk.bf16.mxu0 %vm117_vm0, %v8544_v30 }
 0x787   :  { %2497 = vmatprep.subr.bf16.mxu0 %v10550_v0 }
 0x78a   :  { %2498 = vmatpush1.bf16.msra.mxu0 %v11449_v38 }
 0x78b   :  { %2499 = vmatprep.subr.bf16.mxu0 %v10550_v0 }
 0x78e   :  { %2500 = vmatpush1.bf16.msra.mxu0 %v11456_v39 }
 0x78f   :  { %2501 = vmatprep.subr.bf16.mxu0 %v10550_v0 }
 0x792   :  { %2502 = vmatpush1.bf16.msra.mxu0 %v11463_v40 }
 0x793   :  { %2503 = vmatprep.subr.bf16.mxu0 %v10550_v0 }
 0x796   :  { %2504 = vmatpush1.bf16.msra.mxu0 %v11470_v41 }
 0x797   :  { %2505 = vmatprep.subr.bf16.mxu0 %v10550_v0 }
 0x79a   :  { %2506 = vmatpush1.bf16.msra.mxu0 %v11477_v42 }
 0x79b   :  { %2507 = vmatprep.subr.bf16.mxu0 %v10550_v0 }
 0x79e   :  { %2508 = vmatpush1.bf16.msra.mxu0 %v11484_v43 }
 0x79f   :  { %2509 = vmatprep.subr.bf16.mxu0 %v10550_v0 }
 0x7a2   :  { %2510 = vmatpush1.bf16.msra.mxu0 %v11491_v44 }
 0x7a3   :  { %2511 = vmatprep.subr.bf16.mxu0 %v10550_v0 }
 0x7a4   :  { %v11830_v46 = vpop.f32.mrb[72].mxu1 }
 0x7a5   :  { %v2479_v48 = vpop.f32.mrb[73].mxu1 }
 0x7a6   :  { %2512 = vmatpush1.bf16.msra.mxu0 %v11498_v45  ;;  %v2480_v4 = vpop.f32.mrb[74].mxu1  ;;  %v12018_v48 = vld [vmem:[%s14547_s1 + $0x8] sm:$0xff]  }
 0x7a7   :  { %2513 = vmatprep.subr.bf16.mxu0 %v10550_v0  ;;  %v2481_v50 = vpop.f32.mrb[75].mxu1  ;;  %v12032_v4 = vld [vmem:[%s14547_s1 + $0x18] sm:$0xff]  }
 0x7a8   :  { %v12039_v50 = vld [vmem:[%s14547_s1 + $0x20] sm:$0xff]  }
 0x7aa   :  { %2514 = vmatpush1.bf16.msra.mxu0 %v10697_v15 }
 0x7ab   :  { %2656 = vmatprep.subr.bf16.mxu0 %v10550_v0 }
 0x7ad   :  { %2528 = vmatmul.mubr.bf16.vlgmr.msra.gmra.mrb[76].mxu0 %v8543_v31  ;;  %v10206_v31 = vld [vmem:[%s14549_s3 + $0x228] sm:$0xff]  }
 0x7ae   :  { %2657 = vmatpush1.bf16.msra.mxu0 %v11441_v26  ;;  %8573 = vmatprep.mubr.msk.bf16.mxu0 %vm117_vm0, %v8572_v58 }
 0x7af   :  { %2658 = vmatprep.subr.bf16.mxu0 %v10550_v0 }
 0x7b2   :  { %2659 = vmatpush1.bf16.msra.mxu0 %v11449_v38 }
 0x7b3   :  { %2660 = vmatprep.subr.bf16.mxu0 %v10550_v0 }
 0x7b6   :  { %2661 = vmatpush1.bf16.msra.mxu0 %v11456_v39 }
 0x7b7   :  { %2662 = vmatprep.subr.bf16.mxu0 %v10550_v0 }
 0x7ba   :  { %2663 = vmatpush1.bf16.msra.mxu0 %v11463_v40 }
 0x7bb   :  { %2664 = vmatprep.subr.bf16.mxu0 %v10550_v0 }
 0x7be   :  { %2665 = vmatpush1.bf16.msra.mxu0 %v11470_v41 }
 0x7bf   :  { %2666 = vmatprep.subr.bf16.mxu0 %v10550_v0 }
 0x7c2   :  { %2667 = vmatpush1.bf16.msra.mxu0 %v11477_v42 }
 0x7c3   :  { %2668 = vmatprep.subr.bf16.mxu0 %v10550_v0 }
 0x7c6   :  { %2669 = vmatpush1.bf16.msra.mxu0 %v11484_v43 }
 0x7c7   :  { %2670 = vmatprep.subr.bf16.mxu0 %v10550_v0 }
 0x7ca   :  { %2671 = vmatpush1.bf16.msra.mxu0 %v11491_v44 }
 0x7cb   :  { %2672 = vmatprep.subr.bf16.mxu0 %v10550_v0 }
 0x7ce   :  { %2673 = vmatpush1.bf16.msra.mxu0 %v11498_v45 }
 0x7cf   :  { %2674 = vmatprep.subr.bf16.mxu0 %v10550_v0 }
 0x7d2   :  { %2675 = vmatpush1.bf16.msra.mxu0 %v10697_v15 }
 0x7d3   :  { %2759 = vmatprep.subr.bf16.mxu0 %v10550_v0 }
 0x7d5   :  { %2689 = vmatmul.mubr.bf16.vlgmr.msra.gmra.mrb[80].mxu0 %v8571_v59 }
 0x7d6   :  { %2760 = vmatpush1.bf16.msra.mxu0 %v11441_v26  ;;  %8581 = vmatprep.mubr.msk.bf16.mxu0 %vm117_vm0, %v8580_v62 }
 0x7d7   :  { %2761 = vmatprep.subr.bf16.mxu0 %v10550_v0 }
 0x7da   :  { %2762 = vmatpush1.bf16.msra.mxu0 %v11449_v38 }
 0x7db   :  { %2763 = vmatprep.subr.bf16.mxu0 %v10550_v0 }
 0x7de   :  { %2764 = vmatpush1.bf16.msra.mxu0 %v11456_v39 }
 0x7df   :  { %2765 = vmatprep.subr.bf16.mxu0 %v10550_v0 }
 0x7e2   :  { %2766 = vmatpush1.bf16.msra.mxu0 %v11463_v40 }
 0x7e3   :  { %2767 = vmatprep.subr.bf16.mxu0 %v10550_v0 }
 0x7e6   :  { %2768 = vmatpush1.bf16.msra.mxu0 %v11470_v41 }
 0x7e7   :  { %2769 = vmatprep.subr.bf16.mxu0 %v10550_v0 }
 0x7ea   :  { %2770 = vmatpush1.bf16.msra.mxu0 %v11477_v42 }
 0x7eb   :  { %2771 = vmatprep.subr.bf16.mxu0 %v10550_v0 }
 0x7ee   :  { %2772 = vmatpush1.bf16.msra.mxu0 %v11484_v43 }
 0x7ef   :  { %2773 = vmatprep.subr.bf16.mxu0 %v10550_v0 }
 0x7f2   :  { %2774 = vmatpush1.bf16.msra.mxu0 %v11491_v44 }
 0x7f3   :  { %2775 = vmatprep.subr.bf16.mxu0 %v10550_v0 }
 0x7f6   :  { %2776 = vmatpush1.bf16.msra.mxu0 %v11498_v45 }
 0x7f7   :  { %2777 = vmatprep.subr.bf16.mxu0 %v10550_v0 }
 0x7fa   :  { %2778 = vmatpush1.bf16.msra.mxu0 %v10697_v15 }
 0x7fb   :  { %9672 = vmatprep.subr.bf16.mxu0 %v10551_v37 }
 0x7fd   :  { %2792 = vmatmul.mubr.bf16.vlgmr.msra.gmra.mrb[84].mxu0 %v8579_v2 }
 0x7fe   :  { %9688 = vmatprep.mubr.msk.bf16.mxu0 %vm10552_vm2, %v10551_v37 }
 0x830   :  { %v2322_v61 = vpop.f32.mrb[68].mxu0 }
 0x831   :  { %v11890_v63 = vadd.f32 %v2322_v61, %v11750_v5  ;;  %v9650_v1 = vpop.f32.mrb[69].mxu0 }
 0x832   :  { %v2325_v3 = vpop.f32.mrb[70].mxu0 }
 0x833   :  { %v9651_v6 = vpop.f32.mrb[71].mxu0 }
 0x858   :  { %v2425_v7 = vpop.f32.mrb[72].mxu0 }
 0x859   :  { %v2431_v8 = vmax.f32 %v11811_v32, %v2425_v7  ;;  %v2427_v16 = vpop.f32.mrb[73].mxu0  ;;  %v10207_v32 = vld [vmem:[%s14549_s3 + $0x230] sm:$0xff]  }
 0x85a   :  { %v2428_v5 = vpop.f32.mrb[74].mxu0 }
 0x85b   :  { %v2483_v17 = vmax.f32 %v2431_v8, %v11830_v46  ;;  %v2429_v18 = vpop.f32.mrb[75].mxu0  ;;  %v8611_v46 = vcombine.low %v8610_v35, %v8610_v35 }
 0x85c   :  { %v12087_v18 = vld [vmem:[%s14550_s2] ss:$0 sm:$0xff] }
 0x880   :  { %v2529_v20 = vpop.f32.mrb[76].mxu0 }
 0x881   :  { %v2535_v9 = vmax.f32 %v2483_v17, %v2529_v20  ;;  %v2531_v21 = vpop.f32.mrb[77].mxu0 }
 0x882   :  { %v2532_v22 = vpop.f32.mrb[78].mxu0  ;;  %v8614_v21 = vld [vmem:[%s14548_s0 + $0x110] sm:$0xff] }
 0x883   :  { %v2536_v25 = vadd.f32 %v11432_v29, %v2535_v9  ;;  %v2533_v19 = vpop.f32.mrb[79].mxu0  ;;  %v8582_v29 = vld [vmem:[%s14548_s0 + $0x298] sm:$0xff] }
 0x884   :  { %v8584_v14 = vcombine.high %v8582_v29, %v8582_v29  ;;  %v8583_v23 = vcombine.low %v8582_v29, %v8582_v29 }
 0x885   :  { %v2537_v10 = vmax.f32 %v2536_v25, 0.0  ;;  %v8616_v25 = vcombine.high %v8614_v21, %v8614_v21 }
 0x887   :  { %v2538_v12 = vpack.c.bf16 %v2537_v10, %v2537_v10  ;;  %v8615_v10 = vcombine.low %v8614_v21, %v8614_v21  ;;  %v8662_v21 = vld [vmem:[%s14548_s0 + $0x2a8] sm:$0xff] }
 0x889   :  { %9669 = vmatmul.mubr.bf16.vlgmr.msra.gmra.mrb[76].mxu1 %v2538_v12  ;;  %v8623_v12 = vcombine.low %v8622_v33, %v8622_v33 }
 0x88a   :  { %2708 = vmatpush1.bf16.msra.mxu1 %v11441_v26  ;;  %8577 = vmatprep.mubr.msk.bf16.mxu1 %vm117_vm0, %v8576_v11  ;;  %v8624_v11 = vcombine.high %v8622_v33, %v8622_v33 }
 0x88b   :  { %2709 = vmatprep.subr.bf16.mxu1 %v10550_v0 }
 0x88e   :  { %2710 = vmatpush1.bf16.msra.mxu1 %v11449_v38 }
 0x88f   :  { %2711 = vmatprep.subr.bf16.mxu1 %v10550_v0 }
 0x892   :  { %2712 = vmatpush1.bf16.msra.mxu1 %v11456_v39 }
 0x893   :  { %2713 = vmatprep.subr.bf16.mxu1 %v10550_v0 }
 0x896   :  { %2714 = vmatpush1.bf16.msra.mxu1 %v11463_v40 }
 0x897   :  { %2715 = vmatprep.subr.bf16.mxu1 %v10550_v0 }
 0x89a   :  { %2716 = vmatpush1.bf16.msra.mxu1 %v11470_v41 }
 0x89b   :  { %2717 = vmatprep.subr.bf16.mxu1 %v10550_v0 }
 0x89e   :  { %2718 = vmatpush1.bf16.msra.mxu1 %v11477_v42 }
 0x89f   :  { %2719 = vmatprep.subr.bf16.mxu1 %v10550_v0 }
 0x8a2   :  { %2720 = vmatpush1.bf16.msra.mxu1 %v11484_v43 }
 0x8a3   :  { %2721 = vmatprep.subr.bf16.mxu1 %v10550_v0 }
 0x8a6   :  { %2722 = vmatpush1.bf16.msra.mxu1 %v11491_v44 }
 0x8a7   :  { %2723 = vmatprep.subr.bf16.mxu1 %v10550_v0 }
 0x8a8   :  { %v11951_v24 = vpop.f32.mrb[80].mxu0 }
 0x8a9   :  { %v2692_v27 = vpop.f32.mrb[81].mxu0 }
 0x8aa   :  { %2724 = vmatpush1.bf16.msra.mxu1 %v11498_v45  ;;  %v2693_v28 = vpop.f32.mrb[82].mxu0  ;;  %v10217_v27 = vld [vmem:[%s14549_s3 + $0x240] sm:$0xff]  }
 0x8ab   :  { %2725 = vmatprep.subr.bf16.mxu1 %v10550_v0  ;;  %v2694_v30 = vpop.f32.mrb[83].mxu0 }
 0x8ac   :  { %v10218_v30 = vld [vmem:[%s14549_s3 + $0x248] sm:$0xff]  }
 0x8ae   :  { %2726 = vmatpush1.bf16.msra.mxu1 %v10697_v15 }
 0x8af   :  { %2811 = vmatprep.subr.bf16.mxu1 %v10550_v0 }
 0x8b1   :  { %2740 = vmatmul.mubr.bf16.vlgmr.msra.gmra.mrb[80].mxu1 %v8575_v13 }
 0x8b2   :  { %2812 = vmatpush1.bf16.msra.mxu1 %v11441_v26  ;;  %8585 = vmatprep.mubr.msk.bf16.mxu1 %vm117_vm0, %v8584_v14 }
 0x8b3   :  { %2813 = vmatprep.subr.bf16.mxu1 %v10550_v0 }
 0x8b6   :  { %2814 = vmatpush1.bf16.msra.mxu1 %v11449_v38 }
 0x8b7   :  { %2815 = vmatprep.subr.bf16.mxu1 %v10550_v0 }
 0x8ba   :  { %2816 = vmatpush1.bf16.msra.mxu1 %v11456_v39 }
 0x8bb   :  { %2817 = vmatprep.subr.bf16.mxu1 %v10550_v0 }
 0x8be   :  { %2818 = vmatpush1.bf16.msra.mxu1 %v11463_v40 }
 0x8bf   :  { %2819 = vmatprep.subr.bf16.mxu1 %v10550_v0 }
 0x8c2   :  { %2820 = vmatpush1.bf16.msra.mxu1 %v11470_v41 }
 0x8c3   :  { %2821 = vmatprep.subr.bf16.mxu1 %v10550_v0 }
 0x8c6   :  { %2822 = vmatpush1.bf16.msra.mxu1 %v11477_v42 }
 0x8c7   :  { %2823 = vmatprep.subr.bf16.mxu1 %v10550_v0 }
 0x8ca   :  { %2824 = vmatpush1.bf16.msra.mxu1 %v11484_v43 }
 0x8cb   :  { %2825 = vmatprep.subr.bf16.mxu1 %v10550_v0 }
 0x8ce   :  { %2826 = vmatpush1.bf16.msra.mxu1 %v11491_v44 }
 0x8cf   :  { %2827 = vmatprep.subr.bf16.mxu1 %v10550_v0 }
 0x8d2   :  { %2828 = vmatpush1.bf16.msra.mxu1 %v11498_v45 }
 0x8d3   :  { %2829 = vmatprep.subr.bf16.mxu1 %v10550_v0 }
 0x8d6   :  { %2830 = vmatpush1.bf16.msra.mxu1 %v10697_v15 }
 0x8d7   :  { %2972 = vmatprep.subr.bf16.mxu1 %v10550_v0 }
 0x8d9   :  { %2844 = vmatmul.mubr.bf16.vlgmr.msra.gmra.mrb[84].mxu1 %v8583_v23 }
 0x8da   :  { %2973 = vmatpush1.bf16.msra.mxu1 %v11441_v26  ;;  %v11970_v26 = vpop.f32.mrb[84].mxu0  ;;  %8613 = vmatprep.mubr.msk.bf16.mxu1 %vm117_vm0, %v8612_v36 }
 0x8db   :  { %2974 = vmatprep.subr.bf16.mxu1 %v10550_v0 }
 0x8de   :  { %2975 = vmatpush1.bf16.msra.mxu1 %v11449_v38  ;;  %v10201_v38 = vld [vmem:[%s14549_s3 + $0x200] sm:$0xff]  }
 0x8df   :  { %2976 = vmatprep.subr.bf16.mxu1 %v10550_v0  ;;  %9673 = vmatpush3.bf16.msra.mxu0 %v10201_v38 }
 0x8e0   :  { %9674 = vmatprep.subr.bf16.mxu0 %v10551_v37 }
 0x8e2   :  { %2977 = vmatpush1.bf16.msra.mxu1 %v11456_v39  ;;  %v2795_v39 = vpop.f32.mrb[85].mxu0 }
 0x8e3   :  { %2978 = vmatprep.subr.bf16.mxu1 %v10550_v0  ;;  %v10219_v39 = vld [vmem:[%s14549_s3 + $0x250] sm:$0xff]  }
 0x8e6   :  { %2979 = vmatpush1.bf16.msra.mxu1 %v11463_v40  ;;  %v10202_v40 = vld [vmem:[%s14549_s3 + $0x208] sm:$0xff]  }
 0x8e7   :  { %2980 = vmatprep.subr.bf16.mxu1 %v10550_v0  ;;  %9675 = vmatpush3.bf16.msra.mxu0 %v10202_v40  ;;  %v10220_v40 = vld [vmem:[%s14549_s3 + $0x258] sm:$0xff]  }
 0x8e8   :  { %9676 = vmatprep.subr.bf16.mxu0 %v10551_v37 }
 0x8ea   :  { %2981 = vmatpush1.bf16.msra.mxu1 %v11470_v41  ;;  %v2796_v41 = vpop.f32.mrb[86].mxu0 }
 0x8eb   :  { %2982 = vmatprep.subr.bf16.mxu1 %v10550_v0  ;;  %v10221_v41 = vld [vmem:[%s14549_s3 + $0x260] sm:$0xff]  }
 0x8ee   :  { %2983 = vmatpush1.bf16.msra.mxu1 %v11477_v42  ;;  %v2797_v42 = vpop.f32.mrb[87].mxu0 }
 0x8ef   :  { %2984 = vmatprep.subr.bf16.mxu1 %v10550_v0  ;;  %v10222_v42 = vld [vmem:[%s14549_s3 + $0x268] sm:$0xff]  }
 0x8f2   :  { %2985 = vmatpush1.bf16.msra.mxu1 %v11484_v43  ;;  %v10203_v43 = vld [vmem:[%s14549_s3 + $0x210] sm:$0xff]  }
 0x8f3   :  { %2986 = vmatprep.subr.bf16.mxu1 %v10550_v0  ;;  %9677 = vmatpush3.bf16.msra.mxu0 %v10203_v43  ;;  %v10223_v43 = vld [vmem:[%s14549_s3 + $0x270] sm:$0xff]  }
 0x8f4   :  { %9678 = vmatprep.subr.bf16.mxu0 %v10551_v37 }
 0x8f6   :  { %2987 = vmatpush1.bf16.msra.mxu1 %v11491_v44  ;;  %v10204_v44 = vld [vmem:[%s14549_s3 + $0x218] sm:$0xff]  }
 0x8f7   :  { %2988 = vmatprep.subr.bf16.mxu1 %v10550_v0  ;;  %9679 = vmatpush3.bf16.msra.mxu0 %v10204_v44  ;;  %v10224_v44 = vld [vmem:[%s14549_s3 + $0x278] sm:$0xff]  }
 0x8f8   :  { %9680 = vmatprep.subr.bf16.mxu0 %v10551_v37 }
 0x8fa   :  { %2989 = vmatpush1.bf16.msra.mxu1 %v11498_v45  ;;  %v10205_v45 = vld [vmem:[%s14549_s3 + $0x220] sm:$0xff]  }
 0x8fb   :  { %2990 = vmatprep.subr.bf16.mxu1 %v10550_v0  ;;  %9681 = vmatpush3.bf16.msra.mxu0 %v10205_v45  ;;  %v8650_v45 = vld [vmem:[%s14548_s0 + $0x50] sm:$0xff] }
 0x8fc   :  { %9682 = vmatprep.subr.bf16.mxu0 %v10551_v37 }
 0x8fe   :  { %2991 = vmatpush1.bf16.msra.mxu1 %v10697_v15 }
 0x8ff   :  { %3075 = vmatprep.subr.bf16.mxu1 %v10550_v0  ;;  %9683 = vmatpush3.bf16.msra.mxu0 %v10206_v31  ;;  %v8652_v31 = vcombine.high %v8650_v45, %v8650_v45 }
 0x900   :  { %9684 = vmatprep.subr.bf16.mxu0 %v10551_v37 }
 0x901   :  { %3005 = vmatmul.mubr.bf16.vlgmr.msra.gmra.mrb[88].mxu1 %v8611_v46 }
 0x902   :  { %3076 = vmatpush1.bf16.msra.mxu1 %v12011_v47  ;;  %8621 = vmatprep.mubr.msk.bf16.mxu1 %vm117_vm0, %v8620_v57 }
 0x903   :  { %9685 = vmatpush3.bf16.msra.mxu0 %v10207_v32  ;;  %3077 = vmatprep.subr.bf16.mxu1 %v10550_v0  ;;  %v8651_v32 = vcombine.low %v8650_v45, %v8650_v45 }
 0x904   :  { %9686 = vmatprep.subr.bf16.mxu0 %v10551_v37 }
 0x906   :  { %3078 = vmatpush1.bf16.msra.mxu1 %v12018_v48 }
 0x907   :  { %9687 = vmatpush3.bf16.msra.mxu0 %v10208_v34  ;;  %3079 = vmatprep.subr.bf16.mxu1 %v10550_v0  ;;  %v8658_v34 = vld [vmem:[%s14548_s0 + $0x1e0] sm:$0xff] }
 0x908   :  { %3023 = vmatprep.subr.bf16.mxu0 %v10550_v0  ;;  %v8660_v36 = vcombine.high %v8658_v34, %v8658_v34 }
 0x90a   :  { %3080 = vmatpush1.bf16.msra.mxu1 %v12025_v49 }
 0x90b   :  { %3081 = vmatprep.subr.bf16.mxu1 %v10550_v0 }
 0x90e   :  { %3082 = vmatpush1.bf16.msra.mxu1 %v12032_v4 }
 0x90f   :  { %3083 = vmatprep.subr.bf16.mxu1 %v10550_v0 }
 0x912   :  { %3084 = vmatpush1.bf16.msra.mxu1 %v12039_v50 }
 0x913   :  { %3085 = vmatprep.subr.bf16.mxu1 %v10550_v0 }
 0x916   :  { %3086 = vmatpush1.bf16.msra.mxu1 %v12046_v51 }
 0x917   :  { %3087 = vmatprep.subr.bf16.mxu1 %v10550_v0 }
 0x91a   :  { %3088 = vmatpush1.bf16.msra.mxu1 %v12053_v52 }
 0x91b   :  { %3089 = vmatprep.subr.bf16.mxu1 %v10550_v0 }
 0x91e   :  { %3090 = vmatpush1.bf16.msra.mxu1 %v12060_v53 }
 0x91f   :  { %3091 = vmatprep.subr.bf16.mxu1 %v10550_v0 }
 0x922   :  { %3092 = vmatpush1.bf16.msra.mxu1 %v12067_v54 }
 0x923   :  { %3093 = vmatprep.subr.bf16.mxu1 %v10550_v0 }
 0x926   :  { %3094 = vmatpush1.bf16.msra.mxu1 %v10697_v15 }
 0x927   :  { %9692 = vmatprep.subr.bf16.mxu1 %v10551_v37 }
 0x929   :  { %3108 = vmatmul.mubr.bf16.vlgmr.msra.gmra.mrb[92].mxu1 %v8619_v60 }
 0x92a   :  { %9708 = vmatprep.mubr.msk.bf16.mxu1 %vm10552_vm2, %v10551_v37  ;;  %9693 = vmatpush3.bf16.msra.mxu1 %v10217_v27 }
 0x92b   :  { %9694 = vmatprep.subr.bf16.mxu1 %v10551_v37 }
 0x92e   :  { %9695 = vmatpush3.bf16.msra.mxu1 %v10218_v30  ;;  %v10236_v30 = vld [vmem:[%s14549_s3 + $0x298] sm:$0xff]  }
 0x92f   :  { %9696 = vmatprep.subr.bf16.mxu1 %v10551_v37 }
 0x932   :  { %9697 = vmatpush3.bf16.msra.mxu1 %v10219_v39  ;;  %v10239_v39 = vld [vmem:[%s14549_s3 + $0x2b0] sm:$0xff]  }
 0x933   :  { %9698 = vmatprep.subr.bf16.mxu1 %v10551_v37 }
 0x936   :  { %9699 = vmatpush3.bf16.msra.mxu1 %v10220_v40  ;;  %v10240_v40 = vld [vmem:[%s14549_s3 + $0x2b8] sm:$0xff]  }
 0x937   :  { %9700 = vmatprep.subr.bf16.mxu1 %v10551_v37 }
 0x93a   :  { %9701 = vmatpush3.bf16.msra.mxu1 %v10221_v41  ;;  %v8690_v41 = vld [vmem:[%s14548_s0 + $0x58] sm:$0xff] }
 0x93b   :  { %9702 = vmatprep.subr.bf16.mxu1 %v10551_v37 }
 0x93e   :  { %9703 = vmatpush3.bf16.msra.mxu1 %v10222_v42  ;;  %v8692_v42 = vcombine.high %v8690_v41, %v8690_v41 }
 0x93f   :  { %9704 = vmatprep.subr.bf16.mxu1 %v10551_v37 }
 0x942   :  { %9705 = vmatpush3.bf16.msra.mxu1 %v10223_v43  ;;  %v8691_v43 = vcombine.low %v8690_v41, %v8690_v41 }
 0x943   :  { %9706 = vmatprep.subr.bf16.mxu1 %v10551_v37 }
 0x946   :  { %9707 = vmatpush3.bf16.msra.mxu1 %v10224_v44  ;;  %v8698_v44 = vld [vmem:[%s14548_s0 + $0x1e8] sm:$0xff] }
 0x947   :  { %3339 = vmatprep.subr.bf16.mxu1 %v10550_v0 }
 0x95c   :  { %v2638_v56 = vpop.f32.mrb[76].mxu1 }
 0x95d   :  { %v12075_v58 = vadd.f32 %v2638_v56, %v11890_v63  ;;  %v9670_v59 = vpop.f32.mrb[77].mxu1  ;;  %v8659_v56 = vcombine.low %v8658_v34, %v8658_v34 }
 0x95e   :  { %v2641_v61 = vpop.f32.mrb[78].mxu1 }
 0x95f   :  { %v9671_v62 = vpop.f32.mrb[79].mxu1 }
 0x984   :  { %v2741_v1 = vpop.f32.mrb[80].mxu1 }
 0x985   :  { %v2747_v2 = vmax.f32 %v11951_v24, %v2741_v1  ;;  %v2743_v3 = vpop.f32.mrb[81].mxu1 }
 0x986   :  { %v2744_v63 = vpop.f32.mrb[82].mxu1 }
 0x987   :  { %v2799_v6 = vmax.f32 %v2747_v2, %v11970_v26  ;;  %v2745_v7 = vpop.f32.mrb[83].mxu1 }
 0x9ac   :  { %v2845_v8 = vpop.f32.mrb[84].mxu1 }
 0x9ad   :  { %v2851_v16 = vmax.f32 %v2799_v6, %v2845_v8  ;;  %v2847_v5 = vpop.f32.mrb[85].mxu1 }
 0x9ae   :  { %v2848_v17 = vpop.f32.mrb[86].mxu1  ;;  %v8654_v5 = vld [vmem:[%s14548_s0 + $0x118] sm:$0xff] }
 0x9af   :  { %v2852_v20 = vadd.f32 %v12087_v18, %v2851_v16  ;;  %v2849_v9 = vpop.f32.mrb[87].mxu1 }
 0x9b1   :  { %v2853_v22 = vmax.f32 %v2852_v20, 0.0  ;;  %v8656_v20 = vcombine.high %v8654_v5, %v8654_v5 }
 0x9b3   :  { %v2854_v19 = vpack.c.bf16 %v2853_v22, %v2853_v22  ;;  %v8655_v22 = vcombine.low %v8654_v5, %v8654_v5  ;;  %v8702_v5 = vld [vmem:[%s14548_s0 + $0x2b0] sm:$0xff] }
 0x9b5   :  { %9689 = vmatmul.mubr.bf16.vlgmr.msra.gmra.mrb[88].mxu0 %v2854_v19  ;;  %v8663_v19 = vcombine.low %v8662_v21, %v8662_v21 }
 0x9b6   :  { %3024 = vmatpush1.bf16.msra.mxu0 %v12011_v47  ;;  %8617 = vmatprep.mubr.msk.bf16.mxu0 %vm117_vm0, %v8616_v25  ;;  %v8664_v25 = vcombine.high %v8662_v21, %v8662_v21 }
 0x9b7   :  { %3025 = vmatprep.subr.bf16.mxu0 %v10550_v0 }
 0x9ba   :  { %3026 = vmatpush1.bf16.msra.mxu0 %v12018_v48 }
 0x9bb   :  { %3027 = vmatprep.subr.bf16.mxu0 %v10550_v0 }
 0x9be   :  { %3028 = vmatpush1.bf16.msra.mxu0 %v12025_v49 }
 0x9bf   :  { %3029 = vmatprep.subr.bf16.mxu0 %v10550_v0 }
 0x9c2   :  { %3030 = vmatpush1.bf16.msra.mxu0 %v12032_v4 }
 0x9c3   :  { %3031 = vmatprep.subr.bf16.mxu0 %v10550_v0 }
 0x9c6   :  { %3032 = vmatpush1.bf16.msra.mxu0 %v12039_v50 }
 0x9c7   :  { %3033 = vmatprep.subr.bf16.mxu0 %v10550_v0 }
 0x9ca   :  { %3034 = vmatpush1.bf16.msra.mxu0 %v12046_v51 }
 0x9cb   :  { %3035 = vmatprep.subr.bf16.mxu0 %v10550_v0 }
 0x9ce   :  { %3036 = vmatpush1.bf16.msra.mxu0 %v12053_v52 }
 0x9cf   :  { %3037 = vmatprep.subr.bf16.mxu0 %v10550_v0 }
 0x9d2   :  { %3038 = vmatpush1.bf16.msra.mxu0 %v12060_v53 }
 0x9d3   :  { %3039 = vmatprep.subr.bf16.mxu0 %v10550_v0 }
 0x9d4   :  { %v12141_v29 = vpop.f32.mrb[88].mxu1 }
 0x9d5   :  { %v3008_v13 = vpop.f32.mrb[89].mxu1 }
 0x9d6   :  { %3040 = vmatpush1.bf16.msra.mxu0 %v12067_v54  ;;  %v3009_v14 = vpop.f32.mrb[90].mxu1  ;;  %v10233_v13 = vld [vmem:[%s14549_s3 + $0x280] sm:$0xff]  }
 0x9d7   :  { %3041 = vmatprep.subr.bf16.mxu0 %v10550_v0  ;;  %v3010_v23 = vpop.f32.mrb[91].mxu1 }
 0x9d8   :  { %v10234_v23 = vld [vmem:[%s14549_s3 + $0x288] sm:$0xff]  }
 0x9da   :  { %3042 = vmatpush1.bf16.msra.mxu0 %v10697_v15 }
 0x9db   :  { %3127 = vmatprep.subr.bf16.mxu0 %v10550_v0 }
 0x9dd   :  { %3056 = vmatmul.mubr.bf16.vlgmr.msra.gmra.mrb[92].mxu0 %v8615_v10 }
 0x9de   :  { %3128 = vmatpush1.bf16.msra.mxu0 %v12011_v47  ;;  %8625 = vmatprep.mubr.msk.bf16.mxu0 %vm117_vm0, %v8624_v11 }
 0x9df   :  { %3129 = vmatprep.subr.bf16.mxu0 %v10550_v0 }
 0x9e2   :  { %3130 = vmatpush1.bf16.msra.mxu0 %v12018_v48 }
 0x9e3   :  { %3131 = vmatprep.subr.bf16.mxu0 %v10550_v0 }
 0x9e6   :  { %3132 = vmatpush1.bf16.msra.mxu0 %v12025_v49 }
 0x9e7   :  { %3133 = vmatprep.subr.bf16.mxu0 %v10550_v0 }
 0x9ea   :  { %3134 = vmatpush1.bf16.msra.mxu0 %v12032_v4 }
 0x9eb   :  { %3135 = vmatprep.subr.bf16.mxu0 %v10550_v0 }
 0x9ee   :  { %3136 = vmatpush1.bf16.msra.mxu0 %v12039_v50 }
 0x9ef   :  { %3137 = vmatprep.subr.bf16.mxu0 %v10550_v0 }
 0x9f2   :  { %3138 = vmatpush1.bf16.msra.mxu0 %v12046_v51 }
 0x9f3   :  { %3139 = vmatprep.subr.bf16.mxu0 %v10550_v0 }
 0x9f6   :  { %3140 = vmatpush1.bf16.msra.mxu0 %v12053_v52 }
 0x9f7   :  { %3141 = vmatprep.subr.bf16.mxu0 %v10550_v0 }
 0x9fa   :  { %3142 = vmatpush1.bf16.msra.mxu0 %v12060_v53 }
 0x9fb   :  { %3143 = vmatprep.subr.bf16.mxu0 %v10550_v0 }
 0x9fc   :  { %v12160_v24 = vpop.f32.mrb[92].mxu1 }
 0x9fd   :  { %v3111_v28 = vpop.f32.mrb[93].mxu1 }
 0x9fe   :  { %3144 = vmatpush1.bf16.msra.mxu0 %v12067_v54  ;;  %v3112_v26 = vpop.f32.mrb[94].mxu1  ;;  %v10235_v28 = vld [vmem:[%s14549_s3 + $0x290] sm:$0xff]  }
 0x9ff   :  { %3145 = vmatprep.subr.bf16.mxu0 %v10550_v0  ;;  %v3113_v38 = vpop.f32.mrb[95].mxu1  ;;  %v10237_v26 = vld [vmem:[%s14549_s3 + $0x2a0] sm:$0xff]  }
 0xa00   :  { %v10238_v38 = vld [vmem:[%s14549_s3 + $0x2a8] sm:$0xff]  }
 0xa02   :  { %3146 = vmatpush1.bf16.msra.mxu0 %v10697_v15 }
 0xa03   :  { %3288 = vmatprep.subr.bf16.mxu0 %v10550_v0 }
 0xa05   :  { %3160 = vmatmul.mubr.bf16.vlgmr.msra.gmra.mrb[96].mxu0 %v8623_v12 }
 0xa06   :  { %3289 = vmatpush1.bf16.msra.mxu0 %v12011_v47  ;;  %8653 = vmatprep.mubr.msk.bf16.mxu0 %vm117_vm0, %v8652_v31  ;;  %v8700_v31 = vcombine.high %v8698_v44, %v8698_v44 }
 0xa07   :  { %3290 = vmatprep.subr.bf16.mxu0 %v10550_v0 }
 0xa0a   :  { %3291 = vmatpush1.bf16.msra.mxu0 %v12018_v48 }
 0xa0b   :  { %3292 = vmatprep.subr.bf16.mxu0 %v10550_v0 }
 0xa0e   :  { %3293 = vmatpush1.bf16.msra.mxu0 %v12025_v49 }
 0xa0f   :  { %3294 = vmatprep.subr.bf16.mxu0 %v10550_v0 }
 0xa12   :  { %3295 = vmatpush1.bf16.msra.mxu0 %v12032_v4 }
 0xa13   :  { %3296 = vmatprep.subr.bf16.mxu0 %v10550_v0 }
 0xa16   :  { %3297 = vmatpush1.bf16.msra.mxu0 %v12039_v50 }
 0xa17   :  { %3298 = vmatprep.subr.bf16.mxu0 %v10550_v0 }
 0xa1a   :  { %3299 = vmatpush1.bf16.msra.mxu0 %v12046_v51 }
 0xa1b   :  { %3300 = vmatprep.subr.bf16.mxu0 %v10550_v0 }
 0xa1e   :  { %3301 = vmatpush1.bf16.msra.mxu0 %v12053_v52 }
 0xa1f   :  { %3302 = vmatprep.subr.bf16.mxu0 %v10550_v0 }
 0xa22   :  { %3303 = vmatpush1.bf16.msra.mxu0 %v12060_v53 }
 0xa23   :  { %3304 = vmatprep.subr.bf16.mxu0 %v10550_v0 }
 0xa26   :  { %3305 = vmatpush1.bf16.msra.mxu0 %v12067_v54 }
 0xa27   :  { %3306 = vmatprep.subr.bf16.mxu0 %v10550_v0 }
 0xa2a   :  { %3307 = vmatpush1.bf16.msra.mxu0 %v10697_v15 }
 0xa2b   :  { %3391 = vmatprep.subr.bf16.mxu0 %v10550_v0 }
 0xa2d   :  { %3321 = vmatmul.mubr.bf16.vlgmr.msra.gmra.mrb[100].mxu0 %v8651_v32 }
 0xa2e   :  { %3392 = vmatpush1.bf16.msra.mxu0 %v12011_v47  ;;  %8661 = vmatprep.mubr.msk.bf16.mxu0 %vm117_vm0, %v8660_v36 }
 0xa2f   :  { %3393 = vmatprep.subr.bf16.mxu0 %v10550_v0 }
 0xa32   :  { %3394 = vmatpush1.bf16.msra.mxu0 %v12018_v48 }
 0xa33   :  { %3395 = vmatprep.subr.bf16.mxu0 %v10550_v0 }
 0xa36   :  { %3396 = vmatpush1.bf16.msra.mxu0 %v12025_v49 }
 0xa37   :  { %3397 = vmatprep.subr.bf16.mxu0 %v10550_v0 }
 0xa3a   :  { %3398 = vmatpush1.bf16.msra.mxu0 %v12032_v4 }
 0xa3b   :  { %3399 = vmatprep.subr.bf16.mxu0 %v10550_v0 }
 0xa3e   :  { %3400 = vmatpush1.bf16.msra.mxu0 %v12039_v50 }
 0xa3f   :  { %3401 = vmatprep.subr.bf16.mxu0 %v10550_v0 }
 0xa42   :  { %3402 = vmatpush1.bf16.msra.mxu0 %v12046_v51 }
 0xa43   :  { %3403 = vmatprep.subr.bf16.mxu0 %v10550_v0 }
 0xa46   :  { %3404 = vmatpush1.bf16.msra.mxu0 %v12053_v52 }
 0xa47   :  { %3405 = vmatprep.subr.bf16.mxu0 %v10550_v0 }
 0xa4a   :  { %3406 = vmatpush1.bf16.msra.mxu0 %v12060_v53 }
 0xa4b   :  { %3407 = vmatprep.subr.bf16.mxu0 %v10550_v0 }
 0xa4e   :  { %3408 = vmatpush1.bf16.msra.mxu0 %v12067_v54 }
 0xa4f   :  { %3409 = vmatprep.subr.bf16.mxu0 %v10550_v0 }
 0xa52   :  { %3410 = vmatpush1.bf16.msra.mxu0 %v10697_v15 }
 0xa53   :  { %9712 = vmatprep.subr.bf16.mxu0 %v10551_v37 }
 0xa55   :  { %3424 = vmatmul.mubr.bf16.vlgmr.msra.gmra.mrb[104].mxu0 %v8659_v56 }
 0xa56   :  { %9728 = vmatprep.mubr.msk.bf16.mxu0 %vm10552_vm2, %v10551_v37  ;;  %9713 = vmatpush3.bf16.msra.mxu0 %v10233_v13 }
 0xa57   :  { %9714 = vmatprep.subr.bf16.mxu0 %v10551_v37 }
 0xa5a   :  { %9715 = vmatpush3.bf16.msra.mxu0 %v10234_v23  ;;  %v10252_v23 = vld [vmem:[%s14549_s3 + $0x2d8] sm:$0xff]  }
 0xa5b   :  { %9716 = vmatprep.subr.bf16.mxu0 %v10551_v37 }
 0xa5e   :  { %9717 = vmatpush3.bf16.msra.mxu0 %v10235_v28  ;;  %v10255_v28 = vld [vmem:[%s14549_s3 + $0x2f0] sm:$0xff]  }
 0xa5f   :  { %9718 = vmatprep.subr.bf16.mxu0 %v10551_v37 }
 0xa62   :  { %9719 = vmatpush3.bf16.msra.mxu0 %v10236_v30  ;;  %v10256_v30 = vld [vmem:[%s14549_s3 + $0x2f8] sm:$0xff]  }
 0xa63   :  { %9720 = vmatprep.subr.bf16.mxu0 %v10551_v37 }
 0xa66   :  { %9721 = vmatpush3.bf16.msra.mxu0 %v10237_v26  ;;  %v8730_v26 = vld [vmem:[%s14548_s0 + $0x60] sm:$0xff] }
 0xa67   :  { %9722 = vmatprep.subr.bf16.mxu0 %v10551_v37 }
 0xa6a   :  { %9723 = vmatpush3.bf16.msra.mxu0 %v10238_v38  ;;  %v8732_v38 = vcombine.high %v8730_v26, %v8730_v26 }
 0xa6b   :  { %9724 = vmatprep.subr.bf16.mxu0 %v10551_v37 }
 0xa6e   :  { %9725 = vmatpush3.bf16.msra.mxu0 %v10239_v39  ;;  %v8731_v39 = vcombine.low %v8730_v26, %v8730_v26 }
 0xa6f   :  { %9726 = vmatprep.subr.bf16.mxu0 %v10551_v37 }
 0xa72   :  { %9727 = vmatpush3.bf16.msra.mxu0 %v10240_v40  ;;  %v8738_v40 = vld [vmem:[%s14548_s0 + $0x1f0] sm:$0xff] }
 0xa73   :  { %3655 = vmatprep.subr.bf16.mxu0 %v10550_v0 }
 0xa88   :  { %v2954_v35 = vpop.f32.mrb[88].mxu0 }
 0xa89   :  { %v12220_v46 = vadd.f32 %v2954_v35, %v12075_v58  ;;  %v9690_v55 = vpop.f32.mrb[89].mxu0  ;;  %v8699_v35 = vcombine.low %v8698_v44, %v8698_v44 }
 0xa8a   :  { %v2957_v57 = vpop.f32.mrb[90].mxu0 }
 0xa8b   :  { %v9691_v59 = vpop.f32.mrb[91].mxu0 }
 0xab0   :  { %v3057_v60 = vpop.f32.mrb[92].mxu0 }
 0xab1   :  { %v3063_v61 = vmax.f32 %v12141_v29, %v3057_v60  ;;  %v3059_v62 = vpop.f32.mrb[93].mxu0 }
 0xab2   :  { %v3060_v58 = vpop.f32.mrb[94].mxu0 }
 0xab3   :  { %v3115_v1 = vmax.f32 %v3063_v61, %v12160_v24  ;;  %v3061_v2 = vpop.f32.mrb[95].mxu0 }
 0xad8   :  { %v3161_v3 = vpop.f32.mrb[96].mxu0 }
 0xad9   :  { %v3167_v63 = vmax.f32 %v3115_v1, %v3161_v3  ;;  %v3163_v6 = vpop.f32.mrb[97].mxu0 }
 0xada   :  { %v3164_v7 = vpop.f32.mrb[98].mxu0  ;;  %v8694_v6 = vld [vmem:[%s14548_s0 + $0x120] sm:$0xff] }
 0xadb   :  { %v3168_v8 = vadd.f32 %v12087_v18, %v3167_v63  ;;  %v3165_v16 = vpop.f32.mrb[99].mxu0 }
 0xadd   :  { %v3169_v17 = vmax.f32 %v3168_v8, 0.0  ;;  %v8696_v8 = vcombine.high %v8694_v6, %v8694_v6 }
 0xadf   :  { %v3170_v9 = vpack.c.bf16 %v3169_v17, %v3169_v17  ;;  %v8695_v17 = vcombine.low %v8694_v6, %v8694_v6  ;;  %v12590_v6 = vld [vmem:[%s14547_s1 + $0x38] sm:$0xff]  }
 0xae1   :  { %9709 = vmatmul.mubr.bf16.vlgmr.msra.gmra.mrb[96].mxu1 %v3170_v9  ;;  %v8703_v9 = vcombine.low %v8702_v5, %v8702_v5 }
 0xae2   :  { %3340 = vmatpush1.bf16.msra.mxu1 %v12011_v47  ;;  %8657 = vmatprep.mubr.msk.bf16.mxu1 %vm117_vm0, %v8656_v20  ;;  %v8704_v20 = vcombine.high %v8702_v5, %v8702_v5 }
 0xae3   :  { %3341 = vmatprep.subr.bf16.mxu1 %v10550_v0 }
 0xae6   :  { %3342 = vmatpush1.bf16.msra.mxu1 %v12018_v48 }
 0xae7   :  { %3343 = vmatprep.subr.bf16.mxu1 %v10550_v0 }
 0xaea   :  { %3344 = vmatpush1.bf16.msra.mxu1 %v12025_v49 }
 0xaeb   :  { %3345 = vmatprep.subr.bf16.mxu1 %v10550_v0 }
 0xaee   :  { %3346 = vmatpush1.bf16.msra.mxu1 %v12032_v4 }
 0xaef   :  { %3347 = vmatprep.subr.bf16.mxu1 %v10550_v0 }
 0xaf2   :  { %3348 = vmatpush1.bf16.msra.mxu1 %v12039_v50 }
 0xaf3   :  { %3349 = vmatprep.subr.bf16.mxu1 %v10550_v0 }
 0xaf6   :  { %3350 = vmatpush1.bf16.msra.mxu1 %v12046_v51 }
 0xaf7   :  { %3351 = vmatprep.subr.bf16.mxu1 %v10550_v0 }
 0xafa   :  { %3352 = vmatpush1.bf16.msra.mxu1 %v12053_v52 }
 0xafb   :  { %3353 = vmatprep.subr.bf16.mxu1 %v10550_v0 }
 0xafe   :  { %3354 = vmatpush1.bf16.msra.mxu1 %v12060_v53 }
 0xaff   :  { %3355 = vmatprep.subr.bf16.mxu1 %v10550_v0 }
 0xb00   :  { %v12281_v33 = vpop.f32.mrb[100].mxu0 }
 0xb01   :  { %v3324_v10 = vpop.f32.mrb[101].mxu0 }
 0xb02   :  { %3356 = vmatpush1.bf16.msra.mxu1 %v12067_v54  ;;  %v3325_v11 = vpop.f32.mrb[102].mxu0  ;;  %v10249_v10 = vld [vmem:[%s14549_s3 + $0x2c0] sm:$0xff]  }
 0xb03   :  { %3357 = vmatprep.subr.bf16.mxu1 %v10550_v0  ;;  %v3326_v12 = vpop.f32.mrb[103].mxu0 }
 0xb04   :  { %v10250_v12 = vld [vmem:[%s14549_s3 + $0x2c8] sm:$0xff]  }
 0xb06   :  { %3358 = vmatpush1.bf16.msra.mxu1 %v10697_v15 }
 0xb07   :  { %3443 = vmatprep.subr.bf16.mxu1 %v10550_v0 }
 0xb09   :  { %3372 = vmatmul.mubr.bf16.vlgmr.msra.gmra.mrb[100].mxu1 %v8655_v22 }
 0xb0a   :  { %3444 = vmatpush1.bf16.msra.mxu1 %v12011_v47  ;;  %8665 = vmatprep.mubr.msk.bf16.mxu1 %vm117_vm0, %v8664_v25 }
 0xb0b   :  { %3445 = vmatprep.subr.bf16.mxu1 %v10550_v0 }
 0xb0e   :  { %3446 = vmatpush1.bf16.msra.mxu1 %v12018_v48 }
 0xb0f   :  { %3447 = vmatprep.subr.bf16.mxu1 %v10550_v0 }
 0xb12   :  { %3448 = vmatpush1.bf16.msra.mxu1 %v12025_v49 }
 0xb13   :  { %3449 = vmatprep.subr.bf16.mxu1 %v10550_v0 }
 0xb16   :  { %3450 = vmatpush1.bf16.msra.mxu1 %v12032_v4 }
 0xb17   :  { %3451 = vmatprep.subr.bf16.mxu1 %v10550_v0 }
 0xb1a   :  { %3452 = vmatpush1.bf16.msra.mxu1 %v12039_v50 }
 0xb1b   :  { %3453 = vmatprep.subr.bf16.mxu1 %v10550_v0 }
 0xb1e   :  { %3454 = vmatpush1.bf16.msra.mxu1 %v12046_v51 }
 0xb1f   :  { %3455 = vmatprep.subr.bf16.mxu1 %v10550_v0 }
 0xb22   :  { %3456 = vmatpush1.bf16.msra.mxu1 %v12053_v52 }
 0xb23   :  { %3457 = vmatprep.subr.bf16.mxu1 %v10550_v0 }
 0xb26   :  { %3458 = vmatpush1.bf16.msra.mxu1 %v12060_v53 }
 0xb27   :  { %3459 = vmatprep.subr.bf16.mxu1 %v10550_v0 }
 0xb28   :  { %v12300_v29 = vpop.f32.mrb[104].mxu0 }
 0xb29   :  { %v3427_v14 = vpop.f32.mrb[105].mxu0 }
 0xb2a   :  { %3460 = vmatpush1.bf16.msra.mxu1 %v12067_v54  ;;  %v3428_v24 = vpop.f32.mrb[106].mxu0  ;;  %v10251_v14 = vld [vmem:[%s14549_s3 + $0x2d0] sm:$0xff]  }
 0xb2b   :  { %3461 = vmatprep.subr.bf16.mxu1 %v10550_v0  ;;  %v3429_v27 = vpop.f32.mrb[107].mxu0  ;;  %v10253_v24 = vld [vmem:[%s14549_s3 + $0x2e0] sm:$0xff]  }
 0xb2c   :  { %v10254_v27 = vld [vmem:[%s14549_s3 + $0x2e8] sm:$0xff]  }
 0xb2e   :  { %3462 = vmatpush1.bf16.msra.mxu1 %v10697_v15 }
 0xb2f   :  { %3604 = vmatprep.subr.bf16.mxu1 %v10550_v0 }
 0xb31   :  { %3476 = vmatmul.mubr.bf16.vlgmr.msra.gmra.mrb[104].mxu1 %v8663_v19 }
 0xb32   :  { %3605 = vmatpush1.bf16.msra.mxu1 %v12011_v47  ;;  %8693 = vmatprep.mubr.msk.bf16.mxu1 %vm117_vm0, %v8692_v42  ;;  %v8740_v42 = vcombine.high %v8738_v40, %v8738_v40 }
 0xb33   :  { %3606 = vmatprep.subr.bf16.mxu1 %v10550_v0 }
 0xb36   :  { %3607 = vmatpush1.bf16.msra.mxu1 %v12018_v48 }
 0xb37   :  { %3608 = vmatprep.subr.bf16.mxu1 %v10550_v0 }
 0xb3a   :  { %3609 = vmatpush1.bf16.msra.mxu1 %v12025_v49 }
 0xb3b   :  { %3610 = vmatprep.subr.bf16.mxu1 %v10550_v0 }
 0xb3e   :  { %3611 = vmatpush1.bf16.msra.mxu1 %v12032_v4 }
 0xb3f   :  { %3612 = vmatprep.subr.bf16.mxu1 %v10550_v0 }
 0xb42   :  { %3613 = vmatpush1.bf16.msra.mxu1 %v12039_v50 }
 0xb43   :  { %3614 = vmatprep.subr.bf16.mxu1 %v10550_v0 }
 0xb46   :  { %3615 = vmatpush1.bf16.msra.mxu1 %v12046_v51 }
 0xb47   :  { %3616 = vmatprep.subr.bf16.mxu1 %v10550_v0 }
 0xb4a   :  { %3617 = vmatpush1.bf16.msra.mxu1 %v12053_v52 }
 0xb4b   :  { %3618 = vmatprep.subr.bf16.mxu1 %v10550_v0 }
 0xb4e   :  { %3619 = vmatpush1.bf16.msra.mxu1 %v12060_v53 }
 0xb4f   :  { %3620 = vmatprep.subr.bf16.mxu1 %v10550_v0 }
 0xb52   :  { %3621 = vmatpush1.bf16.msra.mxu1 %v12067_v54 }
 0xb53   :  { %3622 = vmatprep.subr.bf16.mxu1 %v10550_v0 }
 0xb56   :  { %3623 = vmatpush1.bf16.msra.mxu1 %v10697_v15 }
 0xb57   :  { %3707 = vmatprep.subr.bf16.mxu1 %v10550_v0 }
 0xb59   :  { %3637 = vmatmul.mubr.bf16.vlgmr.msra.gmra.mrb[108].mxu1 %v8691_v43 }
 0xb5a   :  { %3708 = vmatpush1.bf16.msra.mxu1 %v12011_v47  ;;  %8701 = vmatprep.mubr.msk.bf16.mxu1 %vm117_vm0, %v8700_v31 }
 0xb5b   :  { %3709 = vmatprep.subr.bf16.mxu1 %v10550_v0 }
 0xb5e   :  { %3710 = vmatpush1.bf16.msra.mxu1 %v12018_v48 }
 0xb5f   :  { %3711 = vmatprep.subr.bf16.mxu1 %v10550_v0 }
 0xb62   :  { %3712 = vmatpush1.bf16.msra.mxu1 %v12025_v49 }
 0xb63   :  { %3713 = vmatprep.subr.bf16.mxu1 %v10550_v0 }
 0xb66   :  { %3714 = vmatpush1.bf16.msra.mxu1 %v12032_v4 }
 0xb67   :  { %3715 = vmatprep.subr.bf16.mxu1 %v10550_v0 }
 0xb6a   :  { %3716 = vmatpush1.bf16.msra.mxu1 %v12039_v50 }
 0xb6b   :  { %3717 = vmatprep.subr.bf16.mxu1 %v10550_v0 }
 0xb6e   :  { %3718 = vmatpush1.bf16.msra.mxu1 %v12046_v51 }
 0xb6f   :  { %3719 = vmatprep.subr.bf16.mxu1 %v10550_v0 }
 0xb72   :  { %3720 = vmatpush1.bf16.msra.mxu1 %v12053_v52 }
 0xb73   :  { %3721 = vmatprep.subr.bf16.mxu1 %v10550_v0 }
 0xb76   :  { %3722 = vmatpush1.bf16.msra.mxu1 %v12060_v53 }
 0xb77   :  { %3723 = vmatprep.subr.bf16.mxu1 %v10550_v0 }
 0xb7a   :  { %3724 = vmatpush1.bf16.msra.mxu1 %v12067_v54 }
 0xb7b   :  { %3725 = vmatprep.subr.bf16.mxu1 %v10550_v0 }
 0xb7e   :  { %3726 = vmatpush1.bf16.msra.mxu1 %v10697_v15 }
 0xb7f   :  { %9732 = vmatprep.subr.bf16.mxu1 %v10551_v37 }
 0xb81   :  { %3740 = vmatmul.mubr.bf16.vlgmr.msra.gmra.mrb[112].mxu1 %v8699_v35 }
 0xb82   :  { %9748 = vmatprep.mubr.msk.bf16.mxu1 %vm10552_vm2, %v10551_v37  ;;  %9733 = vmatpush3.bf16.msra.mxu1 %v10249_v10  ;;  %v10267_v10 = vld [vmem:[%s14549_s3 + $0x310] sm:$0xff]  }
 0xb83   :  { %9734 = vmatprep.subr.bf16.mxu1 %v10551_v37 }
 0xb86   :  { %9735 = vmatpush3.bf16.msra.mxu1 %v10250_v12  ;;  %v10269_v12 = vld [vmem:[%s14549_s3 + $0x320] sm:$0xff]  }
 0xb87   :  { %9736 = vmatprep.subr.bf16.mxu1 %v10551_v37 }
 0xb8a   :  { %9737 = vmatpush3.bf16.msra.mxu1 %v10251_v14  ;;  %v10272_v14 = vld [vmem:[%s14549_s3 + $0x338] sm:$0xff]  }
 0xb8b   :  { %9738 = vmatprep.subr.bf16.mxu1 %v10551_v37 }
 0xb8e   :  { %9739 = vmatpush3.bf16.msra.mxu1 %v10252_v23  ;;  %v8770_v23 = vld [vmem:[%s14548_s0 + $0x68] sm:$0xff] }
 0xb8f   :  { %9740 = vmatprep.subr.bf16.mxu1 %v10551_v37 }
 0xb92   :  { %9741 = vmatpush3.bf16.msra.mxu1 %v10253_v24  ;;  %v8772_v24 = vcombine.high %v8770_v23, %v8770_v23 }
 0xb93   :  { %9742 = vmatprep.subr.bf16.mxu1 %v10551_v37 }
 0xb96   :  { %9743 = vmatpush3.bf16.msra.mxu1 %v10254_v27  ;;  %v8771_v27 = vcombine.low %v8770_v23, %v8770_v23 }
 0xb97   :  { %9744 = vmatprep.subr.bf16.mxu1 %v10551_v37 }
 0xb9a   :  { %9745 = vmatpush3.bf16.msra.mxu1 %v10255_v28  ;;  %v8778_v28 = vld [vmem:[%s14548_s0 + $0x1f8] sm:$0xff] }
 0xb9b   :  { %9746 = vmatprep.subr.bf16.mxu1 %v10551_v37  ;;  %v8780_v26 = vcombine.high %v8778_v28, %v8778_v28 }
 0xb9e   :  { %9747 = vmatpush3.bf16.msra.mxu1 %v10256_v30 }
 0xb9f   :  { %3971 = vmatprep.subr.bf16.mxu1 %v10550_v0 }
 0xbb4   :  { %v3270_v45 = vpop.f32.mrb[96].mxu1 }
 0xbb5   :  { %v12360_v32 = vadd.f32 %v3270_v45, %v12220_v46  ;;  %v9710_v34 = vpop.f32.mrb[97].mxu1  ;;  %v8739_v45 = vcombine.low %v8738_v40, %v8738_v40  ;;  %v8779_v40 = vcombine.low %v8778_v28, %v8778_v28 }
 0xbb6   :  { %v3273_v36 = vpop.f32.mrb[98].mxu1 }
 0xbb7   :  { %v9711_v55 = vpop.f32.mrb[99].mxu1 }
 0xbdc   :  { %v3373_v56 = vpop.f32.mrb[100].mxu1 }
 0xbdd   :  { %v3379_v57 = vmax.f32 %v12281_v33, %v3373_v56  ;;  %v3375_v59 = vpop.f32.mrb[101].mxu1 }
 0xbde   :  { %v3376_v46 = vpop.f32.mrb[102].mxu1 }
 0xbdf   :  { %v3431_v60 = vmax.f32 %v3379_v57, %v12300_v29  ;;  %v3377_v61 = vpop.f32.mrb[103].mxu1 }
 0xc04   :  { %v3477_v62 = vpop.f32.mrb[104].mxu1 }
 0xc05   :  { %v3483_v58 = vmax.f32 %v3431_v60, %v3477_v62  ;;  %v3479_v1 = vpop.f32.mrb[105].mxu1 }
 0xc06   :  { %v3480_v2 = vpop.f32.mrb[106].mxu1  ;;  %v8734_v1 = vld [vmem:[%s14548_s0 + $0x128] sm:$0xff] }
 0xc07   :  { %v3484_v3 = vadd.f32 %v12087_v18, %v3483_v58  ;;  %v3481_v63 = vpop.f32.mrb[107].mxu1 }
 0xc09   :  { %v3485_v7 = vmax.f32 %v3484_v3, 0.0  ;;  %v8736_v3 = vcombine.high %v8734_v1, %v8734_v1 }
 0xc0b   :  { %v3486_v16 = vpack.c.bf16 %v3485_v7, %v3485_v7  ;;  %v12597_v7 = vld [vmem:[%s14547_s1 + $0x40] sm:$0xff]  }
 0xc0d   :  { %9729 = vmatmul.mubr.bf16.vlgmr.msra.gmra.mrb[108].mxu0 %v3486_v16 }
 0xc0e   :  { %3656 = vmatpush1.bf16.msra.mxu0 %v12011_v47  ;;  %8697 = vmatprep.mubr.msk.bf16.mxu0 %vm117_vm0, %v8696_v8 }
 0xc0f   :  { %3657 = vmatprep.subr.bf16.mxu0 %v10550_v0 }
 0xc12   :  { %3658 = vmatpush1.bf16.msra.mxu0 %v12018_v48 }
 0xc13   :  { %3659 = vmatprep.subr.bf16.mxu0 %v10550_v0 }
 0xc16   :  { %3660 = vmatpush1.bf16.msra.mxu0 %v12025_v49 }
 0xc17   :  { %3661 = vmatprep.subr.bf16.mxu0 %v10550_v0 }
 0xc1a   :  { %3662 = vmatpush1.bf16.msra.mxu0 %v12032_v4 }
 0xc1b   :  { %3663 = vmatprep.subr.bf16.mxu0 %v10550_v0 }
 0xc1e   :  { %3664 = vmatpush1.bf16.msra.mxu0 %v12039_v50 }
 0xc1f   :  { %3665 = vmatprep.subr.bf16.mxu0 %v10550_v0 }
 0xc22   :  { %3666 = vmatpush1.bf16.msra.mxu0 %v12046_v51 }
 0xc23   :  { %3667 = vmatprep.subr.bf16.mxu0 %v10550_v0 }
 0xc26   :  { %3668 = vmatpush1.bf16.msra.mxu0 %v12053_v52 }
 0xc27   :  { %3669 = vmatprep.subr.bf16.mxu0 %v10550_v0 }
 0xc2a   :  { %3670 = vmatpush1.bf16.msra.mxu0 %v12060_v53 }
 0xc2b   :  { %3671 = vmatprep.subr.bf16.mxu0 %v10550_v0 }
 0xc2c   :  { %v12421_v21 = vpop.f32.mrb[108].mxu1 }
 0xc2d   :  { %v3640_v22 = vpop.f32.mrb[109].mxu1 }
 0xc2e   :  { %3672 = vmatpush1.bf16.msra.mxu0 %v12067_v54  ;;  %v3641_v25 = vpop.f32.mrb[110].mxu1 }
 0xc2f   :  { %3673 = vmatprep.subr.bf16.mxu0 %v10550_v0  ;;  %v3642_v19 = vpop.f32.mrb[111].mxu1  ;;  %v10266_v25 = vld [vmem:[%s14549_s3 + $0x308] sm:$0xff]  }
 0xc32   :  { %3674 = vmatpush1.bf16.msra.mxu0 %v10697_v15 }
 0xc33   :  { %3759 = vmatprep.subr.bf16.mxu0 %v10550_v0 }
 0xc35   :  { %3688 = vmatmul.mubr.bf16.vlgmr.msra.gmra.mrb[112].mxu0 %v8695_v17 }
 0xc36   :  { %3760 = vmatpush1.bf16.msra.mxu0 %v12011_v47  ;;  %8705 = vmatprep.mubr.msk.bf16.mxu0 %vm117_vm0, %v8704_v20 }
 0xc37   :  { %3761 = vmatprep.subr.bf16.mxu0 %v10550_v0 }
 0xc3a   :  { %3762 = vmatpush1.bf16.msra.mxu0 %v12018_v48 }
 0xc3b   :  { %3763 = vmatprep.subr.bf16.mxu0 %v10550_v0 }
 0xc3e   :  { %3764 = vmatpush1.bf16.msra.mxu0 %v12025_v49 }
 0xc3f   :  { %3765 = vmatprep.subr.bf16.mxu0 %v10550_v0 }
 0xc42   :  { %3766 = vmatpush1.bf16.msra.mxu0 %v12032_v4 }
 0xc43   :  { %3767 = vmatprep.subr.bf16.mxu0 %v10550_v0 }
 0xc46   :  { %3768 = vmatpush1.bf16.msra.mxu0 %v12039_v50 }
 0xc47   :  { %3769 = vmatprep.subr.bf16.mxu0 %v10550_v0 }
 0xc4a   :  { %3770 = vmatpush1.bf16.msra.mxu0 %v12046_v51 }
 0xc4b   :  { %3771 = vmatprep.subr.bf16.mxu0 %v10550_v0 }
 0xc4e   :  { %3772 = vmatpush1.bf16.msra.mxu0 %v12053_v52 }
 0xc4f   :  { %3773 = vmatprep.subr.bf16.mxu0 %v10550_v0 }
 0xc52   :  { %3774 = vmatpush1.bf16.msra.mxu0 %v12060_v53 }
 0xc53   :  { %3775 = vmatprep.subr.bf16.mxu0 %v10550_v0 }
 0xc54   :  { %v12440_v33 = vpop.f32.mrb[112].mxu1 }
 0xc55   :  { %v3743_v11 = vpop.f32.mrb[113].mxu1 }
 0xc56   :  { %3776 = vmatpush1.bf16.msra.mxu0 %v12067_v54  ;;  %v3744_v29 = vpop.f32.mrb[114].mxu1  ;;  %v10268_v11 = vld [vmem:[%s14549_s3 + $0x318] sm:$0xff]  }
 0xc57   :  { %3777 = vmatprep.subr.bf16.mxu0 %v10550_v0  ;;  %v3745_v13 = vpop.f32.mrb[115].mxu1  ;;  %v10270_v29 = vld [vmem:[%s14549_s3 + $0x328] sm:$0xff]  }
 0xc58   :  { %v10271_v13 = vld [vmem:[%s14549_s3 + $0x330] sm:$0xff]  }
 0xc5a   :  { %3778 = vmatpush1.bf16.msra.mxu0 %v10697_v15 }
 0xc5b   :  { %3920 = vmatprep.subr.bf16.mxu0 %v10550_v0 }
 0xc5d   :  { %3792 = vmatmul.mubr.bf16.vlgmr.msra.gmra.mrb[116].mxu0 %v8703_v9 }
 0xc5e   :  { %3921 = vmatpush1.bf16.msra.mxu0 %v12011_v47  ;;  %8733 = vmatprep.mubr.msk.bf16.mxu0 %vm117_vm0, %v8732_v38 }
 0xc5f   :  { %3922 = vmatprep.subr.bf16.mxu0 %v10550_v0 }
 0xc62   :  { %3923 = vmatpush1.bf16.msra.mxu0 %v12018_v48 }
 0xc63   :  { %3924 = vmatprep.subr.bf16.mxu0 %v10550_v0 }
 0xc66   :  { %3925 = vmatpush1.bf16.msra.mxu0 %v12025_v49 }
 0xc67   :  { %3926 = vmatprep.subr.bf16.mxu0 %v10550_v0 }
 0xc6a   :  { %3927 = vmatpush1.bf16.msra.mxu0 %v12032_v4 }
 0xc6b   :  { %3928 = vmatprep.subr.bf16.mxu0 %v10550_v0 }
 0xc6e   :  { %3929 = vmatpush1.bf16.msra.mxu0 %v12039_v50 }
 0xc6f   :  { %3930 = vmatprep.subr.bf16.mxu0 %v10550_v0 }
 0xc72   :  { %3931 = vmatpush1.bf16.msra.mxu0 %v12046_v51 }
 0xc73   :  { %3932 = vmatprep.subr.bf16.mxu0 %v10550_v0 }
 0xc76   :  { %3933 = vmatpush1.bf16.msra.mxu0 %v12053_v52 }
 0xc77   :  { %3934 = vmatprep.subr.bf16.mxu0 %v10550_v0 }
 0xc7a   :  { %3935 = vmatpush1.bf16.msra.mxu0 %v12060_v53 }
 0xc7b   :  { %3936 = vmatprep.subr.bf16.mxu0 %v10550_v0 }
 0xc7e   :  { %3937 = vmatpush1.bf16.msra.mxu0 %v12067_v54 }
 0xc7f   :  { %3938 = vmatprep.subr.bf16.mxu0 %v10550_v0 }
 0xc82   :  { %3939 = vmatpush1.bf16.msra.mxu0 %v10697_v15 }
 0xc83   :  { %4023 = vmatprep.subr.bf16.mxu0 %v10550_v0 }
 0xc85   :  { %3953 = vmatmul.mubr.bf16.vlgmr.msra.gmra.mrb[120].mxu0 %v8731_v39 }
 0xc86   :  { %4024 = vmatpush1.bf16.msra.mxu0 %v12011_v47  ;;  %8741 = vmatprep.mubr.msk.bf16.mxu0 %vm117_vm0, %v8740_v42 }
 0xc87   :  { %4025 = vmatprep.subr.bf16.mxu0 %v10550_v0 }
 0xc8a   :  { %4026 = vmatpush1.bf16.msra.mxu0 %v12018_v48 }
 0xc8b   :  { %4027 = vmatprep.subr.bf16.mxu0 %v10550_v0 }
 0xc8e   :  { %4028 = vmatpush1.bf16.msra.mxu0 %v12025_v49 }
 0xc8f   :  { %4029 = vmatprep.subr.bf16.mxu0 %v10550_v0 }
 0xc92   :  { %4030 = vmatpush1.bf16.msra.mxu0 %v12032_v4 }
 0xc93   :  { %4031 = vmatprep.subr.bf16.mxu0 %v10550_v0 }
 0xc96   :  { %4032 = vmatpush1.bf16.msra.mxu0 %v12039_v50 }
 0xc97   :  { %4033 = vmatprep.subr.bf16.mxu0 %v10550_v0 }
 0xc9a   :  { %4034 = vmatpush1.bf16.msra.mxu0 %v12046_v51 }
 0xc9b   :  { %4035 = vmatprep.subr.bf16.mxu0 %v10550_v0 }
 0xc9e   :  { %4036 = vmatpush1.bf16.msra.mxu0 %v12053_v52 }
 0xc9f   :  { %4037 = vmatprep.subr.bf16.mxu0 %v10550_v0 }
 0xca2   :  { %4038 = vmatpush1.bf16.msra.mxu0 %v12060_v53 }
 0xca3   :  { %4039 = vmatprep.subr.bf16.mxu0 %v10550_v0 }
 0xca6   :  { %4040 = vmatpush1.bf16.msra.mxu0 %v12067_v54 }
 0xca7   :  { %4041 = vmatprep.subr.bf16.mxu0 %v10550_v0 }
 0xcaa   :  { %4042 = vmatpush1.bf16.msra.mxu0 %v10697_v15 }
 0xcab   :  { %9752 = vmatprep.subr.bf16.mxu0 %v10551_v37 }
 0xcad   :  { %4056 = vmatmul.mubr.bf16.vlgmr.msra.gmra.mrb[124].mxu0 %v8739_v45 }
 0xcae   :  { %9768 = vmatprep.mubr.msk.bf16.mxu0 %vm10552_vm2, %v10551_v37 }
 0xce0   :  { %v3586_v41 = vpop.f32.mrb[108].mxu0 }
 0xce1   :  { %v12500_v43 = vadd.f32 %v3586_v41, %v12360_v32  ;;  %v9730_v44 = vpop.f32.mrb[109].mxu0 }
 0xce2   :  { %v3589_v31 = vpop.f32.mrb[110].mxu0 }
 0xce3   :  { %v9731_v34 = vpop.f32.mrb[111].mxu0 }
 0xd08   :  { %v3689_v35 = vpop.f32.mrb[112].mxu0 }
 0xd09   :  { %v3695_v36 = vmax.f32 %v12421_v21, %v3689_v35  ;;  %v3691_v55 = vpop.f32.mrb[113].mxu0  ;;  %v10265_v21 = vld [vmem:[%s14549_s3 + $0x300] sm:$0xff]  }
 0xd0a   :  { %v3692_v32 = vpop.f32.mrb[114].mxu0  ;;  %9753 = vmatpush3.bf16.msra.mxu0 %v10265_v21 }
 0xd0b   :  { %v3747_v56 = vmax.f32 %v3695_v36, %v12440_v33  ;;  %v3693_v57 = vpop.f32.mrb[115].mxu0  ;;  %9754 = vmatprep.subr.bf16.mxu0 %v10551_v37 }
 0xd0c   :  { %v12697_v57 = vld [vmem:[%s14550_s2] ss:$0 sm:$0xff] }
 0xd0e   :  { %9755 = vmatpush3.bf16.msra.mxu0 %v10266_v25  ;;  %v10284_v25 = vld [vmem:[%s14549_s3 + $0x358] sm:$0xff]  }
 0xd0f   :  { %9756 = vmatprep.subr.bf16.mxu0 %v10551_v37 }
 0xd12   :  { %9757 = vmatpush3.bf16.msra.mxu0 %v10267_v10  ;;  %v10287_v10 = vld [vmem:[%s14549_s3 + $0x370] sm:$0xff]  }
 0xd13   :  { %9758 = vmatprep.subr.bf16.mxu0 %v10551_v37 }
 0xd16   :  { %9759 = vmatpush3.bf16.msra.mxu0 %v10268_v11  ;;  %v10288_v11 = vld [vmem:[%s14549_s3 + $0x378] sm:$0xff]  }
 0xd17   :  { %9760 = vmatprep.subr.bf16.mxu0 %v10551_v37 }
 0xd1a   :  { %9761 = vmatpush3.bf16.msra.mxu0 %v10269_v12  ;;  %v8810_v12 = vld [vmem:[%s14548_s0 + $0x70] sm:$0xff] }
 0xd1b   :  { %9762 = vmatprep.subr.bf16.mxu0 %v10551_v37 }
 0xd1e   :  { %9763 = vmatpush3.bf16.msra.mxu0 %v10270_v29  ;;  %v8812_v29 = vcombine.high %v8810_v12, %v8810_v12 }
 0xd1f   :  { %9764 = vmatprep.subr.bf16.mxu0 %v10551_v37 }
 0xd22   :  { %9765 = vmatpush3.bf16.msra.mxu0 %v10271_v13  ;;  %v8811_v13 = vcombine.low %v8810_v12, %v8810_v12 }
 0xd23   :  { %9766 = vmatprep.subr.bf16.mxu0 %v10551_v37 }
 0xd26   :  { %9767 = vmatpush3.bf16.msra.mxu0 %v10272_v14  ;;  %v8818_v14 = vld [vmem:[%s14548_s0 + $0x200] sm:$0xff] }
 0xd27   :  { %4287 = vmatprep.subr.bf16.mxu0 %v10550_v0 }
 0xd30   :  { %v3793_v59 = vpop.f32.mrb[116].mxu0 }
 0xd31   :  { %v3799_v46 = vmax.f32 %v3747_v56, %v3793_v59  ;;  %v3795_v60 = vpop.f32.mrb[117].mxu0 }
 0xd32   :  { %v3796_v61 = vpop.f32.mrb[118].mxu0  ;;  %v8774_v60 = vld [vmem:[%s14548_s0 + $0x130] sm:$0xff] }
 0xd33   :  { %v3800_v62 = vadd.f32 %v12087_v18, %v3799_v46  ;;  %v3797_v58 = vpop.f32.mrb[119].mxu0  ;;  %v12583_v18 = vld [vmem:[%s14547_s1 + $0x30] sm:$0xff]  }
 0xd35   :  { %v3801_v2 = vmax.f32 %v3800_v62, 0.0  ;;  %v8776_v62 = vcombine.high %v8774_v60, %v8774_v60 }
 0xd37   :  { %v3802_v63 = vpack.c.bf16 %v3801_v2, %v3801_v2  ;;  %v8775_v2 = vcombine.low %v8774_v60, %v8774_v60  ;;  %v8822_v60 = vld [vmem:[%s14548_s0 + $0x2c8] sm:$0xff] }
 0xd39   :  { %9749 = vmatmul.mubr.bf16.vlgmr.msra.gmra.mrb[116].mxu1 %v3802_v63 }
 0xd3a   :  { %3972 = vmatpush1.bf16.msra.mxu1 %v12011_v47  ;;  %8737 = vmatprep.mubr.msk.bf16.mxu1 %vm117_vm0, %v8736_v3  ;;  %v8742_v47 = vld [vmem:[%s14548_s0 + $0x2b8] sm:$0xff] }
 0xd3b   :  { %3973 = vmatprep.subr.bf16.mxu1 %v10550_v0  ;;  %v8743_v8 = vcombine.low %v8742_v47, %v8742_v47 }
 0xd3e   :  { %3974 = vmatpush1.bf16.msra.mxu1 %v12018_v48  ;;  %v8735_v48 = vcombine.low %v8734_v1, %v8734_v1  ;;  %v8782_v1 = vld [vmem:[%s14548_s0 + $0x2c0] sm:$0xff] }
 0xd3f   :  { %3975 = vmatprep.subr.bf16.mxu1 %v10550_v0  ;;  %v8784_v3 = vcombine.high %v8782_v1, %v8782_v1  ;;  %v8783_v63 = vcombine.low %v8782_v1, %v8782_v1 }
 0xd42   :  { %3976 = vmatpush1.bf16.msra.mxu1 %v12025_v49  ;;  %v8744_v49 = vcombine.high %v8742_v47, %v8742_v47 }
 0xd43   :  { %3977 = vmatprep.subr.bf16.mxu1 %v10550_v0 }
 0xd46   :  { %3978 = vmatpush1.bf16.msra.mxu1 %v12032_v4  ;;  %v12540_v4 = vld [vmem:[%s14547_s1] sm:$0xff]  }
 0xd47   :  { %3979 = vmatprep.subr.bf16.mxu1 %v10550_v0 }
 0xd4a   :  { %3980 = vmatpush1.bf16.msra.mxu1 %v12039_v50  ;;  %v12548_v50 = vld [vmem:[%s14547_s1 + $0x8] sm:$0xff]  }
 0xd4b   :  { %3981 = vmatprep.subr.bf16.mxu1 %v10550_v0 }
 0xd4e   :  { %3982 = vmatpush1.bf16.msra.mxu1 %v12046_v51  ;;  %v12555_v51 = vld [vmem:[%s14547_s1 + $0x10] sm:$0xff]  }
 0xd4f   :  { %3983 = vmatprep.subr.bf16.mxu1 %v10550_v0 }
 0xd52   :  { %3984 = vmatpush1.bf16.msra.mxu1 %v12053_v52  ;;  %v12562_v52 = vld [vmem:[%s14547_s1 + $0x18] sm:$0xff]  }
 0xd53   :  { %3985 = vmatprep.subr.bf16.mxu1 %v10550_v0 }
 0xd56   :  { %3986 = vmatpush1.bf16.msra.mxu1 %v12060_v53  ;;  %v12569_v53 = vld [vmem:[%s14547_s1 + $0x20] sm:$0xff]  }
 0xd57   :  { %3987 = vmatprep.subr.bf16.mxu1 %v10550_v0 }
 0xd58   :  { %v12606_v16 = vpop.f32.mrb[120].mxu0 }
 0xd59   :  { %v3956_v5 = vpop.f32.mrb[121].mxu0 }
 0xd5a   :  { %3988 = vmatpush1.bf16.msra.mxu1 %v12067_v54  ;;  %v12576_v54 = vld [vmem:[%s14547_s1 + $0x28] sm:$0xff]   ;;  %v3957_v17 = vpop.f32.mrb[122].mxu0  ;;  %v10281_v5 = vld [vmem:[%s14549_s3 + $0x340] sm:$0xff]  }
 0xd5b   :  { %3989 = vmatprep.subr.bf16.mxu1 %v10550_v0  ;;  %v3958_v20 = vpop.f32.mrb[123].mxu0 }
 0xd5c   :  { %v10282_v20 = vld [vmem:[%s14549_s3 + $0x348] sm:$0xff]  }
 0xd5e   :  { %3990 = vmatpush1.bf16.msra.mxu1 %v10697_v15 }
 0xd5f   :  { %4075 = vmatprep.subr.bf16.mxu1 %v10550_v0 }
 0xd61   :  { %4004 = vmatmul.mubr.bf16.vlgmr.msra.gmra.mrb[120].mxu1 %v8735_v48 }
 0xd62   :  { %4076 = vmatpush1.bf16.msra.mxu1 %v12540_v4  ;;  %8745 = vmatprep.mubr.msk.bf16.mxu1 %vm117_vm0, %v8744_v49 }
 0xd63   :  { %4077 = vmatprep.subr.bf16.mxu1 %v10550_v0 }
 0xd66   :  { %4078 = vmatpush1.bf16.msra.mxu1 %v12548_v50 }
 0xd67   :  { %4079 = vmatprep.subr.bf16.mxu1 %v10550_v0 }
 0xd6a   :  { %4080 = vmatpush1.bf16.msra.mxu1 %v12555_v51 }
 0xd6b   :  { %4081 = vmatprep.subr.bf16.mxu1 %v10550_v0 }
 0xd6e   :  { %4082 = vmatpush1.bf16.msra.mxu1 %v12562_v52 }
 0xd6f   :  { %4083 = vmatprep.subr.bf16.mxu1 %v10550_v0 }
 0xd72   :  { %4084 = vmatpush1.bf16.msra.mxu1 %v12569_v53 }
 0xd73   :  { %4085 = vmatprep.subr.bf16.mxu1 %v10550_v0 }
 0xd76   :  { %4086 = vmatpush1.bf16.msra.mxu1 %v12576_v54 }
 0xd77   :  { %4087 = vmatprep.subr.bf16.mxu1 %v10550_v0 }
 0xd7a   :  { %4088 = vmatpush1.bf16.msra.mxu1 %v12583_v18 }
 0xd7b   :  { %4089 = vmatprep.subr.bf16.mxu1 %v10550_v0 }
 0xd7e   :  { %4090 = vmatpush1.bf16.msra.mxu1 %v12590_v6 }
 0xd7f   :  { %4091 = vmatprep.subr.bf16.mxu1 %v10550_v0 }
 0xd80   :  { %v12625_v9 = vpop.f32.mrb[124].mxu0 }
 0xd81   :  { %v4059_v22 = vpop.f32.mrb[125].mxu0 }
 0xd82   :  { %4092 = vmatpush1.bf16.msra.mxu1 %v12597_v7  ;;  %v4060_v19 = vpop.f32.mrb[126].mxu0  ;;  %v10283_v22 = vld [vmem:[%s14549_s3 + $0x350] sm:$0xff]  }
 0xd83   :  { %4093 = vmatprep.subr.bf16.mxu1 %v10550_v0  ;;  %v4061_v33 = vpop.f32.mrb[127].mxu0  ;;  %v10285_v19 = vld [vmem:[%s14549_s3 + $0x360] sm:$0xff]  }
 0xd84   :  { %v10286_v33 = vld [vmem:[%s14549_s3 + $0x368] sm:$0xff]  }
 0xd86   :  { %4094 = vmatpush1.bf16.msra.mxu1 %v10697_v15 }
 0xd87   :  { %4236 = vmatprep.subr.bf16.mxu1 %v10550_v0 }
 0xd89   :  { %4108 = vmatmul.mubr.bf16.vlgmr.msra.gmra.mrb[124].mxu1 %v8743_v8 }
 0xd8a   :  { %4237 = vmatpush1.bf16.msra.mxu1 %v12540_v4  ;;  %8773 = vmatprep.mubr.msk.bf16.mxu1 %vm117_vm0, %v8772_v24  ;;  %v8820_v24 = vcombine.high %v8818_v14, %v8818_v14 }
 0xd8b   :  { %4238 = vmatprep.subr.bf16.mxu1 %v10550_v0 }
 0xd8e   :  { %4239 = vmatpush1.bf16.msra.mxu1 %v12548_v50 }
 0xd8f   :  { %4240 = vmatprep.subr.bf16.mxu1 %v10550_v0 }
 0xd92   :  { %4241 = vmatpush1.bf16.msra.mxu1 %v12555_v51 }
 0xd93   :  { %4242 = vmatprep.subr.bf16.mxu1 %v10550_v0 }
 0xd96   :  { %4243 = vmatpush1.bf16.msra.mxu1 %v12562_v52 }
 0xd97   :  { %4244 = vmatprep.subr.bf16.mxu1 %v10550_v0 }
 0xd9a   :  { %4245 = vmatpush1.bf16.msra.mxu1 %v12569_v53 }
 0xd9b   :  { %4246 = vmatprep.subr.bf16.mxu1 %v10550_v0 }
 0xd9e   :  { %4247 = vmatpush1.bf16.msra.mxu1 %v12576_v54 }
 0xd9f   :  { %4248 = vmatprep.subr.bf16.mxu1 %v10550_v0 }
 0xda2   :  { %4249 = vmatpush1.bf16.msra.mxu1 %v12583_v18 }
 0xda3   :  { %4250 = vmatprep.subr.bf16.mxu1 %v10550_v0 }
 0xda6   :  { %4251 = vmatpush1.bf16.msra.mxu1 %v12590_v6 }
 0xda7   :  { %4252 = vmatprep.subr.bf16.mxu1 %v10550_v0 }
 0xdaa   :  { %4253 = vmatpush1.bf16.msra.mxu1 %v12597_v7 }
 0xdab   :  { %4254 = vmatprep.subr.bf16.mxu1 %v10550_v0 }
 0xdae   :  { %4255 = vmatpush1.bf16.msra.mxu1 %v10697_v15 }
 0xdaf   :  { %4339 = vmatprep.subr.bf16.mxu1 %v10550_v0 }
 0xdb1   :  { %4269 = vmatmul.mubr.bf16.vlgmr.msra.gmra.mrb[128].mxu1 %v8771_v27 }
 0xdb2   :  { %4340 = vmatpush1.bf16.msra.mxu1 %v12540_v4  ;;  %8781 = vmatprep.mubr.msk.bf16.mxu1 %vm117_vm0, %v8780_v26 }
 0xdb3   :  { %4341 = vmatprep.subr.bf16.mxu1 %v10550_v0 }
 0xdb6   :  { %4342 = vmatpush1.bf16.msra.mxu1 %v12548_v50 }
 0xdb7   :  { %4343 = vmatprep.subr.bf16.mxu1 %v10550_v0 }
 0xdba   :  { %4344 = vmatpush1.bf16.msra.mxu1 %v12555_v51 }
 0xdbb   :  { %4345 = vmatprep.subr.bf16.mxu1 %v10550_v0 }
 0xdbe   :  { %4346 = vmatpush1.bf16.msra.mxu1 %v12562_v52 }
 0xdbf   :  { %4347 = vmatprep.subr.bf16.mxu1 %v10550_v0 }
 0xdc2   :  { %4348 = vmatpush1.bf16.msra.mxu1 %v12569_v53 }
 0xdc3   :  { %4349 = vmatprep.subr.bf16.mxu1 %v10550_v0 }
 0xdc6   :  { %4350 = vmatpush1.bf16.msra.mxu1 %v12576_v54 }
 0xdc7   :  { %4351 = vmatprep.subr.bf16.mxu1 %v10550_v0 }
 0xdca   :  { %4352 = vmatpush1.bf16.msra.mxu1 %v12583_v18 }
 0xdcb   :  { %4353 = vmatprep.subr.bf16.mxu1 %v10550_v0 }
 0xdce   :  { %4354 = vmatpush1.bf16.msra.mxu1 %v12590_v6 }
 0xdcf   :  { %4355 = vmatprep.subr.bf16.mxu1 %v10550_v0 }
 0xdd2   :  { %4356 = vmatpush1.bf16.msra.mxu1 %v12597_v7 }
 0xdd3   :  { %4357 = vmatprep.subr.bf16.mxu1 %v10550_v0 }
 0xdd6   :  { %4358 = vmatpush1.bf16.msra.mxu1 %v10697_v15 }
 0xdd7   :  { %9772 = vmatprep.subr.bf16.mxu1 %v10551_v37 }
 0xdd9   :  { %4372 = vmatmul.mubr.bf16.vlgmr.msra.gmra.mrb[132].mxu1 %v8779_v40 }
 0xdda   :  { %9788 = vmatprep.mubr.msk.bf16.mxu1 %vm10552_vm2, %v10551_v37  ;;  %9773 = vmatpush3.bf16.msra.mxu1 %v10281_v5 }
 0xddb   :  { %9774 = vmatprep.subr.bf16.mxu1 %v10551_v37 }
 0xdde   :  { %9775 = vmatpush3.bf16.msra.mxu1 %v10282_v20  ;;  %v10300_v20 = vld [vmem:[%s14549_s3 + $0x398] sm:$0xff]  }
 0xddf   :  { %9776 = vmatprep.subr.bf16.mxu1 %v10551_v37 }
 0xde2   :  { %9777 = vmatpush3.bf16.msra.mxu1 %v10283_v22  ;;  %v10303_v22 = vld [vmem:[%s14549_s3 + $0x3b0] sm:$0xff]  }
 0xde3   :  { %9778 = vmatprep.subr.bf16.mxu1 %v10551_v37 }
 0xde6   :  { %9779 = vmatpush3.bf16.msra.mxu1 %v10284_v25  ;;  %v10304_v25 = vld [vmem:[%s14549_s3 + $0x3b8] sm:$0xff]  }
 0xde7   :  { %9780 = vmatprep.subr.bf16.mxu1 %v10551_v37 }
 0xdea   :  { %9781 = vmatpush3.bf16.msra.mxu1 %v10285_v19  ;;  %v8850_v19 = vld [vmem:[%s14548_s0 + $0x78] sm:$0xff] }
 0xdeb   :  { %9782 = vmatprep.subr.bf16.mxu1 %v10551_v37 }
 0xdee   :  { %9783 = vmatpush3.bf16.msra.mxu1 %v10286_v33  ;;  %v8852_v33 = vcombine.high %v8850_v19, %v8850_v19 }
 0xdef   :  { %9784 = vmatprep.subr.bf16.mxu1 %v10551_v37 }
 0xdf2   :  { %9785 = vmatpush3.bf16.msra.mxu1 %v10287_v10  ;;  %v8851_v10 = vcombine.low %v8850_v19, %v8850_v19 }
 0xdf3   :  { %9786 = vmatprep.subr.bf16.mxu1 %v10551_v37 }
 0xdf6   :  { %9787 = vmatpush3.bf16.msra.mxu1 %v10288_v11  ;;  %v8858_v11 = vld [vmem:[%s14548_s0 + $0x208] sm:$0xff] }
 0xdf7   :  { %4603 = vmatprep.subr.bf16.mxu1 %v10550_v0 }
 0xe0c   :  { %v3902_v30 = vpop.f32.mrb[116].mxu1 }
 0xe0d   :  { %v12685_v38 = vadd.f32 %v3902_v30, %v12500_v43  ;;  %v9750_v39 = vpop.f32.mrb[117].mxu1  ;;  %v8819_v30 = vcombine.low %v8818_v14, %v8818_v14 }
 0xe0e   :  { %v3905_v41 = vpop.f32.mrb[118].mxu1 }
 0xe0f   :  { %v9751_v42 = vpop.f32.mrb[119].mxu1 }
 0xe34   :  { %v4005_v44 = vpop.f32.mrb[120].mxu1 }
 0xe35   :  { %v4011_v45 = vmax.f32 %v12606_v16, %v4005_v44  ;;  %v4007_v31 = vpop.f32.mrb[121].mxu1 }
 0xe36   :  { %v4008_v43 = vpop.f32.mrb[122].mxu1 }
 0xe37   :  { %v4063_v34 = vmax.f32 %v4011_v45, %v12625_v9  ;;  %v4009_v35 = vpop.f32.mrb[123].mxu1 }
 0xe5c   :  { %v4109_v36 = vpop.f32.mrb[124].mxu1 }
 0xe5d   :  { %v4115_v55 = vmax.f32 %v4063_v34, %v4109_v36  ;;  %v4111_v32 = vpop.f32.mrb[125].mxu1 }
 0xe5e   :  { %v4112_v56 = vpop.f32.mrb[126].mxu1  ;;  %v8814_v32 = vld [vmem:[%s14548_s0 + $0x138] sm:$0xff] }
 0xe5f   :  { %v4116_v59 = vadd.f32 %v12697_v57, %v4115_v55  ;;  %v4113_v46 = vpop.f32.mrb[127].mxu1 }
 0xe61   :  { %v4117_v61 = vmax.f32 %v4116_v59, 0.0  ;;  %v8816_v59 = vcombine.high %v8814_v32, %v8814_v32 }
 0xe63   :  { %v4118_v58 = vpack.c.bf16 %v4117_v61, %v4117_v61  ;;  %v8815_v61 = vcombine.low %v8814_v32, %v8814_v32  ;;  %v8862_v32 = vld [vmem:[%s14548_s0 + $0x2d0] sm:$0xff] }
 0xe65   :  { %9769 = vmatmul.mubr.bf16.vlgmr.msra.gmra.mrb[128].mxu0 %v4118_v58  ;;  %v8823_v58 = vcombine.low %v8822_v60, %v8822_v60 }
 0xe66   :  { %4288 = vmatpush1.bf16.msra.mxu0 %v12540_v4  ;;  %8777 = vmatprep.mubr.msk.bf16.mxu0 %vm117_vm0, %v8776_v62  ;;  %v8824_v62 = vcombine.high %v8822_v60, %v8822_v60 }
 0xe67   :  { %4289 = vmatprep.subr.bf16.mxu0 %v10550_v0 }
 0xe6a   :  { %4290 = vmatpush1.bf16.msra.mxu0 %v12548_v50 }
 0xe6b   :  { %4291 = vmatprep.subr.bf16.mxu0 %v10550_v0 }
 0xe6e   :  { %4292 = vmatpush1.bf16.msra.mxu0 %v12555_v51 }
 0xe6f   :  { %4293 = vmatprep.subr.bf16.mxu0 %v10550_v0 }
 0xe72   :  { %4294 = vmatpush1.bf16.msra.mxu0 %v12562_v52 }
 0xe73   :  { %4295 = vmatprep.subr.bf16.mxu0 %v10550_v0 }
 0xe76   :  { %4296 = vmatpush1.bf16.msra.mxu0 %v12569_v53 }
 0xe77   :  { %4297 = vmatprep.subr.bf16.mxu0 %v10550_v0 }
 0xe7a   :  { %4298 = vmatpush1.bf16.msra.mxu0 %v12576_v54 }
 0xe7b   :  { %4299 = vmatprep.subr.bf16.mxu0 %v10550_v0 }
 0xe7e   :  { %4300 = vmatpush1.bf16.msra.mxu0 %v12583_v18 }
 0xe7f   :  { %4301 = vmatprep.subr.bf16.mxu0 %v10550_v0 }
 0xe82   :  { %4302 = vmatpush1.bf16.msra.mxu0 %v12590_v6 }
 0xe83   :  { %4303 = vmatprep.subr.bf16.mxu0 %v10550_v0 }
 0xe84   :  { %v12751_v47 = vpop.f32.mrb[128].mxu1 }
 0xe85   :  { %v4272_v48 = vpop.f32.mrb[129].mxu1 }
 0xe86   :  { %4304 = vmatpush1.bf16.msra.mxu0 %v12597_v7  ;;  %v4273_v49 = vpop.f32.mrb[130].mxu1  ;;  %v10297_v48 = vld [vmem:[%s14549_s3 + $0x380] sm:$0xff]  }
 0xe87   :  { %4305 = vmatprep.subr.bf16.mxu0 %v10550_v0  ;;  %v4274_v8 = vpop.f32.mrb[131].mxu1 }
 0xe88   :  { %v10298_v8 = vld [vmem:[%s14549_s3 + $0x388] sm:$0xff]  }
 0xe8a   :  { %4306 = vmatpush1.bf16.msra.mxu0 %v10697_v15 }
 0xe8b   :  { %4391 = vmatprep.subr.bf16.mxu0 %v10550_v0 }
 0xe8d   :  { %4320 = vmatmul.mubr.bf16.vlgmr.msra.gmra.mrb[132].mxu0 %v8775_v2 }
 0xe8e   :  { %4392 = vmatpush1.bf16.msra.mxu0 %v12540_v4  ;;  %8785 = vmatprep.mubr.msk.bf16.mxu0 %vm117_vm0, %v8784_v3 }
 0xe8f   :  { %4393 = vmatprep.subr.bf16.mxu0 %v10550_v0 }
 0xe92   :  { %4394 = vmatpush1.bf16.msra.mxu0 %v12548_v50 }
 0xe93   :  { %4395 = vmatprep.subr.bf16.mxu0 %v10550_v0 }
 0xe96   :  { %4396 = vmatpush1.bf16.msra.mxu0 %v12555_v51 }
 0xe97   :  { %4397 = vmatprep.subr.bf16.mxu0 %v10550_v0 }
 0xe9a   :  { %4398 = vmatpush1.bf16.msra.mxu0 %v12562_v52 }
 0xe9b   :  { %4399 = vmatprep.subr.bf16.mxu0 %v10550_v0 }
 0xe9e   :  { %4400 = vmatpush1.bf16.msra.mxu0 %v12569_v53 }
 0xe9f   :  { %4401 = vmatprep.subr.bf16.mxu0 %v10550_v0 }
 0xea2   :  { %4402 = vmatpush1.bf16.msra.mxu0 %v12576_v54 }
 0xea3   :  { %4403 = vmatprep.subr.bf16.mxu0 %v10550_v0 }
 0xea6   :  { %4404 = vmatpush1.bf16.msra.mxu0 %v12583_v18 }
 0xea7   :  { %4405 = vmatprep.subr.bf16.mxu0 %v10550_v0 }
 0xeaa   :  { %4406 = vmatpush1.bf16.msra.mxu0 %v12590_v6 }
 0xeab   :  { %4407 = vmatprep.subr.bf16.mxu0 %v10550_v0 }
 0xeac   :  { %v12770_v16 = vpop.f32.mrb[132].mxu1 }
 0xead   :  { %v4375_v17 = vpop.f32.mrb[133].mxu1 }
 0xeae   :  { %4408 = vmatpush1.bf16.msra.mxu0 %v12597_v7  ;;  %v4376_v9 = vpop.f32.mrb[134].mxu1  ;;  %v10299_v17 = vld [vmem:[%s14549_s3 + $0x390] sm:$0xff]  }
 0xeaf   :  { %4409 = vmatprep.subr.bf16.mxu0 %v10550_v0  ;;  %v4377_v21 = vpop.f32.mrb[135].mxu1  ;;  %v10301_v9 = vld [vmem:[%s14549_s3 + $0x3a0] sm:$0xff]  }
 0xeb0   :  { %v10302_v21 = vld [vmem:[%s14549_s3 + $0x3a8] sm:$0xff]  }
 0xeb2   :  { %4410 = vmatpush1.bf16.msra.mxu0 %v10697_v15 }
 0xeb3   :  { %4552 = vmatprep.subr.bf16.mxu0 %v10550_v0 }
 0xeb5   :  { %4424 = vmatmul.mubr.bf16.vlgmr.msra.gmra.mrb[136].mxu0 %v8783_v63 }
 0xeb6   :  { %4553 = vmatpush1.bf16.msra.mxu0 %v12540_v4  ;;  %8813 = vmatprep.mubr.msk.bf16.mxu0 %vm117_vm0, %v8812_v29  ;;  %v8860_v29 = vcombine.high %v8858_v11, %v8858_v11 }
 0xeb7   :  { %4554 = vmatprep.subr.bf16.mxu0 %v10550_v0 }
 0xeba   :  { %4555 = vmatpush1.bf16.msra.mxu0 %v12548_v50 }
 0xebb   :  { %4556 = vmatprep.subr.bf16.mxu0 %v10550_v0 }
 0xebe   :  { %4557 = vmatpush1.bf16.msra.mxu0 %v12555_v51 }
 0xebf   :  { %4558 = vmatprep.subr.bf16.mxu0 %v10550_v0 }
 0xec2   :  { %4559 = vmatpush1.bf16.msra.mxu0 %v12562_v52 }
 0xec3   :  { %4560 = vmatprep.subr.bf16.mxu0 %v10550_v0 }
 0xec6   :  { %4561 = vmatpush1.bf16.msra.mxu0 %v12569_v53 }
 0xec7   :  { %4562 = vmatprep.subr.bf16.mxu0 %v10550_v0 }
 0xeca   :  { %4563 = vmatpush1.bf16.msra.mxu0 %v12576_v54 }
 0xecb   :  { %4564 = vmatprep.subr.bf16.mxu0 %v10550_v0 }
 0xece   :  { %4565 = vmatpush1.bf16.msra.mxu0 %v12583_v18 }
 0xecf   :  { %4566 = vmatprep.subr.bf16.mxu0 %v10550_v0 }
 0xed2   :  { %4567 = vmatpush1.bf16.msra.mxu0 %v12590_v6 }
 0xed3   :  { %4568 = vmatprep.subr.bf16.mxu0 %v10550_v0 }
 0xed6   :  { %4569 = vmatpush1.bf16.msra.mxu0 %v12597_v7 }
 0xed7   :  { %4570 = vmatprep.subr.bf16.mxu0 %v10550_v0 }
 0xeda   :  { %4571 = vmatpush1.bf16.msra.mxu0 %v10697_v15 }
 0xedb   :  { %4655 = vmatprep.subr.bf16.mxu0 %v10550_v0 }
 0xedd   :  { %4585 = vmatmul.mubr.bf16.vlgmr.msra.gmra.mrb[140].mxu0 %v8811_v13 }
 0xede   :  { %4656 = vmatpush1.bf16.msra.mxu0 %v12540_v4  ;;  %8821 = vmatprep.mubr.msk.bf16.mxu0 %vm117_vm0, %v8820_v24 }
 0xedf   :  { %4657 = vmatprep.subr.bf16.mxu0 %v10550_v0 }
 0xee2   :  { %4658 = vmatpush1.bf16.msra.mxu0 %v12548_v50 }
 0xee3   :  { %4659 = vmatprep.subr.bf16.mxu0 %v10550_v0 }
 0xee6   :  { %4660 = vmatpush1.bf16.msra.mxu0 %v12555_v51 }
 0xee7   :  { %4661 = vmatprep.subr.bf16.mxu0 %v10550_v0 }
 0xeea   :  { %4662 = vmatpush1.bf16.msra.mxu0 %v12562_v52 }
 0xeeb   :  { %4663 = vmatprep.subr.bf16.mxu0 %v10550_v0 }
 0xeee   :  { %4664 = vmatpush1.bf16.msra.mxu0 %v12569_v53 }
 0xeef   :  { %4665 = vmatprep.subr.bf16.mxu0 %v10550_v0 }
 0xef2   :  { %4666 = vmatpush1.bf16.msra.mxu0 %v12576_v54 }
 0xef3   :  { %4667 = vmatprep.subr.bf16.mxu0 %v10550_v0 }
 0xef6   :  { %4668 = vmatpush1.bf16.msra.mxu0 %v12583_v18 }
 0xef7   :  { %4669 = vmatprep.subr.bf16.mxu0 %v10550_v0 }
 0xefa   :  { %4670 = vmatpush1.bf16.msra.mxu0 %v12590_v6 }
 0xefb   :  { %4671 = vmatprep.subr.bf16.mxu0 %v10550_v0 }
 0xefe   :  { %4672 = vmatpush1.bf16.msra.mxu0 %v12597_v7 }
 0xeff   :  { %4673 = vmatprep.subr.bf16.mxu0 %v10550_v0 }
 0xf02   :  { %4674 = vmatpush1.bf16.msra.mxu0 %v10697_v15 }
 0xf03   :  { %9792 = vmatprep.subr.bf16.mxu0 %v10551_v37 }
 0xf05   :  { %4688 = vmatmul.mubr.bf16.vlgmr.msra.gmra.mrb[144].mxu0 %v8819_v30 }
 0xf06   :  { %9808 = vmatprep.mubr.msk.bf16.mxu0 %vm10552_vm2, %v10551_v37  ;;  %9793 = vmatpush3.bf16.msra.mxu0 %v10297_v48 }
 0xf07   :  { %9794 = vmatprep.subr.bf16.mxu0 %v10551_v37 }
 0xf0a   :  { %9795 = vmatpush3.bf16.msra.mxu0 %v10298_v8  ;;  %v13098_v8 = vld [vmem:[%s14547_s1 + $0x8] sm:$0xff]  }
 0xf0b   :  { %9796 = vmatprep.subr.bf16.mxu0 %v10551_v37 }
 0xf0e   :  { %9797 = vmatpush3.bf16.msra.mxu0 %v10299_v17  ;;  %v13119_v17 = vld [vmem:[%s14547_s1 + $0x20] sm:$0xff]  }
 0xf0f   :  { %9798 = vmatprep.subr.bf16.mxu0 %v10551_v37 }
 0xf12   :  { %9799 = vmatpush3.bf16.msra.mxu0 %v10300_v20  ;;  %v13126_v20 = vld [vmem:[%s14547_s1 + $0x28] sm:$0xff]  }
 0xf13   :  { %9800 = vmatprep.subr.bf16.mxu0 %v10551_v37 }
 0xf16   :  { %9801 = vmatpush3.bf16.msra.mxu0 %v10301_v9  ;;  %v13133_v9 = vld [vmem:[%s14547_s1 + $0x30] sm:$0xff]  }
 0xf17   :  { %9802 = vmatprep.subr.bf16.mxu0 %v10551_v37 }
 0xf1a   :  { %9803 = vmatpush3.bf16.msra.mxu0 %v10302_v21  ;;  %v13140_v21 = vld [vmem:[%s14547_s1 + $0x38] sm:$0xff]  }
 0xf1b   :  { %9804 = vmatprep.subr.bf16.mxu0 %v10551_v37 }
 0xf1e   :  { %9805 = vmatpush3.bf16.msra.mxu0 %v10303_v22  ;;  %v13147_v22 = vld [vmem:[%s14547_s1 + $0x40] sm:$0xff]  }
 0xf1f   :  { %9806 = vmatprep.subr.bf16.mxu0 %v10551_v37 }
 0xf22   :  { %9807 = vmatpush3.bf16.msra.mxu0 %v10304_v25  ;;  %v8898_v25 = vld [vmem:[%s14548_s0 + $0x210] sm:$0xff] }
 0xf23   :  { %4919 = vmatprep.subr.bf16.mxu0 %v10550_v0 }
 0xf38   :  { %v4218_v23 = vpop.f32.mrb[128].mxu0 }
 0xf39   :  { %v12830_v27 = vadd.f32 %v4218_v23, %v12685_v38  ;;  %v9770_v28 = vpop.f32.mrb[129].mxu0  ;;  %v8859_v23 = vcombine.low %v8858_v11, %v8858_v11 }
 0xf3a   :  { %v4221_v26 = vpop.f32.mrb[130].mxu0 }
 0xf3b   :  { %v9771_v39 = vpop.f32.mrb[131].mxu0 }
 0xf60   :  { %v4321_v40 = vpop.f32.mrb[132].mxu0 }
 0xf61   :  { %v4327_v41 = vmax.f32 %v12751_v47, %v4321_v40  ;;  %v4323_v42 = vpop.f32.mrb[133].mxu0 }
 0xf62   :  { %v4324_v38 = vpop.f32.mrb[134].mxu0 }
 0xf63   :  { %v4379_v44 = vmax.f32 %v4327_v41, %v12770_v16  ;;  %v4325_v45 = vpop.f32.mrb[135].mxu0 }
 0xf88   :  { %v4425_v31 = vpop.f32.mrb[136].mxu0 }
 0xf89   :  { %v4431_v43 = vmax.f32 %v4379_v44, %v4425_v31  ;;  %v4427_v34 = vpop.f32.mrb[137].mxu0 }
 0xf8a   :  { %v4428_v35 = vpop.f32.mrb[138].mxu0  ;;  %v8854_v34 = vld [vmem:[%s14548_s0 + $0x140] sm:$0xff] }
 0xf8b   :  { %v4432_v36 = vadd.f32 %v12697_v57, %v4431_v43  ;;  %v4429_v55 = vpop.f32.mrb[139].mxu0 }
 0xf8d   :  { %v4433_v56 = vmax.f32 %v4432_v36, 0.0  ;;  %v8856_v36 = vcombine.high %v8854_v34, %v8854_v34 }
 0xf8f   :  { %v4434_v46 = vpack.c.bf16 %v4433_v56, %v4433_v56  ;;  %v8855_v56 = vcombine.low %v8854_v34, %v8854_v34 }
 0xf91   :  { %9789 = vmatmul.mubr.bf16.vlgmr.msra.gmra.mrb[136].mxu1 %v4434_v46  ;;  %v8863_v46 = vcombine.low %v8862_v32, %v8862_v32 }
 0xf92   :  { %4604 = vmatpush1.bf16.msra.mxu1 %v12540_v4  ;;  %8817 = vmatprep.mubr.msk.bf16.mxu1 %vm117_vm0, %v8816_v59  ;;  %v8864_v59 = vcombine.high %v8862_v32, %v8862_v32 }
 0xf93   :  { %4605 = vmatprep.subr.bf16.mxu1 %v10550_v0 }
 0xf96   :  { %4606 = vmatpush1.bf16.msra.mxu1 %v12548_v50 }
 0xf97   :  { %4607 = vmatprep.subr.bf16.mxu1 %v10550_v0 }
 0xf9a   :  { %4608 = vmatpush1.bf16.msra.mxu1 %v12555_v51 }
 0xf9b   :  { %4609 = vmatprep.subr.bf16.mxu1 %v10550_v0 }
 0xf9e   :  { %4610 = vmatpush1.bf16.msra.mxu1 %v12562_v52 }
 0xf9f   :  { %4611 = vmatprep.subr.bf16.mxu1 %v10550_v0 }
 0xfa2   :  { %4612 = vmatpush1.bf16.msra.mxu1 %v12569_v53 }
 0xfa3   :  { %4613 = vmatprep.subr.bf16.mxu1 %v10550_v0 }
 0xfa6   :  { %4614 = vmatpush1.bf16.msra.mxu1 %v12576_v54 }
 0xfa7   :  { %4615 = vmatprep.subr.bf16.mxu1 %v10550_v0 }
 0xfaa   :  { %4616 = vmatpush1.bf16.msra.mxu1 %v12583_v18 }
 0xfab   :  { %4617 = vmatprep.subr.bf16.mxu1 %v10550_v0 }
 0xfae   :  { %4618 = vmatpush1.bf16.msra.mxu1 %v12590_v6 }
 0xfaf   :  { %4619 = vmatprep.subr.bf16.mxu1 %v10550_v0 }
 0xfb0   :  { %v12891_v1 = vpop.f32.mrb[140].mxu0 }
 0xfb1   :  { %v4588_v2 = vpop.f32.mrb[141].mxu0 }
 0xfb2   :  { %4620 = vmatpush1.bf16.msra.mxu1 %v12597_v7  ;;  %v4589_v3 = vpop.f32.mrb[142].mxu0  ;;  %v10319_v2 = vld [vmem:[%s14549_s3 + $0x3f0] sm:$0xff]  }
 0xfb3   :  { %4621 = vmatprep.subr.bf16.mxu1 %v10550_v0  ;;  %v4590_v63 = vpop.f32.mrb[143].mxu0  ;;  %v10320_v3 = vld [vmem:[%s14549_s3 + $0x3f8] sm:$0xff]  }
 0xfb4   :  { %v8890_v63 = vld [vmem:[%s14548_s0 + $0x80] sm:$0xff] }
 0xfb5   :  { %v8891_v48 = vcombine.low %v8890_v63, %v8890_v63 }
 0xfb6   :  { %4622 = vmatpush1.bf16.msra.mxu1 %v10697_v15 }
 0xfb7   :  { %4707 = vmatprep.subr.bf16.mxu1 %v10550_v0 }
 0xfb9   :  { %4636 = vmatmul.mubr.bf16.vlgmr.msra.gmra.mrb[140].mxu1 %v8815_v61 }
 0xfba   :  { %4708 = vmatpush1.bf16.msra.mxu1 %v12540_v4  ;;  %8825 = vmatprep.mubr.msk.bf16.mxu1 %vm117_vm0, %v8824_v62 }
 0xfbb   :  { %4709 = vmatprep.subr.bf16.mxu1 %v10550_v0 }
 0xfbe   :  { %4710 = vmatpush1.bf16.msra.mxu1 %v12548_v50 }
 0xfbf   :  { %4711 = vmatprep.subr.bf16.mxu1 %v10550_v0 }
 0xfc2   :  { %4712 = vmatpush1.bf16.msra.mxu1 %v12555_v51 }
 0xfc3   :  { %4713 = vmatprep.subr.bf16.mxu1 %v10550_v0 }
 0xfc6   :  { %4714 = vmatpush1.bf16.msra.mxu1 %v12562_v52 }
 0xfc7   :  { %4715 = vmatprep.subr.bf16.mxu1 %v10550_v0 }
 0xfca   :  { %4716 = vmatpush1.bf16.msra.mxu1 %v12569_v53 }
 0xfcb   :  { %4717 = vmatprep.subr.bf16.mxu1 %v10550_v0 }
 0xfce   :  { %4718 = vmatpush1.bf16.msra.mxu1 %v12576_v54 }
 0xfcf   :  { %4719 = vmatprep.subr.bf16.mxu1 %v10550_v0 }
 0xfd2   :  { %4720 = vmatpush1.bf16.msra.mxu1 %v12583_v18 }
 0xfd3   :  { %4721 = vmatprep.subr.bf16.mxu1 %v10550_v0 }
 0xfd6   :  { %4722 = vmatpush1.bf16.msra.mxu1 %v12590_v6 }
 0xfd7   :  { %4723 = vmatprep.subr.bf16.mxu1 %v10550_v0 }
 0xfd8   :  { %v12910_v47 = vpop.f32.mrb[144].mxu0 }
 0xfd9   :  { %v4691_v49 = vpop.f32.mrb[145].mxu0 }
 0xfda   :  { %4724 = vmatpush1.bf16.msra.mxu1 %v12597_v7  ;;  %v4692_v16 = vpop.f32.mrb[146].mxu0  ;;  %v13091_v49 = vld [vmem:[%s14547_s1] sm:$0xff]  }
 0xfdb   :  { %4725 = vmatprep.subr.bf16.mxu1 %v10550_v0  ;;  %v4693_v5 = vpop.f32.mrb[147].mxu0  ;;  %v13105_v16 = vld [vmem:[%s14547_s1 + $0x10] sm:$0xff]  }
 0xfdc   :  { %v13112_v5 = vld [vmem:[%s14547_s1 + $0x18] sm:$0xff]  }
 0xfde   :  { %4726 = vmatpush1.bf16.msra.mxu1 %v10697_v15 }
 0xfdf   :  { %4868 = vmatprep.subr.bf16.mxu1 %v10550_v0 }
 0xfe1   :  { %4740 = vmatmul.mubr.bf16.vlgmr.msra.gmra.mrb[144].mxu1 %v8823_v58 }
 0xfe2   :  { %4869 = vmatpush1.bf16.msra.mxu1 %v12540_v4  ;;  %8853 = vmatprep.mubr.msk.bf16.mxu1 %vm117_vm0, %v8852_v33  ;;  %v8900_v33 = vcombine.high %v8898_v25, %v8898_v25 }
 0xfe3   :  { %4870 = vmatprep.subr.bf16.mxu1 %v10550_v0 }
 0xfe6   :  { %4871 = vmatpush1.bf16.msra.mxu1 %v12548_v50 }
 0xfe7   :  { %4872 = vmatprep.subr.bf16.mxu1 %v10550_v0 }
 0xfea   :  { %4873 = vmatpush1.bf16.msra.mxu1 %v12555_v51 }
 0xfeb   :  { %4874 = vmatprep.subr.bf16.mxu1 %v10550_v0 }
 0xfee   :  { %4875 = vmatpush1.bf16.msra.mxu1 %v12562_v52 }
 0xfef   :  { %4876 = vmatprep.subr.bf16.mxu1 %v10550_v0 }
 0xff2   :  { %4877 = vmatpush1.bf16.msra.mxu1 %v12569_v53 }
 0xff3   :  { %4878 = vmatprep.subr.bf16.mxu1 %v10550_v0 }
 0xff6   :  { %4879 = vmatpush1.bf16.msra.mxu1 %v12576_v54 }
 0xff7   :  { %4880 = vmatprep.subr.bf16.mxu1 %v10550_v0 }
 0xffa   :  { %4881 = vmatpush1.bf16.msra.mxu1 %v12583_v18 }
 0xffb   :  { %4882 = vmatprep.subr.bf16.mxu1 %v10550_v0 }
 0xffe   :  { %4883 = vmatpush1.bf16.msra.mxu1 %v12590_v6 }
 0xfff   :  { %4884 = vmatprep.subr.bf16.mxu1 %v10550_v0 }
0x1002   :  { %4885 = vmatpush1.bf16.msra.mxu1 %v12597_v7 }
0x1003   :  { %4886 = vmatprep.subr.bf16.mxu1 %v10550_v0 }
0x1006   :  { %4887 = vmatpush1.bf16.msra.mxu1 %v10697_v15 }
0x1007   :  { %4971 = vmatprep.subr.bf16.mxu1 %v10550_v0 }
0x1009   :  { %4901 = vmatmul.mubr.bf16.vlgmr.msra.gmra.mrb[148].mxu1 %v8851_v10 }
0x100a   :  { %4972 = vmatpush1.bf16.msra.mxu1 %v12540_v4  ;;  %8861 = vmatprep.mubr.msk.bf16.mxu1 %vm117_vm0, %v8860_v29 }
0x100b   :  { %4973 = vmatprep.subr.bf16.mxu1 %v10550_v0 }
0x100e   :  { %4974 = vmatpush1.bf16.msra.mxu1 %v12548_v50 }
0x100f   :  { %4975 = vmatprep.subr.bf16.mxu1 %v10550_v0 }
0x1012   :  { %4976 = vmatpush1.bf16.msra.mxu1 %v12555_v51 }
0x1013   :  { %4977 = vmatprep.subr.bf16.mxu1 %v10550_v0 }
0x1016   :  { %4978 = vmatpush1.bf16.msra.mxu1 %v12562_v52 }
0x1017   :  { %4979 = vmatprep.subr.bf16.mxu1 %v10550_v0 }
0x101a   :  { %4980 = vmatpush1.bf16.msra.mxu1 %v12569_v53 }
0x101b   :  { %4981 = vmatprep.subr.bf16.mxu1 %v10550_v0 }
0x101e   :  { %4982 = vmatpush1.bf16.msra.mxu1 %v12576_v54 }
0x101f   :  { %4983 = vmatprep.subr.bf16.mxu1 %v10550_v0 }
0x1022   :  { %4984 = vmatpush1.bf16.msra.mxu1 %v12583_v18 }
0x1023   :  { %4985 = vmatprep.subr.bf16.mxu1 %v10550_v0 }
0x1026   :  { %4986 = vmatpush1.bf16.msra.mxu1 %v12590_v6 }
0x1027   :  { %4987 = vmatprep.subr.bf16.mxu1 %v10550_v0 }
0x102a   :  { %4988 = vmatpush1.bf16.msra.mxu1 %v12597_v7 }
0x102b   :  { %4989 = vmatprep.subr.bf16.mxu1 %v10550_v0 }
0x102e   :  { %4990 = vmatpush1.bf16.msra.mxu1 %v10697_v15 }
0x102f   :  { %9812 = vmatprep.subr.bf16.mxu1 %v10551_v37 }
0x1031   :  { %5004 = vmatmul.mubr.bf16.vlgmr.msra.gmra.mrb[152].mxu1 %v8859_v23 }
0x1032   :  { %9828 = vmatprep.mubr.msk.bf16.mxu1 %vm10552_vm2, %v10551_v37 }
0x1064   :  { %v4534_v12 = vpop.f32.mrb[136].mxu1 }
0x1065   :  { %v12970_v13 = vadd.f32 %v4534_v12, %v12830_v27  ;;  %v9790_v14 = vpop.f32.mrb[137].mxu1  ;;  %v8899_v12 = vcombine.low %v8898_v25, %v8898_v25 }
0x1066   :  { %v4537_v24 = vpop.f32.mrb[138].mxu1 }
0x1067   :  { %v9791_v28 = vpop.f32.mrb[139].mxu1 }
0x108c   :  { %v4637_v30 = vpop.f32.mrb[140].mxu1 }
0x108d   :  { %v4643_v26 = vmax.f32 %v12891_v1, %v4637_v30  ;;  %v4639_v39 = vpop.f32.mrb[141].mxu1  ;;  %v10318_v1 = vld [vmem:[%s14549_s3 + $0x3e8] sm:$0xff]  }
0x108e   :  { %v4640_v27 = vpop.f32.mrb[142].mxu1 }
0x108f   :  { %v4695_v40 = vmax.f32 %v4643_v26, %v12910_v47  ;;  %v4641_v41 = vpop.f32.mrb[143].mxu1  ;;  %v8892_v47 = vcombine.high %v8890_v63, %v8890_v63 }
0x10b4   :  { %v4741_v42 = vpop.f32.mrb[144].mxu1 }
0x10b5   :  { %v4747_v38 = vmax.f32 %v4695_v40, %v4741_v42  ;;  %v4743_v44 = vpop.f32.mrb[145].mxu1 }
0x10b6   :  { %v4744_v45 = vpop.f32.mrb[146].mxu1  ;;  %v8894_v44 = vld [vmem:[%s14548_s0 + $0x148] sm:$0xff] }
0x10b7   :  { %v4748_v31 = vadd.f32 %v12697_v57, %v4747_v38  ;;  %v4745_v43 = vpop.f32.mrb[147].mxu1  ;;  %v8895_v34 = vcombine.low %v8894_v44, %v8894_v44 }
0x10b9   :  { %v4749_v35 = vmax.f32 %v4748_v31, 0.0  ;;  %v8896_v31 = vcombine.high %v8894_v44, %v8894_v44  ;;  %v8942_v44 = vld [vmem:[%s14548_s0 + $0x2e0] sm:$0xff] }
0x10bb   :  { %v4750_v55 = vpack.c.bf16 %v4749_v35, %v4749_v35 }
0x10bd   :  { %9809 = vmatmul.mubr.bf16.vlgmr.msra.gmra.mrb[148].mxu0 %v4750_v55 }
0x10be   :  { %4920 = vmatpush1.bf16.msra.mxu0 %v12540_v4  ;;  %8857 = vmatprep.mubr.msk.bf16.mxu0 %vm117_vm0, %v8856_v36 }
0x10bf   :  { %4921 = vmatprep.subr.bf16.mxu0 %v10550_v0 }
0x10c2   :  { %4922 = vmatpush1.bf16.msra.mxu0 %v12548_v50 }
0x10c3   :  { %4923 = vmatprep.subr.bf16.mxu0 %v10550_v0 }
0x10c6   :  { %4924 = vmatpush1.bf16.msra.mxu0 %v12555_v51 }
0x10c7   :  { %4925 = vmatprep.subr.bf16.mxu0 %v10550_v0 }
0x10ca   :  { %4926 = vmatpush1.bf16.msra.mxu0 %v12562_v52 }
0x10cb   :  { %4927 = vmatprep.subr.bf16.mxu0 %v10550_v0 }
0x10ce   :  { %4928 = vmatpush1.bf16.msra.mxu0 %v12569_v53 }
0x10cf   :  { %4929 = vmatprep.subr.bf16.mxu0 %v10550_v0 }
0x10d2   :  { %4930 = vmatpush1.bf16.msra.mxu0 %v12576_v54 }
0x10d3   :  { %4931 = vmatprep.subr.bf16.mxu0 %v10550_v0 }
0x10d6   :  { %4932 = vmatpush1.bf16.msra.mxu0 %v12583_v18 }
0x10d7   :  { %4933 = vmatprep.subr.bf16.mxu0 %v10550_v0 }
0x10da   :  { %4934 = vmatpush1.bf16.msra.mxu0 %v12590_v6 }
0x10db   :  { %4935 = vmatprep.subr.bf16.mxu0 %v10550_v0 }
0x10dc   :  { %v13031_v60 = vpop.f32.mrb[148].mxu1 }
0x10dd   :  { %v4904_v61 = vpop.f32.mrb[149].mxu1 }
0x10de   :  { %4936 = vmatpush1.bf16.msra.mxu0 %v12597_v7  ;;  %v4905_v62 = vpop.f32.mrb[150].mxu1 }
0x10df   :  { %4937 = vmatprep.subr.bf16.mxu0 %v10550_v0  ;;  %v4906_v58 = vpop.f32.mrb[151].mxu1  ;;  %v10330_v62 = vld [vmem:[%s14549_s3 + $0x408] sm:$0xff]  }
0x10e2   :  { %4938 = vmatpush1.bf16.msra.mxu0 %v10697_v15 }
0x10e3   :  { %5023 = vmatprep.subr.bf16.mxu0 %v10550_v0 }
0x10e5   :  { %4952 = vmatmul.mubr.bf16.vlgmr.msra.gmra.mrb[152].mxu0 %v8855_v56 }
0x10e6   :  { %5024 = vmatpush1.bf16.msra.mxu0 %v12540_v4  ;;  %8865 = vmatprep.mubr.msk.bf16.mxu0 %vm117_vm0, %v8864_v59 }
0x10e7   :  { %5025 = vmatprep.subr.bf16.mxu0 %v10550_v0 }
0x10ea   :  { %5026 = vmatpush1.bf16.msra.mxu0 %v12548_v50 }
0x10eb   :  { %5027 = vmatprep.subr.bf16.mxu0 %v10550_v0 }
0x10ee   :  { %5028 = vmatpush1.bf16.msra.mxu0 %v12555_v51 }
0x10ef   :  { %5029 = vmatprep.subr.bf16.mxu0 %v10550_v0 }
0x10f2   :  { %5030 = vmatpush1.bf16.msra.mxu0 %v12562_v52 }
0x10f3   :  { %5031 = vmatprep.subr.bf16.mxu0 %v10550_v0 }
0x10f6   :  { %5032 = vmatpush1.bf16.msra.mxu0 %v12569_v53 }
0x10f7   :  { %5033 = vmatprep.subr.bf16.mxu0 %v10550_v0 }
0x10fa   :  { %5034 = vmatpush1.bf16.msra.mxu0 %v12576_v54 }
0x10fb   :  { %5035 = vmatprep.subr.bf16.mxu0 %v10550_v0 }
0x10fe   :  { %5036 = vmatpush1.bf16.msra.mxu0 %v12583_v18 }
0x10ff   :  { %5037 = vmatprep.subr.bf16.mxu0 %v10550_v0 }
0x1102   :  { %5038 = vmatpush1.bf16.msra.mxu0 %v12590_v6 }
0x1103   :  { %5039 = vmatprep.subr.bf16.mxu0 %v10550_v0 }
0x1106   :  { %5040 = vmatpush1.bf16.msra.mxu0 %v12597_v7 }
0x1107   :  { %5041 = vmatprep.subr.bf16.mxu0 %v10550_v0 }
0x110a   :  { %5042 = vmatpush1.bf16.msra.mxu0 %v10697_v15 }
0x110b   :  { %5184 = vmatprep.subr.bf16.mxu0 %v10550_v0 }
0x110d   :  { %5056 = vmatmul.mubr.bf16.vlgmr.msra.gmra.mrb[156].mxu0 %v8863_v46 }
0x110e   :  { %5185 = vmatpush1.bf16.msra.mxu0 %v12540_v4  ;;  %v13050_v4 = vpop.f32.mrb[152].mxu1  ;;  %8893 = vmatprep.mubr.msk.bf16.mxu0 %vm117_vm0, %v8892_v47 }
0x110f   :  { %5186 = vmatprep.subr.bf16.mxu0 %v10550_v0 }
0x1112   :  { %5187 = vmatpush1.bf16.msra.mxu0 %v12548_v50  ;;  %v10313_v50 = vld [vmem:[%s14549_s3 + $0x3c0] sm:$0xff]  }
0x1113   :  { %5188 = vmatprep.subr.bf16.mxu0 %v10550_v0  ;;  %9813 = vmatpush3.bf16.msra.mxu1 %v10313_v50  ;;  %v10331_v50 = vld [vmem:[%s14549_s3 + $0x410] sm:$0xff]  }
0x1114   :  { %9814 = vmatprep.subr.bf16.mxu1 %v10551_v37 }
0x1116   :  { %5189 = vmatpush1.bf16.msra.mxu0 %v12555_v51  ;;  %v5007_v51 = vpop.f32.mrb[153].mxu1 }
0x1117   :  { %5190 = vmatprep.subr.bf16.mxu0 %v10550_v0  ;;  %v10332_v51 = vld [vmem:[%s14549_s3 + $0x418] sm:$0xff]  }
0x111a   :  { %5191 = vmatpush1.bf16.msra.mxu0 %v12562_v52  ;;  %v10314_v52 = vld [vmem:[%s14549_s3 + $0x3c8] sm:$0xff]  }
0x111b   :  { %5192 = vmatprep.subr.bf16.mxu0 %v10550_v0  ;;  %9815 = vmatpush3.bf16.msra.mxu1 %v10314_v52  ;;  %v10333_v52 = vld [vmem:[%s14549_s3 + $0x420] sm:$0xff]  }
0x111c   :  { %9816 = vmatprep.subr.bf16.mxu1 %v10551_v37 }
0x111e   :  { %5193 = vmatpush1.bf16.msra.mxu0 %v12569_v53  ;;  %v5008_v53 = vpop.f32.mrb[154].mxu1 }
0x111f   :  { %5194 = vmatprep.subr.bf16.mxu0 %v10550_v0  ;;  %v10334_v53 = vld [vmem:[%s14549_s3 + $0x428] sm:$0xff]  }
0x1122   :  { %5195 = vmatpush1.bf16.msra.mxu0 %v12576_v54  ;;  %v5009_v54 = vpop.f32.mrb[155].mxu1 }
0x1123   :  { %5196 = vmatprep.subr.bf16.mxu0 %v10550_v0  ;;  %v10335_v54 = vld [vmem:[%s14549_s3 + $0x430] sm:$0xff]  }
0x1126   :  { %5197 = vmatpush1.bf16.msra.mxu0 %v12583_v18  ;;  %v10315_v18 = vld [vmem:[%s14549_s3 + $0x3d0] sm:$0xff]  }
0x1127   :  { %5198 = vmatprep.subr.bf16.mxu0 %v10550_v0  ;;  %9817 = vmatpush3.bf16.msra.mxu1 %v10315_v18  ;;  %v10336_v18 = vld [vmem:[%s14549_s3 + $0x438] sm:$0xff]  }
0x1128   :  { %9818 = vmatprep.subr.bf16.mxu1 %v10551_v37 }
0x112a   :  { %5199 = vmatpush1.bf16.msra.mxu0 %v12590_v6  ;;  %v10316_v6 = vld [vmem:[%s14549_s3 + $0x3d8] sm:$0xff]  }
0x112b   :  { %5200 = vmatprep.subr.bf16.mxu0 %v10550_v0  ;;  %9819 = vmatpush3.bf16.msra.mxu1 %v10316_v6  ;;  %v8930_v6 = vld [vmem:[%s14548_s0 + $0x88] sm:$0xff] }
0x112c   :  { %9820 = vmatprep.subr.bf16.mxu1 %v10551_v37 }
0x112e   :  { %5201 = vmatpush1.bf16.msra.mxu0 %v12597_v7  ;;  %v10317_v7 = vld [vmem:[%s14549_s3 + $0x3e0] sm:$0xff]  }
0x112f   :  { %5202 = vmatprep.subr.bf16.mxu0 %v10550_v0  ;;  %9821 = vmatpush3.bf16.msra.mxu1 %v10317_v7  ;;  %v8932_v7 = vcombine.high %v8930_v6, %v8930_v6 }
0x1130   :  { %9822 = vmatprep.subr.bf16.mxu1 %v10551_v37 }
0x1132   :  { %5203 = vmatpush1.bf16.msra.mxu0 %v10697_v15 }
0x1133   :  { %5287 = vmatprep.subr.bf16.mxu0 %v10550_v0  ;;  %9823 = vmatpush3.bf16.msra.mxu1 %v10318_v1  ;;  %v8931_v1 = vcombine.low %v8930_v6, %v8930_v6 }
0x1134   :  { %9824 = vmatprep.subr.bf16.mxu1 %v10551_v37 }
0x1135   :  { %5217 = vmatmul.mubr.bf16.vlgmr.msra.gmra.mrb[160].mxu0 %v8891_v48 }
0x1136   :  { %5288 = vmatpush1.bf16.msra.mxu0 %v13091_v49  ;;  %8901 = vmatprep.mubr.msk.bf16.mxu0 %vm117_vm0, %v8900_v33 }
0x1137   :  { %9825 = vmatpush3.bf16.msra.mxu1 %v10319_v2  ;;  %5289 = vmatprep.subr.bf16.mxu0 %v10550_v0  ;;  %v8938_v2 = vld [vmem:[%s14548_s0 + $0x218] sm:$0xff] }
0x1138   :  { %9826 = vmatprep.subr.bf16.mxu1 %v10551_v37  ;;  %v8940_v63 = vcombine.high %v8938_v2, %v8938_v2  ;;  %v8939_v25 = vcombine.low %v8938_v2, %v8938_v2 }
0x113a   :  { %5290 = vmatpush1.bf16.msra.mxu0 %v13098_v8 }
0x113b   :  { %9827 = vmatpush3.bf16.msra.mxu1 %v10320_v3  ;;  %5291 = vmatprep.subr.bf16.mxu0 %v10550_v0 }
0x113c   :  { %5235 = vmatprep.subr.bf16.mxu1 %v10550_v0 }
0x113e   :  { %5292 = vmatpush1.bf16.msra.mxu0 %v13105_v16 }
0x113f   :  { %5293 = vmatprep.subr.bf16.mxu0 %v10550_v0 }
0x1142   :  { %5294 = vmatpush1.bf16.msra.mxu0 %v13112_v5 }
0x1143   :  { %5295 = vmatprep.subr.bf16.mxu0 %v10550_v0 }
0x1146   :  { %5296 = vmatpush1.bf16.msra.mxu0 %v13119_v17 }
0x1147   :  { %5297 = vmatprep.subr.bf16.mxu0 %v10550_v0 }
0x114a   :  { %5298 = vmatpush1.bf16.msra.mxu0 %v13126_v20 }
0x114b   :  { %5299 = vmatprep.subr.bf16.mxu0 %v10550_v0 }
0x114e   :  { %5300 = vmatpush1.bf16.msra.mxu0 %v13133_v9 }
0x114f   :  { %5301 = vmatprep.subr.bf16.mxu0 %v10550_v0 }
0x1152   :  { %5302 = vmatpush1.bf16.msra.mxu0 %v13140_v21 }
0x1153   :  { %5303 = vmatprep.subr.bf16.mxu0 %v10550_v0 }
0x1156   :  { %5304 = vmatpush1.bf16.msra.mxu0 %v13147_v22 }
0x1157   :  { %5305 = vmatprep.subr.bf16.mxu0 %v10550_v0 }
0x115a   :  { %5306 = vmatpush1.bf16.msra.mxu0 %v10697_v15 }
0x115b   :  { %9832 = vmatprep.subr.bf16.mxu0 %v10551_v37 }
0x115d   :  { %5320 = vmatmul.mubr.bf16.vlgmr.msra.gmra.mrb[164].mxu0 %v8899_v12 }
0x115e   :  { %9848 = vmatprep.mubr.msk.bf16.mxu0 %vm10552_vm2, %v10551_v37 }
0x1190   :  { %v4850_v19 = vpop.f32.mrb[148].mxu0 }
0x1191   :  { %v13155_v10 = vadd.f32 %v4850_v19, %v12970_v13  ;;  %v9810_v11 = vpop.f32.mrb[149].mxu0 }
0x1192   :  { %v4853_v29 = vpop.f32.mrb[150].mxu0 }
0x1193   :  { %v9811_v14 = vpop.f32.mrb[151].mxu0 }
0x11b8   :  { %v4953_v23 = vpop.f32.mrb[152].mxu0 }
0x11b9   :  { %v4959_v24 = vmax.f32 %v13031_v60, %v4953_v23  ;;  %v4955_v28 = vpop.f32.mrb[153].mxu0  ;;  %v10329_v60 = vld [vmem:[%s14549_s3 + $0x400] sm:$0xff]  }
0x11ba   :  { %v4956_v13 = vpop.f32.mrb[154].mxu0  ;;  %9833 = vmatpush3.bf16.msra.mxu0 %v10329_v60 }
0x11bb   :  { %v5011_v30 = vmax.f32 %v4959_v24, %v13050_v4  ;;  %v4957_v26 = vpop.f32.mrb[155].mxu0  ;;  %9834 = vmatprep.subr.bf16.mxu0 %v10551_v37 }
0x11bc   :  { %v13307_v26 = vld [vmem:[%s14550_s2] ss:$0 sm:$0xff] }
0x11be   :  { %9835 = vmatpush3.bf16.msra.mxu0 %v10330_v62  ;;  %v10348_v62 = vld [vmem:[%s14549_s3 + $0x458] sm:$0xff]  }
0x11bf   :  { %9836 = vmatprep.subr.bf16.mxu0 %v10551_v37 }
0x11c2   :  { %9837 = vmatpush3.bf16.msra.mxu0 %v10331_v50  ;;  %v10351_v50 = vld [vmem:[%s14549_s3 + $0x470] sm:$0xff]  }
0x11c3   :  { %9838 = vmatprep.subr.bf16.mxu0 %v10551_v37 }
0x11c6   :  { %9839 = vmatpush3.bf16.msra.mxu0 %v10332_v51  ;;  %v10352_v51 = vld [vmem:[%s14549_s3 + $0x478] sm:$0xff]  }
0x11c7   :  { %9840 = vmatprep.subr.bf16.mxu0 %v10551_v37 }
0x11ca   :  { %9841 = vmatpush3.bf16.msra.mxu0 %v10333_v52  ;;  %v8970_v52 = vld [vmem:[%s14548_s0 + $0x90] sm:$0xff] }
0x11cb   :  { %9842 = vmatprep.subr.bf16.mxu0 %v10551_v37 }
0x11ce   :  { %9843 = vmatpush3.bf16.msra.mxu0 %v10334_v53  ;;  %v8972_v53 = vcombine.high %v8970_v52, %v8970_v52 }
0x11cf   :  { %9844 = vmatprep.subr.bf16.mxu0 %v10551_v37 }
0x11d2   :  { %9845 = vmatpush3.bf16.msra.mxu0 %v10335_v54  ;;  %v8971_v54 = vcombine.low %v8970_v52, %v8970_v52 }
0x11d3   :  { %9846 = vmatprep.subr.bf16.mxu0 %v10551_v37 }
0x11d6   :  { %9847 = vmatpush3.bf16.msra.mxu0 %v10336_v18  ;;  %v8978_v18 = vld [vmem:[%s14548_s0 + $0x220] sm:$0xff] }
0x11d7   :  { %5551 = vmatprep.subr.bf16.mxu0 %v10550_v0 }
0x11e0   :  { %v5057_v39 = vpop.f32.mrb[156].mxu0 }
0x11e1   :  { %v5063_v27 = vmax.f32 %v5011_v30, %v5057_v39  ;;  %v5059_v40 = vpop.f32.mrb[157].mxu0 }
0x11e2   :  { %v5060_v41 = vpop.f32.mrb[158].mxu0  ;;  %v8934_v40 = vld [vmem:[%s14548_s0 + $0x150] sm:$0xff] }
0x11e3   :  { %v5064_v42 = vadd.f32 %v12697_v57, %v5063_v27  ;;  %v5061_v38 = vpop.f32.mrb[159].mxu0  ;;  %v8902_v57 = vld [vmem:[%s14548_s0 + $0x2d8] sm:$0xff] }
0x11e4   :  { %v8904_v35 = vcombine.high %v8902_v57, %v8902_v57  ;;  %v8903_v36 = vcombine.low %v8902_v57, %v8902_v57 }
0x11e5   :  { %v5065_v45 = vmax.f32 %v5064_v42, 0.0  ;;  %v8936_v42 = vcombine.high %v8934_v40, %v8934_v40 }
0x11e7   :  { %v5066_v43 = vpack.c.bf16 %v5065_v45, %v5065_v45  ;;  %v8935_v45 = vcombine.low %v8934_v40, %v8934_v40  ;;  %v8982_v40 = vld [vmem:[%s14548_s0 + $0x2e8] sm:$0xff] }
0x11e9   :  { %9829 = vmatmul.mubr.bf16.vlgmr.msra.gmra.mrb[156].mxu1 %v5066_v43  ;;  %v8943_v43 = vcombine.low %v8942_v44, %v8942_v44 }
0x11ea   :  { %5236 = vmatpush1.bf16.msra.mxu1 %v13091_v49  ;;  %8897 = vmatprep.mubr.msk.bf16.mxu1 %vm117_vm0, %v8896_v31  ;;  %v8944_v31 = vcombine.high %v8942_v44, %v8942_v44 }
0x11eb   :  { %5237 = vmatprep.subr.bf16.mxu1 %v10550_v0 }
0x11ee   :  { %5238 = vmatpush1.bf16.msra.mxu1 %v13098_v8 }
0x11ef   :  { %5239 = vmatprep.subr.bf16.mxu1 %v10550_v0 }
0x11f2   :  { %5240 = vmatpush1.bf16.msra.mxu1 %v13105_v16 }
0x11f3   :  { %5241 = vmatprep.subr.bf16.mxu1 %v10550_v0 }
0x11f6   :  { %5242 = vmatpush1.bf16.msra.mxu1 %v13112_v5 }
0x11f7   :  { %5243 = vmatprep.subr.bf16.mxu1 %v10550_v0 }
0x11fa   :  { %5244 = vmatpush1.bf16.msra.mxu1 %v13119_v17 }
0x11fb   :  { %5245 = vmatprep.subr.bf16.mxu1 %v10550_v0 }
0x11fe   :  { %5246 = vmatpush1.bf16.msra.mxu1 %v13126_v20 }
0x11ff   :  { %5247 = vmatprep.subr.bf16.mxu1 %v10550_v0 }
0x1202   :  { %5248 = vmatpush1.bf16.msra.mxu1 %v13133_v9 }
0x1203   :  { %5249 = vmatprep.subr.bf16.mxu1 %v10550_v0 }
0x1206   :  { %5250 = vmatpush1.bf16.msra.mxu1 %v13140_v21 }
0x1207   :  { %5251 = vmatprep.subr.bf16.mxu1 %v10550_v0 }
0x1208   :  { %v13216_v55 = vpop.f32.mrb[160].mxu0 }
0x1209   :  { %v5220_v32 = vpop.f32.mrb[161].mxu0 }
0x120a   :  { %5252 = vmatpush1.bf16.msra.mxu1 %v13147_v22  ;;  %v5221_v56 = vpop.f32.mrb[162].mxu0  ;;  %v10345_v32 = vld [vmem:[%s14549_s3 + $0x440] sm:$0xff]  }
0x120b   :  { %5253 = vmatprep.subr.bf16.mxu1 %v10550_v0  ;;  %v5222_v59 = vpop.f32.mrb[163].mxu0 }
0x120c   :  { %v10346_v59 = vld [vmem:[%s14549_s3 + $0x448] sm:$0xff]  }
0x120e   :  { %5254 = vmatpush1.bf16.msra.mxu1 %v10697_v15 }
0x120f   :  { %5339 = vmatprep.subr.bf16.mxu1 %v10550_v0 }
0x1211   :  { %5268 = vmatmul.mubr.bf16.vlgmr.msra.gmra.mrb[160].mxu1 %v8895_v34 }
0x1212   :  { %5340 = vmatpush1.bf16.msra.mxu1 %v13091_v49  ;;  %8905 = vmatprep.mubr.msk.bf16.mxu1 %vm117_vm0, %v8904_v35 }
0x1213   :  { %5341 = vmatprep.subr.bf16.mxu1 %v10550_v0 }
0x1216   :  { %5342 = vmatpush1.bf16.msra.mxu1 %v13098_v8 }
0x1217   :  { %5343 = vmatprep.subr.bf16.mxu1 %v10550_v0 }
0x121a   :  { %5344 = vmatpush1.bf16.msra.mxu1 %v13105_v16 }
0x121b   :  { %5345 = vmatprep.subr.bf16.mxu1 %v10550_v0 }
0x121e   :  { %5346 = vmatpush1.bf16.msra.mxu1 %v13112_v5 }
0x121f   :  { %5347 = vmatprep.subr.bf16.mxu1 %v10550_v0 }
0x1222   :  { %5348 = vmatpush1.bf16.msra.mxu1 %v13119_v17 }
0x1223   :  { %5349 = vmatprep.subr.bf16.mxu1 %v10550_v0 }
0x1226   :  { %5350 = vmatpush1.bf16.msra.mxu1 %v13126_v20 }
0x1227   :  { %5351 = vmatprep.subr.bf16.mxu1 %v10550_v0 }
0x122a   :  { %5352 = vmatpush1.bf16.msra.mxu1 %v13133_v9 }
0x122b   :  { %5353 = vmatprep.subr.bf16.mxu1 %v10550_v0 }
0x122e   :  { %5354 = vmatpush1.bf16.msra.mxu1 %v13140_v21 }
0x122f   :  { %5355 = vmatprep.subr.bf16.mxu1 %v10550_v0 }
0x1230   :  { %v13235_v46 = vpop.f32.mrb[164].mxu0 }
0x1231   :  { %v5323_v61 = vpop.f32.mrb[165].mxu0 }
0x1232   :  { %5356 = vmatpush1.bf16.msra.mxu1 %v13147_v22  ;;  %v5324_v58 = vpop.f32.mrb[166].mxu0  ;;  %v10347_v61 = vld [vmem:[%s14549_s3 + $0x450] sm:$0xff]  }
0x1233   :  { %5357 = vmatprep.subr.bf16.mxu1 %v10550_v0  ;;  %v5325_v4 = vpop.f32.mrb[167].mxu0  ;;  %v10349_v58 = vld [vmem:[%s14549_s3 + $0x460] sm:$0xff]  }
0x1234   :  { %v10350_v4 = vld [vmem:[%s14549_s3 + $0x468] sm:$0xff]  }
0x1236   :  { %5358 = vmatpush1.bf16.msra.mxu1 %v10697_v15 }
0x1237   :  { %5500 = vmatprep.subr.bf16.mxu1 %v10550_v0 }
0x1239   :  { %5372 = vmatmul.mubr.bf16.vlgmr.msra.gmra.mrb[164].mxu1 %v8903_v36 }
0x123a   :  { %5501 = vmatpush1.bf16.msra.mxu1 %v13091_v49  ;;  %8933 = vmatprep.mubr.msk.bf16.mxu1 %vm117_vm0, %v8932_v7  ;;  %v8980_v7 = vcombine.high %v8978_v18, %v8978_v18 }
0x123b   :  { %5502 = vmatprep.subr.bf16.mxu1 %v10550_v0 }
0x123e   :  { %5503 = vmatpush1.bf16.msra.mxu1 %v13098_v8 }
0x123f   :  { %5504 = vmatprep.subr.bf16.mxu1 %v10550_v0 }
0x1242   :  { %5505 = vmatpush1.bf16.msra.mxu1 %v13105_v16 }
0x1243   :  { %5506 = vmatprep.subr.bf16.mxu1 %v10550_v0 }
0x1246   :  { %5507 = vmatpush1.bf16.msra.mxu1 %v13112_v5 }
0x1247   :  { %5508 = vmatprep.subr.bf16.mxu1 %v10550_v0 }
0x124a   :  { %5509 = vmatpush1.bf16.msra.mxu1 %v13119_v17 }
0x124b   :  { %5510 = vmatprep.subr.bf16.mxu1 %v10550_v0 }
0x124e   :  { %5511 = vmatpush1.bf16.msra.mxu1 %v13126_v20 }
0x124f   :  { %5512 = vmatprep.subr.bf16.mxu1 %v10550_v0 }
0x1252   :  { %5513 = vmatpush1.bf16.msra.mxu1 %v13133_v9 }
0x1253   :  { %5514 = vmatprep.subr.bf16.mxu1 %v10550_v0 }
0x1256   :  { %5515 = vmatpush1.bf16.msra.mxu1 %v13140_v21 }
0x1257   :  { %5516 = vmatprep.subr.bf16.mxu1 %v10550_v0 }
0x125a   :  { %5517 = vmatpush1.bf16.msra.mxu1 %v13147_v22 }
0x125b   :  { %5518 = vmatprep.subr.bf16.mxu1 %v10550_v0 }
0x125e   :  { %5519 = vmatpush1.bf16.msra.mxu1 %v10697_v15 }
0x125f   :  { %5603 = vmatprep.subr.bf16.mxu1 %v10550_v0 }
0x1261   :  { %5533 = vmatmul.mubr.bf16.vlgmr.msra.gmra.mrb[168].mxu1 %v8931_v1 }
0x1262   :  { %5604 = vmatpush1.bf16.msra.mxu1 %v13091_v49  ;;  %8941 = vmatprep.mubr.msk.bf16.mxu1 %vm117_vm0, %v8940_v63 }
0x1263   :  { %5605 = vmatprep.subr.bf16.mxu1 %v10550_v0 }
0x1266   :  { %5606 = vmatpush1.bf16.msra.mxu1 %v13098_v8 }
0x1267   :  { %5607 = vmatprep.subr.bf16.mxu1 %v10550_v0 }
0x126a   :  { %5608 = vmatpush1.bf16.msra.mxu1 %v13105_v16 }
0x126b   :  { %5609 = vmatprep.subr.bf16.mxu1 %v10550_v0 }
0x126e   :  { %5610 = vmatpush1.bf16.msra.mxu1 %v13112_v5 }
0x126f   :  { %5611 = vmatprep.subr.bf16.mxu1 %v10550_v0 }
0x1272   :  { %5612 = vmatpush1.bf16.msra.mxu1 %v13119_v17 }
0x1273   :  { %5613 = vmatprep.subr.bf16.mxu1 %v10550_v0 }
0x1276   :  { %5614 = vmatpush1.bf16.msra.mxu1 %v13126_v20 }
0x1277   :  { %5615 = vmatprep.subr.bf16.mxu1 %v10550_v0 }
0x127a   :  { %5616 = vmatpush1.bf16.msra.mxu1 %v13133_v9 }
0x127b   :  { %5617 = vmatprep.subr.bf16.mxu1 %v10550_v0 }
0x127e   :  { %5618 = vmatpush1.bf16.msra.mxu1 %v13140_v21 }
0x127f   :  { %5619 = vmatprep.subr.bf16.mxu1 %v10550_v0 }
0x1282   :  { %5620 = vmatpush1.bf16.msra.mxu1 %v13147_v22 }
0x1283   :  { %5621 = vmatprep.subr.bf16.mxu1 %v10550_v0 }
0x1286   :  { %5622 = vmatpush1.bf16.msra.mxu1 %v10697_v15 }
0x1287   :  { %9852 = vmatprep.subr.bf16.mxu1 %v10551_v37 }
0x1289   :  { %5636 = vmatmul.mubr.bf16.vlgmr.msra.gmra.mrb[172].mxu1 %v8939_v25 }
0x128a   :  { %9868 = vmatprep.mubr.msk.bf16.mxu1 %vm10552_vm2, %v10551_v37  ;;  %9853 = vmatpush3.bf16.msra.mxu1 %v10345_v32 }
0x128b   :  { %9854 = vmatprep.subr.bf16.mxu1 %v10551_v37 }
0x128e   :  { %9855 = vmatpush3.bf16.msra.mxu1 %v10346_v59  ;;  %v10364_v59 = vld [vmem:[%s14549_s3 + $0x498] sm:$0xff]  }
0x128f   :  { %9856 = vmatprep.subr.bf16.mxu1 %v10551_v37 }
0x1292   :  { %9857 = vmatpush3.bf16.msra.mxu1 %v10347_v61  ;;  %v10367_v61 = vld [vmem:[%s14549_s3 + $0x4b0] sm:$0xff]  }
0x1293   :  { %9858 = vmatprep.subr.bf16.mxu1 %v10551_v37 }
0x1296   :  { %9859 = vmatpush3.bf16.msra.mxu1 %v10348_v62  ;;  %v10368_v62 = vld [vmem:[%s14549_s3 + $0x4b8] sm:$0xff]  }
0x1297   :  { %9860 = vmatprep.subr.bf16.mxu1 %v10551_v37 }
0x129a   :  { %9861 = vmatpush3.bf16.msra.mxu1 %v10349_v58  ;;  %v9010_v58 = vld [vmem:[%s14548_s0 + $0x98] sm:$0xff] }
0x129b   :  { %9862 = vmatprep.subr.bf16.mxu1 %v10551_v37 }
0x129e   :  { %9863 = vmatpush3.bf16.msra.mxu1 %v10350_v4  ;;  %v9012_v4 = vcombine.high %v9010_v58, %v9010_v58 }
0x129f   :  { %9864 = vmatprep.subr.bf16.mxu1 %v10551_v37 }
0x12a2   :  { %9865 = vmatpush3.bf16.msra.mxu1 %v10351_v50  ;;  %v9011_v50 = vcombine.low %v9010_v58, %v9010_v58 }
0x12a3   :  { %9866 = vmatprep.subr.bf16.mxu1 %v10551_v37 }
0x12a6   :  { %9867 = vmatpush3.bf16.msra.mxu1 %v10352_v51  ;;  %v9018_v51 = vld [vmem:[%s14548_s0 + $0x228] sm:$0xff] }
0x12a7   :  { %5867 = vmatprep.subr.bf16.mxu1 %v10550_v0 }
0x12bc   :  { %v5166_v3 = vpop.f32.mrb[156].mxu1 }
0x12bd   :  { %v13295_v47 = vadd.f32 %v5166_v3, %v13155_v10  ;;  %v9830_v48 = vpop.f32.mrb[157].mxu1  ;;  %v8979_v3 = vcombine.low %v8978_v18, %v8978_v18 }
0x12be   :  { %v5169_v19 = vpop.f32.mrb[158].mxu1 }
0x12bf   :  { %v9831_v33 = vpop.f32.mrb[159].mxu1 }
0x12e4   :  { %v5269_v11 = vpop.f32.mrb[160].mxu1 }
0x12e5   :  { %v5275_v12 = vmax.f32 %v13216_v55, %v5269_v11  ;;  %v5271_v29 = vpop.f32.mrb[161].mxu1 }
0x12e6   :  { %v5272_v10 = vpop.f32.mrb[162].mxu1 }
0x12e7   :  { %v5327_v14 = vmax.f32 %v5275_v12, %v13235_v46  ;;  %v5273_v23 = vpop.f32.mrb[163].mxu1 }
0x130c   :  { %v5373_v24 = vpop.f32.mrb[164].mxu1 }
0x130d   :  { %v5379_v28 = vmax.f32 %v5327_v14, %v5373_v24  ;;  %v5375_v13 = vpop.f32.mrb[165].mxu1 }
0x130e   :  { %v5376_v30 = vpop.f32.mrb[166].mxu1  ;;  %v8974_v13 = vld [vmem:[%s14548_s0 + $0x158] sm:$0xff] }
0x130f   :  { %v5380_v39 = vadd.f32 %v13307_v26, %v5379_v28  ;;  %v5377_v27 = vpop.f32.mrb[167].mxu1 }
0x1311   :  { %v5381_v41 = vmax.f32 %v5380_v39, 0.0  ;;  %v8976_v39 = vcombine.high %v8974_v13, %v8974_v13 }
0x1313   :  { %v5382_v38 = vpack.c.bf16 %v5381_v41, %v5381_v41  ;;  %v8975_v41 = vcombine.low %v8974_v13, %v8974_v13  ;;  %v13663_v13 = vld [vmem:[%s14547_s1 + $0x30] sm:$0xff]  }
0x1315   :  { %9849 = vmatmul.mubr.bf16.vlgmr.msra.gmra.mrb[168].mxu0 %v5382_v38  ;;  %v8983_v38 = vcombine.low %v8982_v40, %v8982_v40 }
0x1316   :  { %5552 = vmatpush1.bf16.msra.mxu0 %v13091_v49  ;;  %8937 = vmatprep.mubr.msk.bf16.mxu0 %vm117_vm0, %v8936_v42  ;;  %v8984_v42 = vcombine.high %v8982_v40, %v8982_v40 }
0x1317   :  { %5553 = vmatprep.subr.bf16.mxu0 %v10550_v0 }
0x131a   :  { %5554 = vmatpush1.bf16.msra.mxu0 %v13098_v8 }
0x131b   :  { %5555 = vmatprep.subr.bf16.mxu0 %v10550_v0 }
0x131e   :  { %5556 = vmatpush1.bf16.msra.mxu0 %v13105_v16 }
0x131f   :  { %5557 = vmatprep.subr.bf16.mxu0 %v10550_v0 }
0x1322   :  { %5558 = vmatpush1.bf16.msra.mxu0 %v13112_v5 }
0x1323   :  { %5559 = vmatprep.subr.bf16.mxu0 %v10550_v0 }
0x1326   :  { %5560 = vmatpush1.bf16.msra.mxu0 %v13119_v17 }
0x1327   :  { %5561 = vmatprep.subr.bf16.mxu0 %v10550_v0 }
0x132a   :  { %5562 = vmatpush1.bf16.msra.mxu0 %v13126_v20 }
0x132b   :  { %5563 = vmatprep.subr.bf16.mxu0 %v10550_v0 }
0x132e   :  { %5564 = vmatpush1.bf16.msra.mxu0 %v13133_v9 }
0x132f   :  { %5565 = vmatprep.subr.bf16.mxu0 %v10550_v0 }
0x1332   :  { %5566 = vmatpush1.bf16.msra.mxu0 %v13140_v21 }
0x1333   :  { %5567 = vmatprep.subr.bf16.mxu0 %v10550_v0 }
0x1334   :  { %v13361_v57 = vpop.f32.mrb[168].mxu1 }
0x1335   :  { %v5536_v34 = vpop.f32.mrb[169].mxu1 }
0x1336   :  { %5568 = vmatpush1.bf16.msra.mxu0 %v13147_v22  ;;  %v5537_v35 = vpop.f32.mrb[170].mxu1  ;;  %v10361_v34 = vld [vmem:[%s14549_s3 + $0x480] sm:$0xff]  }
0x1337   :  { %5569 = vmatprep.subr.bf16.mxu0 %v10550_v0  ;;  %v5538_v36 = vpop.f32.mrb[171].mxu1 }
0x1338   :  { %v10362_v36 = vld [vmem:[%s14549_s3 + $0x488] sm:$0xff]  }
0x133a   :  { %5570 = vmatpush1.bf16.msra.mxu0 %v10697_v15 }
0x133b   :  { %5655 = vmatprep.subr.bf16.mxu0 %v10550_v0 }
0x133d   :  { %5584 = vmatmul.mubr.bf16.vlgmr.msra.gmra.mrb[172].mxu0 %v8935_v45 }
0x133e   :  { %5656 = vmatpush1.bf16.msra.mxu0 %v13091_v49  ;;  %8945 = vmatprep.mubr.msk.bf16.mxu0 %vm117_vm0, %v8944_v31 }
0x133f   :  { %5657 = vmatprep.subr.bf16.mxu0 %v10550_v0 }
0x1342   :  { %5658 = vmatpush1.bf16.msra.mxu0 %v13098_v8 }
0x1343   :  { %5659 = vmatprep.subr.bf16.mxu0 %v10550_v0 }
0x1346   :  { %5660 = vmatpush1.bf16.msra.mxu0 %v13105_v16 }
0x1347   :  { %5661 = vmatprep.subr.bf16.mxu0 %v10550_v0 }
0x134a   :  { %5662 = vmatpush1.bf16.msra.mxu0 %v13112_v5 }
0x134b   :  { %5663 = vmatprep.subr.bf16.mxu0 %v10550_v0 }
0x134e   :  { %5664 = vmatpush1.bf16.msra.mxu0 %v13119_v17 }
0x134f   :  { %5665 = vmatprep.subr.bf16.mxu0 %v10550_v0 }
0x1352   :  { %5666 = vmatpush1.bf16.msra.mxu0 %v13126_v20 }
0x1353   :  { %5667 = vmatprep.subr.bf16.mxu0 %v10550_v0 }
0x1356   :  { %5668 = vmatpush1.bf16.msra.mxu0 %v13133_v9 }
0x1357   :  { %5669 = vmatprep.subr.bf16.mxu0 %v10550_v0 }
0x135a   :  { %5670 = vmatpush1.bf16.msra.mxu0 %v13140_v21 }
0x135b   :  { %5671 = vmatprep.subr.bf16.mxu0 %v10550_v0 }
0x135c   :  { %v13380_v55 = vpop.f32.mrb[172].mxu1 }
0x135d   :  { %v5639_v56 = vpop.f32.mrb[173].mxu1 }
0x135e   :  { %5672 = vmatpush1.bf16.msra.mxu0 %v13147_v22  ;;  %v5640_v46 = vpop.f32.mrb[174].mxu1  ;;  %v10363_v56 = vld [vmem:[%s14549_s3 + $0x490] sm:$0xff]  }
0x135f   :  { %5673 = vmatprep.subr.bf16.mxu0 %v10550_v0  ;;  %v5641_v60 = vpop.f32.mrb[175].mxu1  ;;  %v10365_v46 = vld [vmem:[%s14549_s3 + $0x4a0] sm:$0xff]  }
0x1360   :  { %v10366_v60 = vld [vmem:[%s14549_s3 + $0x4a8] sm:$0xff]  }
0x1362   :  { %5674 = vmatpush1.bf16.msra.mxu0 %v10697_v15 }
0x1363   :  { %5816 = vmatprep.subr.bf16.mxu0 %v10550_v0 }
0x1365   :  { %5688 = vmatmul.mubr.bf16.vlgmr.msra.gmra.mrb[176].mxu0 %v8943_v43 }
0x1366   :  { %5817 = vmatpush1.bf16.msra.mxu0 %v13091_v49  ;;  %8973 = vmatprep.mubr.msk.bf16.mxu0 %vm117_vm0, %v8972_v53  ;;  %v9020_v53 = vcombine.high %v9018_v51, %v9018_v51 }
0x1367   :  { %5818 = vmatprep.subr.bf16.mxu0 %v10550_v0 }
0x136a   :  { %5819 = vmatpush1.bf16.msra.mxu0 %v13098_v8 }
0x136b   :  { %5820 = vmatprep.subr.bf16.mxu0 %v10550_v0 }
0x136e   :  { %5821 = vmatpush1.bf16.msra.mxu0 %v13105_v16 }
0x136f   :  { %5822 = vmatprep.subr.bf16.mxu0 %v10550_v0 }
0x1372   :  { %5823 = vmatpush1.bf16.msra.mxu0 %v13112_v5 }
0x1373   :  { %5824 = vmatprep.subr.bf16.mxu0 %v10550_v0 }
0x1376   :  { %5825 = vmatpush1.bf16.msra.mxu0 %v13119_v17 }
0x1377   :  { %5826 = vmatprep.subr.bf16.mxu0 %v10550_v0 }
0x137a   :  { %5827 = vmatpush1.bf16.msra.mxu0 %v13126_v20 }
0x137b   :  { %5828 = vmatprep.subr.bf16.mxu0 %v10550_v0 }
0x137e   :  { %5829 = vmatpush1.bf16.msra.mxu0 %v13133_v9 }
0x137f   :  { %5830 = vmatprep.subr.bf16.mxu0 %v10550_v0 }
0x1382   :  { %5831 = vmatpush1.bf16.msra.mxu0 %v13140_v21 }
0x1383   :  { %5832 = vmatprep.subr.bf16.mxu0 %v10550_v0 }
0x1386   :  { %5833 = vmatpush1.bf16.msra.mxu0 %v13147_v22 }
0x1387   :  { %5834 = vmatprep.subr.bf16.mxu0 %v10550_v0 }
0x138a   :  { %5835 = vmatpush1.bf16.msra.mxu0 %v10697_v15 }
0x138b   :  { %5919 = vmatprep.subr.bf16.mxu0 %v10550_v0 }
0x138d   :  { %5849 = vmatmul.mubr.bf16.vlgmr.msra.gmra.mrb[180].mxu0 %v8971_v54 }
0x138e   :  { %5920 = vmatpush1.bf16.msra.mxu0 %v13091_v49  ;;  %8981 = vmatprep.mubr.msk.bf16.mxu0 %vm117_vm0, %v8980_v7 }
0x138f   :  { %5921 = vmatprep.subr.bf16.mxu0 %v10550_v0 }
0x1392   :  { %5922 = vmatpush1.bf16.msra.mxu0 %v13098_v8 }
0x1393   :  { %5923 = vmatprep.subr.bf16.mxu0 %v10550_v0 }
0x1396   :  { %5924 = vmatpush1.bf16.msra.mxu0 %v13105_v16 }
0x1397   :  { %5925 = vmatprep.subr.bf16.mxu0 %v10550_v0 }
0x139a   :  { %5926 = vmatpush1.bf16.msra.mxu0 %v13112_v5 }
0x139b   :  { %5927 = vmatprep.subr.bf16.mxu0 %v10550_v0 }
0x139e   :  { %5928 = vmatpush1.bf16.msra.mxu0 %v13119_v17 }
0x139f   :  { %5929 = vmatprep.subr.bf16.mxu0 %v10550_v0 }
0x13a2   :  { %5930 = vmatpush1.bf16.msra.mxu0 %v13126_v20 }
0x13a3   :  { %5931 = vmatprep.subr.bf16.mxu0 %v10550_v0 }
0x13a6   :  { %5932 = vmatpush1.bf16.msra.mxu0 %v13133_v9 }
0x13a7   :  { %5933 = vmatprep.subr.bf16.mxu0 %v10550_v0 }
0x13aa   :  { %5934 = vmatpush1.bf16.msra.mxu0 %v13140_v21 }
0x13ab   :  { %5935 = vmatprep.subr.bf16.mxu0 %v10550_v0 }
0x13ae   :  { %5936 = vmatpush1.bf16.msra.mxu0 %v13147_v22 }
0x13af   :  { %5937 = vmatprep.subr.bf16.mxu0 %v10550_v0 }
0x13b2   :  { %5938 = vmatpush1.bf16.msra.mxu0 %v10697_v15 }
0x13b3   :  { %9872 = vmatprep.subr.bf16.mxu0 %v10551_v37 }
0x13b5   :  { %5952 = vmatmul.mubr.bf16.vlgmr.msra.gmra.mrb[184].mxu0 %v8979_v3 }
0x13b6   :  { %9888 = vmatprep.mubr.msk.bf16.mxu0 %vm10552_vm2, %v10551_v37  ;;  %9873 = vmatpush3.bf16.msra.mxu0 %v10361_v34 }
0x13b7   :  { %9874 = vmatprep.subr.bf16.mxu0 %v10551_v37 }
0x13ba   :  { %9875 = vmatpush3.bf16.msra.mxu0 %v10362_v36  ;;  %v10380_v36 = vld [vmem:[%s14549_s3 + $0x4d8] sm:$0xff]  }
0x13bb   :  { %9876 = vmatprep.subr.bf16.mxu0 %v10551_v37 }
0x13be   :  { %9877 = vmatpush3.bf16.msra.mxu0 %v10363_v56  ;;  %v10383_v56 = vld [vmem:[%s14549_s3 + $0x4f0] sm:$0xff]  }
0x13bf   :  { %9878 = vmatprep.subr.bf16.mxu0 %v10551_v37 }
0x13c2   :  { %9879 = vmatpush3.bf16.msra.mxu0 %v10364_v59  ;;  %v10384_v59 = vld [vmem:[%s14549_s3 + $0x4f8] sm:$0xff]  }
0x13c3   :  { %9880 = vmatprep.subr.bf16.mxu0 %v10551_v37 }
0x13c6   :  { %9881 = vmatpush3.bf16.msra.mxu0 %v10365_v46  ;;  %v9050_v46 = vld [vmem:[%s14548_s0 + $0xa0] sm:$0xff] }
0x13c7   :  { %9882 = vmatprep.subr.bf16.mxu0 %v10551_v37 }
0x13ca   :  { %9883 = vmatpush3.bf16.msra.mxu0 %v10366_v60  ;;  %v9052_v60 = vcombine.high %v9050_v46, %v9050_v46 }
0x13cb   :  { %9884 = vmatprep.subr.bf16.mxu0 %v10551_v37 }
0x13ce   :  { %9885 = vmatpush3.bf16.msra.mxu0 %v10367_v61  ;;  %v9051_v61 = vcombine.low %v9050_v46, %v9050_v46 }
0x13cf   :  { %9886 = vmatprep.subr.bf16.mxu0 %v10551_v37 }
0x13d2   :  { %9887 = vmatpush3.bf16.msra.mxu0 %v10368_v62  ;;  %v9058_v62 = vld [vmem:[%s14548_s0 + $0x230] sm:$0xff] }
0x13d3   :  { %6183 = vmatprep.subr.bf16.mxu0 %v10550_v0 }
0x13e8   :  { %v5482_v6 = vpop.f32.mrb[168].mxu0 }
0x13e9   :  { %v13440_v1 = vadd.f32 %v5482_v6, %v13295_v47  ;;  %v9850_v2 = vpop.f32.mrb[169].mxu0  ;;  %v9019_v6 = vcombine.low %v9018_v51, %v9018_v51 }
0x13ea   :  { %v5485_v63 = vpop.f32.mrb[170].mxu0 }
0x13eb   :  { %v9851_v48 = vpop.f32.mrb[171].mxu0 }
0x1410   :  { %v5585_v25 = vpop.f32.mrb[172].mxu0 }
0x1411   :  { %v5591_v19 = vmax.f32 %v13361_v57, %v5585_v25  ;;  %v5587_v33 = vpop.f32.mrb[173].mxu0 }
0x1412   :  { %v5588_v47 = vpop.f32.mrb[174].mxu0 }
0x1413   :  { %v5643_v11 = vmax.f32 %v5591_v19, %v13380_v55  ;;  %v5589_v12 = vpop.f32.mrb[175].mxu0 }
0x1438   :  { %v5689_v29 = vpop.f32.mrb[176].mxu0 }
0x1439   :  { %v5695_v10 = vmax.f32 %v5643_v11, %v5689_v29  ;;  %v5691_v14 = vpop.f32.mrb[177].mxu0 }
0x143a   :  { %v5692_v23 = vpop.f32.mrb[178].mxu0  ;;  %v9014_v14 = vld [vmem:[%s14548_s0 + $0x160] sm:$0xff] }
0x143b   :  { %v5696_v24 = vadd.f32 %v13307_v26, %v5695_v10  ;;  %v5693_v28 = vpop.f32.mrb[179].mxu0 }
0x143d   :  { %v5697_v30 = vmax.f32 %v5696_v24, 0.0  ;;  %v9016_v24 = vcombine.high %v9014_v14, %v9014_v14 }
0x143f   :  { %v5698_v27 = vpack.c.bf16 %v5697_v30, %v5697_v30  ;;  %v13670_v30 = vld [vmem:[%s14547_s1 + $0x38] sm:$0xff]  }
0x1441   :  { %9869 = vmatmul.mubr.bf16.vlgmr.msra.gmra.mrb[176].mxu1 %v5698_v27 }
0x1442   :  { %5868 = vmatpush1.bf16.msra.mxu1 %v13091_v49  ;;  %8977 = vmatprep.mubr.msk.bf16.mxu1 %vm117_vm0, %v8976_v39  ;;  %v13677_v39 = vld [vmem:[%s14547_s1 + $0x40] sm:$0xff]  }
0x1443   :  { %5869 = vmatprep.subr.bf16.mxu1 %v10550_v0 }
0x1446   :  { %5870 = vmatpush1.bf16.msra.mxu1 %v13098_v8 }
0x1447   :  { %5871 = vmatprep.subr.bf16.mxu1 %v10550_v0 }
0x144a   :  { %5872 = vmatpush1.bf16.msra.mxu1 %v13105_v16 }
0x144b   :  { %5873 = vmatprep.subr.bf16.mxu1 %v10550_v0 }
0x144e   :  { %5874 = vmatpush1.bf16.msra.mxu1 %v13112_v5 }
0x144f   :  { %5875 = vmatprep.subr.bf16.mxu1 %v10550_v0 }
0x1452   :  { %5876 = vmatpush1.bf16.msra.mxu1 %v13119_v17 }
0x1453   :  { %5877 = vmatprep.subr.bf16.mxu1 %v10550_v0 }
0x1456   :  { %5878 = vmatpush1.bf16.msra.mxu1 %v13126_v20 }
0x1457   :  { %5879 = vmatprep.subr.bf16.mxu1 %v10550_v0 }
0x145a   :  { %5880 = vmatpush1.bf16.msra.mxu1 %v13133_v9 }
0x145b   :  { %5881 = vmatprep.subr.bf16.mxu1 %v10550_v0 }
0x145e   :  { %5882 = vmatpush1.bf16.msra.mxu1 %v13140_v21 }
0x145f   :  { %5883 = vmatprep.subr.bf16.mxu1 %v10550_v0 }
0x1460   :  { %v13501_v44 = vpop.f32.mrb[180].mxu0 }
0x1461   :  { %v5852_v45 = vpop.f32.mrb[181].mxu0 }
0x1462   :  { %5884 = vmatpush1.bf16.msra.mxu1 %v13147_v22  ;;  %v5853_v31 = vpop.f32.mrb[182].mxu0  ;;  %v10377_v45 = vld [vmem:[%s14549_s3 + $0x4c0] sm:$0xff]  }
0x1463   :  { %5885 = vmatprep.subr.bf16.mxu1 %v10550_v0  ;;  %v5854_v43 = vpop.f32.mrb[183].mxu0 }
0x1464   :  { %v10378_v43 = vld [vmem:[%s14549_s3 + $0x4c8] sm:$0xff]  }
0x1466   :  { %5886 = vmatpush1.bf16.msra.mxu1 %v10697_v15 }
0x1467   :  { %5971 = vmatprep.subr.bf16.mxu1 %v10550_v0 }
0x1469   :  { %5900 = vmatmul.mubr.bf16.vlgmr.msra.gmra.mrb[180].mxu1 %v8975_v41 }
0x146a   :  { %5972 = vmatpush1.bf16.msra.mxu1 %v13091_v49  ;;  %8985 = vmatprep.mubr.msk.bf16.mxu1 %vm117_vm0, %v8984_v42 }
0x146b   :  { %5973 = vmatprep.subr.bf16.mxu1 %v10550_v0 }
0x146e   :  { %5974 = vmatpush1.bf16.msra.mxu1 %v13098_v8 }
0x146f   :  { %5975 = vmatprep.subr.bf16.mxu1 %v10550_v0 }
0x1472   :  { %5976 = vmatpush1.bf16.msra.mxu1 %v13105_v16 }
0x1473   :  { %5977 = vmatprep.subr.bf16.mxu1 %v10550_v0 }
0x1476   :  { %5978 = vmatpush1.bf16.msra.mxu1 %v13112_v5 }
0x1477   :  { %5979 = vmatprep.subr.bf16.mxu1 %v10550_v0 }
0x147a   :  { %5980 = vmatpush1.bf16.msra.mxu1 %v13119_v17 }
0x147b   :  { %5981 = vmatprep.subr.bf16.mxu1 %v10550_v0 }
0x147e   :  { %5982 = vmatpush1.bf16.msra.mxu1 %v13126_v20 }
0x147f   :  { %5983 = vmatprep.subr.bf16.mxu1 %v10550_v0 }
0x1482   :  { %5984 = vmatpush1.bf16.msra.mxu1 %v13133_v9 }
0x1483   :  { %5985 = vmatprep.subr.bf16.mxu1 %v10550_v0 }
0x1486   :  { %5986 = vmatpush1.bf16.msra.mxu1 %v13140_v21 }
0x1487   :  { %5987 = vmatprep.subr.bf16.mxu1 %v10550_v0 }
0x1488   :  { %v13520_v57 = vpop.f32.mrb[184].mxu0 }
0x1489   :  { %v5955_v35 = vpop.f32.mrb[185].mxu0 }
0x148a   :  { %5988 = vmatpush1.bf16.msra.mxu1 %v13147_v22  ;;  %v5956_v55 = vpop.f32.mrb[186].mxu0  ;;  %v10379_v35 = vld [vmem:[%s14549_s3 + $0x4d0] sm:$0xff]  }
0x148b   :  { %5989 = vmatprep.subr.bf16.mxu1 %v10550_v0  ;;  %v5957_v32 = vpop.f32.mrb[187].mxu0  ;;  %v10381_v55 = vld [vmem:[%s14549_s3 + $0x4e0] sm:$0xff]  }
0x148c   :  { %v10382_v32 = vld [vmem:[%s14549_s3 + $0x4e8] sm:$0xff]  }
0x148e   :  { %5990 = vmatpush1.bf16.msra.mxu1 %v10697_v15 }
0x148f   :  { %6132 = vmatprep.subr.bf16.mxu1 %v10550_v0 }
0x1491   :  { %6004 = vmatmul.mubr.bf16.vlgmr.msra.gmra.mrb[184].mxu1 %v8983_v38 }
0x1492   :  { %6133 = vmatpush1.bf16.msra.mxu1 %v13091_v49  ;;  %9013 = vmatprep.mubr.msk.bf16.mxu1 %vm117_vm0, %v9012_v4  ;;  %v9060_v4 = vcombine.high %v9058_v62, %v9058_v62 }
0x1493   :  { %6134 = vmatprep.subr.bf16.mxu1 %v10550_v0 }
0x1496   :  { %6135 = vmatpush1.bf16.msra.mxu1 %v13098_v8 }
0x1497   :  { %6136 = vmatprep.subr.bf16.mxu1 %v10550_v0 }
0x149a   :  { %6137 = vmatpush1.bf16.msra.mxu1 %v13105_v16 }
0x149b   :  { %6138 = vmatprep.subr.bf16.mxu1 %v10550_v0 }
0x149e   :  { %6139 = vmatpush1.bf16.msra.mxu1 %v13112_v5 }
0x149f   :  { %6140 = vmatprep.subr.bf16.mxu1 %v10550_v0 }
0x14a2   :  { %6141 = vmatpush1.bf16.msra.mxu1 %v13119_v17 }
0x14a3   :  { %6142 = vmatprep.subr.bf16.mxu1 %v10550_v0 }
0x14a6   :  { %6143 = vmatpush1.bf16.msra.mxu1 %v13126_v20 }
0x14a7   :  { %6144 = vmatprep.subr.bf16.mxu1 %v10550_v0 }
0x14aa   :  { %6145 = vmatpush1.bf16.msra.mxu1 %v13133_v9 }
0x14ab   :  { %6146 = vmatprep.subr.bf16.mxu1 %v10550_v0 }
0x14ae   :  { %6147 = vmatpush1.bf16.msra.mxu1 %v13140_v21 }
0x14af   :  { %6148 = vmatprep.subr.bf16.mxu1 %v10550_v0 }
0x14b2   :  { %6149 = vmatpush1.bf16.msra.mxu1 %v13147_v22 }
0x14b3   :  { %6150 = vmatprep.subr.bf16.mxu1 %v10550_v0 }
0x14b6   :  { %6151 = vmatpush1.bf16.msra.mxu1 %v10697_v15 }
0x14b7   :  { %6235 = vmatprep.subr.bf16.mxu1 %v10550_v0 }
0x14b9   :  { %6165 = vmatmul.mubr.bf16.vlgmr.msra.gmra.mrb[188].mxu1 %v9011_v50 }
0x14ba   :  { %6236 = vmatpush1.bf16.msra.mxu1 %v13091_v49  ;;  %9021 = vmatprep.mubr.msk.bf16.mxu1 %vm117_vm0, %v9020_v53 }
0x14bb   :  { %6237 = vmatprep.subr.bf16.mxu1 %v10550_v0 }
0x14be   :  { %6238 = vmatpush1.bf16.msra.mxu1 %v13098_v8 }
0x14bf   :  { %6239 = vmatprep.subr.bf16.mxu1 %v10550_v0 }
0x14c2   :  { %6240 = vmatpush1.bf16.msra.mxu1 %v13105_v16 }
0x14c3   :  { %6241 = vmatprep.subr.bf16.mxu1 %v10550_v0 }
0x14c6   :  { %6242 = vmatpush1.bf16.msra.mxu1 %v13112_v5 }
0x14c7   :  { %6243 = vmatprep.subr.bf16.mxu1 %v10550_v0 }
0x14ca   :  { %6244 = vmatpush1.bf16.msra.mxu1 %v13119_v17 }
0x14cb   :  { %6245 = vmatprep.subr.bf16.mxu1 %v10550_v0 }
0x14ce   :  { %6246 = vmatpush1.bf16.msra.mxu1 %v13126_v20 }
0x14cf   :  { %6247 = vmatprep.subr.bf16.mxu1 %v10550_v0 }
0x14d2   :  { %6248 = vmatpush1.bf16.msra.mxu1 %v13133_v9 }
0x14d3   :  { %6249 = vmatprep.subr.bf16.mxu1 %v10550_v0 }
0x14d6   :  { %6250 = vmatpush1.bf16.msra.mxu1 %v13140_v21 }
0x14d7   :  { %6251 = vmatprep.subr.bf16.mxu1 %v10550_v0 }
0x14da   :  { %6252 = vmatpush1.bf16.msra.mxu1 %v13147_v22 }
0x14db   :  { %6253 = vmatprep.subr.bf16.mxu1 %v10550_v0 }
0x14de   :  { %6254 = vmatpush1.bf16.msra.mxu1 %v10697_v15 }
0x14df   :  { %9892 = vmatprep.subr.bf16.mxu1 %v10551_v37 }
0x14e1   :  { %6268 = vmatmul.mubr.bf16.vlgmr.msra.gmra.mrb[192].mxu1 %v9019_v6 }
0x14e2   :  { %9908 = vmatprep.mubr.msk.bf16.mxu1 %vm10552_vm2, %v10551_v37  ;;  %9893 = vmatpush3.bf16.msra.mxu1 %v10377_v45  ;;  %v10395_v45 = vld [vmem:[%s14549_s3 + $0x510] sm:$0xff]  }
0x14e3   :  { %9894 = vmatprep.subr.bf16.mxu1 %v10551_v37 }
0x14e6   :  { %9895 = vmatpush3.bf16.msra.mxu1 %v10378_v43  ;;  %v10397_v43 = vld [vmem:[%s14549_s3 + $0x520] sm:$0xff]  }
0x14e7   :  { %9896 = vmatprep.subr.bf16.mxu1 %v10551_v37 }
0x14ea   :  { %9897 = vmatpush3.bf16.msra.mxu1 %v10379_v35  ;;  %v10400_v35 = vld [vmem:[%s14549_s3 + $0x538] sm:$0xff]  }
0x14eb   :  { %9898 = vmatprep.subr.bf16.mxu1 %v10551_v37 }
0x14ee   :  { %9899 = vmatpush3.bf16.msra.mxu1 %v10380_v36  ;;  %v9090_v36 = vld [vmem:[%s14548_s0 + $0xa8] sm:$0xff] }
0x14ef   :  { %9900 = vmatprep.subr.bf16.mxu1 %v10551_v37 }
0x14f2   :  { %9901 = vmatpush3.bf16.msra.mxu1 %v10381_v55  ;;  %v9092_v55 = vcombine.high %v9090_v36, %v9090_v36 }
0x14f3   :  { %9902 = vmatprep.subr.bf16.mxu1 %v10551_v37 }
0x14f6   :  { %9903 = vmatpush3.bf16.msra.mxu1 %v10382_v32  ;;  %v9091_v32 = vcombine.low %v9090_v36, %v9090_v36 }
0x14f7   :  { %9904 = vmatprep.subr.bf16.mxu1 %v10551_v37 }
0x14fa   :  { %9905 = vmatpush3.bf16.msra.mxu1 %v10383_v56  ;;  %v9098_v56 = vld [vmem:[%s14548_s0 + $0x238] sm:$0xff] }
0x14fb   :  { %9906 = vmatprep.subr.bf16.mxu1 %v10551_v37  ;;  %v9100_v46 = vcombine.high %v9098_v56, %v9098_v56 }
0x14fe   :  { %9907 = vmatpush3.bf16.msra.mxu1 %v10384_v59 }
0x14ff   :  { %6499 = vmatprep.subr.bf16.mxu1 %v10550_v0 }
0x1514   :  { %v5798_v52 = vpop.f32.mrb[176].mxu1 }
0x1515   :  { %v13580_v54 = vadd.f32 %v5798_v52, %v13440_v1  ;;  %v9870_v18 = vpop.f32.mrb[177].mxu1  ;;  %v9059_v52 = vcombine.low %v9058_v62, %v9058_v62  ;;  %v9099_v62 = vcombine.low %v9098_v56, %v9098_v56 }
0x1516   :  { %v5801_v7 = vpop.f32.mrb[178].mxu1 }
0x1517   :  { %v9871_v2 = vpop.f32.mrb[179].mxu1 }
0x153c   :  { %v5901_v3 = vpop.f32.mrb[180].mxu1 }
0x153d   :  { %v5907_v63 = vmax.f32 %v13501_v44, %v5901_v3  ;;  %v5903_v48 = vpop.f32.mrb[181].mxu1 }
0x153e   :  { %v5904_v1 = vpop.f32.mrb[182].mxu1 }
0x153f   :  { %v5959_v25 = vmax.f32 %v5907_v63, %v13520_v57  ;;  %v5905_v19 = vpop.f32.mrb[183].mxu1 }
0x1564   :  { %v6005_v33 = vpop.f32.mrb[184].mxu1 }
0x1565   :  { %v6011_v47 = vmax.f32 %v5959_v25, %v6005_v33  ;;  %v6007_v11 = vpop.f32.mrb[185].mxu1 }
0x1566   :  { %v6008_v12 = vpop.f32.mrb[186].mxu1  ;;  %v9054_v11 = vld [vmem:[%s14548_s0 + $0x168] sm:$0xff] }
0x1567   :  { %v6012_v29 = vadd.f32 %v13307_v26, %v6011_v47  ;;  %v6009_v10 = vpop.f32.mrb[187].mxu1 }
0x1569   :  { %v6013_v23 = vmax.f32 %v6012_v29, 0.0  ;;  %v9056_v29 = vcombine.high %v9054_v11, %v9054_v11 }
0x156b   :  { %v6014_v28 = vpack.c.bf16 %v6013_v23, %v6013_v23 }
0x156d   :  { %9889 = vmatmul.mubr.bf16.vlgmr.msra.gmra.mrb[188].mxu0 %v6014_v28 }
0x156e   :  { %6184 = vmatpush1.bf16.msra.mxu0 %v13091_v49  ;;  %9017 = vmatprep.mubr.msk.bf16.mxu0 %vm117_vm0, %v9016_v24  ;;  %v9022_v49 = vld [vmem:[%s14548_s0 + $0x2f0] sm:$0xff] }
0x156f   :  { %6185 = vmatprep.subr.bf16.mxu0 %v10550_v0  ;;  %v9023_v27 = vcombine.low %v9022_v49, %v9022_v49 }
0x1572   :  { %6186 = vmatpush1.bf16.msra.mxu0 %v13098_v8  ;;  %v9015_v8 = vcombine.low %v9014_v14, %v9014_v14  ;;  %v9055_v14 = vcombine.low %v9054_v11, %v9054_v11  ;;  %v9102_v11 = vld [vmem:[%s14548_s0 + $0x300] sm:$0xff] }
0x1573   :  { %6187 = vmatprep.subr.bf16.mxu0 %v10550_v0 }
0x1576   :  { %6188 = vmatpush1.bf16.msra.mxu0 %v13105_v16  ;;  %v9024_v16 = vcombine.high %v9022_v49, %v9022_v49 }
0x1577   :  { %6189 = vmatprep.subr.bf16.mxu0 %v10550_v0 }
0x157a   :  { %6190 = vmatpush1.bf16.msra.mxu0 %v13112_v5  ;;  %v13620_v5 = vld [vmem:[%s14547_s1] sm:$0xff]  }
0x157b   :  { %6191 = vmatprep.subr.bf16.mxu0 %v10550_v0 }
0x157e   :  { %6192 = vmatpush1.bf16.msra.mxu0 %v13119_v17  ;;  %v13628_v17 = vld [vmem:[%s14547_s1 + $0x8] sm:$0xff]  }
0x157f   :  { %6193 = vmatprep.subr.bf16.mxu0 %v10550_v0 }
0x1582   :  { %6194 = vmatpush1.bf16.msra.mxu0 %v13126_v20  ;;  %v13635_v20 = vld [vmem:[%s14547_s1 + $0x10] sm:$0xff]  }
0x1583   :  { %6195 = vmatprep.subr.bf16.mxu0 %v10550_v0 }
0x1586   :  { %6196 = vmatpush1.bf16.msra.mxu0 %v13133_v9  ;;  %v13642_v9 = vld [vmem:[%s14547_s1 + $0x18] sm:$0xff]  }
0x1587   :  { %6197 = vmatprep.subr.bf16.mxu0 %v10550_v0 }
0x158a   :  { %6198 = vmatpush1.bf16.msra.mxu0 %v13140_v21  ;;  %v13649_v21 = vld [vmem:[%s14547_s1 + $0x20] sm:$0xff]  }
0x158b   :  { %6199 = vmatprep.subr.bf16.mxu0 %v10550_v0 }
0x158c   :  { %v13686_v40 = vpop.f32.mrb[188].mxu1 }
0x158d   :  { %v6168_v41 = vpop.f32.mrb[189].mxu1 }
0x158e   :  { %6200 = vmatpush1.bf16.msra.mxu0 %v13147_v22  ;;  %v13656_v22 = vld [vmem:[%s14547_s1 + $0x28] sm:$0xff]   ;;  %v6169_v42 = vpop.f32.mrb[190].mxu1 }
0x158f   :  { %6201 = vmatprep.subr.bf16.mxu0 %v10550_v0  ;;  %v6170_v38 = vpop.f32.mrb[191].mxu1  ;;  %v10394_v42 = vld [vmem:[%s14549_s3 + $0x508] sm:$0xff]  }
0x1592   :  { %6202 = vmatpush1.bf16.msra.mxu0 %v10697_v15 }
0x1593   :  { %6287 = vmatprep.subr.bf16.mxu0 %v10550_v0 }
0x1595   :  { %6216 = vmatmul.mubr.bf16.vlgmr.msra.gmra.mrb[192].mxu0 %v9015_v8 }
0x1596   :  { %6288 = vmatpush1.bf16.msra.mxu0 %v13620_v5  ;;  %9025 = vmatprep.mubr.msk.bf16.mxu0 %vm117_vm0, %v9024_v16 }
0x1597   :  { %6289 = vmatprep.subr.bf16.mxu0 %v10550_v0 }
0x159a   :  { %6290 = vmatpush1.bf16.msra.mxu0 %v13628_v17 }
0x159b   :  { %6291 = vmatprep.subr.bf16.mxu0 %v10550_v0 }
0x159e   :  { %6292 = vmatpush1.bf16.msra.mxu0 %v13635_v20 }
0x159f   :  { %6293 = vmatprep.subr.bf16.mxu0 %v10550_v0 }
0x15a2   :  { %6294 = vmatpush1.bf16.msra.mxu0 %v13642_v9 }
0x15a3   :  { %6295 = vmatprep.subr.bf16.mxu0 %v10550_v0 }
0x15a6   :  { %6296 = vmatpush1.bf16.msra.mxu0 %v13649_v21 }
0x15a7   :  { %6297 = vmatprep.subr.bf16.mxu0 %v10550_v0 }
0x15aa   :  { %6298 = vmatpush1.bf16.msra.mxu0 %v13656_v22 }
0x15ab   :  { %6299 = vmatprep.subr.bf16.mxu0 %v10550_v0 }
0x15ae   :  { %6300 = vmatpush1.bf16.msra.mxu0 %v13663_v13 }
0x15af   :  { %6301 = vmatprep.subr.bf16.mxu0 %v10550_v0 }
0x15b2   :  { %6302 = vmatpush1.bf16.msra.mxu0 %v13670_v30 }
0x15b3   :  { %6303 = vmatprep.subr.bf16.mxu0 %v10550_v0 }
0x15b4   :  { %v13705_v44 = vpop.f32.mrb[192].mxu1 }
0x15b5   :  { %v6271_v31 = vpop.f32.mrb[193].mxu1 }
0x15b6   :  { %6304 = vmatpush1.bf16.msra.mxu0 %v13677_v39  ;;  %v6272_v57 = vpop.f32.mrb[194].mxu1  ;;  %v10396_v31 = vld [vmem:[%s14549_s3 + $0x518] sm:$0xff]  }
0x15b7   :  { %6305 = vmatprep.subr.bf16.mxu0 %v10550_v0  ;;  %v6273_v34 = vpop.f32.mrb[195].mxu1  ;;  %v10398_v57 = vld [vmem:[%s14549_s3 + $0x528] sm:$0xff]  }
0x15b8   :  { %v10399_v34 = vld [vmem:[%s14549_s3 + $0x530] sm:$0xff]  }
0x15ba   :  { %6306 = vmatpush1.bf16.msra.mxu0 %v10697_v15 }
0x15bb   :  { %6448 = vmatprep.subr.bf16.mxu0 %v10550_v0 }
0x15bd   :  { %6320 = vmatmul.mubr.bf16.vlgmr.msra.gmra.mrb[196].mxu0 %v9023_v27 }
0x15be   :  { %6449 = vmatpush1.bf16.msra.mxu0 %v13620_v5  ;;  %9053 = vmatprep.mubr.msk.bf16.mxu0 %vm117_vm0, %v9052_v60 }
0x15bf   :  { %6450 = vmatprep.subr.bf16.mxu0 %v10550_v0 }
0x15c2   :  { %6451 = vmatpush1.bf16.msra.mxu0 %v13628_v17 }
0x15c3   :  { %6452 = vmatprep.subr.bf16.mxu0 %v10550_v0 }
0x15c6   :  { %6453 = vmatpush1.bf16.msra.mxu0 %v13635_v20 }
0x15c7   :  { %6454 = vmatprep.subr.bf16.mxu0 %v10550_v0 }
0x15ca   :  { %6455 = vmatpush1.bf16.msra.mxu0 %v13642_v9 }
0x15cb   :  { %6456 = vmatprep.subr.bf16.mxu0 %v10550_v0 }
0x15ce   :  { %6457 = vmatpush1.bf16.msra.mxu0 %v13649_v21 }
0x15cf   :  { %6458 = vmatprep.subr.bf16.mxu0 %v10550_v0 }
0x15d2   :  { %6459 = vmatpush1.bf16.msra.mxu0 %v13656_v22 }
0x15d3   :  { %6460 = vmatprep.subr.bf16.mxu0 %v10550_v0 }
0x15d6   :  { %6461 = vmatpush1.bf16.msra.mxu0 %v13663_v13 }
0x15d7   :  { %6462 = vmatprep.subr.bf16.mxu0 %v10550_v0 }
0x15da   :  { %6463 = vmatpush1.bf16.msra.mxu0 %v13670_v30 }
0x15db   :  { %6464 = vmatprep.subr.bf16.mxu0 %v10550_v0 }
0x15de   :  { %6465 = vmatpush1.bf16.msra.mxu0 %v13677_v39 }
0x15df   :  { %6466 = vmatprep.subr.bf16.mxu0 %v10550_v0 }
0x15e2   :  { %6467 = vmatpush1.bf16.msra.mxu0 %v10697_v15 }
0x15e3   :  { %6551 = vmatprep.subr.bf16.mxu0 %v10550_v0 }
0x15e5   :  { %6481 = vmatmul.mubr.bf16.vlgmr.msra.gmra.mrb[200].mxu0 %v9051_v61 }
0x15e6   :  { %6552 = vmatpush1.bf16.msra.mxu0 %v13620_v5  ;;  %9061 = vmatprep.mubr.msk.bf16.mxu0 %vm117_vm0, %v9060_v4 }
0x15e7   :  { %6553 = vmatprep.subr.bf16.mxu0 %v10550_v0 }
0x15ea   :  { %6554 = vmatpush1.bf16.msra.mxu0 %v13628_v17 }
0x15eb   :  { %6555 = vmatprep.subr.bf16.mxu0 %v10550_v0 }
0x15ee   :  { %6556 = vmatpush1.bf16.msra.mxu0 %v13635_v20 }
0x15ef   :  { %6557 = vmatprep.subr.bf16.mxu0 %v10550_v0 }
0x15f2   :  { %6558 = vmatpush1.bf16.msra.mxu0 %v13642_v9 }
0x15f3   :  { %6559 = vmatprep.subr.bf16.mxu0 %v10550_v0 }
0x15f6   :  { %6560 = vmatpush1.bf16.msra.mxu0 %v13649_v21 }
0x15f7   :  { %6561 = vmatprep.subr.bf16.mxu0 %v10550_v0 }
0x15fa   :  { %6562 = vmatpush1.bf16.msra.mxu0 %v13656_v22 }
0x15fb   :  { %6563 = vmatprep.subr.bf16.mxu0 %v10550_v0 }
0x15fe   :  { %6564 = vmatpush1.bf16.msra.mxu0 %v13663_v13 }
0x15ff   :  { %6565 = vmatprep.subr.bf16.mxu0 %v10550_v0 }
0x1602   :  { %6566 = vmatpush1.bf16.msra.mxu0 %v13670_v30 }
0x1603   :  { %6567 = vmatprep.subr.bf16.mxu0 %v10550_v0 }
0x1606   :  { %6568 = vmatpush1.bf16.msra.mxu0 %v13677_v39 }
0x1607   :  { %6569 = vmatprep.subr.bf16.mxu0 %v10550_v0 }
0x160a   :  { %6570 = vmatpush1.bf16.msra.mxu0 %v10697_v15 }
0x160b   :  { %9912 = vmatprep.subr.bf16.mxu0 %v10551_v37 }
0x160d   :  { %6584 = vmatmul.mubr.bf16.vlgmr.msra.gmra.mrb[204].mxu0 %v9059_v52 }
0x160e   :  { %9928 = vmatprep.mubr.msk.bf16.mxu0 %vm10552_vm2, %v10551_v37 }
0x1640   :  { %v6114_v58 = vpop.f32.mrb[188].mxu0 }
0x1641   :  { %v13765_v50 = vadd.f32 %v6114_v58, %v13580_v54  ;;  %v9890_v51 = vpop.f32.mrb[189].mxu0 }
0x1642   :  { %v6117_v53 = vpop.f32.mrb[190].mxu0 }
0x1643   :  { %v9891_v18 = vpop.f32.mrb[191].mxu0 }
0x1668   :  { %v6217_v6 = vpop.f32.mrb[192].mxu0 }
0x1669   :  { %v6223_v7 = vmax.f32 %v13686_v40, %v6217_v6  ;;  %v6219_v2 = vpop.f32.mrb[193].mxu0  ;;  %v10393_v40 = vld [vmem:[%s14549_s3 + $0x500] sm:$0xff]  }
0x166a   :  { %v6220_v54 = vpop.f32.mrb[194].mxu0  ;;  %9913 = vmatpush3.bf16.msra.mxu0 %v10393_v40 }
0x166b   :  { %v6275_v3 = vmax.f32 %v6223_v7, %v13705_v44  ;;  %v6221_v63 = vpop.f32.mrb[195].mxu0  ;;  %9914 = vmatprep.subr.bf16.mxu0 %v10551_v37 }
0x166c   :  { %v13917_v63 = vld [vmem:[%s14550_s2] ss:$0 sm:$0xff] }
0x166e   :  { %9915 = vmatpush3.bf16.msra.mxu0 %v10394_v42  ;;  %v10412_v42 = vld [vmem:[%s14549_s3 + $0x558] sm:$0xff]  }
0x166f   :  { %9916 = vmatprep.subr.bf16.mxu0 %v10551_v37 }
0x1672   :  { %9917 = vmatpush3.bf16.msra.mxu0 %v10395_v45  ;;  %v10415_v45 = vld [vmem:[%s14549_s3 + $0x570] sm:$0xff]  }
0x1673   :  { %9918 = vmatprep.subr.bf16.mxu0 %v10551_v37 }
0x1676   :  { %9919 = vmatpush3.bf16.msra.mxu0 %v10396_v31  ;;  %v10416_v31 = vld [vmem:[%s14549_s3 + $0x578] sm:$0xff]  }
0x1677   :  { %9920 = vmatprep.subr.bf16.mxu0 %v10551_v37 }
0x167a   :  { %9921 = vmatpush3.bf16.msra.mxu0 %v10397_v43  ;;  %v9130_v43 = vld [vmem:[%s14548_s0 + $0xb0] sm:$0xff] }
0x167b   :  { %9922 = vmatprep.subr.bf16.mxu0 %v10551_v37 }
0x167e   :  { %9923 = vmatpush3.bf16.msra.mxu0 %v10398_v57  ;;  %v9132_v57 = vcombine.high %v9130_v43, %v9130_v43 }
0x167f   :  { %9924 = vmatprep.subr.bf16.mxu0 %v10551_v37 }
0x1682   :  { %9925 = vmatpush3.bf16.msra.mxu0 %v10399_v34  ;;  %v9131_v34 = vcombine.low %v9130_v43, %v9130_v43 }
0x1683   :  { %9926 = vmatprep.subr.bf16.mxu0 %v10551_v37 }
0x1686   :  { %9927 = vmatpush3.bf16.msra.mxu0 %v10400_v35  ;;  %v9138_v35 = vld [vmem:[%s14548_s0 + $0x240] sm:$0xff] }
0x1687   :  { %6815 = vmatprep.subr.bf16.mxu0 %v10550_v0 }
0x1690   :  { %v6321_v48 = vpop.f32.mrb[196].mxu0 }
0x1691   :  { %v6327_v1 = vmax.f32 %v6275_v3, %v6321_v48  ;;  %v6323_v25 = vpop.f32.mrb[197].mxu0 }
0x1692   :  { %v6324_v19 = vpop.f32.mrb[198].mxu0  ;;  %v9094_v25 = vld [vmem:[%s14548_s0 + $0x170] sm:$0xff] }
0x1693   :  { %v6328_v33 = vadd.f32 %v13307_v26, %v6327_v1  ;;  %v6325_v47 = vpop.f32.mrb[199].mxu0  ;;  %v9062_v26 = vld [vmem:[%s14548_s0 + $0x2f8] sm:$0xff] }
0x1694   :  { %v9064_v23 = vcombine.high %v9062_v26, %v9062_v26  ;;  %v9063_v24 = vcombine.low %v9062_v26, %v9062_v26 }
0x1695   :  { %v6329_v12 = vmax.f32 %v6328_v33, 0.0  ;;  %v9096_v33 = vcombine.high %v9094_v25, %v9094_v25 }
0x1697   :  { %v6330_v10 = vpack.c.bf16 %v6329_v12, %v6329_v12  ;;  %v9095_v12 = vcombine.low %v9094_v25, %v9094_v25  ;;  %v9142_v25 = vld [vmem:[%s14548_s0 + $0x308] sm:$0xff] }
0x1699   :  { %9909 = vmatmul.mubr.bf16.vlgmr.msra.gmra.mrb[196].mxu1 %v6330_v10  ;;  %v9103_v10 = vcombine.low %v9102_v11, %v9102_v11 }
0x169a   :  { %6500 = vmatpush1.bf16.msra.mxu1 %v13620_v5  ;;  %9057 = vmatprep.mubr.msk.bf16.mxu1 %vm117_vm0, %v9056_v29  ;;  %v9104_v29 = vcombine.high %v9102_v11, %v9102_v11 }
0x169b   :  { %6501 = vmatprep.subr.bf16.mxu1 %v10550_v0 }
0x169e   :  { %6502 = vmatpush1.bf16.msra.mxu1 %v13628_v17 }
0x169f   :  { %6503 = vmatprep.subr.bf16.mxu1 %v10550_v0 }
0x16a2   :  { %6504 = vmatpush1.bf16.msra.mxu1 %v13635_v20 }
0x16a3   :  { %6505 = vmatprep.subr.bf16.mxu1 %v10550_v0 }
0x16a6   :  { %6506 = vmatpush1.bf16.msra.mxu1 %v13642_v9 }
0x16a7   :  { %6507 = vmatprep.subr.bf16.mxu1 %v10550_v0 }
0x16aa   :  { %6508 = vmatpush1.bf16.msra.mxu1 %v13649_v21 }
0x16ab   :  { %6509 = vmatprep.subr.bf16.mxu1 %v10550_v0 }
0x16ae   :  { %6510 = vmatpush1.bf16.msra.mxu1 %v13656_v22 }
0x16af   :  { %6511 = vmatprep.subr.bf16.mxu1 %v10550_v0 }
0x16b2   :  { %6512 = vmatpush1.bf16.msra.mxu1 %v13663_v13 }
0x16b3   :  { %6513 = vmatprep.subr.bf16.mxu1 %v10550_v0 }
0x16b6   :  { %6514 = vmatpush1.bf16.msra.mxu1 %v13670_v30 }
0x16b7   :  { %6515 = vmatprep.subr.bf16.mxu1 %v10550_v0 }
0x16b8   :  { %v13826_v28 = vpop.f32.mrb[200].mxu0 }
0x16b9   :  { %v6484_v49 = vpop.f32.mrb[201].mxu0 }
0x16ba   :  { %6516 = vmatpush1.bf16.msra.mxu1 %v13677_v39  ;;  %v6485_v8 = vpop.f32.mrb[202].mxu0  ;;  %v10409_v49 = vld [vmem:[%s14549_s3 + $0x540] sm:$0xff]  }
0x16bb   :  { %6517 = vmatprep.subr.bf16.mxu1 %v10550_v0  ;;  %v6486_v16 = vpop.f32.mrb[203].mxu0 }
0x16bc   :  { %v10410_v16 = vld [vmem:[%s14549_s3 + $0x548] sm:$0xff]  }
0x16be   :  { %6518 = vmatpush1.bf16.msra.mxu1 %v10697_v15 }
0x16bf   :  { %6603 = vmatprep.subr.bf16.mxu1 %v10550_v0 }
0x16c1   :  { %6532 = vmatmul.mubr.bf16.vlgmr.msra.gmra.mrb[200].mxu1 %v9055_v14 }
0x16c2   :  { %6604 = vmatpush1.bf16.msra.mxu1 %v13620_v5  ;;  %9065 = vmatprep.mubr.msk.bf16.mxu1 %vm117_vm0, %v9064_v23 }
0x16c3   :  { %6605 = vmatprep.subr.bf16.mxu1 %v10550_v0 }
0x16c6   :  { %6606 = vmatpush1.bf16.msra.mxu1 %v13628_v17 }
0x16c7   :  { %6607 = vmatprep.subr.bf16.mxu1 %v10550_v0 }
0x16ca   :  { %6608 = vmatpush1.bf16.msra.mxu1 %v13635_v20 }
0x16cb   :  { %6609 = vmatprep.subr.bf16.mxu1 %v10550_v0 }
0x16ce   :  { %6610 = vmatpush1.bf16.msra.mxu1 %v13642_v9 }
0x16cf   :  { %6611 = vmatprep.subr.bf16.mxu1 %v10550_v0 }
0x16d2   :  { %6612 = vmatpush1.bf16.msra.mxu1 %v13649_v21 }
0x16d3   :  { %6613 = vmatprep.subr.bf16.mxu1 %v10550_v0 }
0x16d6   :  { %6614 = vmatpush1.bf16.msra.mxu1 %v13656_v22 }
0x16d7   :  { %6615 = vmatprep.subr.bf16.mxu1 %v10550_v0 }
0x16da   :  { %6616 = vmatpush1.bf16.msra.mxu1 %v13663_v13 }
0x16db   :  { %6617 = vmatprep.subr.bf16.mxu1 %v10550_v0 }
0x16de   :  { %6618 = vmatpush1.bf16.msra.mxu1 %v13670_v30 }
0x16df   :  { %6619 = vmatprep.subr.bf16.mxu1 %v10550_v0 }
0x16e0   :  { %v13845_v27 = vpop.f32.mrb[204].mxu0 }
0x16e1   :  { %v6587_v41 = vpop.f32.mrb[205].mxu0 }
0x16e2   :  { %6620 = vmatpush1.bf16.msra.mxu1 %v13677_v39  ;;  %v6588_v38 = vpop.f32.mrb[206].mxu0  ;;  %v10411_v41 = vld [vmem:[%s14549_s3 + $0x550] sm:$0xff]  }
0x16e3   :  { %6621 = vmatprep.subr.bf16.mxu1 %v10550_v0  ;;  %v6589_v44 = vpop.f32.mrb[207].mxu0  ;;  %v10413_v38 = vld [vmem:[%s14549_s3 + $0x560] sm:$0xff]  }
0x16e4   :  { %v10414_v44 = vld [vmem:[%s14549_s3 + $0x568] sm:$0xff]  }
0x16e6   :  { %6622 = vmatpush1.bf16.msra.mxu1 %v10697_v15 }
0x16e7   :  { %6764 = vmatprep.subr.bf16.mxu1 %v10550_v0 }
0x16e9   :  { %6636 = vmatmul.mubr.bf16.vlgmr.msra.gmra.mrb[204].mxu1 %v9063_v24 }
0x16ea   :  { %6765 = vmatpush1.bf16.msra.mxu1 %v13620_v5  ;;  %9093 = vmatprep.mubr.msk.bf16.mxu1 %vm117_vm0, %v9092_v55  ;;  %v9140_v55 = vcombine.high %v9138_v35, %v9138_v35 }
0x16eb   :  { %6766 = vmatprep.subr.bf16.mxu1 %v10550_v0 }
0x16ee   :  { %6767 = vmatpush1.bf16.msra.mxu1 %v13628_v17 }
0x16ef   :  { %6768 = vmatprep.subr.bf16.mxu1 %v10550_v0 }
0x16f2   :  { %6769 = vmatpush1.bf16.msra.mxu1 %v13635_v20 }
0x16f3   :  { %6770 = vmatprep.subr.bf16.mxu1 %v10550_v0 }
0x16f6   :  { %6771 = vmatpush1.bf16.msra.mxu1 %v13642_v9 }
0x16f7   :  { %6772 = vmatprep.subr.bf16.mxu1 %v10550_v0 }
0x16fa   :  { %6773 = vmatpush1.bf16.msra.mxu1 %v13649_v21 }
0x16fb   :  { %6774 = vmatprep.subr.bf16.mxu1 %v10550_v0 }
0x16fe   :  { %6775 = vmatpush1.bf16.msra.mxu1 %v13656_v22 }
0x16ff   :  { %6776 = vmatprep.subr.bf16.mxu1 %v10550_v0 }
0x1702   :  { %6777 = vmatpush1.bf16.msra.mxu1 %v13663_v13 }
0x1703   :  { %6778 = vmatprep.subr.bf16.mxu1 %v10550_v0 }
0x1706   :  { %6779 = vmatpush1.bf16.msra.mxu1 %v13670_v30 }
0x1707   :  { %6780 = vmatprep.subr.bf16.mxu1 %v10550_v0 }
0x170a   :  { %6781 = vmatpush1.bf16.msra.mxu1 %v13677_v39 }
0x170b   :  { %6782 = vmatprep.subr.bf16.mxu1 %v10550_v0 }
0x170e   :  { %6783 = vmatpush1.bf16.msra.mxu1 %v10697_v15 }
0x170f   :  { %6867 = vmatprep.subr.bf16.mxu1 %v10550_v0 }
0x1711   :  { %6797 = vmatmul.mubr.bf16.vlgmr.msra.gmra.mrb[208].mxu1 %v9091_v32 }
0x1712   :  { %6868 = vmatpush1.bf16.msra.mxu1 %v13620_v5  ;;  %9101 = vmatprep.mubr.msk.bf16.mxu1 %vm117_vm0, %v9100_v46 }
0x1713   :  { %6869 = vmatprep.subr.bf16.mxu1 %v10550_v0 }
0x1716   :  { %6870 = vmatpush1.bf16.msra.mxu1 %v13628_v17 }
0x1717   :  { %6871 = vmatprep.subr.bf16.mxu1 %v10550_v0 }
0x171a   :  { %6872 = vmatpush1.bf16.msra.mxu1 %v13635_v20 }
0x171b   :  { %6873 = vmatprep.subr.bf16.mxu1 %v10550_v0 }
0x171e   :  { %6874 = vmatpush1.bf16.msra.mxu1 %v13642_v9 }
0x171f   :  { %6875 = vmatprep.subr.bf16.mxu1 %v10550_v0 }
0x1722   :  { %6876 = vmatpush1.bf16.msra.mxu1 %v13649_v21 }
0x1723   :  { %6877 = vmatprep.subr.bf16.mxu1 %v10550_v0 }
0x1726   :  { %6878 = vmatpush1.bf16.msra.mxu1 %v13656_v22 }
0x1727   :  { %6879 = vmatprep.subr.bf16.mxu1 %v10550_v0 }
0x172a   :  { %6880 = vmatpush1.bf16.msra.mxu1 %v13663_v13 }
0x172b   :  { %6881 = vmatprep.subr.bf16.mxu1 %v10550_v0 }
0x172e   :  { %6882 = vmatpush1.bf16.msra.mxu1 %v13670_v30 }
0x172f   :  { %6883 = vmatprep.subr.bf16.mxu1 %v10550_v0 }
0x1732   :  { %6884 = vmatpush1.bf16.msra.mxu1 %v13677_v39 }
0x1733   :  { %6885 = vmatprep.subr.bf16.mxu1 %v10550_v0 }
0x1736   :  { %6886 = vmatpush1.bf16.msra.mxu1 %v10697_v15 }
0x1737   :  { %9932 = vmatprep.subr.bf16.mxu1 %v10551_v37 }
0x1739   :  { %6900 = vmatmul.mubr.bf16.vlgmr.msra.gmra.mrb[212].mxu1 %v9099_v62 }
0x173a   :  { %9948 = vmatprep.mubr.msk.bf16.mxu1 %vm10552_vm2, %v10551_v37  ;;  %9933 = vmatpush3.bf16.msra.mxu1 %v10409_v49 }
0x173b   :  { %9934 = vmatprep.subr.bf16.mxu1 %v10551_v37 }
0x173e   :  { %9935 = vmatpush3.bf16.msra.mxu1 %v10410_v16  ;;  %v14178_v16 = vld [vmem:[%s14547_s1 + $0x8] sm:$0xff]  }
0x173f   :  { %9936 = vmatprep.subr.bf16.mxu1 %v10551_v37 }
0x1742   :  { %9937 = vmatpush3.bf16.msra.mxu1 %v10411_v41  ;;  %v14199_v41 = vld [vmem:[%s14547_s1 + $0x20] sm:$0xff]  }
0x1743   :  { %9938 = vmatprep.subr.bf16.mxu1 %v10551_v37 }
0x1746   :  { %9939 = vmatpush3.bf16.msra.mxu1 %v10412_v42  ;;  %v14206_v42 = vld [vmem:[%s14547_s1 + $0x28] sm:$0xff]  }
0x1747   :  { %9940 = vmatprep.subr.bf16.mxu1 %v10551_v37 }
0x174a   :  { %9941 = vmatpush3.bf16.msra.mxu1 %v10413_v38  ;;  %v14213_v38 = vld [vmem:[%s14547_s1 + $0x30] sm:$0xff]  }
0x174b   :  { %9942 = vmatprep.subr.bf16.mxu1 %v10551_v37 }
0x174e   :  { %9943 = vmatpush3.bf16.msra.mxu1 %v10414_v44  ;;  %v14220_v44 = vld [vmem:[%s14547_s1 + $0x38] sm:$0xff]  }
0x174f   :  { %9944 = vmatprep.subr.bf16.mxu1 %v10551_v37 }
0x1752   :  { %9945 = vmatpush3.bf16.msra.mxu1 %v10415_v45  ;;  %v14227_v45 = vld [vmem:[%s14547_s1 + $0x40] sm:$0xff]  }
0x1753   :  { %9946 = vmatprep.subr.bf16.mxu1 %v10551_v37 }
0x1756   :  { %9947 = vmatpush3.bf16.msra.mxu1 %v10416_v31  ;;  %v9178_v31 = vld [vmem:[%s14548_s0 + $0x248] sm:$0xff] }
0x1757   :  { %7131 = vmatprep.subr.bf16.mxu1 %v10550_v0 }
0x176c   :  { %v6430_v59 = vpop.f32.mrb[196].mxu1 }
0x176d   :  { %v13905_v60 = vadd.f32 %v6430_v59, %v13765_v50  ;;  %v9910_v61 = vpop.f32.mrb[197].mxu1  ;;  %v9139_v59 = vcombine.low %v9138_v35, %v9138_v35 }
0x176e   :  { %v6433_v58 = vpop.f32.mrb[198].mxu1 }
0x176f   :  { %v9911_v4 = vpop.f32.mrb[199].mxu1 }
0x1794   :  { %v6533_v51 = vpop.f32.mrb[200].mxu1 }
0x1795   :  { %v6539_v52 = vmax.f32 %v13826_v28, %v6533_v51  ;;  %v6535_v53 = vpop.f32.mrb[201].mxu1 }
0x1796   :  { %v6536_v50 = vpop.f32.mrb[202].mxu1 }
0x1797   :  { %v6591_v18 = vmax.f32 %v6539_v52, %v13845_v27  ;;  %v6537_v6 = vpop.f32.mrb[203].mxu1 }
0x17bc   :  { %v6637_v7 = vpop.f32.mrb[204].mxu1 }
0x17bd   :  { %v6643_v2 = vmax.f32 %v6591_v18, %v6637_v7  ;;  %v6639_v54 = vpop.f32.mrb[205].mxu1 }
0x17be   :  { %v6640_v3 = vpop.f32.mrb[206].mxu1  ;;  %v9134_v54 = vld [vmem:[%s14548_s0 + $0x178] sm:$0xff] }
0x17bf   :  { %v6644_v48 = vadd.f32 %v13917_v63, %v6643_v2  ;;  %v6641_v1 = vpop.f32.mrb[207].mxu1 }
0x17c1   :  { %v6645_v19 = vmax.f32 %v6644_v48, 0.0  ;;  %v9136_v48 = vcombine.high %v9134_v54, %v9134_v54 }
0x17c3   :  { %v6646_v47 = vpack.c.bf16 %v6645_v19, %v6645_v19  ;;  %v9135_v19 = vcombine.low %v9134_v54, %v9134_v54  ;;  %v9182_v54 = vld [vmem:[%s14548_s0 + $0x310] sm:$0xff] }
0x17c5   :  { %9929 = vmatmul.mubr.bf16.vlgmr.msra.gmra.mrb[208].mxu0 %v6646_v47  ;;  %v9143_v47 = vcombine.low %v9142_v25, %v9142_v25 }
0x17c6   :  { %6816 = vmatpush1.bf16.msra.mxu0 %v13620_v5  ;;  %9097 = vmatprep.mubr.msk.bf16.mxu0 %vm117_vm0, %v9096_v33  ;;  %v9144_v33 = vcombine.high %v9142_v25, %v9142_v25 }
0x17c7   :  { %6817 = vmatprep.subr.bf16.mxu0 %v10550_v0 }
0x17ca   :  { %6818 = vmatpush1.bf16.msra.mxu0 %v13628_v17 }
0x17cb   :  { %6819 = vmatprep.subr.bf16.mxu0 %v10550_v0 }
0x17ce   :  { %6820 = vmatpush1.bf16.msra.mxu0 %v13635_v20 }
0x17cf   :  { %6821 = vmatprep.subr.bf16.mxu0 %v10550_v0 }
0x17d2   :  { %6822 = vmatpush1.bf16.msra.mxu0 %v13642_v9 }
0x17d3   :  { %6823 = vmatprep.subr.bf16.mxu0 %v10550_v0 }
0x17d6   :  { %6824 = vmatpush1.bf16.msra.mxu0 %v13649_v21 }
0x17d7   :  { %6825 = vmatprep.subr.bf16.mxu0 %v10550_v0 }
0x17da   :  { %6826 = vmatpush1.bf16.msra.mxu0 %v13656_v22 }
0x17db   :  { %6827 = vmatprep.subr.bf16.mxu0 %v10550_v0 }
0x17de   :  { %6828 = vmatpush1.bf16.msra.mxu0 %v13663_v13 }
0x17df   :  { %6829 = vmatprep.subr.bf16.mxu0 %v10550_v0 }
0x17e2   :  { %6830 = vmatpush1.bf16.msra.mxu0 %v13670_v30 }
0x17e3   :  { %6831 = vmatprep.subr.bf16.mxu0 %v10550_v0 }
0x17e4   :  { %v13971_v26 = vpop.f32.mrb[208].mxu1 }
0x17e5   :  { %v6800_v14 = vpop.f32.mrb[209].mxu1 }
0x17e6   :  { %6832 = vmatpush1.bf16.msra.mxu0 %v13677_v39  ;;  %v6801_v23 = vpop.f32.mrb[210].mxu1  ;;  %v10431_v14 = vld [vmem:[%s14549_s3 + $0x5b0] sm:$0xff]  }
0x17e7   :  { %6833 = vmatprep.subr.bf16.mxu0 %v10550_v0  ;;  %v6802_v24 = vpop.f32.mrb[211].mxu1  ;;  %v10432_v23 = vld [vmem:[%s14549_s3 + $0x5b8] sm:$0xff]  }
0x17e8   :  { %v9170_v24 = vld [vmem:[%s14548_s0 + $0xb8] sm:$0xff] }
0x17e9   :  { %v9171_v49 = vcombine.low %v9170_v24, %v9170_v24 }
0x17ea   :  { %6834 = vmatpush1.bf16.msra.mxu0 %v10697_v15 }
0x17eb   :  { %6919 = vmatprep.subr.bf16.mxu0 %v10550_v0 }
0x17ed   :  { %6848 = vmatmul.mubr.bf16.vlgmr.msra.gmra.mrb[212].mxu0 %v9095_v12 }
0x17ee   :  { %6920 = vmatpush1.bf16.msra.mxu0 %v13620_v5  ;;  %9105 = vmatprep.mubr.msk.bf16.mxu0 %vm117_vm0, %v9104_v29 }
0x17ef   :  { %6921 = vmatprep.subr.bf16.mxu0 %v10550_v0 }
0x17f2   :  { %6922 = vmatpush1.bf16.msra.mxu0 %v13628_v17 }
0x17f3   :  { %6923 = vmatprep.subr.bf16.mxu0 %v10550_v0 }
0x17f6   :  { %6924 = vmatpush1.bf16.msra.mxu0 %v13635_v20 }
0x17f7   :  { %6925 = vmatprep.subr.bf16.mxu0 %v10550_v0 }
0x17fa   :  { %6926 = vmatpush1.bf16.msra.mxu0 %v13642_v9 }
0x17fb   :  { %6927 = vmatprep.subr.bf16.mxu0 %v10550_v0 }
0x17fe   :  { %6928 = vmatpush1.bf16.msra.mxu0 %v13649_v21 }
0x17ff   :  { %6929 = vmatprep.subr.bf16.mxu0 %v10550_v0 }
0x1802   :  { %6930 = vmatpush1.bf16.msra.mxu0 %v13656_v22 }
0x1803   :  { %6931 = vmatprep.subr.bf16.mxu0 %v10550_v0 }
0x1806   :  { %6932 = vmatpush1.bf16.msra.mxu0 %v13663_v13 }
0x1807   :  { %6933 = vmatprep.subr.bf16.mxu0 %v10550_v0 }
0x180a   :  { %6934 = vmatpush1.bf16.msra.mxu0 %v13670_v30 }
0x180b   :  { %6935 = vmatprep.subr.bf16.mxu0 %v10550_v0 }
0x180c   :  { %v13990_v28 = vpop.f32.mrb[212].mxu1 }
0x180d   :  { %v6903_v8 = vpop.f32.mrb[213].mxu1 }
0x180e   :  { %6936 = vmatpush1.bf16.msra.mxu0 %v13677_v39  ;;  %v6904_v27 = vpop.f32.mrb[214].mxu1  ;;  %v14171_v8 = vld [vmem:[%s14547_s1] sm:$0xff]  }
0x180f   :  { %6937 = vmatprep.subr.bf16.mxu0 %v10550_v0  ;;  %v6905_v40 = vpop.f32.mrb[215].mxu1  ;;  %v14185_v27 = vld [vmem:[%s14547_s1 + $0x10] sm:$0xff]  }
0x1810   :  { %v14192_v40 = vld [vmem:[%s14547_s1 + $0x18] sm:$0xff]  }
0x1812   :  { %6938 = vmatpush1.bf16.msra.mxu0 %v10697_v15 }
0x1813   :  { %7080 = vmatprep.subr.bf16.mxu0 %v10550_v0 }
0x1815   :  { %6952 = vmatmul.mubr.bf16.vlgmr.msra.gmra.mrb[216].mxu0 %v9103_v10 }
0x1816   :  { %7081 = vmatpush1.bf16.msra.mxu0 %v13620_v5  ;;  %9133 = vmatprep.mubr.msk.bf16.mxu0 %vm117_vm0, %v9132_v57  ;;  %v9180_v57 = vcombine.high %v9178_v31, %v9178_v31 }
0x1817   :  { %7082 = vmatprep.subr.bf16.mxu0 %v10550_v0 }
0x181a   :  { %7083 = vmatpush1.bf16.msra.mxu0 %v13628_v17 }
0x181b   :  { %7084 = vmatprep.subr.bf16.mxu0 %v10550_v0 }
0x181e   :  { %7085 = vmatpush1.bf16.msra.mxu0 %v13635_v20 }
0x181f   :  { %7086 = vmatprep.subr.bf16.mxu0 %v10550_v0 }
0x1822   :  { %7087 = vmatpush1.bf16.msra.mxu0 %v13642_v9 }
0x1823   :  { %7088 = vmatprep.subr.bf16.mxu0 %v10550_v0 }
0x1826   :  { %7089 = vmatpush1.bf16.msra.mxu0 %v13649_v21 }
0x1827   :  { %7090 = vmatprep.subr.bf16.mxu0 %v10550_v0 }
0x182a   :  { %7091 = vmatpush1.bf16.msra.mxu0 %v13656_v22 }
0x182b   :  { %7092 = vmatprep.subr.bf16.mxu0 %v10550_v0 }
0x182e   :  { %7093 = vmatpush1.bf16.msra.mxu0 %v13663_v13 }
0x182f   :  { %7094 = vmatprep.subr.bf16.mxu0 %v10550_v0 }
0x1832   :  { %7095 = vmatpush1.bf16.msra.mxu0 %v13670_v30 }
0x1833   :  { %7096 = vmatprep.subr.bf16.mxu0 %v10550_v0 }
0x1836   :  { %7097 = vmatpush1.bf16.msra.mxu0 %v13677_v39 }
0x1837   :  { %7098 = vmatprep.subr.bf16.mxu0 %v10550_v0 }
0x183a   :  { %7099 = vmatpush1.bf16.msra.mxu0 %v10697_v15 }
0x183b   :  { %7183 = vmatprep.subr.bf16.mxu0 %v10550_v0 }
0x183d   :  { %7113 = vmatmul.mubr.bf16.vlgmr.msra.gmra.mrb[220].mxu0 %v9131_v34 }
0x183e   :  { %7184 = vmatpush1.bf16.msra.mxu0 %v13620_v5  ;;  %9141 = vmatprep.mubr.msk.bf16.mxu0 %vm117_vm0, %v9140_v55 }
0x183f   :  { %7185 = vmatprep.subr.bf16.mxu0 %v10550_v0 }
0x1842   :  { %7186 = vmatpush1.bf16.msra.mxu0 %v13628_v17 }
0x1843   :  { %7187 = vmatprep.subr.bf16.mxu0 %v10550_v0 }
0x1846   :  { %7188 = vmatpush1.bf16.msra.mxu0 %v13635_v20 }
0x1847   :  { %7189 = vmatprep.subr.bf16.mxu0 %v10550_v0 }
0x184a   :  { %7190 = vmatpush1.bf16.msra.mxu0 %v13642_v9 }
0x184b   :  { %7191 = vmatprep.subr.bf16.mxu0 %v10550_v0 }
0x184e   :  { %7192 = vmatpush1.bf16.msra.mxu0 %v13649_v21 }
0x184f   :  { %7193 = vmatprep.subr.bf16.mxu0 %v10550_v0 }
0x1852   :  { %7194 = vmatpush1.bf16.msra.mxu0 %v13656_v22 }
0x1853   :  { %7195 = vmatprep.subr.bf16.mxu0 %v10550_v0 }
0x1856   :  { %7196 = vmatpush1.bf16.msra.mxu0 %v13663_v13 }
0x1857   :  { %7197 = vmatprep.subr.bf16.mxu0 %v10550_v0 }
0x185a   :  { %7198 = vmatpush1.bf16.msra.mxu0 %v13670_v30 }
0x185b   :  { %7199 = vmatprep.subr.bf16.mxu0 %v10550_v0 }
0x185e   :  { %7200 = vmatpush1.bf16.msra.mxu0 %v13677_v39 }
0x185f   :  { %7201 = vmatprep.subr.bf16.mxu0 %v10550_v0 }
0x1862   :  { %7202 = vmatpush1.bf16.msra.mxu0 %v10697_v15 }
0x1863   :  { %9952 = vmatprep.subr.bf16.mxu0 %v10551_v37 }
0x1865   :  { %7216 = vmatmul.mubr.bf16.vlgmr.msra.gmra.mrb[224].mxu0 %v9139_v59 }
0x1866   :  { %9968 = vmatprep.mubr.msk.bf16.mxu0 %vm10552_vm2, %v10551_v37 }
0x1898   :  { %v6746_v36 = vpop.f32.mrb[208].mxu0 }
0x1899   :  { %v14050_v32 = vadd.f32 %v6746_v36, %v13905_v60  ;;  %v9930_v56 = vpop.f32.mrb[209].mxu0  ;;  %v9179_v36 = vcombine.low %v9178_v31, %v9178_v31 }
0x189a   :  { %v6749_v46 = vpop.f32.mrb[210].mxu0 }
0x189b   :  { %v9931_v61 = vpop.f32.mrb[211].mxu0 }
0x18c0   :  { %v6849_v62 = vpop.f32.mrb[212].mxu0 }
0x18c1   :  { %v6855_v58 = vmax.f32 %v13971_v26, %v6849_v62  ;;  %v6851_v4 = vpop.f32.mrb[213].mxu0  ;;  %v10430_v26 = vld [vmem:[%s14549_s3 + $0x5a8] sm:$0xff]  }
0x18c2   :  { %v6852_v60 = vpop.f32.mrb[214].mxu0 }
0x18c3   :  { %v6907_v51 = vmax.f32 %v6855_v58, %v13990_v28  ;;  %v6853_v52 = vpop.f32.mrb[215].mxu0  ;;  %v9172_v28 = vcombine.high %v9170_v24, %v9170_v24 }
0x18e8   :  { %v6953_v53 = vpop.f32.mrb[216].mxu0 }
0x18e9   :  { %v6959_v50 = vmax.f32 %v6907_v51, %v6953_v53  ;;  %v6955_v18 = vpop.f32.mrb[217].mxu0 }
0x18ea   :  { %v6956_v6 = vpop.f32.mrb[218].mxu0  ;;  %v9174_v18 = vld [vmem:[%s14548_s0 + $0x180] sm:$0xff] }
0x18eb   :  { %v6960_v7 = vadd.f32 %v13917_v63, %v6959_v50  ;;  %v6957_v2 = vpop.f32.mrb[219].mxu0 }
0x18ed   :  { %v6961_v3 = vmax.f32 %v6960_v7, 0.0  ;;  %v9176_v7 = vcombine.high %v9174_v18, %v9174_v18 }
0x18ef   :  { %v6962_v1 = vpack.c.bf16 %v6961_v3, %v6961_v3  ;;  %v9175_v3 = vcombine.low %v9174_v18, %v9174_v18 }
0x18f1   :  { %9949 = vmatmul.mubr.bf16.vlgmr.msra.gmra.mrb[216].mxu1 %v6962_v1  ;;  %v9183_v1 = vcombine.low %v9182_v54, %v9182_v54 }
0x18f2   :  { %7132 = vmatpush1.bf16.msra.mxu1 %v13620_v5  ;;  %9137 = vmatprep.mubr.msk.bf16.mxu1 %vm117_vm0, %v9136_v48  ;;  %v9184_v48 = vcombine.high %v9182_v54, %v9182_v54  ;;  %v10461_v54 = vld [vmem:[%s14549_s3 + $0x620] sm:$0xff]  }
0x18f3   :  { %7133 = vmatprep.subr.bf16.mxu1 %v10550_v0 }
0x18f6   :  { %7134 = vmatpush1.bf16.msra.mxu1 %v13628_v17 }
0x18f7   :  { %7135 = vmatprep.subr.bf16.mxu1 %v10550_v0 }
0x18fa   :  { %7136 = vmatpush1.bf16.msra.mxu1 %v13635_v20 }
0x18fb   :  { %7137 = vmatprep.subr.bf16.mxu1 %v10550_v0 }
0x18fe   :  { %7138 = vmatpush1.bf16.msra.mxu1 %v13642_v9 }
0x18ff   :  { %7139 = vmatprep.subr.bf16.mxu1 %v10550_v0 }
0x1902   :  { %7140 = vmatpush1.bf16.msra.mxu1 %v13649_v21 }
0x1903   :  { %7141 = vmatprep.subr.bf16.mxu1 %v10550_v0 }
0x1906   :  { %7142 = vmatpush1.bf16.msra.mxu1 %v13656_v22 }
0x1907   :  { %7143 = vmatprep.subr.bf16.mxu1 %v10550_v0 }
0x190a   :  { %7144 = vmatpush1.bf16.msra.mxu1 %v13663_v13 }
0x190b   :  { %7145 = vmatprep.subr.bf16.mxu1 %v10550_v0 }
0x190e   :  { %7146 = vmatpush1.bf16.msra.mxu1 %v13670_v30 }
0x190f   :  { %7147 = vmatprep.subr.bf16.mxu1 %v10550_v0 }
0x1910   :  { %v14111_v11 = vpop.f32.mrb[220].mxu0 }
0x1911   :  { %v7116_v12 = vpop.f32.mrb[221].mxu0 }
0x1912   :  { %7148 = vmatpush1.bf16.msra.mxu1 %v13677_v39  ;;  %v7117_v29 = vpop.f32.mrb[222].mxu0  ;;  %v10441_v12 = vld [vmem:[%s14549_s3 + $0x5c0] sm:$0xff]  }
0x1913   :  { %7149 = vmatprep.subr.bf16.mxu1 %v10550_v0  ;;  %v7118_v10 = vpop.f32.mrb[223].mxu0 }
0x1914   :  { %v10442_v10 = vld [vmem:[%s14549_s3 + $0x5c8] sm:$0xff]  }
0x1916   :  { %7150 = vmatpush1.bf16.msra.mxu1 %v10697_v15 }
0x1917   :  { %7235 = vmatprep.subr.bf16.mxu1 %v10550_v0 }
0x1919   :  { %7164 = vmatmul.mubr.bf16.vlgmr.msra.gmra.mrb[220].mxu1 %v9135_v19 }
0x191a   :  { %7236 = vmatpush1.bf16.msra.mxu1 %v13620_v5  ;;  %9145 = vmatprep.mubr.msk.bf16.mxu1 %vm117_vm0, %v9144_v33 }
0x191b   :  { %7237 = vmatprep.subr.bf16.mxu1 %v10550_v0 }
0x191e   :  { %7238 = vmatpush1.bf16.msra.mxu1 %v13628_v17 }
0x191f   :  { %7239 = vmatprep.subr.bf16.mxu1 %v10550_v0 }
0x1922   :  { %7240 = vmatpush1.bf16.msra.mxu1 %v13635_v20 }
0x1923   :  { %7241 = vmatprep.subr.bf16.mxu1 %v10550_v0 }
0x1926   :  { %7242 = vmatpush1.bf16.msra.mxu1 %v13642_v9 }
0x1927   :  { %7243 = vmatprep.subr.bf16.mxu1 %v10550_v0 }
0x192a   :  { %7244 = vmatpush1.bf16.msra.mxu1 %v13649_v21 }
0x192b   :  { %7245 = vmatprep.subr.bf16.mxu1 %v10550_v0 }
0x192e   :  { %7246 = vmatpush1.bf16.msra.mxu1 %v13656_v22 }
0x192f   :  { %7247 = vmatprep.subr.bf16.mxu1 %v10550_v0 }
0x1932   :  { %7248 = vmatpush1.bf16.msra.mxu1 %v13663_v13 }
0x1933   :  { %7249 = vmatprep.subr.bf16.mxu1 %v10550_v0 }
0x1936   :  { %7250 = vmatpush1.bf16.msra.mxu1 %v13670_v30 }
0x1937   :  { %7251 = vmatprep.subr.bf16.mxu1 %v10550_v0 }
0x193a   :  { %7252 = vmatpush1.bf16.msra.mxu1 %v13677_v39 }
0x193b   :  { %7253 = vmatprep.subr.bf16.mxu1 %v10550_v0 }
0x193e   :  { %7254 = vmatpush1.bf16.msra.mxu1 %v10697_v15 }
0x193f   :  { %7396 = vmatprep.subr.bf16.mxu1 %v10550_v0 }
0x1941   :  { %7268 = vmatmul.mubr.bf16.vlgmr.msra.gmra.mrb[224].mxu1 %v9143_v47 }
0x1942   :  { %7397 = vmatpush1.bf16.msra.mxu1 %v13620_v5  ;;  %v14130_v5 = vpop.f32.mrb[224].mxu0  ;;  %9173 = vmatprep.mubr.msk.bf16.mxu1 %vm117_vm0, %v9172_v28 }
0x1943   :  { %7398 = vmatprep.subr.bf16.mxu1 %v10550_v0 }
0x1946   :  { %7399 = vmatpush1.bf16.msra.mxu1 %v13628_v17  ;;  %v10425_v17 = vld [vmem:[%s14549_s3 + $0x580] sm:$0xff]  }
0x1947   :  { %7400 = vmatprep.subr.bf16.mxu1 %v10550_v0  ;;  %9953 = vmatpush3.bf16.msra.mxu0 %v10425_v17 }
0x1948   :  { %9954 = vmatprep.subr.bf16.mxu0 %v10551_v37 }
0x194a   :  { %7401 = vmatpush1.bf16.msra.mxu1 %v13635_v20  ;;  %v7219_v20 = vpop.f32.mrb[225].mxu0 }
0x194b   :  { %7402 = vmatprep.subr.bf16.mxu1 %v10550_v0  ;;  %v10443_v20 = vld [vmem:[%s14549_s3 + $0x5d0] sm:$0xff]  }
0x194e   :  { %7403 = vmatpush1.bf16.msra.mxu1 %v13642_v9  ;;  %v10426_v9 = vld [vmem:[%s14549_s3 + $0x588] sm:$0xff]  }
0x194f   :  { %7404 = vmatprep.subr.bf16.mxu1 %v10550_v0  ;;  %9955 = vmatpush3.bf16.msra.mxu0 %v10426_v9  ;;  %v10444_v9 = vld [vmem:[%s14549_s3 + $0x5d8] sm:$0xff]  }
0x1950   :  { %9956 = vmatprep.subr.bf16.mxu0 %v10551_v37 }
0x1952   :  { %7405 = vmatpush1.bf16.msra.mxu1 %v13649_v21  ;;  %v7220_v21 = vpop.f32.mrb[226].mxu0 }
0x1953   :  { %7406 = vmatprep.subr.bf16.mxu1 %v10550_v0  ;;  %v10445_v21 = vld [vmem:[%s14549_s3 + $0x5e0] sm:$0xff]  }
0x1956   :  { %7407 = vmatpush1.bf16.msra.mxu1 %v13656_v22  ;;  %v7221_v22 = vpop.f32.mrb[227].mxu0 }
0x1957   :  { %7408 = vmatprep.subr.bf16.mxu1 %v10550_v0  ;;  %v10446_v22 = vld [vmem:[%s14549_s3 + $0x5e8] sm:$0xff]  }
0x195a   :  { %7409 = vmatpush1.bf16.msra.mxu1 %v13663_v13  ;;  %v10427_v13 = vld [vmem:[%s14549_s3 + $0x590] sm:$0xff]  }
0x195b   :  { %7410 = vmatprep.subr.bf16.mxu1 %v10550_v0  ;;  %9957 = vmatpush3.bf16.msra.mxu0 %v10427_v13  ;;  %v10447_v13 = vld [vmem:[%s14549_s3 + $0x5f0] sm:$0xff]  }
0x195c   :  { %9958 = vmatprep.subr.bf16.mxu0 %v10551_v37 }
0x195e   :  { %7411 = vmatpush1.bf16.msra.mxu1 %v13670_v30  ;;  %v10428_v30 = vld [vmem:[%s14549_s3 + $0x598] sm:$0xff]  }
0x195f   :  { %7412 = vmatprep.subr.bf16.mxu1 %v10550_v0  ;;  %9959 = vmatpush3.bf16.msra.mxu0 %v10428_v30  ;;  %v10448_v30 = vld [vmem:[%s14549_s3 + $0x5f8] sm:$0xff]  }
0x1960   :  { %9960 = vmatprep.subr.bf16.mxu0 %v10551_v37 }
0x1962   :  { %7413 = vmatpush1.bf16.msra.mxu1 %v13677_v39  ;;  %v10429_v39 = vld [vmem:[%s14549_s3 + $0x5a0] sm:$0xff]  }
0x1963   :  { %7414 = vmatprep.subr.bf16.mxu1 %v10550_v0  ;;  %9961 = vmatpush3.bf16.msra.mxu0 %v10429_v39  ;;  %v9210_v39 = vld [vmem:[%s14548_s0 + $0xc0] sm:$0xff] }
0x1964   :  { %9962 = vmatprep.subr.bf16.mxu0 %v10551_v37 }
0x1966   :  { %7415 = vmatpush1.bf16.msra.mxu1 %v10697_v15 }
0x1967   :  { %7499 = vmatprep.subr.bf16.mxu1 %v10550_v0  ;;  %9963 = vmatpush3.bf16.msra.mxu0 %v10430_v26  ;;  %v9212_v26 = vcombine.high %v9210_v39, %v9210_v39 }
0x1968   :  { %9964 = vmatprep.subr.bf16.mxu0 %v10551_v37 }
0x1969   :  { %7429 = vmatmul.mubr.bf16.vlgmr.msra.gmra.mrb[228].mxu1 %v9171_v49 }
0x196a   :  { %7500 = vmatpush1.bf16.msra.mxu1 %v14171_v8  ;;  %9181 = vmatprep.mubr.msk.bf16.mxu1 %vm117_vm0, %v9180_v57 }
0x196b   :  { %9965 = vmatpush3.bf16.msra.mxu0 %v10431_v14  ;;  %7501 = vmatprep.subr.bf16.mxu1 %v10550_v0  ;;  %v9211_v14 = vcombine.low %v9210_v39, %v9210_v39 }
0x196c   :  { %9966 = vmatprep.subr.bf16.mxu0 %v10551_v37 }
0x196e   :  { %7502 = vmatpush1.bf16.msra.mxu1 %v14178_v16 }
0x196f   :  { %9967 = vmatpush3.bf16.msra.mxu0 %v10432_v23  ;;  %7503 = vmatprep.subr.bf16.mxu1 %v10550_v0  ;;  %v9218_v23 = vld [vmem:[%s14548_s0 + $0x250] sm:$0xff] }
0x1970   :  { %7447 = vmatprep.subr.bf16.mxu0 %v10550_v0  ;;  %v9220_v28 = vcombine.high %v9218_v23, %v9218_v23 }
0x1972   :  { %7504 = vmatpush1.bf16.msra.mxu1 %v14185_v27 }
0x1973   :  { %7505 = vmatprep.subr.bf16.mxu1 %v10550_v0 }
0x1976   :  { %7506 = vmatpush1.bf16.msra.mxu1 %v14192_v40 }
0x1977   :  { %7507 = vmatprep.subr.bf16.mxu1 %v10550_v0 }
0x197a   :  { %7508 = vmatpush1.bf16.msra.mxu1 %v14199_v41 }
0x197b   :  { %7509 = vmatprep.subr.bf16.mxu1 %v10550_v0 }
0x197e   :  { %7510 = vmatpush1.bf16.msra.mxu1 %v14206_v42 }
0x197f   :  { %7511 = vmatprep.subr.bf16.mxu1 %v10550_v0 }
0x1982   :  { %7512 = vmatpush1.bf16.msra.mxu1 %v14213_v38 }
0x1983   :  { %7513 = vmatprep.subr.bf16.mxu1 %v10550_v0 }
0x1986   :  { %7514 = vmatpush1.bf16.msra.mxu1 %v14220_v44 }
0x1987   :  { %7515 = vmatprep.subr.bf16.mxu1 %v10550_v0 }
0x198a   :  { %7516 = vmatpush1.bf16.msra.mxu1 %v14227_v45 }
0x198b   :  { %7517 = vmatprep.subr.bf16.mxu1 %v10550_v0 }
0x198e   :  { %7518 = vmatpush1.bf16.msra.mxu1 %v10697_v15 }
0x198f   :  { %9972 = vmatprep.subr.bf16.mxu1 %v10551_v37 }
0x1991   :  { %7532 = vmatmul.mubr.bf16.vlgmr.msra.gmra.mrb[232].mxu1 %v9179_v36 }
0x1992   :  { %9988 = vmatprep.mubr.msk.bf16.mxu1 %vm10552_vm2, %v10551_v37  ;;  %9973 = vmatpush3.bf16.msra.mxu1 %v10441_v12  ;;  %v10470_v12 = vld [vmem:[%s14551_s5 + $0x28] sm:$0xff]  }
0x1993   :  { %9974 = vmatprep.subr.bf16.mxu1 %v10551_v37 }
0x1996   :  { %9975 = vmatpush3.bf16.msra.mxu1 %v10442_v10 }
0x1997   :  { %9976 = vmatprep.subr.bf16.mxu1 %v10551_v37 }
0x199a   :  { %9977 = vmatpush3.bf16.msra.mxu1 %v10443_v20 }
0x199b   :  { %9978 = vmatprep.subr.bf16.mxu1 %v10551_v37 }
0x199e   :  { %9979 = vmatpush3.bf16.msra.mxu1 %v10444_v9 }
0x199f   :  { %9980 = vmatprep.subr.bf16.mxu1 %v10551_v37 }
0x19a2   :  { %9981 = vmatpush3.bf16.msra.mxu1 %v10445_v21 }
0x19a3   :  { %9982 = vmatprep.subr.bf16.mxu1 %v10551_v37 }
0x19a6   :  { %9983 = vmatpush3.bf16.msra.mxu1 %v10446_v22 }
0x19a7   :  { %9984 = vmatprep.subr.bf16.mxu1 %v10551_v37 }
0x19aa   :  { %9985 = vmatpush3.bf16.msra.mxu1 %v10447_v13 }
0x19ab   :  { %9986 = vmatprep.subr.bf16.mxu1 %v10551_v37 }
0x19ae   :  { %9987 = vmatpush3.bf16.msra.mxu1 %v10448_v30 }
0x19af   :  { %7763 = vmatprep.subr.bf16.mxu1 %v10550_v0 }
0x19c4   :  { %v7062_v43 = vpop.f32.mrb[216].mxu1 }
0x19c5   :  { %v14235_v34 = vadd.f32 %v7062_v43, %v14050_v32  ;;  %v9950_v35 = vpop.f32.mrb[217].mxu1  ;;  %v9219_v43 = vcombine.low %v9218_v23, %v9218_v23 }
0x19c6   :  { %v7065_v55 = vpop.f32.mrb[218].mxu1 }
0x19c7   :  { %v9951_v56 = vpop.f32.mrb[219].mxu1 }
0x19ec   :  { %v7165_v59 = vpop.f32.mrb[220].mxu1 }
0x19ed   :  { %v7171_v46 = vmax.f32 %v14111_v11, %v7165_v59  ;;  %v7167_v61 = vpop.f32.mrb[221].mxu1 }
0x19ee   :  { %v7168_v32 = vpop.f32.mrb[222].mxu1 }
0x19ef   :  { %v7223_v62 = vmax.f32 %v7171_v46, %v14130_v5  ;;  %v7169_v58 = vpop.f32.mrb[223].mxu1 }
0x1a14   :  { %v7269_v4 = vpop.f32.mrb[224].mxu1 }
0x1a15   :  { %v7275_v60 = vmax.f32 %v7223_v62, %v7269_v4  ;;  %v7271_v51 = vpop.f32.mrb[225].mxu1 }
0x1a16   :  { %v7272_v52 = vpop.f32.mrb[226].mxu1  ;;  %v9214_v51 = vld [vmem:[%s14548_s0 + $0x188] sm:$0xff] }
0x1a17   :  { %v7276_v53 = vadd.f32 %v13917_v63, %v7275_v60  ;;  %v7273_v50 = vpop.f32.mrb[227].mxu1  ;;  %v9215_v18 = vcombine.low %v9214_v51, %v9214_v51 }
0x1a19   :  { %v7277_v6 = vmax.f32 %v7276_v53, 0.0  ;;  %v9216_v53 = vcombine.high %v9214_v51, %v9214_v51 }
0x1a1b   :  { %v7278_v2 = vpack.c.bf16 %v7277_v6, %v7277_v6 }
0x1a1d   :  { %9969 = vmatmul.mubr.bf16.vlgmr.msra.gmra.mrb[228].mxu0 %v7278_v2  ;;  %v10460_v2 = vld [vmem:[%s14549_s3 + $0x618] sm:$0xff]  }
0x1a1e   :  { %7448 = vmatpush1.bf16.msra.mxu0 %v14171_v8  ;;  %9177 = vmatprep.mubr.msk.bf16.mxu0 %vm117_vm0, %v9176_v7  ;;  %v10459_v7 = vld [vmem:[%s14549_s3 + $0x610] sm:$0xff]  }
0x1a1f   :  { %7449 = vmatprep.subr.bf16.mxu0 %v10550_v0 }
0x1a22   :  { %7450 = vmatpush1.bf16.msra.mxu0 %v14178_v16 }
0x1a23   :  { %7451 = vmatprep.subr.bf16.mxu0 %v10550_v0 }
0x1a26   :  { %7452 = vmatpush1.bf16.msra.mxu0 %v14185_v27 }
0x1a27   :  { %7453 = vmatprep.subr.bf16.mxu0 %v10550_v0 }
0x1a2a   :  { %7454 = vmatpush1.bf16.msra.mxu0 %v14192_v40 }
0x1a2b   :  { %7455 = vmatprep.subr.bf16.mxu0 %v10550_v0 }
0x1a2e   :  { %7456 = vmatpush1.bf16.msra.mxu0 %v14199_v41 }
0x1a2f   :  { %7457 = vmatprep.subr.bf16.mxu0 %v10550_v0 }
0x1a32   :  { %7458 = vmatpush1.bf16.msra.mxu0 %v14206_v42 }
0x1a33   :  { %7459 = vmatprep.subr.bf16.mxu0 %v10550_v0 }
0x1a36   :  { %7460 = vmatpush1.bf16.msra.mxu0 %v14213_v38 }
0x1a37   :  { %7461 = vmatprep.subr.bf16.mxu0 %v10550_v0 }
0x1a3a   :  { %7462 = vmatpush1.bf16.msra.mxu0 %v14220_v44 }
0x1a3b   :  { %7463 = vmatprep.subr.bf16.mxu0 %v10550_v0 }
0x1a3c   :  { %v14296_v25 = vpop.f32.mrb[228].mxu1 }
0x1a3d   :  { %v7432_v19 = vpop.f32.mrb[229].mxu1 }
0x1a3e   :  { %7464 = vmatpush1.bf16.msra.mxu0 %v14227_v45  ;;  %v7433_v33 = vpop.f32.mrb[230].mxu1  ;;  %v10466_v19 = vld [vmem:[%s14551_s5 + $0x8] sm:$0xff]  }
0x1a3f   :  { %7465 = vmatprep.subr.bf16.mxu0 %v10550_v0  ;;  %v7434_v47 = vpop.f32.mrb[231].mxu1  ;;  %v10467_v33 = vld [vmem:[%s14551_s5 + $0x10] sm:$0xff]  }
0x1a40   :  { %v10468_v47 = vld [vmem:[%s14551_s5 + $0x18] sm:$0xff]  }
0x1a42   :  { %7466 = vmatpush1.bf16.msra.mxu0 %v10697_v15 }
0x1a43   :  { %7551 = vmatprep.subr.bf16.mxu0 %v10550_v0 }
0x1a45   :  { %7480 = vmatmul.mubr.bf16.vlgmr.msra.gmra.mrb[232].mxu0 %v9175_v3  ;;  %v10462_v3 = vld [vmem:[%s14549_s3 + $0x628] sm:$0xff]  }
0x1a46   :  { %7552 = vmatpush1.bf16.msra.mxu0 %v14171_v8  ;;  %9185 = vmatprep.mubr.msk.bf16.mxu0 %vm117_vm0, %v9184_v48  ;;  %v10463_v48 = vld [vmem:[%s14549_s3 + $0x630] sm:$0xff]  }
0x1a47   :  { %7553 = vmatprep.subr.bf16.mxu0 %v10550_v0 }
0x1a4a   :  { %7554 = vmatpush1.bf16.msra.mxu0 %v14178_v16 }
0x1a4b   :  { %7555 = vmatprep.subr.bf16.mxu0 %v10550_v0 }
0x1a4e   :  { %7556 = vmatpush1.bf16.msra.mxu0 %v14185_v27 }
0x1a4f   :  { %7557 = vmatprep.subr.bf16.mxu0 %v10550_v0 }
0x1a52   :  { %7558 = vmatpush1.bf16.msra.mxu0 %v14192_v40 }
0x1a53   :  { %7559 = vmatprep.subr.bf16.mxu0 %v10550_v0 }
0x1a56   :  { %7560 = vmatpush1.bf16.msra.mxu0 %v14199_v41 }
0x1a57   :  { %7561 = vmatprep.subr.bf16.mxu0 %v10550_v0 }
0x1a5a   :  { %7562 = vmatpush1.bf16.msra.mxu0 %v14206_v42 }
0x1a5b   :  { %7563 = vmatprep.subr.bf16.mxu0 %v10550_v0 }
0x1a5e   :  { %7564 = vmatpush1.bf16.msra.mxu0 %v14213_v38 }
0x1a5f   :  { %7565 = vmatprep.subr.bf16.mxu0 %v10550_v0 }
0x1a62   :  { %7566 = vmatpush1.bf16.msra.mxu0 %v14220_v44 }
0x1a63   :  { %7567 = vmatprep.subr.bf16.mxu0 %v10550_v0 }
0x1a64   :  { %v14315_v11 = vpop.f32.mrb[232].mxu1 }
0x1a65   :  { %v7535_v29 = vpop.f32.mrb[233].mxu1 }
0x1a66   :  { %7568 = vmatpush1.bf16.msra.mxu0 %v14227_v45  ;;  %v7536_v5 = vpop.f32.mrb[234].mxu1 }
0x1a67   :  { %7569 = vmatprep.subr.bf16.mxu0 %v10550_v0  ;;  %v7537_v17 = vpop.f32.mrb[235].mxu1 }
0x1a6a   :  { %7570 = vmatpush1.bf16.msra.mxu0 %v10697_v15 }
0x1a6b   :  { %7712 = vmatprep.subr.bf16.mxu0 %v10550_v0 }
0x1a6d   :  { %7584 = vmatmul.mubr.bf16.vlgmr.msra.gmra.mrb[236].mxu0 %v9183_v1  ;;  %v10464_v1 = vld [vmem:[%s14549_s3 + $0x638] sm:$0xff]  }
0x1a6e   :  { %7713 = vmatpush1.bf16.msra.mxu0 %v14171_v8  ;;  %9213 = vmatprep.mubr.msk.bf16.mxu0 %vm117_vm0, %v9212_v26 }
0x1a6f   :  { %7714 = vmatprep.subr.bf16.mxu0 %v10550_v0 }
0x1a72   :  { %7715 = vmatpush1.bf16.msra.mxu0 %v14178_v16 }
0x1a73   :  { %7716 = vmatprep.subr.bf16.mxu0 %v10550_v0 }
0x1a76   :  { %7717 = vmatpush1.bf16.msra.mxu0 %v14185_v27 }
0x1a77   :  { %7718 = vmatprep.subr.bf16.mxu0 %v10550_v0 }
0x1a7a   :  { %7719 = vmatpush1.bf16.msra.mxu0 %v14192_v40 }
0x1a7b   :  { %7720 = vmatprep.subr.bf16.mxu0 %v10550_v0 }
0x1a7e   :  { %7721 = vmatpush1.bf16.msra.mxu0 %v14199_v41 }
0x1a7f   :  { %7722 = vmatprep.subr.bf16.mxu0 %v10550_v0 }
0x1a82   :  { %7723 = vmatpush1.bf16.msra.mxu0 %v14206_v42 }
0x1a83   :  { %7724 = vmatprep.subr.bf16.mxu0 %v10550_v0 }
0x1a86   :  { %7725 = vmatpush1.bf16.msra.mxu0 %v14213_v38 }
0x1a87   :  { %7726 = vmatprep.subr.bf16.mxu0 %v10550_v0 }
0x1a8a   :  { %7727 = vmatpush1.bf16.msra.mxu0 %v14220_v44 }
0x1a8b   :  { %7728 = vmatprep.subr.bf16.mxu0 %v10550_v0 }
0x1a8e   :  { %7729 = vmatpush1.bf16.msra.mxu0 %v14227_v45 }
0x1a8f   :  { %7730 = vmatprep.subr.bf16.mxu0 %v10550_v0 }
0x1a92   :  { %7731 = vmatpush1.bf16.msra.mxu0 %v10697_v15 }
0x1a93   :  { %7815 = vmatprep.subr.bf16.mxu0 %v10550_v0 }
0x1a95   :  { %7745 = vmatmul.mubr.bf16.vlgmr.msra.gmra.mrb[240].mxu0 %v9211_v14 }
0x1a96   :  { %7816 = vmatpush1.bf16.msra.mxu0 %v14171_v8  ;;  %9221 = vmatprep.mubr.msk.bf16.mxu0 %vm117_vm0, %v9220_v28  ;;  %v10549_v28 = vld [vmem:[%s14550_s2] ss:$0 sm:$0xff] }
0x1a97   :  { %7817 = vmatprep.subr.bf16.mxu0 %v10550_v0 }
0x1a9a   :  { %7818 = vmatpush1.bf16.msra.mxu0 %v14178_v16 }
0x1a9b   :  { %7819 = vmatprep.subr.bf16.mxu0 %v10550_v0 }
0x1a9e   :  { %7820 = vmatpush1.bf16.msra.mxu0 %v14185_v27 }
0x1a9f   :  { %7821 = vmatprep.subr.bf16.mxu0 %v10550_v0 }
0x1aa2   :  { %7822 = vmatpush1.bf16.msra.mxu0 %v14192_v40 }
0x1aa3   :  { %7823 = vmatprep.subr.bf16.mxu0 %v10550_v0 }
0x1aa6   :  { %7824 = vmatpush1.bf16.msra.mxu0 %v14199_v41 }
0x1aa7   :  { %7825 = vmatprep.subr.bf16.mxu0 %v10550_v0 }
0x1aaa   :  { %7826 = vmatpush1.bf16.msra.mxu0 %v14206_v42 }
0x1aab   :  { %7827 = vmatprep.subr.bf16.mxu0 %v10550_v0 }
0x1aae   :  { %7828 = vmatpush1.bf16.msra.mxu0 %v14213_v38 }
0x1aaf   :  { %7829 = vmatprep.subr.bf16.mxu0 %v10550_v0 }
0x1ab2   :  { %7830 = vmatpush1.bf16.msra.mxu0 %v14220_v44 }
0x1ab3   :  { %7831 = vmatprep.subr.bf16.mxu0 %v10550_v0 }
0x1ab6   :  { %7832 = vmatpush1.bf16.msra.mxu0 %v14227_v45 }
0x1ab7   :  { %7833 = vmatprep.subr.bf16.mxu0 %v10550_v0 }
0x1aba   :  { %7834 = vmatpush1.bf16.msra.mxu0 %v10697_v15 }
0x1abb   :  { %9992 = vmatprep.subr.bf16.mxu0 %v10551_v37 }
0x1abd   :  { %7848 = vmatmul.mubr.bf16.vlgmr.msra.gmra.mrb[244].mxu0 %v9219_v43 }
0x1abe   :  { %10008 = vmatprep.mubr.msk.bf16.mxu0 %vm10552_vm2, %v10551_v37 }
0x1af0   :  { %v7378_v24 = vpop.f32.mrb[228].mxu0 }
0x1af1   :  { %v14375_v49 = vadd.f32 %v7378_v24, %v14235_v34  ;;  %v9970_v31 = vpop.f32.mrb[229].mxu0 }
0x1af2   :  { %v7381_v57 = vpop.f32.mrb[230].mxu0 }
0x1af3   :  { %v9971_v35 = vpop.f32.mrb[231].mxu0 }
0x1af4   :  { %v10471_v35 = vld [vmem:[%s14551_s5 + $0x30] sm:$0xff]  }
0x1b18   :  { %v7481_v36 = vpop.f32.mrb[232].mxu0 }
0x1b19   :  { %v7487_v55 = vmax.f32 %v14296_v25, %v7481_v36  ;;  %v7483_v56 = vpop.f32.mrb[233].mxu0  ;;  %v10465_v25 = vld [vmem:[%s14551_s5] sm:$0xff]   ;;  %v10472_v36 = vld [vmem:[%s14551_s5 + $0x38] sm:$0xff]  }
0x1b1a   :  { %v7484_v34 = vpop.f32.mrb[234].mxu0  ;;  %v10474_v56 = vld [vmem:[%s14552_s7 + $0x8] sm:$0xff]  }
0x1b1b   :  { %v7539_v59 = vmax.f32 %v7487_v55, %v14315_v11  ;;  %v7485_v46 = vpop.f32.mrb[235].mxu0  ;;  %v10469_v11 = vld [vmem:[%s14551_s5 + $0x20] sm:$0xff]   ;;  %v10475_v34 = vld [vmem:[%s14552_s7 + $0x10] sm:$0xff]  }
0x1b1c   :  { %v10473_v55 = vld [vmem:[%s14552_s7] sm:$0xff]  }
0x1b1d   :  { %v10477_v46 = vld [vmem:[%s14552_s7 + $0x20] sm:$0xff]  }
0x1b40   :  { %v7585_v61 = vpop.f32.mrb[236].mxu0 }
0x1b41   :  { %v7591_v32 = vmax.f32 %v7539_v59, %v7585_v61  ;;  %v7587_v62 = vpop.f32.mrb[237].mxu0  ;;  %v10476_v59 = vld [vmem:[%s14552_s7 + $0x18] sm:$0xff]   ;;  %v10478_v61 = vld [vmem:[%s14552_s7 + $0x28] sm:$0xff]  }
0x1b42   :  { %v7588_v58 = vpop.f32.mrb[238].mxu0  ;;  %v9250_v62 = vld [vmem:[%s14553_s4] ss:$0 sm:$0xff] }
0x1b43   :  { %v7592_v4 = vadd.f32 %v13917_v63, %v7591_v32  ;;  %v7589_v60 = vpop.f32.mrb[239].mxu0  ;;  %v9222_v63 = vld [vmem:[%s14548_s0 + $0x318] sm:$0xff] }
0x1b44   :  { %v9224_v6 = vcombine.high %v9222_v63, %v9222_v63 }
0x1b45   :  { %v7593_v52 = vmax.f32 %v7592_v4, 0.0 }
0x1b47   :  { %v7594_v50 = vpack.c.bf16 %v7593_v52, %v7593_v52 }
0x1b49   :  { %9989 = vmatmul.mubr.bf16.vlgmr.msra.gmra.mrb[236].mxu1 %v7594_v50 }
0x1b4a   :  { %7764 = vmatpush1.bf16.msra.mxu1 %v14171_v8  ;;  %9217 = vmatprep.mubr.msk.bf16.mxu1 %vm117_vm0, %v9216_v53 }
0x1b4b   :  { %7765 = vmatprep.subr.bf16.mxu1 %v10550_v0 }
0x1b4e   :  { %7766 = vmatpush1.bf16.msra.mxu1 %v14178_v16 }
0x1b4f   :  { %7767 = vmatprep.subr.bf16.mxu1 %v10550_v0 }
0x1b52   :  { %7768 = vmatpush1.bf16.msra.mxu1 %v14185_v27 }
0x1b53   :  { %7769 = vmatprep.subr.bf16.mxu1 %v10550_v0 }
0x1b56   :  { %7770 = vmatpush1.bf16.msra.mxu1 %v14192_v40 }
0x1b57   :  { %7771 = vmatprep.subr.bf16.mxu1 %v10550_v0 }
0x1b5a   :  { %7772 = vmatpush1.bf16.msra.mxu1 %v14199_v41 }
0x1b5b   :  { %7773 = vmatprep.subr.bf16.mxu1 %v10550_v0 }
0x1b5e   :  { %7774 = vmatpush1.bf16.msra.mxu1 %v14206_v42 }
0x1b5f   :  { %7775 = vmatprep.subr.bf16.mxu1 %v10550_v0 }
0x1b62   :  { %7776 = vmatpush1.bf16.msra.mxu1 %v14213_v38 }
0x1b63   :  { %7777 = vmatprep.subr.bf16.mxu1 %v10550_v0 }
0x1b66   :  { %7778 = vmatpush1.bf16.msra.mxu1 %v14220_v44 }
0x1b67   :  { %7779 = vmatprep.subr.bf16.mxu1 %v10550_v0 }
0x1b6a   :  { %7780 = vmatpush1.bf16.msra.mxu1 %v14227_v45 }
0x1b6b   :  { %7781 = vmatprep.subr.bf16.mxu1 %v10550_v0 }
0x1b6e   :  { %7782 = vmatpush1.bf16.msra.mxu1 %v10697_v15 }
0x1b6f   :  { %7867 = vmatprep.subr.bf16.mxu1 %v10550_v0 }
0x1b71   :  { %7796 = vmatmul.mubr.bf16.vlgmr.msra.gmra.mrb[240].mxu1 %v9215_v18  ;;  %v10480_v18 = vld [vmem:[%s14552_s7 + $0x38] sm:$0xff]  }
0x1b72   :  { %7868 = vmatpush1.bf16.msra.mxu1 %v14171_v8  ;;  %9225 = vmatprep.mubr.msk.bf16.mxu1 %vm117_vm0, %v9224_v6  ;;  %v9223_v8 = vcombine.low %v9222_v63, %v9222_v63  ;;  %v10479_v63 = vld [vmem:[%s14552_s7 + $0x30] sm:$0xff]   ;;  %v9251_v6 = vld [vmem:[%s14554_s6] ss:$0 sm:$0xff] }
0x1b73   :  { %7869 = vmatprep.subr.bf16.mxu1 %v10550_v0 }
0x1b76   :  { %7870 = vmatpush1.bf16.msra.mxu1 %v14178_v16  ;;  %v7746_v16 = vpop.f32.mrb[240].mxu0 }
0x1b77   :  { %7871 = vmatprep.subr.bf16.mxu1 %v10550_v0 }
0x1b7a   :  { %7872 = vmatpush1.bf16.msra.mxu1 %v14185_v27  ;;  %v7748_v27 = vpop.f32.mrb[241].mxu0 }
0x1b7b   :  { %7873 = vmatprep.subr.bf16.mxu1 %v10550_v0 }
0x1b7e   :  { %7874 = vmatpush1.bf16.msra.mxu1 %v14192_v40  ;;  %v7749_v40 = vpop.f32.mrb[242].mxu0 }
0x1b7f   :  { %7875 = vmatprep.subr.bf16.mxu1 %v10550_v0 }
0x1b82   :  { %7876 = vmatpush1.bf16.msra.mxu1 %v14199_v41  ;;  %v7750_v41 = vpop.f32.mrb[243].mxu0 }
0x1b83   :  { %7877 = vmatprep.subr.bf16.mxu1 %v10550_v0 }
0x1b86   :  { %7878 = vmatpush1.bf16.msra.mxu1 %v14206_v42 }
0x1b87   :  { %7879 = vmatprep.subr.bf16.mxu1 %v10550_v0 }
0x1b8a   :  { %7880 = vmatpush1.bf16.msra.mxu1 %v14213_v38  ;;  %v10457_v38 = vld [vmem:[%s14549_s3 + $0x600] sm:$0xff]  }
0x1b8b   :  { %7881 = vmatprep.subr.bf16.mxu1 %v10550_v0  ;;  %9993 = vmatpush3.bf16.msra.mxu0 %v10457_v38 }
0x1b8c   :  { %9994 = vmatprep.subr.bf16.mxu0 %v10551_v37 }
0x1b8e   :  { %7882 = vmatpush1.bf16.msra.mxu1 %v14220_v44 }
0x1b8f   :  { %7883 = vmatprep.subr.bf16.mxu1 %v10550_v0 }
0x1b90   :  { %v7849_v42 = vpop.f32.mrb[244].mxu0 }
0x1b91   :  { %v7851_v44 = vpop.f32.mrb[245].mxu0 }
0x1b92   :  { %7884 = vmatpush1.bf16.msra.mxu1 %v14227_v45 }
0x1b93   :  { %7885 = vmatprep.subr.bf16.mxu1 %v10550_v0  ;;  %v10458_v0 = vld [vmem:[%s14549_s3 + $0x608] sm:$0xff]  }
0x1b94   :  { %9995 = vmatpush3.bf16.msra.mxu0 %v10458_v0 }
0x1b95   :  { %9996 = vmatprep.subr.bf16.mxu0 %v10551_v37 }
0x1b96   :  { %7886 = vmatpush1.bf16.msra.mxu1 %v10697_v15  ;;  %v7852_v15 = vpop.f32.mrb[246].mxu0 }
0x1b97   :  { %10012 = vmatprep.subr.bf16.mxu1 %v10551_v37  ;;  %v7853_v45 = vpop.f32.mrb[247].mxu0 }
0x1b98   :  { %9997 = vmatpush3.bf16.msra.mxu0 %v10459_v7 }
0x1b99   :  { %7900 = vmatmul.mubr.bf16.vlgmr.msra.gmra.mrb[244].mxu1 %v9223_v8  ;;  %9998 = vmatprep.subr.bf16.mxu0 %v10551_v37 }
0x1b9a   :  { %10028 = vmatprep.mubr.msk.bf16.mxu1 %vm10552_vm2, %v10551_v37  ;;  %10013 = vmatpush3.bf16.msra.mxu1 %v10465_v25 }
0x1b9b   :  { %10014 = vmatprep.subr.bf16.mxu1 %v10551_v37 }
0x1b9c   :  { %9999 = vmatpush3.bf16.msra.mxu0 %v10460_v2 }
0x1b9d   :  { %10000 = vmatprep.subr.bf16.mxu0 %v10551_v37 }
0x1b9e   :  { %10015 = vmatpush3.bf16.msra.mxu1 %v10466_v19 }
0x1b9f   :  { %10016 = vmatprep.subr.bf16.mxu1 %v10551_v37 }
0x1ba0   :  { %10001 = vmatpush3.bf16.msra.mxu0 %v10461_v54 }
0x1ba1   :  { %10002 = vmatprep.subr.bf16.mxu0 %v10551_v37 }
0x1ba2   :  { %10017 = vmatpush3.bf16.msra.mxu1 %v10467_v33 }
0x1ba3   :  { %10018 = vmatprep.subr.bf16.mxu1 %v10551_v37 }
0x1ba4   :  { %10003 = vmatpush3.bf16.msra.mxu0 %v10462_v3 }
0x1ba5   :  { %10004 = vmatprep.subr.bf16.mxu0 %v10551_v37 }
0x1ba6   :  { %10019 = vmatpush3.bf16.msra.mxu1 %v10468_v47 }
0x1ba7   :  { %10020 = vmatprep.subr.bf16.mxu1 %v10551_v37 }
0x1ba8   :  { %10005 = vmatpush3.bf16.msra.mxu0 %v10463_v48 }
0x1ba9   :  { %10006 = vmatprep.subr.bf16.mxu0 %v10551_v37 }
0x1baa   :  { %10021 = vmatpush3.bf16.msra.mxu1 %v10469_v11 }
0x1bab   :  { %10022 = vmatprep.subr.bf16.mxu1 %v10551_v37 }
0x1bac   :  { %10007 = vmatpush3.bf16.msra.mxu0 %v10464_v1 }
0x1bad   :  { %10032 = vmatprep.subr.bf16.mxu0 %v10551_v37 }
0x1bae   :  { %10023 = vmatpush3.bf16.msra.mxu1 %v10470_v12 }
0x1baf   :  { %10024 = vmatprep.subr.bf16.mxu1 %v10551_v37 }
0x1bb2   :  { %10025 = vmatpush3.bf16.msra.mxu1 %v10471_v35 }
0x1bb3   :  { %10026 = vmatprep.subr.bf16.mxu1 %v10551_v37 }
0x1bb6   :  { %10027 = vmatpush3.bf16.msra.mxu1 %v10472_v36 }
0x1c1c   :  { %v7694_v29 = vpop.f32.mrb[236].mxu1 }
0x1c1d   :  { %v7700_v10 = vadd.f32 %v7694_v29, %v14375_v49  ;;  %v9990_v5 = vpop.f32.mrb[237].mxu1 }
0x1c1e   :  { %v7697_v17 = vpop.f32.mrb[238].mxu1 }
0x1c1f   :  { %v9991_v20 = vpop.f32.mrb[239].mxu1 }
0x1c44   :  { %v7797_v9 = vpop.f32.mrb[240].mxu1 }
0x1c45   :  { %v7803_v21 = vmax.f32 %v7746_v16, %v7797_v9  ;;  %v7799_v22 = vpop.f32.mrb[241].mxu1 }
0x1c46   :  { %v7800_v13 = vpop.f32.mrb[242].mxu1 }
0x1c47   :  { %v7855_v30 = vmax.f32 %v7803_v21, %v7849_v42  ;;  %v7801_v39 = vpop.f32.mrb[243].mxu1 }
0x1c6c   :  { %v7901_v26 = vpop.f32.mrb[244].mxu1 }
0x1c6d   :  { %v7907_v14 = vmax.f32 %v7855_v30, %v7901_v26  ;;  %v7903_v23 = vpop.f32.mrb[245].mxu1 }
0x1c6e   :  { %v7904_v24 = vpop.f32.mrb[246].mxu1 }
0x1c6f   :  { %v7908_v31 = vadd.f32 %v10549_v28, %v7907_v14  ;;  %v7905_v43 = vpop.f32.mrb[247].mxu1 }
0x1c71   :  { %v7909_v49 = vmax.f32 %v7908_v31, 0.0 }
0x1c73   :  { %v7910_v57 = vpack.c.bf16 %v7909_v49, %v7909_v49 }
0x1c75   :  { %10009 = vmatmul.mubr.bf16.vlgmr.msra.gmra.mrb[248].mxu0 %v7910_v57 }
0x1c76   :  { %10048 = vmatprep.mubr.msk.bf16.mxu0 %vm10552_vm2, %v10551_v37  ;;  %10033 = vmatpush3.bf16.msra.mxu0 %v10473_v55 }
0x1c77   :  { %10034 = vmatprep.subr.bf16.mxu0 %v10551_v37 }
0x1c7a   :  { %10035 = vmatpush3.bf16.msra.mxu0 %v10474_v56 }
0x1c7b   :  { %10036 = vmatprep.subr.bf16.mxu0 %v10551_v37 }
0x1c7e   :  { %10037 = vmatpush3.bf16.msra.mxu0 %v10475_v34 }
0x1c7f   :  { %10038 = vmatprep.subr.bf16.mxu0 %v10551_v37 }
0x1c82   :  { %10039 = vmatpush3.bf16.msra.mxu0 %v10476_v59 }
0x1c83   :  { %10040 = vmatprep.subr.bf16.mxu0 %v10551_v37 }
0x1c86   :  { %10041 = vmatpush3.bf16.msra.mxu0 %v10477_v46 }
0x1c87   :  { %10042 = vmatprep.subr.bf16.mxu0 %v10551_v37 }
0x1c8a   :  { %10043 = vmatpush3.bf16.msra.mxu0 %v10478_v61 }
0x1c8b   :  { %10044 = vmatprep.subr.bf16.mxu0 %v10551_v37 }
0x1c8e   :  { %10045 = vmatpush3.bf16.msra.mxu0 %v10479_v63 }
0x1c8f   :  { %10046 = vmatprep.subr.bf16.mxu0 %v10551_v37  ;;  %v9260_v37 = vld [vmem:[%s14555_s8] ss:$0 sm:$0xff] }
0x1c92   :  { %10047 = vmatpush3.bf16.msra.mxu0 %v10480_v18 }
0x1d48   :  { %v8010_v32 = vpop.f32.mrb[248].mxu0 }
0x1d49   :  { %v8016_v58 = vadd.f32 %v8010_v32, %v7700_v10  ;;  %v10010_v4 = vpop.f32.mrb[249].mxu0 }
0x1d4a   :  { %v8013_v60 = vpop.f32.mrb[250].mxu0 }
0x1d4b   :  { %v8024_v51 = vadd.f32 %v9250_v62, %v8016_v58  ;;  %v10011_v52 = vpop.f32.mrb[251].mxu0 }
0x1d4d   :  { %v8025_v53 = vmax.f32 %v8024_v51, 0.0 }
0x1d4f   :  { %v8026_v50 = vpack.c.bf16 %v8025_v53, %v8025_v53 }
0x1d51   :  { %10029 = vmatmul.mubr.bf16.vlgmr.msra.gmra.mrb[248].mxu1 %v8026_v50 }
0x1e24   :  { %v8132_v8 = vpop.f32.mrb[248].mxu1 }
0x1e25   :  { %v8133_v16 = vadd.f32 %v9251_v6, %v8132_v8  ;;  %v10030_v27 = vpop.f32.mrb[249].mxu1 }
0x1e26   :  { %v8135_v40 = vpop.f32.mrb[250].mxu1 }
0x1e27   :  { %v8138_v41 = vmax.f32 %v8133_v16, 0.0  ;;  %v10031_v42 = vpop.f32.mrb[251].mxu1 }
0x1e29   :  { %v8139_v38 = vpack.c.bf16 %v8138_v41, %v8138_v41 }
0x1e2b   :  { %10049 = vmatmul.mubr.bf16.vlgmr.msra.gmra.mrb[252].mxu0 %v8139_v38 }
0x1efe   :  { %v8245_v44 = vpop.f32.mrb[252].mxu0 }
0x1eff   :  { %v8246_v0 = vadd.f32 %v9260_v37, %v8245_v44  ;;  %v10050_v15 = vpop.f32.mrb[253].mxu0 }
0x1f00   :  { %v8248_v45 = vpop.f32.mrb[254].mxu0 }
0x1f01   :  { %8251 = vst [vmem:[%s14556_s9] sm:$0xff] %v8246_v0  ;;  %v10051_v7 = vpop.f32.mrb[255].mxu0 }

</bundles_post_ra>
